<compile_context>
chip_gen: v7x
topology: tpu7x:2x2x1
jax: 0.10.0
libtpu: 0.0.40
codegen_flags: <defaults>
</compile_context>

<pallas_src>
import functools

import jax
import jax.numpy as jnp
from jax import lax
from jax.experimental import pallas as pl
from jax.experimental.pallas import tpu as pltpu

EPS = 1e-5  # PyTorch BatchNorm3d default eps

MXU_INPUT_DTYPE = jnp.bfloat16      # conv operands fed to the MXU (f32 accumulate)
INTERMEDIATE_DTYPE = jnp.bfloat16   # storage dtype of inter-layer activations
VMEM_LIMIT_BYTES = 32 * 1024 * 1024


def _round_up(x, m):
    return ((x + m - 1) // m) * m


# ---------------- kernel A: M on lanes (big layers, K-block grid) -------------
def conv_bn_act_cm_kernel(p_ref, w_ref, gb_ref, o_ref, acc_ref, *,
                          negative_slope, inv_m):
    """One (Cout-block, K-block) grid step.

    p_ref  : (Kblk, M)    bf16 patch slab (M = B*Do*Ho*Wo on the lane axis)
    w_ref  : (Cblk, Kblk) bf16 weight slab (K-block axis squeezed)
    gb_ref : (Cblk, 2)    f32; col 0 = gamma, col 1 = beta
    o_ref  : (Cblk, M)    output block (bf16 for intermediate layers)
    acc_ref: (Cblk, M)    f32 VMEM accumulator, resident across the K axis
    """
    kb = pl.program_id(1)

    @pl.when(kb == 0)
    def _init():
        acc_ref[...] = jnp.zeros_like(acc_ref)

    acc_ref[...] += jnp.dot(w_ref[...], p_ref[...],
                            preferred_element_type=jnp.float32)

    @pl.when(kb == pl.num_programs(1) - 1)
    def _finalize():
        # Training-mode BatchNorm3d: biased stats over all M = N*D*H*W
        # positions per channel.  Single traversal with a per-channel shift
        # (first column) so E[(y-c)^2] - (E[y]-c)^2 never cancels.
        y = acc_ref[...]
        c = y[:, 0:1]
        ys = y - c
        m_s = jnp.sum(ys, axis=1, keepdims=True) * inv_m          # E[y] - c
        q_s = jnp.sum(ys * ys, axis=1, keepdims=True) * inv_m     # E[(y-c)^2]
        var = q_s - m_s * m_s
        mean = c + m_s
        scale = gb_ref[:, 0:1] * lax.rsqrt(var + EPS)
        shift = gb_ref[:, 1:2] - mean * scale
        yn = acc_ref[...] * scale + shift      # re-stream y from the VMEM scratch
        o_ref[...] = jnp.where(yn >= 0.0, yn,
                               negative_slope * yn).astype(o_ref.dtype)


def conv_bn_act_cm(patches, w_mat, gamma, beta, negative_slope, out_dtype):
    """patches: (K, M), w_mat: (Cout, K) -> (Cout, M) in out_dtype."""
    K, M = patches.shape
    Cout = w_mat.shape[0]

    cblk = 8 if Cout >= 16 else Cout          # >=2 channel blocks for v7x megacore
    ncb = Cout // cblk
    kblk = 128 if K > 512 else min(_round_up(K, 8), _round_up((K + 3) // 4, 8))
    nk = (K + kblk - 1) // kblk
    kpad = nk * kblk
    if kpad != K:
        patches = jnp.pad(patches, ((0, kpad - K), (0, 0)))
        w_mat = jnp.pad(w_mat, ((0, 0), (0, kpad - K)))
    w_blk = w_mat.reshape(Cout, nk, kblk).transpose(1, 0, 2)      # (nk, Cout, kblk)
    gb = jnp.stack([gamma, beta], axis=1)                         # (Cout, 2) f32

    kern = functools.partial(conv_bn_act_cm_kernel,
                             negative_slope=negative_slope, inv_m=1.0 / M)
    return pl.pallas_call(
        kern,
        out_shape=jax.ShapeDtypeStruct((Cout, M), out_dtype),
        grid_spec=pltpu.PrefetchScalarGridSpec(
            num_scalar_prefetch=0,
            grid=(ncb, nk),
            in_specs=[
                pl.BlockSpec((kblk, M), lambda c, k: (k, 0)),
                pl.BlockSpec((None, cblk, kblk), lambda c, k: (k, c, 0)),
                pl.BlockSpec((cblk, 2), lambda c, k: (c, 0)),
            ],
            out_specs=pl.BlockSpec((cblk, M), lambda c, k: (c, 0)),
            scratch_shapes=[pltpu.VMEM((cblk, M), jnp.float32)],
        ),
        compiler_params=pltpu.CompilerParams(
            dimension_semantics=("parallel", "arbitrary"),
            vmem_limit_bytes=VMEM_LIMIT_BYTES),
    )(patches, w_blk, gb)


# ------------- kernel B: Cout on lanes (tiny tail layers, gridless) -----------
def conv_bn_act_mm_kernel(p_ref, w_ref, gb_ref, o_ref, *, negative_slope, inv_m):
    """p_ref: (M, K) bf16, w_ref: (K, Cout) bf16, gb_ref: (2, Cout) f32,
    o_ref: (M, Cout).  M < 128, so Cout sits on the lane axis and the BN
    reduction is a cheap sublane reduce."""
    y = jnp.dot(p_ref[...], w_ref[...],
                preferred_element_type=jnp.float32)               # (M, Cout) f32
    c = y[0:1, :]
    ys = y - c
    m_s = jnp.sum(ys, axis=0, keepdims=True) * inv_m
    q_s = jnp.sum(ys * ys, axis=0, keepdims=True) * inv_m
    var = q_s - m_s * m_s
    mean = c + m_s
    scale = gb_ref[0:1, :] * lax.rsqrt(var + EPS)
    shift = gb_ref[1:2, :] - mean * scale
    yn = y * scale + shift
    o_ref[...] = jnp.where(yn >= 0.0, yn, negative_slope * yn).astype(o_ref.dtype)


def conv_bn_act_mm(patches_mk, w_kc, gamma, beta, negative_slope, out_dtype):
    """patches_mk: (M, K), w_kc: (K, Cout) -> (M, Cout) in out_dtype."""
    M = patches_mk.shape[0]
    Cout = w_kc.shape[1]
    gb = jnp.stack([gamma, beta], axis=0)                         # (2, Cout) f32
    kern = functools.partial(conv_bn_act_mm_kernel,
                             negative_slope=negative_slope, inv_m=1.0 / M)
    # Gridless call: every operand is tiny (<0.5 MB); whole arrays live in VMEM.
    return pl.pallas_call(
        kern,
        out_shape=jax.ShapeDtypeStruct((M, Cout), out_dtype),
    )(patches_mk, w_kc, gb)


# ------------------------------ JAX glue -------------------------------------
def extract_patches(x, k, stride, pad):
    """x: (C, B, D, H, W) -> (C*k^3, B*Do*Ho*Wo); row order (c, dz, dy, dx),
    column order (b, do, ho, wo).  Slices + stack + reshape only."""
    C, B = x.shape[:2]
    if pad > 0:
        x = jnp.pad(x, ((0, 0), (0, 0), (pad, pad), (pad, pad), (pad, pad)))
    Dp, Hp, Wp = x.shape[2:]
    Do = (Dp - k) // stride + 1
    Ho = (Hp - k) // stride + 1
    Wo = (Wp - k) // stride + 1
    taps = []
    for dz in range(k):
        for dy in range(k):
            for dx in range(k):
                taps.append(x[:, :,
                              dz:dz + stride * Do:stride,
                              dy:dy + stride * Ho:stride,
                              dx:dx + stride * Wo:stride])
    pat = jnp.stack(taps, axis=1)                      # (C, k^3, B, Do, Ho, Wo)
    return pat.reshape(C * k ** 3, B * Do * Ho * Wo), (B, Do, Ho, Wo)


def encoder_layer(x_cm, p, out_dtype):
    """x_cm: channel-major (Cin, B, D, H, W) -> (Cout, B, Do, Ho, Wo)."""
    k, s, pad, slope = p["k"], p["stride"], p["pad"], p["slope"]
    Cout = p["w"].shape[0]
    pat, (B, Do, Ho, Wo) = extract_patches(x_cm.astype(MXU_INPUT_DTYPE), k, s, pad)
    M = B * Do * Ho * Wo
    w_mat = p["w"].reshape(Cout, -1).astype(MXU_INPUT_DTYPE)      # (Cout, Cin*k^3)
    if M >= 128:
        # M lane-dense layout, K-block pipelined grid.
        out = conv_bn_act_cm(pat, w_mat, p["gamma"], p["beta"], slope, out_dtype)
        return out.reshape(Cout, B, Do, Ho, Wo)
    # Tail layers (M < 128): Cout lane-dense layout, gridless.
    out = conv_bn_act_mm(pat.T, w_mat.T, p["gamma"], p["beta"], slope, out_dtype)
    return out.T.reshape(Cout, B, Do, Ho, Wo)


def encoder_forward(x_ncdhw, params, batch_size):
    h = jnp.swapaxes(x_ncdhw, 0, 1)                    # (C, B, D, H, W), once
    n = len(params)
    for li, p in enumerate(params):
        out_dtype = jnp.float32 if li == n - 1 else INTERMEDIATE_DTYPE
        h = encoder_layer(h, p, out_dtype)
    # (C, B, D, H, W) -> z.view(B, C*D*H*W), matching PyTorch NCDHW flatten.
    return jnp.moveaxis(h, 1, 0).reshape(batch_size, -1)


# ----------------------- deterministic parameter init ------------------------
def init_params(key, in_channels=1, dim=8, n_downsample=3):
    params = []
    c_in, c_out = in_channels, dim
    specs = [(3, 1, 0, 0.2)]                           # Conv3d(k3) + BN + LeakyReLU(0.2)
    for _ in range(n_downsample):
        specs.append((4, 3, 1, 0.0))                   # Conv3d(k4,s3,p1) + BN + ReLU
    for (k, s, p, slope) in specs:
        key, kw, kb = jax.random.split(key, 3)
        fan_in = c_in * k ** 3
        w = jax.random.normal(kw, (c_out, c_in, k, k, k), jnp.float32) / jnp.sqrt(fan_in)
        b = 0.01 * jax.random.normal(kb, (c_out,), jnp.float32)
        params.append(dict(w=w, b=b,
                           gamma=jnp.ones((c_out,), jnp.float32),
                           beta=jnp.zeros((c_out,), jnp.float32),
                           k=k, stride=s, pad=p, slope=slope))
        c_in, c_out = c_out, c_out * 2
    return params


# ------------------------ pure-JAX reference (check) --------------------------
def reference_forward(x, params, batch_size,
                      mxu_dtype=jnp.float32, intermediate_dtype=jnp.float32):
    """PyTorch-semantics reference.  With the default f32 dtypes it is the exact
    module; with bf16 dtypes it mirrors the kernel's precision policy (bf16 MXU
    inputs, f32 accumulate/BN, bf16 intermediate storage) for a tight check."""
    h = x
    n = len(params)
    for li, p in enumerate(params):
        y = lax.conv_general_dilated(
            h.astype(mxu_dtype), p["w"].astype(mxu_dtype),
            (p["stride"],) * 3, [(p["pad"], p["pad"])] * 3,
            dimension_numbers=("NCDHW", "OIDHW", "NCDHW"),
            preferred_element_type=jnp.float32)
        y = y + p["b"].reshape(1, -1, 1, 1, 1)          # bias kept: BN cancels it
        mean = jnp.mean(y, axis=(0, 2, 3, 4), keepdims=True)
        var = jnp.mean(jnp.square(y - mean), axis=(0, 2, 3, 4), keepdims=True)
        y = (y - mean) * lax.rsqrt(var + EPS)
        y = y * p["gamma"].reshape(1, -1, 1, 1, 1) + p["beta"].reshape(1, -1, 1, 1, 1)
        h = jnp.where(y >= 0, y, p["slope"] * y)
        h = h.astype(intermediate_dtype if li < n - 1 else jnp.float32)
    return h.reshape(batch_size, -1)


if __name__ == "__main__":
    key = jax.random.PRNGKey(0)
    key, kx = jax.random.split(key)

    # batch=8 (still tiny) so the final batch-only BatchNorm is well conditioned
    # enough to validate a bf16 pipeline; batch=2 makes it sign(y0-y1) which no
    # reduced-precision kernel can match elementwise.
    batch_size, in_channels, spatial = 8, 1, 16
    x = jax.random.normal(kx, (batch_size, in_channels, spatial, spatial, spatial),
                          jnp.float32)

    params = init_params(key, in_channels=in_channels, dim=8, n_downsample=3)

    z = jax.block_until_ready(encoder_forward(x, params, batch_size))
    assert z.shape == (batch_size, 64), z.shape

    # Tight check vs. a reference using the identical precision policy.
    z_ref = jax.block_until_ready(
        reference_forward(x, params, batch_size,
                          mxu_dtype=MXU_INPUT_DTYPE,
                          intermediate_dtype=INTERMEDIATE_DTYPE))
    max_err = jnp.max(jnp.abs(z - z_ref))
    assert jnp.allclose(z, z_ref, atol=2e-2, rtol=2e-2), f"max abs err {max_err}"

    # Loose sanity check vs. the exact f32 module: the last BN's batch-only
    # statistics can amplify bf16 rounding arbitrarily on near-degenerate
    # channels, so require that the vast majority of elements match closely
    # instead of an elementwise allclose.
    z_f32 = jax.block_until_ready(reference_forward(x, params, batch_size))
    frac_ok = jnp.mean((jnp.abs(z - z_f32) < 0.1).astype(jnp.float32))
    assert frac_ok >= 0.9, f"only {frac_ok} of elements within 0.1 of f32 reference"

    print("KERNEL_OK")
</pallas_src>

<mosaic_0001>
module attributes {stable_mosaic.version = 11 : i64} {
  func.func @conv_bn_act_cm_kernel(%arg0: i32, %arg1: i32, %arg2: memref<8x21952xbf16, #tpu.memory_space<vmem>>, %arg3: memref<1x8x8xbf16, #tpu.memory_space<vmem>>, %arg4: memref<8x2xf32, #tpu.memory_space<vmem>>, %arg5: memref<8x21952xbf16, #tpu.memory_space<vmem>>, %arg6: memref<8x21952xf32, #tpu.memory_space<vmem>>) attributes {dimension_semantics = [#tpu.dimension_semantics<parallel>, #tpu.dimension_semantics<arbitrary>], iteration_bounds = array<i64: 1, 4>, scalar_prefetch = 0 : i64, scratch_operands = 1 : i64, tpu.core_type = #tpu.core_type<tc>, window_params = [{transform_indices = @transform_0, window_bounds = array<i64: 8, 21952>}, {transform_indices = @transform_1, window_bounds = array<i64: 1, 8, 8>}, {transform_indices = @transform_2, window_bounds = array<i64: 8, 2>}, {transform_indices = @transform_3, window_bounds = array<i64: 8, 21952>}]} {
    %c0_i32 = arith.constant 0 : i32
    %0 = arith.cmpi eq, %arg1, %c0_i32 : i32
    %1 = arith.extui %0 : i1 to i32
    %c0_i32_0 = arith.constant 0 : i32
    %2 = arith.cmpi ne, %1, %c0_i32_0 : i32
    scf.if %2 {
      %cst_10 = arith.constant 0.000000e+00 : f32
      %13 = vector.broadcast %cst_10 : f32 to vector<8x21952xf32>
      %c0_11 = arith.constant 0 : index
      %c0_12 = arith.constant 0 : index
      %14 = vector.load %arg6[%c0_11, %c0_12] : memref<8x21952xf32, #tpu.memory_space<vmem>>, vector<8x21952xf32>
      tpu.vector_store %arg6[%c0_11, %c0_12], %13 {strides = array<i32>} : memref<8x21952xf32, #tpu.memory_space<vmem>>, vector<8x21952xf32>,
    } else {
    }
    %c0 = arith.constant 0 : index
    %c0_1 = arith.constant 0 : index
    %3 = vector.load %arg6[%c0, %c0_1] : memref<8x21952xf32, #tpu.memory_space<vmem>>, vector<8x21952xf32>
    %c0_2 = arith.constant 0 : index
    %c0_3 = arith.constant 0 : index
    %c0_4 = arith.constant 0 : index
    %4 = vector.load %arg3[%c0_2, %c0_3, %c0_4] : memref<1x8x8xbf16, #tpu.memory_space<vmem>>, vector<1x8x8xbf16>
    %5 = vector.shape_cast %4 : vector<1x8x8xbf16> to vector<8x8xbf16>
    %c0_5 = arith.constant 0 : index
    %c0_6 = arith.constant 0 : index
    %6 = vector.load %arg2[%c0_5, %c0_6] : memref<8x21952xbf16, #tpu.memory_space<vmem>>, vector<8x21952xbf16>
    %cst = arith.constant dense<0.000000e+00> : vector<8x21952xf32>
    %7 = tpu.matmul %5, %6, %cst {dimension_numbers = #tpu.dot_dimension_numbers<[1], [0], [0], [1], [0, 0, 1, 1], [], []>} : vector<8x8xbf16>, vector<8x21952xbf16>, vector<8x21952xf32> -> vector<8x21952xf32>
    %8 = arith.addf %3, %7 : vector<8x21952xf32>
    %c0_7 = arith.constant 0 : index
    %c0_8 = arith.constant 0 : index
    %9 = vector.load %arg6[%c0_7, %c0_8] : memref<8x21952xf32, #tpu.memory_space<vmem>>, vector<8x21952xf32>
    tpu.vector_store %arg6[%c0_7, %c0_8], %8 {strides = array<i32>} : memref<8x21952xf32, #tpu.memory_space<vmem>>, vector<8x21952xf32>,
    %c3_i32 = arith.constant 3 : i32
    %10 = arith.cmpi eq, %arg1, %c3_i32 : i32
    %11 = arith.extui %10 : i1 to i32
    %c0_i32_9 = arith.constant 0 : i32
    %12 = arith.cmpi ne, %11, %c0_i32_9 : i32
    scf.if %12 {
      %c0_10 = arith.constant 0 : index
      %c0_11 = arith.constant 0 : index
      %13 = vector.load %arg6[%c0_10, %c0_11] : memref<8x21952xf32, #tpu.memory_space<vmem>>, vector<8x21952xf32>
      %14 = vector.extract_strided_slice %13 {offsets = [0, 0], sizes = [8, 1], strides = [1, 1]} : vector<8x21952xf32> to vector<8x1xf32>
      %15 = vector.broadcast %14 : vector<8x1xf32> to vector<8x21952xf32>
      %16 = arith.subf %13, %15 : vector<8x21952xf32>
      %cst_12 = arith.constant dense<0.000000e+00> : vector<8xf32>
      %17 = vector.multi_reduction <add>, %16, %cst_12 [1] : vector<8x21952xf32> to vector<8xf32>
      %18 = vector.shape_cast %17 : vector<8xf32> to vector<8x1xf32>
      %cst_13 = arith.constant 4.55539375E-5 : f32
      %19 = vector.broadcast %cst_13 : f32 to vector<8x1xf32>
      %20 = arith.mulf %18, %19 : vector<8x1xf32>
      %21 = arith.mulf %16, %16 : vector<8x21952xf32>
      %cst_14 = arith.constant dense<0.000000e+00> : vector<8xf32>
      %22 = vector.multi_reduction <add>, %21, %cst_14 [1] : vector<8x21952xf32> to vector<8xf32>
      %23 = vector.shape_cast %22 : vector<8xf32> to vector<8x1xf32>
      %cst_15 = arith.constant 4.55539375E-5 : f32
      %24 = vector.broadcast %cst_15 : f32 to vector<8x1xf32>
      %25 = arith.mulf %23, %24 : vector<8x1xf32>
      %26 = arith.mulf %20, %20 : vector<8x1xf32>
      %27 = arith.subf %25, %26 : vector<8x1xf32>
      %28 = arith.addf %14, %20 : vector<8x1xf32>
      %c0_16 = arith.constant 0 : index
      %c0_17 = arith.constant 0 : index
      %29 = vector.load %arg4[%c0_16, %c0_17] : memref<8x2xf32, #tpu.memory_space<vmem>>, vector<8x1xf32>
      %cst_18 = arith.constant 9.99999974E-6 : f32
      %30 = vector.broadcast %cst_18 : f32 to vector<8x1xf32>
      %31 = arith.addf %27, %30 : vector<8x1xf32>
      %32 = math.rsqrt %31 : vector<8x1xf32>
      %33 = arith.mulf %29, %32 : vector<8x1xf32>
      %c0_19 = arith.constant 0 : index
      %c1 = arith.constant 1 : index
      %34 = vector.load %arg4[%c0_19, %c1] : memref<8x2xf32, #tpu.memory_space<vmem>>, vector<8x1xf32>
      %35 = arith.mulf %28, %33 : vector<8x1xf32>
      %36 = arith.subf %34, %35 : vector<8x1xf32>
      %c0_20 = arith.constant 0 : index
      %c0_21 = arith.constant 0 : index
      %37 = vector.load %arg6[%c0_20, %c0_21] : memref<8x21952xf32, #tpu.memory_space<vmem>>, vector<8x21952xf32>
      %38 = vector.broadcast %33 : vector<8x1xf32> to vector<8x21952xf32>
      %39 = arith.mulf %37, %38 : vector<8x21952xf32>
      %40 = vector.broadcast %36 : vector<8x1xf32> to vector<8x21952xf32>
      %41 = arith.addf %39, %40 : vector<8x21952xf32>
      %cst_22 = arith.constant 0.000000e+00 : f32
      %42 = vector.broadcast %cst_22 : f32 to vector<8x21952xf32>
      %43 = arith.cmpf oge, %41, %42 : vector<8x21952xf32>
      %cst_23 = arith.constant 2.000000e-01 : f32
      %44 = vector.broadcast %cst_23 : f32 to vector<8x21952xf32>
      %45 = arith.mulf %44, %41 : vector<8x21952xf32>
      %46 = arith.select %43, %41, %45 : vector<8x21952xi1>, vector<8x21952xf32>
      %47 = arith.truncf %46 : vector<8x21952xf32> to vector<8x21952xbf16>
      %c0_24 = arith.constant 0 : index
      %c0_25 = arith.constant 0 : index
      %48 = vector.load %arg5[%c0_24, %c0_25] : memref<8x21952xbf16, #tpu.memory_space<vmem>>, vector<8x21952xbf16>
      tpu.vector_store %arg5[%c0_24, %c0_25], %47 {strides = array<i32>} : memref<8x21952xbf16, #tpu.memory_space<vmem>>, vector<8x21952xbf16>,
    } else {
    }
    return
  }
  func.func @transform_0(%arg0: i32, %arg1: i32) -> (i32, i32) {
    %c0_i32 = arith.constant 0 : i32
    %c0_i32_0 = arith.constant 0 : i32
    return %arg1, %c0_i32 : i32, i32
  }
  func.func @transform_1(%arg0: i32, %arg1: i32) -> (i32, i32, i32) {
    %c0_i32 = arith.constant 0 : i32
    %c0_i32_0 = arith.constant 0 : i32
    return %arg1, %arg0, %c0_i32 : i32, i32, i32
  }
  func.func @transform_2(%arg0: i32, %arg1: i32) -> (i32, i32) {
    %c0_i32 = arith.constant 0 : i32
    %c0_i32_0 = arith.constant 0 : i32
    return %arg0, %c0_i32 : i32, i32
  }
  func.func @transform_3(%arg0: i32, %arg1: i32) -> (i32, i32) {
    %c0_i32 = arith.constant 0 : i32
    %c0_i32_0 = arith.constant 0 : i32
    return %arg0, %c0_i32 : i32, i32
  }
}

</mosaic_0001>

<bundles_post_ra>
// kernel: tpu_custom_call.1
= control target key start
LH: loop header
LB: loop body
LE: loop exit
PB: predicated region body
PF: predicated region fallthrough
CT: control target
= control target key end

     0   :  { %8 = vsyncpa [#allocation4], 0  ;;  %s14437_s0 = inlined_call_operand.hbm [shape: bf16[32,21952], index: 0, kind: input, shape index: {}]   ;;  %s14438_s1 = inlined_call_operand.hbm [shape: bf16[4,8,8], index: 1, kind: input, shape index: {}]   ;;  %s14439_s2 = inlined_call_operand.vmem [shape: f32[8,2], index: 2, kind: input, shape index: {}]   ;;  %s14440_s3 = inlined_call_operand.hbm [shape: bf16[8,21952], index: 3, kind: output, shape index: {}]  }
   0x1   :  { %10 = vsyncpa [#allocation4 + $0x1], 0 }
   0x2   :  { %11 = vsyncpa [#allocation7], 0 }
   0x3   :  { %13 = vsyncpa [#allocation7 + $0x1], 0 }
   0x4   :  { %14 = vsyncpa [#allocation5], 0  ;;  %s9219_s12 = smov 0   ;;  %s9221_s13 = smov 0  }
   0x5   :  { %s9223_s14 = smov 0   ;;  %s9225_s15 = smov 0  }
   0x6   :  { %s9227_s16 = smov 0   ;;  %s9229_s17 = smov 0  }
   0x7 LB: > { %s8152_s18 = sadd.s32 4294967295, %s9189_s17   ;;  %s29_s19 = sadd.s32 1, %s9185_s16  ;;  %s9189_s17 = sphi %s9229_s17, %s20_s17   ;;  %s9185_s16 = sphi %s9227_s16, %s15964_s16   ;;  %s9181_s15 = sphi %s9225_s15, %s15963_s15   ;;  %s9177_s14 = sphi %s9223_s14, %s15962_s14   ;;  %s9173_s13 = sphi %s9221_s13, %s15961_s13   ;;  %s9169_s12 = sphi %s9219_s12, %s15960_s12  }
   0x8   : > { %p30_p0 = scmp.ge.s32.totalorder %s29_s19, 4  ;;  %s39_s20 = sadd.s32 1, %s9177_s14 }
   0x9   : > { %p46_p1 = scmp.ne.s32.totalorder %s9177_s14, %s9173_s13  ;;  %p47_p2 = scmp.eq.s32.totalorder %s9189_s17, 0 }
   0xa   : > { %s15966_s19 = smov (%p30_p0, %s29_s19), 0  ;;  %p52_p4 = scmp.ne.s32.totalorder %s9173_s13, %s9169_s12 }
   0xb   : > { %p48_p3 = por %p47_p2, %p46_p1  ;;  %s36_s21 = ssub.s32 %s9185_s16, %s15966_s19 }
   0xc   : > { %p53_p5 = scmp.eq.s32.totalorder %s8152_s18, 0  ;;  %p37_p6 = scmp.eq.s32.totalorder %s36_s21, 0 }
   0xd   : > { %p8701_p8 = scmp.lt.s32.totalorder %s9189_s17, 4  ;;  %s9269_s24 = sand.u32 1, %s9177_s14  }
   0xe   : > { %p9260_p7 = por %p53_p5, %p52_p4  ;;  %s8684_s25 = smul.u32 11008, %s9185_s16 }
   0xf   : > { %s9266_s23 = scalar_select %p37_p6, %s9177_s14, %s39_s20  }
  0x10   : > { %s14629_s22 = scalar_select %p9260_p7, 1, 0 }
  0x11   : > { %s8683_s26 = smul.u32 688, %s9269_s24  ;;  %s9276_s29 = scalar_lea.hbm %s14437_s0, %s8684_s25 }
  0x12   : > { %p9278_p9 = pnand %p8701_p8, %p48_p3  ;;  %s164_s6 = scalar_lea.sflag [#allocation4], %s9269_s24 }
  0x13   : > { %s167_s4 = scalar_lea.vmem [#allocation3], %s8683_s26  ;;  %s9045_s7 = scalar_lea.hbm %s9276_s29, 11008 }
  0x14   : > { %s175_s5 = sshll.u32 %s167_s4, 4  ;;  %p9046_p12 = scmp.ne.s32.totalorder %s9276_s29, %s9045_s7  ;;  %s9283_s5 = int_to_ptr.vmem [resolvable:$true] %s175_s5 }
  0x15   : > { %p9047_p13 = pneg %p9278_p9  ;;  %s9050_s10 = scalar_lea.hbm %s14437_s0, 44032 }
  0x16   : > { %p9051_p2 = scmp.lt.u32.totalorder %s9276_s29, %s14437_s0  ;;  %p9052_p3 = scmp.lt.u32.totalorder %s9050_s10, %s9045_s7 }
  0x17   : > { %p9048_p0 = pnand %p9047_p13, %p9046_p12  ;;  %p9054_p5 = scmp.lt.u32.totalorder %s9045_s7, %s9276_s29 }
  0x18   : > { %p9053_p4 = por %p9052_p3, %p9051_p2 }
  0x19   : > { %p9049_p1 = pneg %p9048_p0 }
  0x1a   : > { %p9055_p6 = por %p9054_p5, %p9053_p4 }
  0x1c   : > { %p9056_p8 = pnand %p9055_p6, %p9049_p1 }
  0x1e   : > { %9059 = shalt.err (!%p9056_p8)
}
  0x1f   : > { %s9060_s20 = scalar_lea.vmem %s9283_s5, 11008  ;;  %s9191_s21 = smov [#allocation3]  }
  0x20   : > { %p9061_p12 = scmp.ne.s32.totalorder %s9283_s5, %s9060_s20  ;;  %s9065_s25 = sshll.u32 %s9191_s21, 4  ;;  %s9066_s25 = int_to_ptr.vmem [resolvable:$false] %s9065_s25 }
  0x21   : > { %s9067_s26 = scalar_lea.vmem %s9066_s25, 22016  ;;  %p9068_p11 = scmp.lt.s32.totalorder %s9283_s5, %s9066_s25 }
  0x22   : > { %p9063_p0 = pnand %p9061_p12, %p9047_p13  ;;  %p9069_p2 = scmp.lt.s32.totalorder %s9067_s26, %s9060_s20 }
  0x24   : > { %p9064_p10 = pneg %p9063_p0  ;;  %p9070_p3 = por %p9069_p2, %p9068_p11 }
  0x26   : > { %p9071_p4 = pnand %p9070_p3, %p9064_p10 }
  0x28   : > { %9074 = shalt.err (!%p9071_p4)
}
  0x29   : > { %8697 = dma.hbm_to_vmem [thread:$0]  (!%p9278_p9), %s9276_s29, 11008, %s9283_s5, %s164_s6  }
  0x2a   : > { %p14631_p1 = scmp.lt.s32.totalorder %s9189_s17, 5  ;;  %p14632_p5 = scmp.ge.s32.totalorder %s9189_s17, 1 }
  0x2b   : > { %s8157_s28 = sshll.u32 %s9269_s24, 2  ;;  %s8158_s4 = sshll.u32 %s9185_s16, 6 }
  0x2c   : > { %p9316_p6 = pnand %p14632_p5, %p14631_p1  ;;  %s9325_s9 = scalar_lea.hbm %s14438_s1, %s8158_s4 }
  0x2d   : > { %s186_s10 = scalar_lea.vmem [#allocation6], %s8157_s28  ;;  %s183_s29 = scalar_lea.sflag [#allocation7], %s9269_s24 }
  0x2e   : > { %s14633_s27 = scalar_select %p9316_p6, 1, 0 }
  0x2f   : > { %s194_s11 = sshll.u32 %s186_s10, 4  ;;  %s9075_s5 = scalar_lea.hbm %s9325_s9, 64  ;;  %s195_s11 = int_to_ptr.vmem [resolvable:$true] %s194_s11 }
  0x30   : > { %p9076_p10 = scmp.ne.s32.totalorder %s9325_s9, %s9075_s5  ;;  %s9080_s20 = scalar_lea.hbm %s14438_s1, 256 }
  0x31   : > { %p9081_p12 = scmp.lt.u32.totalorder %s9325_s9, %s14438_s1  ;;  %p9082_p0 = scmp.lt.u32.totalorder %s9080_s20, %s9075_s5 }
  0x32   : > { %p9078_p11 = pnand %p9076_p10, %p9047_p13  ;;  %p9084_p3 = scmp.lt.u32.totalorder %s9075_s5, %s9325_s9 }
  0x33   : > { %p9083_p2 = por %p9082_p0, %p9081_p12 }
  0x34   : > { %p9079_p8 = pneg %p9078_p11 }
  0x35   : > { %p9085_p4 = por %p9084_p3, %p9083_p2 }
  0x37   : > { %p9086_p1 = pnand %p9085_p4, %p9079_p8 }
  0x39   : > { %9089 = shalt.err (!%p9086_p1)
}
  0x3a   : > { %s9090_s24 = scalar_lea.vmem %s195_s11, 64  ;;  %s9192_s26 = smov [#allocation6]  }
  0x3b   : > { %p9091_p5 = scmp.ne.s32.totalorder %s195_s11, %s9090_s24  ;;  %s9095_s28 = sshll.u32 %s9192_s26, 4  ;;  %s9096_s28 = int_to_ptr.vmem [resolvable:$false] %s9095_s28 }
  0x3c   : > { %s9097_s4 = scalar_lea.vmem %s9096_s28, 128  ;;  %p9098_p7 = scmp.lt.s32.totalorder %s195_s11, %s9096_s28 }
  0x3d   : > { %p9093_p10 = pnand %p9091_p5, %p9047_p13  ;;  %p9099_p6 = scmp.lt.s32.totalorder %s9097_s4, %s9090_s24 }
  0x3f   : > { %p9094_p11 = pneg %p9093_p10  ;;  %p9100_p0 = por %p9099_p6, %p9098_p7 }
  0x41   : > { %p9101_p12 = pnand %p9100_p0, %p9094_p11 }
  0x43   : > { %9104 = shalt.err (!%p9101_p12)
}
  0x44   : > { %8700 = dma.hbm_to_vmem [thread:$0]  (!%p9278_p9), %s9325_s9, 64, %s195_s11, %s183_s29  }
  0x45   : > { %p14634_p8 = scmp.ne.s32.totalorder %s14633_s27, 0 }
  0x46   : > { %s205_s7 = sand.u32 (!%p14634_p8), 1, %s9173_s13   ;;  %p14635_p13 = scmp.ne.s32.totalorder (!%p14634_p8), %s14629_s22, 0 }
  0x47   : > { %203 = sbr.rel (%p14634_p8) target bundleno = 2021 (0x7e5), region = 32  ;;  %s206_s10 = scalar_lea.sflag (!%p14634_p8), [#allocation4], %s205_s7 }
  0x48   : > { %s8685_s8 = smul.u32 (!%p14634_p8), 688, %s205_s7 }
  0x4a   : > { %s9350_s5 = scalar_lea.vmem (!%p14634_p8), [#allocation3], %s8685_s8 }
  0x4e   : > { %9156 = dma.done.wait (%p14635_p13), %s206_s10, 11008  }
  0x4f   : > { %9158 = vsyncadd (%p14635_p13), %s206_s10, 4294956288  ;;  %s8160_s6 = sshll.u32 %s205_s7, 2  ;;  %s215_s30 = scalar_lea.sflag [#allocation7], %s205_s7 }
  0x50   : > { %s9356_s12 = scalar_lea.vmem [#allocation6], %s8160_s6 }
  0x51   : > { %9160 = dma.done.wait (%p14635_p13), %s215_s30, 64  }
  0x52   : > { %9162 = vsyncadd (%p14635_p13), %s215_s30, 4294967232  ;;  %p8161_p7 = scmp.ne.s32.totalorder %s9181_s15, 0 }
  0x53   : > { %vm425_vm0 = vcmask (!%p8161_p7), 523264   ;;  %v9193_v0 = vmov (!%p8161_p7), 0.0  }
  0x54   : > { %253 = sbr.rel (%p8161_p7) target bundleno = 170 (0xaa), region = 44  ;;  %254 = vst [vmem:[#allocation2] sm:$0xff] (!%p8161_p7), %v9193_v0  ;;  %255 = vst [vmem:[#allocation2 + $0x8] sm:$0xff] (!%p8161_p7), %v9193_v0 }
  0x55   : > { %256 = vst [vmem:[#allocation2 + $0x10] sm:$0xff] (!%p8161_p7), %v9193_v0  ;;  %257 = vst [vmem:[#allocation2 + $0x18] sm:$0xff] (!%p8161_p7), %v9193_v0 }
  0x56   : > { %258 = vst [vmem:[#allocation2 + $0x20] sm:$0xff] (!%p8161_p7), %v9193_v0  ;;  %259 = vst [vmem:[#allocation2 + $0x28] sm:$0xff] (!%p8161_p7), %v9193_v0 }
  0x57   : > { %260 = vst [vmem:[#allocation2 + $0x30] sm:$0xff] (!%p8161_p7), %v9193_v0  ;;  %261 = vst [vmem:[#allocation2 + $0x38] sm:$0xff] (!%p8161_p7), %v9193_v0 }
  0x58   : > { %262 = vst [vmem:[#allocation2 + $0x40] sm:$0xff] (!%p8161_p7), %v9193_v0  ;;  %263 = vst [vmem:[#allocation2 + $0x48] sm:$0xff] (!%p8161_p7), %v9193_v0 }
  0x59   : > { %264 = vst [vmem:[#allocation2 + $0x50] sm:$0xff] (!%p8161_p7), %v9193_v0  ;;  %265 = vst [vmem:[#allocation2 + $0x58] sm:$0xff] (!%p8161_p7), %v9193_v0 }
  0x5a   : > { %266 = vst [vmem:[#allocation2 + $0x60] sm:$0xff] (!%p8161_p7), %v9193_v0  ;;  %267 = vst [vmem:[#allocation2 + $0x68] sm:$0xff] (!%p8161_p7), %v9193_v0 }
  0x5b   : > { %268 = vst [vmem:[#allocation2 + $0x70] sm:$0xff] %v9193_v0  ;;  %269 = vst [vmem:[#allocation2 + $0x78] sm:$0xff] %v9193_v0 }
  0x5c   : > { %270 = vst [vmem:[#allocation2 + $0x80] sm:$0xff] %v9193_v0  ;;  %271 = vst [vmem:[#allocation2 + $0x88] sm:$0xff] %v9193_v0 }
  0x5d   : > { %272 = vst [vmem:[#allocation2 + $0x90] sm:$0xff] %v9193_v0  ;;  %273 = vst [vmem:[#allocation2 + $0x98] sm:$0xff] %v9193_v0 }
  0x5e   : > { %274 = vst [vmem:[#allocation2 + $0xa0] sm:$0xff] %v9193_v0  ;;  %275 = vst [vmem:[#allocation2 + $0xa8] sm:$0xff] %v9193_v0 }
  0x5f   : > { %276 = vst [vmem:[#allocation2 + $0xb0] sm:$0xff] %v9193_v0  ;;  %277 = vst [vmem:[#allocation2 + $0xb8] sm:$0xff] %v9193_v0 }
  0x60   : > { %278 = vst [vmem:[#allocation2 + $0xc0] sm:$0xff] %v9193_v0  ;;  %279 = vst [vmem:[#allocation2 + $0xc8] sm:$0xff] %v9193_v0 }
  0x61   : > { %280 = vst [vmem:[#allocation2 + $0xd0] sm:$0xff] %v9193_v0  ;;  %281 = vst [vmem:[#allocation2 + $0xd8] sm:$0xff] %v9193_v0 }
  0x62   : > { %282 = vst [vmem:[#allocation2 + $0xe0] sm:$0xff] %v9193_v0  ;;  %283 = vst [vmem:[#allocation2 + $0xe8] sm:$0xff] %v9193_v0 }
  0x63   : > { %284 = vst [vmem:[#allocation2 + $0xf0] sm:$0xff] %v9193_v0  ;;  %285 = vst [vmem:[#allocation2 + $0xf8] sm:$0xff] %v9193_v0 }
  0x64   : > { %286 = vst [vmem:[#allocation2 + $0x100] sm:$0xff] %v9193_v0  ;;  %287 = vst [vmem:[#allocation2 + $0x108] sm:$0xff] %v9193_v0 }
  0x65   : > { %288 = vst [vmem:[#allocation2 + $0x110] sm:$0xff] %v9193_v0  ;;  %289 = vst [vmem:[#allocation2 + $0x118] sm:$0xff] %v9193_v0 }
  0x66   : > { %290 = vst [vmem:[#allocation2 + $0x120] sm:$0xff] %v9193_v0  ;;  %291 = vst [vmem:[#allocation2 + $0x128] sm:$0xff] %v9193_v0 }
  0x67   : > { %292 = vst [vmem:[#allocation2 + $0x130] sm:$0xff] %v9193_v0  ;;  %293 = vst [vmem:[#allocation2 + $0x138] sm:$0xff] %v9193_v0 }
  0x68   : > { %294 = vst [vmem:[#allocation2 + $0x140] sm:$0xff] %v9193_v0  ;;  %295 = vst [vmem:[#allocation2 + $0x148] sm:$0xff] %v9193_v0 }
  0x69   : > { %296 = vst [vmem:[#allocation2 + $0x150] sm:$0xff] %v9193_v0  ;;  %297 = vst [vmem:[#allocation2 + $0x158] sm:$0xff] %v9193_v0 }
  0x6a   : > { %298 = vst [vmem:[#allocation2 + $0x160] sm:$0xff] %v9193_v0  ;;  %299 = vst [vmem:[#allocation2 + $0x168] sm:$0xff] %v9193_v0 }
  0x6b   : > { %300 = vst [vmem:[#allocation2 + $0x170] sm:$0xff] %v9193_v0  ;;  %301 = vst [vmem:[#allocation2 + $0x178] sm:$0xff] %v9193_v0 }
  0x6c   : > { %302 = vst [vmem:[#allocation2 + $0x180] sm:$0xff] %v9193_v0  ;;  %303 = vst [vmem:[#allocation2 + $0x188] sm:$0xff] %v9193_v0 }
  0x6d   : > { %304 = vst [vmem:[#allocation2 + $0x190] sm:$0xff] %v9193_v0  ;;  %305 = vst [vmem:[#allocation2 + $0x198] sm:$0xff] %v9193_v0 }
  0x6e   : > { %306 = vst [vmem:[#allocation2 + $0x1a0] sm:$0xff] %v9193_v0  ;;  %307 = vst [vmem:[#allocation2 + $0x1a8] sm:$0xff] %v9193_v0 }
  0x6f   : > { %308 = vst [vmem:[#allocation2 + $0x1b0] sm:$0xff] %v9193_v0  ;;  %309 = vst [vmem:[#allocation2 + $0x1b8] sm:$0xff] %v9193_v0 }
  0x70   : > { %310 = vst [vmem:[#allocation2 + $0x1c0] sm:$0xff] %v9193_v0  ;;  %311 = vst [vmem:[#allocation2 + $0x1c8] sm:$0xff] %v9193_v0 }
  0x71   : > { %312 = vst [vmem:[#allocation2 + $0x1d0] sm:$0xff] %v9193_v0  ;;  %313 = vst [vmem:[#allocation2 + $0x1d8] sm:$0xff] %v9193_v0 }
  0x72   : > { %314 = vst [vmem:[#allocation2 + $0x1e0] sm:$0xff] %v9193_v0  ;;  %315 = vst [vmem:[#allocation2 + $0x1e8] sm:$0xff] %v9193_v0 }
  0x73   : > { %316 = vst [vmem:[#allocation2 + $0x1f0] sm:$0xff] %v9193_v0  ;;  %317 = vst [vmem:[#allocation2 + $0x1f8] sm:$0xff] %v9193_v0 }
  0x74   : > { %318 = vst [vmem:[#allocation2 + $0x200] sm:$0xff] %v9193_v0  ;;  %319 = vst [vmem:[#allocation2 + $0x208] sm:$0xff] %v9193_v0 }
  0x75   : > { %320 = vst [vmem:[#allocation2 + $0x210] sm:$0xff] %v9193_v0  ;;  %321 = vst [vmem:[#allocation2 + $0x218] sm:$0xff] %v9193_v0 }
  0x76   : > { %322 = vst [vmem:[#allocation2 + $0x220] sm:$0xff] %v9193_v0  ;;  %323 = vst [vmem:[#allocation2 + $0x228] sm:$0xff] %v9193_v0 }
  0x77   : > { %324 = vst [vmem:[#allocation2 + $0x230] sm:$0xff] %v9193_v0  ;;  %325 = vst [vmem:[#allocation2 + $0x238] sm:$0xff] %v9193_v0 }
  0x78   : > { %326 = vst [vmem:[#allocation2 + $0x240] sm:$0xff] %v9193_v0  ;;  %327 = vst [vmem:[#allocation2 + $0x248] sm:$0xff] %v9193_v0 }
  0x79   : > { %328 = vst [vmem:[#allocation2 + $0x250] sm:$0xff] %v9193_v0  ;;  %329 = vst [vmem:[#allocation2 + $0x258] sm:$0xff] %v9193_v0 }
  0x7a   : > { %330 = vst [vmem:[#allocation2 + $0x260] sm:$0xff] %v9193_v0  ;;  %331 = vst [vmem:[#allocation2 + $0x268] sm:$0xff] %v9193_v0 }
  0x7b   : > { %332 = vst [vmem:[#allocation2 + $0x270] sm:$0xff] %v9193_v0  ;;  %333 = vst [vmem:[#allocation2 + $0x278] sm:$0xff] %v9193_v0 }
  0x7c   : > { %334 = vst [vmem:[#allocation2 + $0x280] sm:$0xff] %v9193_v0  ;;  %335 = vst [vmem:[#allocation2 + $0x288] sm:$0xff] %v9193_v0 }
  0x7d   : > { %336 = vst [vmem:[#allocation2 + $0x290] sm:$0xff] %v9193_v0  ;;  %337 = vst [vmem:[#allocation2 + $0x298] sm:$0xff] %v9193_v0 }
  0x7e   : > { %338 = vst [vmem:[#allocation2 + $0x2a0] sm:$0xff] %v9193_v0  ;;  %339 = vst [vmem:[#allocation2 + $0x2a8] sm:$0xff] %v9193_v0 }
  0x7f   : > { %340 = vst [vmem:[#allocation2 + $0x2b0] sm:$0xff] %v9193_v0  ;;  %341 = vst [vmem:[#allocation2 + $0x2b8] sm:$0xff] %v9193_v0 }
  0x80   : > { %342 = vst [vmem:[#allocation2 + $0x2c0] sm:$0xff] %v9193_v0  ;;  %343 = vst [vmem:[#allocation2 + $0x2c8] sm:$0xff] %v9193_v0 }
  0x81   : > { %344 = vst [vmem:[#allocation2 + $0x2d0] sm:$0xff] %v9193_v0  ;;  %345 = vst [vmem:[#allocation2 + $0x2d8] sm:$0xff] %v9193_v0 }
  0x82   : > { %346 = vst [vmem:[#allocation2 + $0x2e0] sm:$0xff] %v9193_v0  ;;  %347 = vst [vmem:[#allocation2 + $0x2e8] sm:$0xff] %v9193_v0 }
  0x83   : > { %348 = vst [vmem:[#allocation2 + $0x2f0] sm:$0xff] %v9193_v0  ;;  %349 = vst [vmem:[#allocation2 + $0x2f8] sm:$0xff] %v9193_v0 }
  0x84   : > { %350 = vst [vmem:[#allocation2 + $0x300] sm:$0xff] %v9193_v0  ;;  %351 = vst [vmem:[#allocation2 + $0x308] sm:$0xff] %v9193_v0 }
  0x85   : > { %352 = vst [vmem:[#allocation2 + $0x310] sm:$0xff] %v9193_v0  ;;  %353 = vst [vmem:[#allocation2 + $0x318] sm:$0xff] %v9193_v0 }
  0x86   : > { %354 = vst [vmem:[#allocation2 + $0x320] sm:$0xff] %v9193_v0  ;;  %355 = vst [vmem:[#allocation2 + $0x328] sm:$0xff] %v9193_v0 }
  0x87   : > { %356 = vst [vmem:[#allocation2 + $0x330] sm:$0xff] %v9193_v0  ;;  %357 = vst [vmem:[#allocation2 + $0x338] sm:$0xff] %v9193_v0 }
  0x88   : > { %358 = vst [vmem:[#allocation2 + $0x340] sm:$0xff] %v9193_v0  ;;  %359 = vst [vmem:[#allocation2 + $0x348] sm:$0xff] %v9193_v0 }
  0x89   : > { %360 = vst [vmem:[#allocation2 + $0x350] sm:$0xff] %v9193_v0  ;;  %361 = vst [vmem:[#allocation2 + $0x358] sm:$0xff] %v9193_v0 }
  0x8a   : > { %362 = vst [vmem:[#allocation2 + $0x360] sm:$0xff] %v9193_v0  ;;  %363 = vst [vmem:[#allocation2 + $0x368] sm:$0xff] %v9193_v0 }
  0x8b   : > { %364 = vst [vmem:[#allocation2 + $0x370] sm:$0xff] %v9193_v0  ;;  %365 = vst [vmem:[#allocation2 + $0x378] sm:$0xff] %v9193_v0 }
  0x8c   : > { %366 = vst [vmem:[#allocation2 + $0x380] sm:$0xff] %v9193_v0  ;;  %367 = vst [vmem:[#allocation2 + $0x388] sm:$0xff] %v9193_v0 }
  0x8d   : > { %368 = vst [vmem:[#allocation2 + $0x390] sm:$0xff] %v9193_v0  ;;  %369 = vst [vmem:[#allocation2 + $0x398] sm:$0xff] %v9193_v0 }
  0x8e   : > { %370 = vst [vmem:[#allocation2 + $0x3a0] sm:$0xff] %v9193_v0  ;;  %371 = vst [vmem:[#allocation2 + $0x3a8] sm:$0xff] %v9193_v0 }
  0x8f   : > { %372 = vst [vmem:[#allocation2 + $0x3b0] sm:$0xff] %v9193_v0  ;;  %373 = vst [vmem:[#allocation2 + $0x3b8] sm:$0xff] %v9193_v0 }
  0x90   : > { %374 = vst [vmem:[#allocation2 + $0x3c0] sm:$0xff] %v9193_v0  ;;  %375 = vst [vmem:[#allocation2 + $0x3c8] sm:$0xff] %v9193_v0 }
  0x91   : > { %376 = vst [vmem:[#allocation2 + $0x3d0] sm:$0xff] %v9193_v0  ;;  %377 = vst [vmem:[#allocation2 + $0x3d8] sm:$0xff] %v9193_v0 }
  0x92   : > { %378 = vst [vmem:[#allocation2 + $0x3e0] sm:$0xff] %v9193_v0  ;;  %379 = vst [vmem:[#allocation2 + $0x3e8] sm:$0xff] %v9193_v0 }
  0x93   : > { %380 = vst [vmem:[#allocation2 + $0x3f0] sm:$0xff] %v9193_v0  ;;  %381 = vst [vmem:[#allocation2 + $0x3f8] sm:$0xff] %v9193_v0 }
  0x94   : > { %382 = vst [vmem:[#allocation2 + $0x400] sm:$0xff] %v9193_v0  ;;  %383 = vst [vmem:[#allocation2 + $0x408] sm:$0xff] %v9193_v0 }
  0x95   : > { %384 = vst [vmem:[#allocation2 + $0x410] sm:$0xff] %v9193_v0  ;;  %385 = vst [vmem:[#allocation2 + $0x418] sm:$0xff] %v9193_v0 }
  0x96   : > { %386 = vst [vmem:[#allocation2 + $0x420] sm:$0xff] %v9193_v0  ;;  %387 = vst [vmem:[#allocation2 + $0x428] sm:$0xff] %v9193_v0 }
  0x97   : > { %388 = vst [vmem:[#allocation2 + $0x430] sm:$0xff] %v9193_v0  ;;  %389 = vst [vmem:[#allocation2 + $0x438] sm:$0xff] %v9193_v0 }
  0x98   : > { %390 = vst [vmem:[#allocation2 + $0x440] sm:$0xff] %v9193_v0  ;;  %391 = vst [vmem:[#allocation2 + $0x448] sm:$0xff] %v9193_v0 }
  0x99   : > { %392 = vst [vmem:[#allocation2 + $0x450] sm:$0xff] %v9193_v0  ;;  %393 = vst [vmem:[#allocation2 + $0x458] sm:$0xff] %v9193_v0 }
  0x9a   : > { %394 = vst [vmem:[#allocation2 + $0x460] sm:$0xff] %v9193_v0  ;;  %395 = vst [vmem:[#allocation2 + $0x468] sm:$0xff] %v9193_v0 }
  0x9b   : > { %396 = vst [vmem:[#allocation2 + $0x470] sm:$0xff] %v9193_v0  ;;  %397 = vst [vmem:[#allocation2 + $0x478] sm:$0xff] %v9193_v0 }
  0x9c   : > { %398 = vst [vmem:[#allocation2 + $0x480] sm:$0xff] %v9193_v0  ;;  %399 = vst [vmem:[#allocation2 + $0x488] sm:$0xff] %v9193_v0 }
  0x9d   : > { %400 = vst [vmem:[#allocation2 + $0x490] sm:$0xff] %v9193_v0  ;;  %401 = vst [vmem:[#allocation2 + $0x498] sm:$0xff] %v9193_v0 }
  0x9e   : > { %402 = vst [vmem:[#allocation2 + $0x4a0] sm:$0xff] %v9193_v0  ;;  %403 = vst [vmem:[#allocation2 + $0x4a8] sm:$0xff] %v9193_v0 }
  0x9f   : > { %404 = vst [vmem:[#allocation2 + $0x4b0] sm:$0xff] %v9193_v0  ;;  %405 = vst [vmem:[#allocation2 + $0x4b8] sm:$0xff] %v9193_v0 }
  0xa0   : > { %406 = vst [vmem:[#allocation2 + $0x4c0] sm:$0xff] %v9193_v0  ;;  %407 = vst [vmem:[#allocation2 + $0x4c8] sm:$0xff] %v9193_v0 }
  0xa1   : > { %408 = vst [vmem:[#allocation2 + $0x4d0] sm:$0xff] %v9193_v0  ;;  %409 = vst [vmem:[#allocation2 + $0x4d8] sm:$0xff] %v9193_v0 }
  0xa2   : > { %410 = vst [vmem:[#allocation2 + $0x4e0] sm:$0xff] %v9193_v0  ;;  %411 = vst [vmem:[#allocation2 + $0x4e8] sm:$0xff] %v9193_v0 }
  0xa3   : > { %412 = vst [vmem:[#allocation2 + $0x4f0] sm:$0xff] %v9193_v0  ;;  %413 = vst [vmem:[#allocation2 + $0x4f8] sm:$0xff] %v9193_v0 }
  0xa4   : > { %414 = vst [vmem:[#allocation2 + $0x500] sm:$0xff] %v9193_v0  ;;  %415 = vst [vmem:[#allocation2 + $0x508] sm:$0xff] %v9193_v0 }
  0xa5   : > { %416 = vst [vmem:[#allocation2 + $0x510] sm:$0xff] %v9193_v0  ;;  %417 = vst [vmem:[#allocation2 + $0x518] sm:$0xff] %v9193_v0 }
  0xa6   : > { %418 = vst [vmem:[#allocation2 + $0x520] sm:$0xff] %v9193_v0  ;;  %419 = vst [vmem:[#allocation2 + $0x528] sm:$0xff] %v9193_v0 }
  0xa7   : > { %420 = vst [vmem:[#allocation2 + $0x530] sm:$0xff] %v9193_v0  ;;  %421 = vst [vmem:[#allocation2 + $0x538] sm:$0xff] %v9193_v0 }
  0xa8   : > { %422 = vst [vmem:[#allocation2 + $0x540] sm:$0xff] %v9193_v0  ;;  %423 = vst [vmem:[#allocation2 + $0x548] sm:$0xff] %v9193_v0 }
  0xa9   : > { %424 = vst [vmem:[#allocation2 + $0x550] sm:$0xff] %v9193_v0  ;;  %426 = vst.msk [vmem:[#allocation2 + $0x558] sm:$0xff] %vm425_vm0, %v9193_v0 }
  0xaa PF: > { %v600_v1 = vld [vmem:[%s9350_s5] sm:$0xff]  ;;  %vm14628_vm1 = vcmask 1043456   ;;  %v601_v2 = vld [vmem:[%s9350_s5 + $0x8] sm:$0xff]  ;;  %v9194_v7 = vmov 0   ;;  %v602_v8 = vld [vmem:[%s9350_s5 + $0x10] sm:$0xff]  ;;  %vm1116_vm2 = vcmask 64512  }
  0xab   : > { %v8163_v3 = vcombine.high %v600_v1, %v600_v1  ;;  %v8165_v4 = vcombine.high %v601_v2, %v601_v2  ;;  %v8162_v5 = vcombine.low %v600_v1, %v600_v1  ;;  %v8164_v6 = vcombine.low %v601_v2, %v601_v2  ;;  %1669 = vmatprep.mubr.bf16.mxu0 %v9194_v7  ;;  %v603_v9 = vld [vmem:[%s9350_s5 + $0x18] sm:$0xff]  ;;  %v604_v16 = vld [vmem:[%s9350_s5 + $0x20] sm:$0xff]  ;;  %v605_v17 = vld [vmem:[%s9350_s5 + $0x28] sm:$0xff]  ;;  %p8506_p9 = scmp.ne.s32.totalorder %s9181_s15, 3 }
  0xac   : > { %1710 = vmatprep.mubr.bf16.mxu1 %v9194_v7  ;;  %v8167_v10 = vcombine.high %v602_v8, %v602_v8  ;;  %v8169_v11 = vcombine.high %v603_v9, %v603_v9  ;;  %v8166_v12 = vcombine.low %v602_v8, %v602_v8  ;;  %v8168_v15 = vcombine.low %v603_v9, %v603_v9  ;;  %v9549_v18 = vld [vmem:[%s9356_s12] sm:$0xf]  ;;  %v607_v26 = vld [vmem:[%s9350_s5 + $0x38] sm:$0xff]  ;;  %v609_v34 = vld [vmem:[%s9350_s5 + $0x48] sm:$0xff] }
  0xad   : > { %8334 = vmatprep.subr.msk.bf16.mxu0 %vm14628_vm1, %v8163_v3  ;;  %8336 = vmatprep.subr.msk.bf16.mxu1 %vm14628_vm1, %v8165_v4  ;;  %v1122_v13 = vsel %vm14628_vm1, %v8162_v5, 0  ;;  %v1128_v14 = vsel %vm14628_vm1, %v8164_v6, 0  ;;  %v8171_v21 = vcombine.high %v604_v16, %v604_v16  ;;  %v8173_v22 = vcombine.high %v605_v17, %v605_v17  ;;  %v606_v25 = vld [vmem:[%s9350_s5 + $0x30] sm:$0xff]  ;;  %v608_v33 = vld [vmem:[%s9350_s5 + $0x40] sm:$0xff]  ;;  %v611_v42 = vld [vmem:[%s9350_s5 + $0x58] sm:$0xff] }
  0xae   : > { %1638 = vmatpush1.bf16.msra.mxu0 %v1122_v13  ;;  %1679 = vmatpush1.bf16.msra.mxu1 %v1128_v14  ;;  %v1134_v19 = vsel %vm14628_vm1, %v8166_v12, 0  ;;  %v1140_v20 = vsel %vm14628_vm1, %v8168_v15, 0  ;;  %v8170_v23 = vcombine.low %v604_v16, %v604_v16  ;;  %v8172_v24 = vcombine.low %v605_v17, %v605_v17  ;;  %v610_v41 = vld [vmem:[%s9350_s5 + $0x50] sm:$0xff]  ;;  %v612_v49 = vld [vmem:[%s9350_s5 + $0x60] sm:$0xff]  ;;  %v613_v50 = vld [vmem:[%s9350_s5 + $0x68] sm:$0xff] }
  0xaf   : > { %8338 = vmatprep.subr.msk.bf16.mxu0 %vm14628_vm1, %v8167_v10  ;;  %8340 = vmatprep.subr.msk.bf16.mxu1 %vm14628_vm1, %v8169_v11  ;;  %v8175_v29 = vcombine.high %v606_v25, %v606_v25  ;;  %v8177_v30 = vcombine.high %v607_v26, %v607_v26  ;;  %v8174_v31 = vcombine.low %v606_v25, %v606_v25  ;;  %v614_v57 = vld [vmem:[%s9350_s5 + $0x70] sm:$0xff]  ;;  %v615_v58 = vld [vmem:[%s9350_s5 + $0x78] sm:$0xff]  ;;  %v616_v1 = vld [vmem:[%s9350_s5 + $0x80] sm:$0xff]  ;;  %vm5506_vm3 = vcmask 523264  }
  0xb0   : > { %v1146_v27 = vsel %vm14628_vm1, %v8170_v23, 0  ;;  %v1152_v28 = vsel %vm14628_vm1, %v8172_v24, 0  ;;  %v8176_v32 = vcombine.low %v607_v26, %v607_v26  ;;  %v8179_v37 = vcombine.high %v608_v33, %v608_v33  ;;  %v617_v2 = vld [vmem:[%s9350_s5 + $0x88] sm:$0xff]  ;;  %v618_v10 = vld [vmem:[%s9350_s5 + $0x90] sm:$0xff]  ;;  %v619_v11 = vld [vmem:[%s9350_s5 + $0x98] sm:$0xff] }
  0xb1   : > { %8335 = vmatmul.mubr.msk.bf16.vlgmr.msra.gmra.mrb[0].mxu0 %vm1116_vm2, %v9549_v18  ;;  %8337 = vmatmul.mubr.msk.bf16.vlgmr.msra.gmra.mrb[0].mxu1 %vm1116_vm2, %v9549_v18  ;;  %v1158_v35 = vsel %vm14628_vm1, %v8174_v31, 0  ;;  %v8181_v38 = vcombine.high %v609_v34, %v609_v34  ;;  %v8178_v39 = vcombine.low %v608_v33, %v608_v33  ;;  %v8180_v40 = vcombine.low %v609_v34, %v609_v34 }
  0xb2   : > { %1720 = vmatpush1.bf16.msra.mxu0 %v1134_v19  ;;  %1761 = vmatpush1.bf16.msra.mxu1 %v1140_v20  ;;  %v1164_v36 = vsel %vm14628_vm1, %v8176_v32, 0  ;;  %v8183_v45 = vcombine.high %v610_v41, %v610_v41  ;;  %v8185_v46 = vcombine.high %v611_v42, %v611_v42  ;;  %v8182_v47 = vcombine.low %v610_v41, %v610_v41  ;;  %v620_v19 = vld [vmem:[%s9350_s5 + $0xa0] sm:$0xff]  ;;  %v621_v20 = vld [vmem:[%s9350_s5 + $0xa8] sm:$0xff] }
  0xb3   : > { %1751 = vmatprep.mubr.bf16.mxu0 %v9194_v7  ;;  %1792 = vmatprep.mubr.bf16.mxu1 %v9194_v7  ;;  %v1170_v43 = vsel %vm14628_vm1, %v8178_v39, 0  ;;  %v1176_v44 = vsel %vm14628_vm1, %v8180_v40, 0  ;;  %v8184_v48 = vcombine.low %v611_v42, %v611_v42  ;;  %v8187_v53 = vcombine.high %v612_v49, %v612_v49 }
  0xb4   : > { %8342 = vmatprep.subr.msk.bf16.mxu0 %vm14628_vm1, %v8171_v21  ;;  %8344 = vmatprep.subr.msk.bf16.mxu1 %vm14628_vm1, %v8173_v22  ;;  %v1182_v51 = vsel %vm14628_vm1, %v8182_v47, 0  ;;  %v8189_v54 = vcombine.high %v613_v50, %v613_v50  ;;  %v8186_v55 = vcombine.low %v612_v49, %v612_v49  ;;  %v8188_v56 = vcombine.low %v613_v50, %v613_v50 }
  0xb5   : > { %v1188_v52 = vsel %vm14628_vm1, %v8184_v48, 0  ;;  %v8191_v61 = vcombine.high %v614_v57, %v614_v57  ;;  %v8193_v62 = vcombine.high %v615_v58, %v615_v58  ;;  %v8190_v63 = vcombine.low %v614_v57, %v614_v57 }
  0xb6   : > { %v1194_v59 = vsel %vm14628_vm1, %v8186_v55, 0  ;;  %v1200_v60 = vsel %vm14628_vm1, %v8188_v56, 0  ;;  %v8192_v0 = vcombine.low %v615_v58, %v615_v58  ;;  %v8195_v5 = vcombine.high %v616_v1, %v616_v1 }
  0xb7   : > { %v1206_v3 = vsel %vm14628_vm1, %v8190_v63, 0  ;;  %v8197_v6 = vcombine.high %v617_v2, %v617_v2  ;;  %v8194_v8 = vcombine.low %v616_v1, %v616_v1  ;;  %v8196_v9 = vcombine.low %v617_v2, %v617_v2 }
  0xb8   : > { %v1212_v4 = vsel %vm14628_vm1, %v8192_v0, 0  ;;  %v8199_v14 = vcombine.high %v618_v10, %v618_v10  ;;  %v8201_v15 = vcombine.high %v619_v11, %v619_v11  ;;  %v8198_v16 = vcombine.low %v618_v10, %v618_v10 }
  0xb9   : > { %8339 = vmatmul.mubr.msk.bf16.vlgmr.msra.gmra.mrb[4].mxu0 %vm1116_vm2, %v9549_v18  ;;  %8341 = vmatmul.mubr.msk.bf16.vlgmr.msra.gmra.mrb[4].mxu1 %vm1116_vm2, %v9549_v18  ;;  %v1218_v12 = vsel %vm14628_vm1, %v8194_v8, 0  ;;  %v1224_v13 = vsel %vm14628_vm1, %v8196_v9, 0  ;;  %v8200_v17 = vcombine.low %v619_v11, %v619_v11  ;;  %v8203_v23 = vcombine.high %v620_v19, %v620_v19 }
  0xba   : > { %1802 = vmatpush1.bf16.msra.mxu0 %v1146_v27  ;;  %1843 = vmatpush1.bf16.msra.mxu1 %v1152_v28  ;;  %v1230_v21 = vsel %vm14628_vm1, %v8198_v16, 0  ;;  %v8205_v24 = vcombine.high %v621_v20, %v621_v20  ;;  %v8202_v25 = vcombine.low %v620_v19, %v620_v19  ;;  %v8204_v26 = vcombine.low %v621_v20, %v621_v20  ;;  %v622_v27 = vld [vmem:[%s9350_s5 + $0xb0] sm:$0xff]  ;;  %v623_v28 = vld [vmem:[%s9350_s5 + $0xb8] sm:$0xff] }
  0xbb   : > { %1833 = vmatprep.mubr.bf16.mxu0 %v9194_v7  ;;  %1874 = vmatprep.mubr.bf16.mxu1 %v9194_v7  ;;  %v1236_v22 = vsel %vm14628_vm1, %v8200_v17, 0  ;;  %v8207_v31 = vcombine.high %v622_v27, %v622_v27  ;;  %v8209_v32 = vcombine.high %v623_v28, %v623_v28  ;;  %v8206_v33 = vcombine.low %v622_v27, %v622_v27 }
  0xbc   : > { %8346 = vmatprep.subr.msk.bf16.mxu0 %vm14628_vm1, %v8175_v29  ;;  %8348 = vmatprep.subr.msk.bf16.mxu1 %vm14628_vm1, %v8177_v30  ;;  %v1242_v29 = vsel %vm14628_vm1, %v8202_v25, 0  ;;  %v1248_v30 = vsel %vm14628_vm1, %v8204_v26, 0  ;;  %v8208_v34 = vcombine.low %v623_v28, %v623_v28 }
  0xc1   : > { %8343 = vmatmul.mubr.msk.bf16.vlgmr.msra.gmra.mrb[8].mxu0 %vm1116_vm2, %v9549_v18  ;;  %8345 = vmatmul.mubr.msk.bf16.vlgmr.msra.gmra.mrb[8].mxu1 %vm1116_vm2, %v9549_v18 }
  0xc2   : > { %1884 = vmatpush1.bf16.msra.mxu0 %v1158_v35  ;;  %1925 = vmatpush1.bf16.msra.mxu1 %v1164_v36  ;;  %v624_v35 = vld [vmem:[%s9350_s5 + $0xc0] sm:$0xff]  ;;  %v625_v36 = vld [vmem:[%s9350_s5 + $0xc8] sm:$0xff] }
  0xc3   : > { %1915 = vmatprep.mubr.bf16.mxu0 %v9194_v7  ;;  %1956 = vmatprep.mubr.bf16.mxu1 %v9194_v7  ;;  %v8211_v39 = vcombine.high %v624_v35, %v624_v35  ;;  %v8213_v40 = vcombine.high %v625_v36, %v625_v36  ;;  %v8210_v41 = vcombine.low %v624_v35, %v624_v35 }
  0xc4   : > { %8350 = vmatprep.subr.msk.bf16.mxu0 %vm14628_vm1, %v8179_v37  ;;  %8352 = vmatprep.subr.msk.bf16.mxu1 %vm14628_vm1, %v8181_v38  ;;  %v1254_v37 = vsel %vm14628_vm1, %v8206_v33, 0  ;;  %v1260_v38 = vsel %vm14628_vm1, %v8208_v34, 0  ;;  %v8212_v42 = vcombine.low %v625_v36, %v625_v36 }
  0xc9   : > { %8347 = vmatmul.mubr.msk.bf16.vlgmr.msra.gmra.mrb[12].mxu0 %vm1116_vm2, %v9549_v18  ;;  %8349 = vmatmul.mubr.msk.bf16.vlgmr.msra.gmra.mrb[12].mxu1 %vm1116_vm2, %v9549_v18 }
  0xca   : > { %1966 = vmatpush1.bf16.msra.mxu0 %v1170_v43  ;;  %2007 = vmatpush1.bf16.msra.mxu1 %v1176_v44  ;;  %v626_v43 = vld [vmem:[%s9350_s5 + $0xd0] sm:$0xff]  ;;  %v627_v44 = vld [vmem:[%s9350_s5 + $0xd8] sm:$0xff] }
  0xcb   : > { %1997 = vmatprep.mubr.bf16.mxu0 %v9194_v7  ;;  %2038 = vmatprep.mubr.bf16.mxu1 %v9194_v7  ;;  %v8215_v47 = vcombine.high %v626_v43, %v626_v43  ;;  %v8217_v48 = vcombine.high %v627_v44, %v627_v44  ;;  %v8214_v49 = vcombine.low %v626_v43, %v626_v43 }
  0xcc   : > { %8354 = vmatprep.subr.msk.bf16.mxu0 %vm14628_vm1, %v8183_v45  ;;  %8356 = vmatprep.subr.msk.bf16.mxu1 %vm14628_vm1, %v8185_v46  ;;  %v1266_v45 = vsel %vm14628_vm1, %v8210_v41, 0  ;;  %v1272_v46 = vsel %vm14628_vm1, %v8212_v42, 0  ;;  %v8216_v50 = vcombine.low %v627_v44, %v627_v44 }
  0xd1   : > { %8351 = vmatmul.mubr.msk.bf16.vlgmr.msra.gmra.mrb[16].mxu0 %vm1116_vm2, %v9549_v18  ;;  %8353 = vmatmul.mubr.msk.bf16.vlgmr.msra.gmra.mrb[16].mxu1 %vm1116_vm2, %v9549_v18 }
  0xd2   : > { %2048 = vmatpush1.bf16.msra.mxu0 %v1182_v51  ;;  %2089 = vmatpush1.bf16.msra.mxu1 %v1188_v52  ;;  %v628_v51 = vld [vmem:[%s9350_s5 + $0xe0] sm:$0xff]  ;;  %v629_v52 = vld [vmem:[%s9350_s5 + $0xe8] sm:$0xff] }
  0xd3   : > { %2079 = vmatprep.mubr.bf16.mxu0 %v9194_v7  ;;  %2120 = vmatprep.mubr.bf16.mxu1 %v9194_v7  ;;  %v8219_v55 = vcombine.high %v628_v51, %v628_v51  ;;  %v8221_v56 = vcombine.high %v629_v52, %v629_v52  ;;  %v8218_v57 = vcombine.low %v628_v51, %v628_v51 }
  0xd4   : > { %8358 = vmatprep.subr.msk.bf16.mxu0 %vm14628_vm1, %v8187_v53  ;;  %8360 = vmatprep.subr.msk.bf16.mxu1 %vm14628_vm1, %v8189_v54  ;;  %v1278_v53 = vsel %vm14628_vm1, %v8214_v49, 0  ;;  %v1284_v54 = vsel %vm14628_vm1, %v8216_v50, 0  ;;  %v8220_v58 = vcombine.low %v629_v52, %v629_v52 }
  0xd9   : > { %8355 = vmatmul.mubr.msk.bf16.vlgmr.msra.gmra.mrb[20].mxu0 %vm1116_vm2, %v9549_v18  ;;  %8357 = vmatmul.mubr.msk.bf16.vlgmr.msra.gmra.mrb[20].mxu1 %vm1116_vm2, %v9549_v18 }
  0xda   : > { %2130 = vmatpush1.bf16.msra.mxu0 %v1194_v59  ;;  %2171 = vmatpush1.bf16.msra.mxu1 %v1200_v60  ;;  %v630_v59 = vld [vmem:[%s9350_s5 + $0xf0] sm:$0xff]  ;;  %v631_v60 = vld [vmem:[%s9350_s5 + $0xf8] sm:$0xff] }
  0xdb   : > { %2161 = vmatprep.mubr.bf16.mxu0 %v9194_v7  ;;  %2202 = vmatprep.mubr.bf16.mxu1 %v9194_v7  ;;  %v8223_v63 = vcombine.high %v630_v59, %v630_v59  ;;  %v8225_v0 = vcombine.high %v631_v60, %v631_v60  ;;  %v8222_v1 = vcombine.low %v630_v59, %v630_v59 }
  0xdc   : > { %8362 = vmatprep.subr.msk.bf16.mxu0 %vm14628_vm1, %v8191_v61  ;;  %8364 = vmatprep.subr.msk.bf16.mxu1 %vm14628_vm1, %v8193_v62  ;;  %v1290_v61 = vsel %vm14628_vm1, %v8218_v57, 0  ;;  %v1296_v62 = vsel %vm14628_vm1, %v8220_v58, 0  ;;  %v8224_v2 = vcombine.low %v631_v60, %v631_v60 }
  0xe1   : > { %8359 = vmatmul.mubr.msk.bf16.vlgmr.msra.gmra.mrb[24].mxu0 %vm1116_vm2, %v9549_v18  ;;  %8361 = vmatmul.mubr.msk.bf16.vlgmr.msra.gmra.mrb[24].mxu1 %vm1116_vm2, %v9549_v18 }
  0xe2   : > { %2212 = vmatpush1.bf16.msra.mxu0 %v1206_v3  ;;  %2253 = vmatpush1.bf16.msra.mxu1 %v1212_v4  ;;  %v632_v3 = vld [vmem:[%s9350_s5 + $0x100] sm:$0xff]  ;;  %v633_v4 = vld [vmem:[%s9350_s5 + $0x108] sm:$0xff] }
  0xe3   : > { %2243 = vmatprep.mubr.bf16.mxu0 %v9194_v7  ;;  %2284 = vmatprep.mubr.bf16.mxu1 %v9194_v7  ;;  %v8227_v8 = vcombine.high %v632_v3, %v632_v3  ;;  %v8229_v9 = vcombine.high %v633_v4, %v633_v4  ;;  %v8226_v10 = vcombine.low %v632_v3, %v632_v3 }
  0xe4   : > { %8366 = vmatprep.subr.msk.bf16.mxu0 %vm14628_vm1, %v8195_v5  ;;  %8368 = vmatprep.subr.msk.bf16.mxu1 %vm14628_vm1, %v8197_v6  ;;  %v1302_v5 = vsel %vm14628_vm1, %v8222_v1, 0  ;;  %v1308_v6 = vsel %vm14628_vm1, %v8224_v2, 0  ;;  %v8228_v11 = vcombine.low %v633_v4, %v633_v4 }
  0xe9   : > { %8363 = vmatmul.mubr.msk.bf16.vlgmr.msra.gmra.mrb[28].mxu0 %vm1116_vm2, %v9549_v18  ;;  %8365 = vmatmul.mubr.msk.bf16.vlgmr.msra.gmra.mrb[28].mxu1 %vm1116_vm2, %v9549_v18 }
  0xea   : > { %2294 = vmatpush1.bf16.msra.mxu0 %v1218_v12  ;;  %2335 = vmatpush1.bf16.msra.mxu1 %v1224_v13  ;;  %v634_v12 = vld [vmem:[%s9350_s5 + $0x110] sm:$0xff]  ;;  %v635_v13 = vld [vmem:[%s9350_s5 + $0x118] sm:$0xff] }
  0xeb   : > { %2325 = vmatprep.mubr.bf16.mxu0 %v9194_v7  ;;  %2366 = vmatprep.mubr.bf16.mxu1 %v9194_v7  ;;  %v8231_v16 = vcombine.high %v634_v12, %v634_v12  ;;  %v8233_v17 = vcombine.high %v635_v13, %v635_v13  ;;  %v8230_v19 = vcombine.low %v634_v12, %v634_v12 }
  0xec   : > { %8370 = vmatprep.subr.msk.bf16.mxu0 %vm14628_vm1, %v8199_v14  ;;  %8372 = vmatprep.subr.msk.bf16.mxu1 %vm14628_vm1, %v8201_v15  ;;  %v1314_v14 = vsel %vm14628_vm1, %v8226_v10, 0  ;;  %v1320_v15 = vsel %vm14628_vm1, %v8228_v11, 0  ;;  %v8232_v20 = vcombine.low %v635_v13, %v635_v13 }
  0xf1   : > { %8367 = vmatmul.mubr.msk.bf16.vlgmr.msra.gmra.mrb[32].mxu0 %vm1116_vm2, %v9549_v18  ;;  %8369 = vmatmul.mubr.msk.bf16.vlgmr.msra.gmra.mrb[32].mxu1 %vm1116_vm2, %v9549_v18 }
  0xf2   : > { %2376 = vmatpush1.bf16.msra.mxu0 %v1230_v21  ;;  %2417 = vmatpush1.bf16.msra.mxu1 %v1236_v22  ;;  %v636_v21 = vld [vmem:[%s9350_s5 + $0x120] sm:$0xff]  ;;  %v637_v22 = vld [vmem:[%s9350_s5 + $0x128] sm:$0xff] }
  0xf3   : > { %2407 = vmatprep.mubr.bf16.mxu0 %v9194_v7  ;;  %2448 = vmatprep.mubr.bf16.mxu1 %v9194_v7  ;;  %v8235_v25 = vcombine.high %v636_v21, %v636_v21  ;;  %v8237_v26 = vcombine.high %v637_v22, %v637_v22  ;;  %v8234_v27 = vcombine.low %v636_v21, %v636_v21 }
  0xf4   : > { %8374 = vmatprep.subr.msk.bf16.mxu0 %vm14628_vm1, %v8203_v23  ;;  %8376 = vmatprep.subr.msk.bf16.mxu1 %vm14628_vm1, %v8205_v24  ;;  %v1326_v23 = vsel %vm14628_vm1, %v8230_v19, 0  ;;  %v1332_v24 = vsel %vm14628_vm1, %v8232_v20, 0  ;;  %v8236_v28 = vcombine.low %v637_v22, %v637_v22 }
  0xf9   : > { %8371 = vmatmul.mubr.msk.bf16.vlgmr.msra.gmra.mrb[36].mxu0 %vm1116_vm2, %v9549_v18  ;;  %8373 = vmatmul.mubr.msk.bf16.vlgmr.msra.gmra.mrb[36].mxu1 %vm1116_vm2, %v9549_v18 }
  0xfa   : > { %2458 = vmatpush1.bf16.msra.mxu0 %v1242_v29  ;;  %2499 = vmatpush1.bf16.msra.mxu1 %v1248_v30  ;;  %v638_v29 = vld [vmem:[%s9350_s5 + $0x130] sm:$0xff]  ;;  %v639_v30 = vld [vmem:[%s9350_s5 + $0x138] sm:$0xff] }
  0xfb   : > { %2489 = vmatprep.mubr.bf16.mxu0 %v9194_v7  ;;  %2530 = vmatprep.mubr.bf16.mxu1 %v9194_v7  ;;  %v8239_v33 = vcombine.high %v638_v29, %v638_v29  ;;  %v8241_v34 = vcombine.high %v639_v30, %v639_v30  ;;  %v8238_v35 = vcombine.low %v638_v29, %v638_v29 }
  0xfc   : > { %8378 = vmatprep.subr.msk.bf16.mxu0 %vm14628_vm1, %v8207_v31  ;;  %8380 = vmatprep.subr.msk.bf16.mxu1 %vm14628_vm1, %v8209_v32  ;;  %v1338_v31 = vsel %vm14628_vm1, %v8234_v27, 0  ;;  %v1344_v32 = vsel %vm14628_vm1, %v8236_v28, 0  ;;  %v8240_v36 = vcombine.low %v639_v30, %v639_v30 }
 0x101   : > { %8375 = vmatmul.mubr.msk.bf16.vlgmr.msra.gmra.mrb[40].mxu0 %vm1116_vm2, %v9549_v18  ;;  %8377 = vmatmul.mubr.msk.bf16.vlgmr.msra.gmra.mrb[40].mxu1 %vm1116_vm2, %v9549_v18 }
 0x102   : > { %2540 = vmatpush1.bf16.msra.mxu0 %v1254_v37  ;;  %2581 = vmatpush1.bf16.msra.mxu1 %v1260_v38  ;;  %v640_v37 = vld [vmem:[%s9350_s5 + $0x140] sm:$0xff]  ;;  %v641_v38 = vld [vmem:[%s9350_s5 + $0x148] sm:$0xff] }
 0x103   : > { %2571 = vmatprep.mubr.bf16.mxu0 %v9194_v7  ;;  %2612 = vmatprep.mubr.bf16.mxu1 %v9194_v7  ;;  %v8243_v41 = vcombine.high %v640_v37, %v640_v37  ;;  %v8245_v42 = vcombine.high %v641_v38, %v641_v38  ;;  %v8242_v43 = vcombine.low %v640_v37, %v640_v37 }
 0x104   : > { %8382 = vmatprep.subr.msk.bf16.mxu0 %vm14628_vm1, %v8211_v39  ;;  %8384 = vmatprep.subr.msk.bf16.mxu1 %vm14628_vm1, %v8213_v40  ;;  %v1350_v39 = vsel %vm14628_vm1, %v8238_v35, 0  ;;  %v1356_v40 = vsel %vm14628_vm1, %v8240_v36, 0  ;;  %v8244_v44 = vcombine.low %v641_v38, %v641_v38 }
 0x109   : > { %8379 = vmatmul.mubr.msk.bf16.vlgmr.msra.gmra.mrb[44].mxu0 %vm1116_vm2, %v9549_v18  ;;  %8381 = vmatmul.mubr.msk.bf16.vlgmr.msra.gmra.mrb[44].mxu1 %vm1116_vm2, %v9549_v18 }
 0x10a   : > { %2622 = vmatpush1.bf16.msra.mxu0 %v1266_v45  ;;  %2663 = vmatpush1.bf16.msra.mxu1 %v1272_v46  ;;  %v642_v45 = vld [vmem:[%s9350_s5 + $0x150] sm:$0xff]  ;;  %v643_v46 = vld [vmem:[%s9350_s5 + $0x158] sm:$0xff] }
 0x10b   : > { %2653 = vmatprep.mubr.bf16.mxu0 %v9194_v7  ;;  %2694 = vmatprep.mubr.bf16.mxu1 %v9194_v7  ;;  %v8247_v49 = vcombine.high %v642_v45, %v642_v45  ;;  %v8249_v50 = vcombine.high %v643_v46, %v643_v46  ;;  %v8246_v51 = vcombine.low %v642_v45, %v642_v45  ;;  %v427_v45 = vld [vmem:[#allocation2] sm:$0xff] }
 0x10c   : > { %8386 = vmatprep.subr.msk.bf16.mxu0 %vm14628_vm1, %v8215_v47  ;;  %8388 = vmatprep.subr.msk.bf16.mxu1 %vm14628_vm1, %v8217_v48  ;;  %v1362_v47 = vsel %vm14628_vm1, %v8242_v43, 0  ;;  %v1368_v48 = vsel %vm14628_vm1, %v8244_v44, 0  ;;  %v8248_v52 = vcombine.low %v643_v46, %v643_v46  ;;  %v429_v46 = vld [vmem:[#allocation2 + $0x10] sm:$0xff] }
 0x111   : > { %8383 = vmatmul.mubr.msk.bf16.vlgmr.msra.gmra.mrb[48].mxu0 %vm1116_vm2, %v9549_v18  ;;  %8385 = vmatmul.mubr.msk.bf16.vlgmr.msra.gmra.mrb[48].mxu1 %vm1116_vm2, %v9549_v18 }
 0x112   : > { %2704 = vmatpush1.bf16.msra.mxu0 %v1278_v53  ;;  %2745 = vmatpush1.bf16.msra.mxu1 %v1284_v54  ;;  %v644_v53 = vld [vmem:[%s9350_s5 + $0x160] sm:$0xff]  ;;  %v645_v54 = vld [vmem:[%s9350_s5 + $0x168] sm:$0xff] }
 0x113   : > { %2735 = vmatprep.mubr.bf16.mxu0 %v9194_v7  ;;  %2776 = vmatprep.mubr.bf16.mxu1 %v9194_v7  ;;  %v8251_v57 = vcombine.high %v644_v53, %v644_v53  ;;  %v8253_v58 = vcombine.high %v645_v54, %v645_v54  ;;  %v8250_v59 = vcombine.low %v644_v53, %v644_v53 }
 0x114   : > { %8390 = vmatprep.subr.msk.bf16.mxu0 %vm14628_vm1, %v8219_v55  ;;  %8392 = vmatprep.subr.msk.bf16.mxu1 %vm14628_vm1, %v8221_v56  ;;  %v1374_v55 = vsel %vm14628_vm1, %v8246_v51, 0  ;;  %v1380_v56 = vsel %vm14628_vm1, %v8248_v52, 0  ;;  %v8252_v60 = vcombine.low %v645_v54, %v645_v54 }
 0x119   : > { %8387 = vmatmul.mubr.msk.bf16.vlgmr.msra.gmra.mrb[52].mxu0 %vm1116_vm2, %v9549_v18  ;;  %8389 = vmatmul.mubr.msk.bf16.vlgmr.msra.gmra.mrb[52].mxu1 %vm1116_vm2, %v9549_v18 }
 0x11a   : > { %2786 = vmatpush1.bf16.msra.mxu0 %v1290_v61  ;;  %2827 = vmatpush1.bf16.msra.mxu1 %v1296_v62  ;;  %v646_v61 = vld [vmem:[%s9350_s5 + $0x170] sm:$0xff]  ;;  %v647_v62 = vld [vmem:[%s9350_s5 + $0x178] sm:$0xff] }
 0x11b   : > { %2817 = vmatprep.mubr.bf16.mxu0 %v9194_v7  ;;  %2858 = vmatprep.mubr.bf16.mxu1 %v9194_v7  ;;  %v8255_v1 = vcombine.high %v646_v61, %v646_v61  ;;  %v8257_v2 = vcombine.high %v647_v62, %v647_v62  ;;  %v8254_v3 = vcombine.low %v646_v61, %v646_v61 }
 0x11c   : > { %8394 = vmatprep.subr.msk.bf16.mxu0 %vm14628_vm1, %v8223_v63  ;;  %8396 = vmatprep.subr.msk.bf16.mxu1 %vm14628_vm1, %v8225_v0  ;;  %v1386_v63 = vsel %vm14628_vm1, %v8250_v59, 0  ;;  %v1392_v0 = vsel %vm14628_vm1, %v8252_v60, 0  ;;  %v8256_v4 = vcombine.low %v647_v62, %v647_v62 }
 0x121   : > { %8391 = vmatmul.mubr.msk.bf16.vlgmr.msra.gmra.mrb[56].mxu0 %vm1116_vm2, %v9549_v18  ;;  %8393 = vmatmul.mubr.msk.bf16.vlgmr.msra.gmra.mrb[56].mxu1 %vm1116_vm2, %v9549_v18 }
 0x122   : > { %2868 = vmatpush1.bf16.msra.mxu0 %v1302_v5  ;;  %2909 = vmatpush1.bf16.msra.mxu1 %v1308_v6  ;;  %v648_v5 = vld [vmem:[%s9350_s5 + $0x180] sm:$0xff]  ;;  %v649_v6 = vld [vmem:[%s9350_s5 + $0x188] sm:$0xff] }
 0x123   : > { %2899 = vmatprep.mubr.bf16.mxu0 %v9194_v7  ;;  %2940 = vmatprep.mubr.bf16.mxu1 %v9194_v7  ;;  %v8259_v10 = vcombine.high %v648_v5, %v648_v5  ;;  %v8261_v11 = vcombine.high %v649_v6, %v649_v6  ;;  %v8258_v12 = vcombine.low %v648_v5, %v648_v5  ;;  %v431_v5 = vld [vmem:[#allocation2 + $0x20] sm:$0xff] }
 0x124   : > { %8398 = vmatprep.subr.msk.bf16.mxu0 %vm14628_vm1, %v8227_v8  ;;  %8400 = vmatprep.subr.msk.bf16.mxu1 %vm14628_vm1, %v8229_v9  ;;  %v1398_v8 = vsel %vm14628_vm1, %v8254_v3, 0  ;;  %v1404_v9 = vsel %vm14628_vm1, %v8256_v4, 0  ;;  %v8260_v13 = vcombine.low %v649_v6, %v649_v6  ;;  %v433_v6 = vld [vmem:[#allocation2 + $0x30] sm:$0xff] }
 0x129   : > { %8395 = vmatmul.mubr.msk.bf16.vlgmr.msra.gmra.mrb[60].mxu0 %vm1116_vm2, %v9549_v18  ;;  %8397 = vmatmul.mubr.msk.bf16.vlgmr.msra.gmra.mrb[60].mxu1 %vm1116_vm2, %v9549_v18 }
 0x12a   : > { %2950 = vmatpush1.bf16.msra.mxu0 %v1314_v14  ;;  %2991 = vmatpush1.bf16.msra.mxu1 %v1320_v15  ;;  %v650_v14 = vld [vmem:[%s9350_s5 + $0x190] sm:$0xff]  ;;  %v651_v15 = vld [vmem:[%s9350_s5 + $0x198] sm:$0xff] }
 0x12b   : > { %2981 = vmatprep.mubr.bf16.mxu0 %v9194_v7  ;;  %3022 = vmatprep.mubr.bf16.mxu1 %v9194_v7  ;;  %v8263_v19 = vcombine.high %v650_v14, %v650_v14  ;;  %v8265_v20 = vcombine.high %v651_v15, %v651_v15  ;;  %v8262_v21 = vcombine.low %v650_v14, %v650_v14 }
 0x12c   : > { %8402 = vmatprep.subr.msk.bf16.mxu0 %vm14628_vm1, %v8231_v16  ;;  %8404 = vmatprep.subr.msk.bf16.mxu1 %vm14628_vm1, %v8233_v17  ;;  %v1410_v16 = vsel %vm14628_vm1, %v8258_v12, 0  ;;  %v1416_v17 = vsel %vm14628_vm1, %v8260_v13, 0  ;;  %v8264_v22 = vcombine.low %v651_v15, %v651_v15 }
 0x131   : > { %8399 = vmatmul.mubr.msk.bf16.vlgmr.msra.gmra.mrb[64].mxu0 %vm1116_vm2, %v9549_v18  ;;  %8401 = vmatmul.mubr.msk.bf16.vlgmr.msra.gmra.mrb[64].mxu1 %vm1116_vm2, %v9549_v18 }
 0x132   : > { %3032 = vmatpush1.bf16.msra.mxu0 %v1326_v23  ;;  %3073 = vmatpush1.bf16.msra.mxu1 %v1332_v24  ;;  %v652_v23 = vld [vmem:[%s9350_s5 + $0x1a0] sm:$0xff]  ;;  %v653_v24 = vld [vmem:[%s9350_s5 + $0x1a8] sm:$0xff] }
 0x133   : > { %3063 = vmatprep.mubr.bf16.mxu0 %v9194_v7  ;;  %3104 = vmatprep.mubr.bf16.mxu1 %v9194_v7  ;;  %v8267_v27 = vcombine.high %v652_v23, %v652_v23  ;;  %v8269_v28 = vcombine.high %v653_v24, %v653_v24  ;;  %v8266_v29 = vcombine.low %v652_v23, %v652_v23 }
 0x134   : > { %8406 = vmatprep.subr.msk.bf16.mxu0 %vm14628_vm1, %v8235_v25  ;;  %8408 = vmatprep.subr.msk.bf16.mxu1 %vm14628_vm1, %v8237_v26  ;;  %v1422_v25 = vsel %vm14628_vm1, %v8262_v21, 0  ;;  %v1428_v26 = vsel %vm14628_vm1, %v8264_v22, 0  ;;  %v8268_v30 = vcombine.low %v653_v24, %v653_v24 }
 0x139   : > { %8403 = vmatmul.mubr.msk.bf16.vlgmr.msra.gmra.mrb[68].mxu0 %vm1116_vm2, %v9549_v18  ;;  %8405 = vmatmul.mubr.msk.bf16.vlgmr.msra.gmra.mrb[68].mxu1 %vm1116_vm2, %v9549_v18 }
 0x13a   : > { %3114 = vmatpush1.bf16.msra.mxu0 %v1338_v31  ;;  %3155 = vmatpush1.bf16.msra.mxu1 %v1344_v32  ;;  %v654_v31 = vld [vmem:[%s9350_s5 + $0x1b0] sm:$0xff]  ;;  %v655_v32 = vld [vmem:[%s9350_s5 + $0x1b8] sm:$0xff] }
 0x13b   : > { %3145 = vmatprep.mubr.bf16.mxu0 %v9194_v7  ;;  %3186 = vmatprep.mubr.bf16.mxu1 %v9194_v7  ;;  %v8271_v35 = vcombine.high %v654_v31, %v654_v31  ;;  %v8273_v36 = vcombine.high %v655_v32, %v655_v32  ;;  %v8270_v37 = vcombine.low %v654_v31, %v654_v31  ;;  %v435_v31 = vld [vmem:[#allocation2 + $0x40] sm:$0xff] }
 0x13c   : > { %8410 = vmatprep.subr.msk.bf16.mxu0 %vm14628_vm1, %v8239_v33  ;;  %8412 = vmatprep.subr.msk.bf16.mxu1 %vm14628_vm1, %v8241_v34  ;;  %v1434_v33 = vsel %vm14628_vm1, %v8266_v29, 0  ;;  %v1440_v34 = vsel %vm14628_vm1, %v8268_v30, 0  ;;  %v8272_v38 = vcombine.low %v655_v32, %v655_v32  ;;  %v437_v32 = vld [vmem:[#allocation2 + $0x50] sm:$0xff] }
 0x141   : > { %8407 = vmatmul.mubr.msk.bf16.vlgmr.msra.gmra.mrb[72].mxu0 %vm1116_vm2, %v9549_v18  ;;  %8409 = vmatmul.mubr.msk.bf16.vlgmr.msra.gmra.mrb[72].mxu1 %vm1116_vm2, %v9549_v18 }
 0x142   : > { %3196 = vmatpush1.bf16.msra.mxu0 %v1350_v39  ;;  %3237 = vmatpush1.bf16.msra.mxu1 %v1356_v40  ;;  %v656_v39 = vld [vmem:[%s9350_s5 + $0x1c0] sm:$0xff]  ;;  %v657_v40 = vld [vmem:[%s9350_s5 + $0x1c8] sm:$0xff] }
 0x143   : > { %3227 = vmatprep.mubr.bf16.mxu0 %v9194_v7  ;;  %3268 = vmatprep.mubr.bf16.mxu1 %v9194_v7  ;;  %v8275_v43 = vcombine.high %v656_v39, %v656_v39  ;;  %v8277_v44 = vcombine.high %v657_v40, %v657_v40 }
 0x144   : > { %8414 = vmatprep.subr.msk.bf16.mxu0 %vm14628_vm1, %v8243_v41  ;;  %8416 = vmatprep.subr.msk.bf16.mxu1 %vm14628_vm1, %v8245_v42  ;;  %v1446_v41 = vsel %vm14628_vm1, %v8270_v37, 0  ;;  %v1452_v42 = vsel %vm14628_vm1, %v8272_v38, 0 }
 0x149   : > { %8411 = vmatmul.mubr.msk.bf16.vlgmr.msra.gmra.mrb[76].mxu0 %vm1116_vm2, %v9549_v18  ;;  %8413 = vmatmul.mubr.msk.bf16.vlgmr.msra.gmra.mrb[76].mxu1 %vm1116_vm2, %v9549_v18 }
 0x14a   : > { %3278 = vmatpush1.bf16.msra.mxu0 %v1362_v47  ;;  %3319 = vmatpush1.bf16.msra.mxu1 %v1368_v48  ;;  %v428_v47 = vld [vmem:[#allocation2 + $0x8] sm:$0xff]  ;;  %v430_v48 = vld [vmem:[#allocation2 + $0x18] sm:$0xff] }
 0x14b   : > { %3309 = vmatprep.mubr.bf16.mxu0 %v9194_v7  ;;  %3350 = vmatprep.mubr.bf16.mxu1 %v9194_v7 }
 0x14c   : > { %8418 = vmatprep.subr.msk.bf16.mxu0 %vm14628_vm1, %v8247_v49  ;;  %8420 = vmatprep.subr.msk.bf16.mxu1 %vm14628_vm1, %v8249_v50  ;;  %v8274_v49 = vcombine.low %v656_v39, %v656_v39  ;;  %v8276_v50 = vcombine.low %v657_v40, %v657_v40 }
 0x151   : > { %8415 = vmatmul.mubr.msk.bf16.vlgmr.msra.gmra.mrb[80].mxu0 %vm1116_vm2, %v9549_v18  ;;  %8417 = vmatmul.mubr.msk.bf16.vlgmr.msra.gmra.mrb[80].mxu1 %vm1116_vm2, %v9549_v18 }
 0x152   : > { %3360 = vmatpush1.bf16.msra.mxu0 %v1374_v55  ;;  %3401 = vmatpush1.bf16.msra.mxu1 %v1380_v56 }
 0x153   : > { %3391 = vmatprep.mubr.bf16.mxu0 %v9194_v7  ;;  %3432 = vmatprep.mubr.bf16.mxu1 %v9194_v7 }
 0x154   : > { %8422 = vmatprep.subr.msk.bf16.mxu0 %vm14628_vm1, %v8251_v57  ;;  %8424 = vmatprep.subr.msk.bf16.mxu1 %vm14628_vm1, %v8253_v58  ;;  %v658_v57 = vld [vmem:[%s9350_s5 + $0x1d0] sm:$0xff]  ;;  %v659_v58 = vld [vmem:[%s9350_s5 + $0x1d8] sm:$0xff] }
 0x155   : > { %v8279_v3 = vcombine.high %v658_v57, %v658_v57  ;;  %v8281_v4 = vcombine.high %v659_v58, %v659_v58 }
 0x159   : > { %8419 = vmatmul.mubr.msk.bf16.vlgmr.msra.gmra.mrb[84].mxu0 %vm1116_vm2, %v9549_v18  ;;  %8421 = vmatmul.mubr.msk.bf16.vlgmr.msra.gmra.mrb[84].mxu1 %vm1116_vm2, %v9549_v18 }
 0x15a   : > { %3442 = vmatpush1.bf16.msra.mxu0 %v1386_v63  ;;  %3483 = vmatpush1.bf16.msra.mxu1 %v1392_v0 }
 0x15b   : > { %3473 = vmatprep.mubr.bf16.mxu0 %v9194_v7  ;;  %3514 = vmatprep.mubr.bf16.mxu1 %v9194_v7 }
 0x15c   : > { %8426 = vmatprep.subr.msk.bf16.mxu0 %vm14628_vm1, %v8255_v1  ;;  %8428 = vmatprep.subr.msk.bf16.mxu1 %vm14628_vm1, %v8257_v2  ;;  %v1458_v1 = vsel %vm14628_vm1, %v8274_v49, 0  ;;  %v1464_v2 = vsel %vm14628_vm1, %v8276_v50, 0 }
 0x161   : > { %8423 = vmatmul.mubr.msk.bf16.vlgmr.msra.gmra.mrb[88].mxu0 %vm1116_vm2, %v9549_v18  ;;  %8425 = vmatmul.mubr.msk.bf16.vlgmr.msra.gmra.mrb[88].mxu1 %vm1116_vm2, %v9549_v18 }
 0x162   : > { %3524 = vmatpush1.bf16.msra.mxu0 %v1398_v8  ;;  %3565 = vmatpush1.bf16.msra.mxu1 %v1404_v9  ;;  %v432_v8 = vld [vmem:[#allocation2 + $0x28] sm:$0xff]  ;;  %v434_v9 = vld [vmem:[#allocation2 + $0x38] sm:$0xff] }
 0x163   : > { %3555 = vmatprep.mubr.bf16.mxu0 %v9194_v7  ;;  %3596 = vmatprep.mubr.bf16.mxu1 %v9194_v7 }
 0x164   : > { %8430 = vmatprep.subr.msk.bf16.mxu0 %vm14628_vm1, %v8259_v10  ;;  %8432 = vmatprep.subr.msk.bf16.mxu1 %vm14628_vm1, %v8261_v11  ;;  %v8278_v10 = vcombine.low %v658_v57, %v658_v57  ;;  %v8280_v11 = vcombine.low %v659_v58, %v659_v58  ;;  %v440_v57 = vld [vmem:[#allocation2 + $0x68] sm:$0xff]  ;;  %v442_v58 = vld [vmem:[#allocation2 + $0x78] sm:$0xff] }
 0x169   : > { %8427 = vmatmul.mubr.msk.bf16.vlgmr.msra.gmra.mrb[92].mxu0 %vm1116_vm2, %v9549_v18  ;;  %8429 = vmatmul.mubr.msk.bf16.vlgmr.msra.gmra.mrb[92].mxu1 %vm1116_vm2, %v9549_v18 }
 0x16a   : > { %3606 = vmatpush1.bf16.msra.mxu0 %v1410_v16  ;;  %3647 = vmatpush1.bf16.msra.mxu1 %v1416_v17 }
 0x16b   : > { %3637 = vmatprep.mubr.bf16.mxu0 %v9194_v7  ;;  %3678 = vmatprep.mubr.bf16.mxu1 %v9194_v7 }
 0x16c   : > { %8434 = vmatprep.subr.msk.bf16.mxu0 %vm14628_vm1, %v8263_v19  ;;  %8436 = vmatprep.subr.msk.bf16.mxu1 %vm14628_vm1, %v8265_v20  ;;  %v660_v19 = vld [vmem:[%s9350_s5 + $0x1e0] sm:$0xff]  ;;  %v661_v20 = vld [vmem:[%s9350_s5 + $0x1e8] sm:$0xff] }
 0x16d   : > { %v8283_v29 = vcombine.high %v660_v19, %v660_v19  ;;  %v8285_v30 = vcombine.high %v661_v20, %v661_v20 }
 0x171   : > { %8431 = vmatmul.mubr.msk.bf16.vlgmr.msra.gmra.mrb[96].mxu0 %vm1116_vm2, %v9549_v18  ;;  %8433 = vmatmul.mubr.msk.bf16.vlgmr.msra.gmra.mrb[96].mxu1 %vm1116_vm2, %v9549_v18 }
 0x172   : > { %3688 = vmatpush1.bf16.msra.mxu0 %v1422_v25  ;;  %3729 = vmatpush1.bf16.msra.mxu1 %v1428_v26 }
 0x173   : > { %3719 = vmatprep.mubr.bf16.mxu0 %v9194_v7  ;;  %3760 = vmatprep.mubr.bf16.mxu1 %v9194_v7 }
 0x174   : > { %8438 = vmatprep.subr.msk.bf16.mxu0 %vm14628_vm1, %v8267_v27  ;;  %8440 = vmatprep.subr.msk.bf16.mxu1 %vm14628_vm1, %v8269_v28  ;;  %v1470_v27 = vsel %vm14628_vm1, %v8278_v10, 0  ;;  %v1476_v28 = vsel %vm14628_vm1, %v8280_v11, 0 }
 0x179   : > { %8435 = vmatmul.mubr.msk.bf16.vlgmr.msra.gmra.mrb[100].mxu0 %vm1116_vm2, %v9549_v18  ;;  %8437 = vmatmul.mubr.msk.bf16.vlgmr.msra.gmra.mrb[100].mxu1 %vm1116_vm2, %v9549_v18 }
 0x17a   : > { %3770 = vmatpush1.bf16.msra.mxu0 %v1434_v33  ;;  %3811 = vmatpush1.bf16.msra.mxu1 %v1440_v34  ;;  %v436_v33 = vld [vmem:[#allocation2 + $0x48] sm:$0xff]  ;;  %v438_v34 = vld [vmem:[#allocation2 + $0x58] sm:$0xff] }
 0x17b   : > { %3801 = vmatprep.mubr.bf16.mxu0 %v9194_v7  ;;  %3842 = vmatprep.mubr.bf16.mxu1 %v9194_v7 }
 0x17c   : > { %8442 = vmatprep.subr.msk.bf16.mxu0 %vm14628_vm1, %v8271_v35  ;;  %8444 = vmatprep.subr.msk.bf16.mxu1 %vm14628_vm1, %v8273_v36  ;;  %v8282_v35 = vcombine.low %v660_v19, %v660_v19  ;;  %v8284_v36 = vcombine.low %v661_v20, %v661_v20  ;;  %v444_v19 = vld [vmem:[#allocation2 + $0x88] sm:$0xff]  ;;  %v446_v20 = vld [vmem:[#allocation2 + $0x98] sm:$0xff] }
 0x17e   : > { %v1482_v50 = vsel %vm14628_vm1, %v8282_v35, 0 }
 0x181   : > { %8439 = vmatmul.mubr.msk.bf16.vlgmr.msra.gmra.mrb[104].mxu0 %vm1116_vm2, %v9549_v18  ;;  %8441 = vmatmul.mubr.msk.bf16.vlgmr.msra.gmra.mrb[104].mxu1 %vm1116_vm2, %v9549_v18 }
 0x182   : > { %3852 = vmatpush1.bf16.msra.mxu0 %v1446_v41  ;;  %3893 = vmatpush1.bf16.msra.mxu1 %v1452_v42  ;;  %v662_v42 = vld [vmem:[%s9350_s5 + $0x1f0] sm:$0xff] }
 0x183   : > { %3883 = vmatprep.mubr.bf16.mxu0 %v9194_v7  ;;  %3924 = vmatprep.mubr.bf16.mxu1 %v9194_v7 }
 0x184   : > { %v1671_v51 = vpop.f32.mrb[0].mxu0  ;;  %v1712_v52 = vpop.f32.mrb[0].mxu1  ;;  %8446 = vmatprep.subr.msk.bf16.mxu0 %vm14628_vm1, %v8275_v43  ;;  %8448 = vmatprep.subr.msk.bf16.mxu1 %vm14628_vm1, %v8277_v44  ;;  %v663_v43 = vld [vmem:[%s9350_s5 + $0x1f8] sm:$0xff] }
 0x185   : > { %v5163_v53 = vadd.f32 %v1671_v51, %v427_v45  ;;  %v5165_v54 = vadd.f32 %v1712_v52, %v429_v46  ;;  %v1673_v55 = vpop.f32.mrb[1].mxu0  ;;  %v1714_v56 = vpop.f32.mrb[1].mxu1  ;;  %v1488_v51 = vsel %vm14628_vm1, %v8284_v36, 0  ;;  %v8287_v52 = vcombine.high %v662_v42, %v662_v42 }
 0x186   : > { %v5164_v59 = vadd.f32 %v1673_v55, %v428_v47  ;;  %v5166_v60 = vadd.f32 %v1714_v56, %v430_v48  ;;  %v1675_v61 = vpop.f32.mrb[2].mxu0  ;;  %v1716_v62 = vpop.f32.mrb[2].mxu1  ;;  %v439_v55 = vld [vmem:[#allocation2 + $0x60] sm:$0xff]  ;;  %v441_v56 = vld [vmem:[#allocation2 + $0x70] sm:$0xff] }
 0x187   : > { %5335 = vst [vmem:[#allocation2] sm:$0xff] %v5163_v53  ;;  %5337 = vst [vmem:[#allocation2 + $0x10] sm:$0xff] %v5165_v54  ;;  %v1676_v63 = vpop.f32.mrb[3].mxu0  ;;  %v1717_v0 = vpop.f32.mrb[3].mxu1  ;;  %v8289_v53 = vcombine.high %v663_v43, %v663_v43  ;;  %v9904_v54 = vld [vmem:[%s9356_s12] sm:$0xf] }
 0x188   : > { %5336 = vst [vmem:[#allocation2 + $0x8] sm:$0xff] %v5164_v59  ;;  %5338 = vst [vmem:[#allocation2 + $0x18] sm:$0xff] %v5166_v60  ;;  %v8286_v59 = vcombine.low %v662_v42, %v662_v42  ;;  %v8288_v60 = vcombine.low %v663_v43, %v663_v43  ;;  %v448_v42 = vld [vmem:[#allocation2 + $0xa8] sm:$0xff]  ;;  %v450_v43 = vld [vmem:[#allocation2 + $0xb8] sm:$0xff] }
 0x189   : > { %8443 = vmatmul.mubr.msk.bf16.vlgmr.msra.gmra.mrb[108].mxu0 %vm1116_vm2, %v9549_v18  ;;  %8445 = vmatmul.mubr.msk.bf16.vlgmr.msra.gmra.mrb[108].mxu1 %vm1116_vm2, %v9549_v18 }
 0x18a   : > { %3934 = vmatpush1.bf16.msra.mxu0 %v1458_v1  ;;  %3975 = vmatpush1.bf16.msra.mxu1 %v1464_v2 }
 0x18b   : > { %3965 = vmatprep.mubr.bf16.mxu0 %v9194_v7  ;;  %4006 = vmatprep.mubr.bf16.mxu1 %v9194_v7 }
 0x18c   : > { %v1753_v12 = vpop.f32.mrb[4].mxu0  ;;  %v1794_v13 = vpop.f32.mrb[4].mxu1  ;;  %8450 = vmatprep.subr.msk.bf16.mxu0 %vm14628_vm1, %v8279_v3  ;;  %8452 = vmatprep.subr.msk.bf16.mxu1 %vm14628_vm1, %v8281_v4  ;;  %v664_v3 = vld [vmem:[%s9350_s5 + $0x200] sm:$0xff]  ;;  %v665_v4 = vld [vmem:[%s9350_s5 + $0x208] sm:$0xff] }
 0x18d   : > { %v5167_v14 = vadd.f32 %v1753_v12, %v431_v5  ;;  %v5169_v15 = vadd.f32 %v1794_v13, %v433_v6  ;;  %v1755_v16 = vpop.f32.mrb[5].mxu0  ;;  %v1796_v17 = vpop.f32.mrb[5].mxu1  ;;  %v1494_v12 = vsel %vm14628_vm1, %v8286_v59, 0  ;;  %v1500_v13 = vsel %vm14628_vm1, %v8288_v60, 0 }
 0x18e   : > { %v5168_v21 = vadd.f32 %v1755_v16, %v432_v8  ;;  %v5170_v22 = vadd.f32 %v1796_v17, %v434_v9  ;;  %v1757_v23 = vpop.f32.mrb[6].mxu0  ;;  %v1798_v24 = vpop.f32.mrb[6].mxu1  ;;  %v443_v16 = vld [vmem:[#allocation2 + $0x80] sm:$0xff]  ;;  %v445_v17 = vld [vmem:[#allocation2 + $0x90] sm:$0xff] }
 0x18f   : > { %5339 = vst [vmem:[#allocation2 + $0x20] sm:$0xff] %v5167_v14  ;;  %5341 = vst [vmem:[#allocation2 + $0x30] sm:$0xff] %v5169_v15  ;;  %v1758_v25 = vpop.f32.mrb[7].mxu0  ;;  %v1799_v26 = vpop.f32.mrb[7].mxu1  ;;  %v8291_v14 = vcombine.high %v664_v3, %v664_v3  ;;  %v8293_v15 = vcombine.high %v665_v4, %v665_v4 }
 0x190   : > { %5340 = vst [vmem:[#allocation2 + $0x28] sm:$0xff] %v5168_v21  ;;  %5342 = vst [vmem:[#allocation2 + $0x38] sm:$0xff] %v5170_v22  ;;  %v8290_v21 = vcombine.low %v664_v3, %v664_v3  ;;  %v8292_v22 = vcombine.low %v665_v4, %v665_v4  ;;  %v452_v3 = vld [vmem:[#allocation2 + $0xc8] sm:$0xff]  ;;  %v454_v4 = vld [vmem:[#allocation2 + $0xd8] sm:$0xff] }
 0x191   : > { %8447 = vmatmul.mubr.msk.bf16.vlgmr.msra.gmra.mrb[112].mxu0 %vm1116_vm2, %v9549_v18  ;;  %8449 = vmatmul.mubr.msk.bf16.vlgmr.msra.gmra.mrb[112].mxu1 %vm1116_vm2, %v9549_v18 }
 0x192   : > { %4016 = vmatpush1.bf16.msra.mxu0 %v1470_v27  ;;  %4057 = vmatpush1.bf16.msra.mxu1 %v1476_v28 }
 0x193   : > { %4047 = vmatprep.mubr.bf16.mxu0 %v9194_v7  ;;  %4088 = vmatprep.mubr.bf16.mxu1 %v9194_v7 }
 0x194   : > { %v1835_v37 = vpop.f32.mrb[8].mxu0  ;;  %v1876_v38 = vpop.f32.mrb[8].mxu1  ;;  %8454 = vmatprep.subr.msk.bf16.mxu0 %vm14628_vm1, %v8283_v29  ;;  %8456 = vmatprep.subr.msk.bf16.mxu1 %vm14628_vm1, %v8285_v30  ;;  %v666_v29 = vld [vmem:[%s9350_s5 + $0x210] sm:$0xff]  ;;  %v667_v30 = vld [vmem:[%s9350_s5 + $0x218] sm:$0xff] }
 0x195   : > { %v5171_v18 = vadd.f32 %v1835_v37, %v435_v31  ;;  %v5173_v39 = vadd.f32 %v1876_v38, %v437_v32  ;;  %v1837_v40 = vpop.f32.mrb[9].mxu0  ;;  %v1878_v41 = vpop.f32.mrb[9].mxu1  ;;  %v1506_v37 = vsel %vm14628_vm1, %v8290_v21, 0  ;;  %v1512_v38 = vsel %vm14628_vm1, %v8292_v22, 0 }
 0x196   : > { %v5172_v44 = vadd.f32 %v1837_v40, %v436_v33  ;;  %v5174_v45 = vadd.f32 %v1878_v41, %v438_v34  ;;  %v1839_v46 = vpop.f32.mrb[10].mxu0  ;;  %v1880_v47 = vpop.f32.mrb[10].mxu1  ;;  %v447_v40 = vld [vmem:[#allocation2 + $0xa0] sm:$0xff]  ;;  %v449_v41 = vld [vmem:[#allocation2 + $0xb0] sm:$0xff] }
 0x197   : > { %5343 = vst [vmem:[#allocation2 + $0x40] sm:$0xff] %v5171_v18  ;;  %5345 = vst [vmem:[#allocation2 + $0x50] sm:$0xff] %v5173_v39  ;;  %v1840_v48 = vpop.f32.mrb[11].mxu0  ;;  %v1881_v49 = vpop.f32.mrb[11].mxu1  ;;  %v8295_v18 = vcombine.high %v666_v29, %v666_v29  ;;  %v8297_v39 = vcombine.high %v667_v30, %v667_v30 }
 0x198   : > { %5344 = vst [vmem:[#allocation2 + $0x48] sm:$0xff] %v5172_v44  ;;  %5346 = vst [vmem:[#allocation2 + $0x58] sm:$0xff] %v5174_v45  ;;  %v8294_v44 = vcombine.low %v666_v29, %v666_v29  ;;  %v8296_v45 = vcombine.low %v667_v30, %v667_v30  ;;  %v456_v29 = vld [vmem:[#allocation2 + $0xe8] sm:$0xff]  ;;  %v458_v30 = vld [vmem:[#allocation2 + $0xf8] sm:$0xff] }
 0x199   : > { %8451 = vmatmul.mubr.msk.bf16.vlgmr.msra.gmra.mrb[116].mxu0 %vm1116_vm2, %v9904_v54  ;;  %8453 = vmatmul.mubr.msk.bf16.vlgmr.msra.gmra.mrb[116].mxu1 %vm1116_vm2, %v9904_v54 }
 0x19a   : > { %4098 = vmatpush1.bf16.msra.mxu0 %v1482_v50  ;;  %4139 = vmatpush1.bf16.msra.mxu1 %v1488_v51 }
 0x19b   : > { %4129 = vmatprep.mubr.bf16.mxu0 %v9194_v7  ;;  %4170 = vmatprep.mubr.bf16.mxu1 %v9194_v7 }
 0x19c   : > { %v1917_v61 = vpop.f32.mrb[12].mxu0  ;;  %v1958_v62 = vpop.f32.mrb[12].mxu1  ;;  %8458 = vmatprep.subr.msk.bf16.mxu0 %vm14628_vm1, %v8287_v52  ;;  %8460 = vmatprep.subr.msk.bf16.mxu1 %vm14628_vm1, %v8289_v53  ;;  %v668_v52 = vld [vmem:[%s9350_s5 + $0x220] sm:$0xff]  ;;  %v669_v53 = vld [vmem:[%s9350_s5 + $0x228] sm:$0xff] }
 0x19d   : > { %v5175_v63 = vadd.f32 %v1917_v61, %v439_v55  ;;  %v5177_v0 = vadd.f32 %v1958_v62, %v441_v56  ;;  %v1919_v1 = vpop.f32.mrb[13].mxu0  ;;  %v1960_v2 = vpop.f32.mrb[13].mxu1  ;;  %v1518_v61 = vsel %vm14628_vm1, %v8294_v44, 0  ;;  %v1524_v62 = vsel %vm14628_vm1, %v8296_v45, 0 }
 0x19e   : > { %v5176_v5 = vadd.f32 %v1919_v1, %v440_v57  ;;  %v5178_v6 = vadd.f32 %v1960_v2, %v442_v58  ;;  %v1921_v8 = vpop.f32.mrb[14].mxu0  ;;  %v1962_v9 = vpop.f32.mrb[14].mxu1  ;;  %v451_v1 = vld [vmem:[#allocation2 + $0xc0] sm:$0xff]  ;;  %v453_v2 = vld [vmem:[#allocation2 + $0xd0] sm:$0xff] }
 0x19f   : > { %5347 = vst [vmem:[#allocation2 + $0x60] sm:$0xff] %v5175_v63  ;;  %5349 = vst [vmem:[#allocation2 + $0x70] sm:$0xff] %v5177_v0  ;;  %v1922_v10 = vpop.f32.mrb[15].mxu0  ;;  %v1963_v11 = vpop.f32.mrb[15].mxu1  ;;  %v8299_v63 = vcombine.high %v668_v52, %v668_v52  ;;  %v8301_v0 = vcombine.high %v669_v53, %v669_v53 }
 0x1a0   : > { %5348 = vst [vmem:[#allocation2 + $0x68] sm:$0xff] %v5176_v5  ;;  %5350 = vst [vmem:[#allocation2 + $0x78] sm:$0xff] %v5178_v6  ;;  %v8298_v5 = vcombine.low %v668_v52, %v668_v52  ;;  %v8300_v6 = vcombine.low %v669_v53, %v669_v53  ;;  %v460_v52 = vld [vmem:[#allocation2 + $0x108] sm:$0xff]  ;;  %v462_v53 = vld [vmem:[#allocation2 + $0x118] sm:$0xff] }
 0x1a1   : > { %8455 = vmatmul.mubr.msk.bf16.vlgmr.msra.gmra.mrb[120].mxu0 %vm1116_vm2, %v9904_v54  ;;  %8457 = vmatmul.mubr.msk.bf16.vlgmr.msra.gmra.mrb[120].mxu1 %vm1116_vm2, %v9904_v54 }
 0x1a2   : > { %4180 = vmatpush1.bf16.msra.mxu0 %v1494_v12  ;;  %4221 = vmatpush1.bf16.msra.mxu1 %v1500_v13 }
 0x1a3   : > { %4211 = vmatprep.mubr.bf16.mxu0 %v9194_v7  ;;  %4252 = vmatprep.mubr.bf16.mxu1 %v9194_v7 }
 0x1a4   : > { %v1999_v23 = vpop.f32.mrb[16].mxu0  ;;  %v2040_v24 = vpop.f32.mrb[16].mxu1  ;;  %8462 = vmatprep.subr.msk.bf16.mxu0 %vm14628_vm1, %v8291_v14  ;;  %8464 = vmatprep.subr.msk.bf16.mxu1 %vm14628_vm1, %v8293_v15  ;;  %v670_v14 = vld [vmem:[%s9350_s5 + $0x230] sm:$0xff]  ;;  %v671_v15 = vld [vmem:[%s9350_s5 + $0x238] sm:$0xff] }
 0x1a5   : > { %v5179_v25 = vadd.f32 %v1999_v23, %v443_v16  ;;  %v5181_v26 = vadd.f32 %v2040_v24, %v445_v17  ;;  %v2001_v27 = vpop.f32.mrb[17].mxu0  ;;  %v2042_v28 = vpop.f32.mrb[17].mxu1  ;;  %v1530_v23 = vsel %vm14628_vm1, %v8298_v5, 0  ;;  %v1536_v24 = vsel %vm14628_vm1, %v8300_v6, 0 }
 0x1a6   : > { %v5180_v31 = vadd.f32 %v2001_v27, %v444_v19  ;;  %v5182_v32 = vadd.f32 %v2042_v28, %v446_v20  ;;  %v2003_v33 = vpop.f32.mrb[18].mxu0  ;;  %v2044_v34 = vpop.f32.mrb[18].mxu1  ;;  %v455_v27 = vld [vmem:[#allocation2 + $0xe0] sm:$0xff]  ;;  %v457_v28 = vld [vmem:[#allocation2 + $0xf0] sm:$0xff] }
 0x1a7   : > { %5351 = vst [vmem:[#allocation2 + $0x80] sm:$0xff] %v5179_v25  ;;  %5353 = vst [vmem:[#allocation2 + $0x90] sm:$0xff] %v5181_v26  ;;  %v2004_v35 = vpop.f32.mrb[19].mxu0  ;;  %v2045_v36 = vpop.f32.mrb[19].mxu1  ;;  %v8303_v25 = vcombine.high %v670_v14, %v670_v14  ;;  %v8305_v26 = vcombine.high %v671_v15, %v671_v15 }
 0x1a8   : > { %5352 = vst [vmem:[#allocation2 + $0x88] sm:$0xff] %v5180_v31  ;;  %5354 = vst [vmem:[#allocation2 + $0x98] sm:$0xff] %v5182_v32  ;;  %v8302_v31 = vcombine.low %v670_v14, %v670_v14  ;;  %v8304_v32 = vcombine.low %v671_v15, %v671_v15  ;;  %v464_v14 = vld [vmem:[#allocation2 + $0x128] sm:$0xff]  ;;  %v466_v15 = vld [vmem:[#allocation2 + $0x138] sm:$0xff] }
 0x1a9   : > { %8459 = vmatmul.mubr.msk.bf16.vlgmr.msra.gmra.mrb[124].mxu0 %vm1116_vm2, %v9904_v54  ;;  %8461 = vmatmul.mubr.msk.bf16.vlgmr.msra.gmra.mrb[124].mxu1 %vm1116_vm2, %v9904_v54 }
 0x1aa   : > { %4262 = vmatpush1.bf16.msra.mxu0 %v1506_v37  ;;  %4303 = vmatpush1.bf16.msra.mxu1 %v1512_v38 }
 0x1ab   : > { %4293 = vmatprep.mubr.bf16.mxu0 %v9194_v7  ;;  %4334 = vmatprep.mubr.bf16.mxu1 %v9194_v7 }
 0x1ac   : > { %v2081_v46 = vpop.f32.mrb[20].mxu0  ;;  %v2122_v47 = vpop.f32.mrb[20].mxu1  ;;  %8466 = vmatprep.subr.msk.bf16.mxu0 %vm14628_vm1, %v8295_v18  ;;  %8468 = vmatprep.subr.msk.bf16.mxu1 %vm14628_vm1, %v8297_v39  ;;  %v672_v18 = vld [vmem:[%s9350_s5 + $0x240] sm:$0xff]  ;;  %v673_v39 = vld [vmem:[%s9350_s5 + $0x248] sm:$0xff] }
 0x1ad   : > { %v5183_v48 = vadd.f32 %v2081_v46, %v447_v40  ;;  %v5185_v49 = vadd.f32 %v2122_v47, %v449_v41  ;;  %v2083_v50 = vpop.f32.mrb[21].mxu0  ;;  %v2124_v51 = vpop.f32.mrb[21].mxu1  ;;  %v1542_v46 = vsel %vm14628_vm1, %v8302_v31, 0  ;;  %v1548_v47 = vsel %vm14628_vm1, %v8304_v32, 0 }
 0x1ae   : > { %v5184_v55 = vadd.f32 %v2083_v50, %v448_v42  ;;  %v5186_v56 = vadd.f32 %v2124_v51, %v450_v43  ;;  %v2085_v57 = vpop.f32.mrb[22].mxu0  ;;  %v2126_v58 = vpop.f32.mrb[22].mxu1  ;;  %v459_v50 = vld [vmem:[#allocation2 + $0x100] sm:$0xff]  ;;  %v461_v51 = vld [vmem:[#allocation2 + $0x110] sm:$0xff] }
 0x1af   : > { %5355 = vst [vmem:[#allocation2 + $0xa0] sm:$0xff] %v5183_v48  ;;  %5357 = vst [vmem:[#allocation2 + $0xb0] sm:$0xff] %v5185_v49  ;;  %v2086_v59 = vpop.f32.mrb[23].mxu0  ;;  %v2127_v60 = vpop.f32.mrb[23].mxu1  ;;  %v8307_v48 = vcombine.high %v672_v18, %v672_v18  ;;  %v8309_v49 = vcombine.high %v673_v39, %v673_v39 }
 0x1b0   : > { %5356 = vst [vmem:[#allocation2 + $0xa8] sm:$0xff] %v5184_v55  ;;  %5358 = vst [vmem:[#allocation2 + $0xb8] sm:$0xff] %v5186_v56  ;;  %v8306_v55 = vcombine.low %v672_v18, %v672_v18  ;;  %v8308_v56 = vcombine.low %v673_v39, %v673_v39  ;;  %v468_v18 = vld [vmem:[#allocation2 + $0x148] sm:$0xff]  ;;  %v470_v39 = vld [vmem:[#allocation2 + $0x158] sm:$0xff] }
 0x1b1   : > { %8463 = vmatmul.mubr.msk.bf16.vlgmr.msra.gmra.mrb[128].mxu0 %vm1116_vm2, %v9904_v54  ;;  %8465 = vmatmul.mubr.msk.bf16.vlgmr.msra.gmra.mrb[128].mxu1 %vm1116_vm2, %v9904_v54 }
 0x1b2   : > { %4344 = vmatpush1.bf16.msra.mxu0 %v1518_v61  ;;  %4385 = vmatpush1.bf16.msra.mxu1 %v1524_v62 }
 0x1b3   : > { %4375 = vmatprep.mubr.bf16.mxu0 %v9194_v7  ;;  %4416 = vmatprep.mubr.bf16.mxu1 %v9194_v7 }
 0x1b4   : > { %v2163_v8 = vpop.f32.mrb[24].mxu0  ;;  %v2204_v9 = vpop.f32.mrb[24].mxu1  ;;  %8470 = vmatprep.subr.msk.bf16.mxu0 %vm14628_vm1, %v8299_v63  ;;  %8472 = vmatprep.subr.msk.bf16.mxu1 %vm14628_vm1, %v8301_v0  ;;  %v674_v63 = vld [vmem:[%s9350_s5 + $0x250] sm:$0xff]  ;;  %v675_v0 = vld [vmem:[%s9350_s5 + $0x258] sm:$0xff] }
 0x1b5   : > { %v5187_v10 = vadd.f32 %v2163_v8, %v451_v1  ;;  %v5189_v11 = vadd.f32 %v2204_v9, %v453_v2  ;;  %v2165_v12 = vpop.f32.mrb[25].mxu0  ;;  %v2206_v13 = vpop.f32.mrb[25].mxu1  ;;  %v1554_v8 = vsel %vm14628_vm1, %v8306_v55, 0  ;;  %v1560_v9 = vsel %vm14628_vm1, %v8308_v56, 0 }
 0x1b6   : > { %v5188_v16 = vadd.f32 %v2165_v12, %v452_v3  ;;  %v5190_v17 = vadd.f32 %v2206_v13, %v454_v4  ;;  %v2167_v19 = vpop.f32.mrb[26].mxu0  ;;  %v2208_v20 = vpop.f32.mrb[26].mxu1  ;;  %v463_v12 = vld [vmem:[#allocation2 + $0x120] sm:$0xff]  ;;  %v465_v13 = vld [vmem:[#allocation2 + $0x130] sm:$0xff] }
 0x1b7   : > { %5359 = vst [vmem:[#allocation2 + $0xc0] sm:$0xff] %v5187_v10  ;;  %5361 = vst [vmem:[#allocation2 + $0xd0] sm:$0xff] %v5189_v11  ;;  %v2168_v21 = vpop.f32.mrb[27].mxu0  ;;  %v2209_v22 = vpop.f32.mrb[27].mxu1  ;;  %v8311_v10 = vcombine.high %v674_v63, %v674_v63  ;;  %v8313_v11 = vcombine.high %v675_v0, %v675_v0 }
 0x1b8   : > { %5360 = vst [vmem:[#allocation2 + $0xc8] sm:$0xff] %v5188_v16  ;;  %5362 = vst [vmem:[#allocation2 + $0xd8] sm:$0xff] %v5190_v17  ;;  %v8310_v16 = vcombine.low %v674_v63, %v674_v63  ;;  %v8312_v17 = vcombine.low %v675_v0, %v675_v0  ;;  %v472_v63 = vld [vmem:[#allocation2 + $0x168] sm:$0xff]  ;;  %v474_v0 = vld [vmem:[#allocation2 + $0x178] sm:$0xff] }
 0x1b9   : > { %8467 = vmatmul.mubr.msk.bf16.vlgmr.msra.gmra.mrb[132].mxu0 %vm1116_vm2, %v9904_v54  ;;  %8469 = vmatmul.mubr.msk.bf16.vlgmr.msra.gmra.mrb[132].mxu1 %vm1116_vm2, %v9904_v54 }
 0x1ba   : > { %4426 = vmatpush1.bf16.msra.mxu0 %v1530_v23  ;;  %4467 = vmatpush1.bf16.msra.mxu1 %v1536_v24 }
 0x1bb   : > { %4457 = vmatprep.mubr.bf16.mxu0 %v9194_v7  ;;  %4498 = vmatprep.mubr.bf16.mxu1 %v9194_v7 }
 0x1bc   : > { %v2245_v33 = vpop.f32.mrb[28].mxu0  ;;  %v2286_v34 = vpop.f32.mrb[28].mxu1  ;;  %8474 = vmatprep.subr.msk.bf16.mxu0 %vm14628_vm1, %v8303_v25  ;;  %8476 = vmatprep.subr.msk.bf16.mxu1 %vm14628_vm1, %v8305_v26  ;;  %v676_v25 = vld [vmem:[%s9350_s5 + $0x260] sm:$0xff]  ;;  %v677_v26 = vld [vmem:[%s9350_s5 + $0x268] sm:$0xff] }
 0x1bd   : > { %v5191_v35 = vadd.f32 %v2245_v33, %v455_v27  ;;  %v5193_v36 = vadd.f32 %v2286_v34, %v457_v28  ;;  %v2247_v37 = vpop.f32.mrb[29].mxu0  ;;  %v2288_v38 = vpop.f32.mrb[29].mxu1  ;;  %v1566_v33 = vsel %vm14628_vm1, %v8310_v16, 0  ;;  %v1572_v34 = vsel %vm14628_vm1, %v8312_v17, 0 }
 0x1be   : > { %v5192_v40 = vadd.f32 %v2247_v37, %v456_v29  ;;  %v5194_v41 = vadd.f32 %v2288_v38, %v458_v30  ;;  %v2249_v42 = vpop.f32.mrb[30].mxu0  ;;  %v2290_v43 = vpop.f32.mrb[30].mxu1  ;;  %v467_v37 = vld [vmem:[#allocation2 + $0x140] sm:$0xff]  ;;  %v469_v38 = vld [vmem:[#allocation2 + $0x150] sm:$0xff] }
 0x1bf   : > { %5363 = vst [vmem:[#allocation2 + $0xe0] sm:$0xff] %v5191_v35  ;;  %5365 = vst [vmem:[#allocation2 + $0xf0] sm:$0xff] %v5193_v36  ;;  %v2250_v44 = vpop.f32.mrb[31].mxu0  ;;  %v2291_v45 = vpop.f32.mrb[31].mxu1  ;;  %v8315_v35 = vcombine.high %v676_v25, %v676_v25  ;;  %v8317_v36 = vcombine.high %v677_v26, %v677_v26 }
 0x1c0   : > { %5364 = vst [vmem:[#allocation2 + $0xe8] sm:$0xff] %v5192_v40  ;;  %5366 = vst [vmem:[#allocation2 + $0xf8] sm:$0xff] %v5194_v41  ;;  %v8314_v40 = vcombine.low %v676_v25, %v676_v25  ;;  %v8316_v41 = vcombine.low %v677_v26, %v677_v26  ;;  %v476_v25 = vld [vmem:[#allocation2 + $0x188] sm:$0xff]  ;;  %v478_v26 = vld [vmem:[#allocation2 + $0x198] sm:$0xff] }
 0x1c1   : > { %8471 = vmatmul.mubr.msk.bf16.vlgmr.msra.gmra.mrb[136].mxu0 %vm1116_vm2, %v9904_v54  ;;  %8473 = vmatmul.mubr.msk.bf16.vlgmr.msra.gmra.mrb[136].mxu1 %vm1116_vm2, %v9904_v54 }
 0x1c2   : > { %4508 = vmatpush1.bf16.msra.mxu0 %v1542_v46  ;;  %4549 = vmatpush1.bf16.msra.mxu1 %v1548_v47 }
 0x1c3   : > { %4539 = vmatprep.mubr.bf16.mxu0 %v9194_v7  ;;  %4580 = vmatprep.mubr.bf16.mxu1 %v9194_v7 }
 0x1c4   : > { %v2327_v57 = vpop.f32.mrb[32].mxu0  ;;  %v2368_v58 = vpop.f32.mrb[32].mxu1  ;;  %8478 = vmatprep.subr.msk.bf16.mxu0 %vm14628_vm1, %v8307_v48  ;;  %8480 = vmatprep.subr.msk.bf16.mxu1 %vm14628_vm1, %v8309_v49  ;;  %v678_v48 = vld [vmem:[%s9350_s5 + $0x270] sm:$0xff]  ;;  %v679_v49 = vld [vmem:[%s9350_s5 + $0x278] sm:$0xff] }
 0x1c5   : > { %v5195_v59 = vadd.f32 %v2327_v57, %v459_v50  ;;  %v5197_v60 = vadd.f32 %v2368_v58, %v461_v51  ;;  %v2329_v61 = vpop.f32.mrb[33].mxu0  ;;  %v2370_v62 = vpop.f32.mrb[33].mxu1  ;;  %v1578_v57 = vsel %vm14628_vm1, %v8314_v40, 0  ;;  %v1584_v58 = vsel %vm14628_vm1, %v8316_v41, 0 }
 0x1c6   : > { %v5196_v1 = vadd.f32 %v2329_v61, %v460_v52  ;;  %v5198_v2 = vadd.f32 %v2370_v62, %v462_v53  ;;  %v2331_v3 = vpop.f32.mrb[34].mxu0  ;;  %v2372_v4 = vpop.f32.mrb[34].mxu1  ;;  %v471_v61 = vld [vmem:[#allocation2 + $0x160] sm:$0xff]  ;;  %v473_v62 = vld [vmem:[#allocation2 + $0x170] sm:$0xff] }
 0x1c7   : > { %5367 = vst [vmem:[#allocation2 + $0x100] sm:$0xff] %v5195_v59  ;;  %5369 = vst [vmem:[#allocation2 + $0x110] sm:$0xff] %v5197_v60  ;;  %v2332_v5 = vpop.f32.mrb[35].mxu0  ;;  %v2373_v6 = vpop.f32.mrb[35].mxu1  ;;  %v8319_v59 = vcombine.high %v678_v48, %v678_v48  ;;  %v8321_v60 = vcombine.high %v679_v49, %v679_v49 }
 0x1c8   : > { %5368 = vst [vmem:[#allocation2 + $0x108] sm:$0xff] %v5196_v1  ;;  %5370 = vst [vmem:[#allocation2 + $0x118] sm:$0xff] %v5198_v2  ;;  %v8318_v1 = vcombine.low %v678_v48, %v678_v48  ;;  %v8320_v2 = vcombine.low %v679_v49, %v679_v49  ;;  %v480_v48 = vld [vmem:[#allocation2 + $0x1a8] sm:$0xff]  ;;  %v482_v49 = vld [vmem:[#allocation2 + $0x1b8] sm:$0xff] }
 0x1c9   : > { %8475 = vmatmul.mubr.msk.bf16.vlgmr.msra.gmra.mrb[140].mxu0 %vm1116_vm2, %v9904_v54  ;;  %8477 = vmatmul.mubr.msk.bf16.vlgmr.msra.gmra.mrb[140].mxu1 %vm1116_vm2, %v9904_v54 }
 0x1ca   : > { %4590 = vmatpush1.bf16.msra.mxu0 %v1554_v8  ;;  %4631 = vmatpush1.bf16.msra.mxu1 %v1560_v9 }
 0x1cb   : > { %4621 = vmatprep.mubr.bf16.mxu0 %v9194_v7  ;;  %4662 = vmatprep.mubr.bf16.mxu1 %v9194_v7 }
 0x1cc   : > { %v2409_v19 = vpop.f32.mrb[36].mxu0  ;;  %v2450_v20 = vpop.f32.mrb[36].mxu1  ;;  %8482 = vmatprep.subr.msk.bf16.mxu0 %vm14628_vm1, %v8311_v10  ;;  %8484 = vmatprep.subr.msk.bf16.mxu1 %vm14628_vm1, %v8313_v11  ;;  %v680_v10 = vld [vmem:[%s9350_s5 + $0x280] sm:$0xff]  ;;  %v681_v11 = vld [vmem:[%s9350_s5 + $0x288] sm:$0xff] }
 0x1cd   : > { %v5199_v21 = vadd.f32 %v2409_v19, %v463_v12  ;;  %v5201_v22 = vadd.f32 %v2450_v20, %v465_v13  ;;  %v2411_v23 = vpop.f32.mrb[37].mxu0  ;;  %v2452_v24 = vpop.f32.mrb[37].mxu1  ;;  %v1590_v19 = vsel %vm14628_vm1, %v8318_v1, 0  ;;  %v1596_v20 = vsel %vm14628_vm1, %v8320_v2, 0 }
 0x1ce   : > { %v5200_v27 = vadd.f32 %v2411_v23, %v464_v14  ;;  %v5202_v28 = vadd.f32 %v2452_v24, %v466_v15  ;;  %v2413_v29 = vpop.f32.mrb[38].mxu0  ;;  %v2454_v30 = vpop.f32.mrb[38].mxu1  ;;  %v475_v23 = vld [vmem:[#allocation2 + $0x180] sm:$0xff]  ;;  %v477_v24 = vld [vmem:[#allocation2 + $0x190] sm:$0xff] }
 0x1cf   : > { %5371 = vst [vmem:[#allocation2 + $0x120] sm:$0xff] %v5199_v21  ;;  %5373 = vst [vmem:[#allocation2 + $0x130] sm:$0xff] %v5201_v22  ;;  %v2414_v31 = vpop.f32.mrb[39].mxu0  ;;  %v2455_v32 = vpop.f32.mrb[39].mxu1  ;;  %v8323_v21 = vcombine.high %v680_v10, %v680_v10  ;;  %v8325_v22 = vcombine.high %v681_v11, %v681_v11 }
 0x1d0   : > { %5372 = vst [vmem:[#allocation2 + $0x128] sm:$0xff] %v5200_v27  ;;  %5374 = vst [vmem:[#allocation2 + $0x138] sm:$0xff] %v5202_v28  ;;  %v8322_v27 = vcombine.low %v680_v10, %v680_v10  ;;  %v8324_v28 = vcombine.low %v681_v11, %v681_v11  ;;  %v484_v10 = vld [vmem:[#allocation2 + $0x1c8] sm:$0xff]  ;;  %v486_v11 = vld [vmem:[#allocation2 + $0x1d8] sm:$0xff] }
 0x1d1   : > { %8479 = vmatmul.mubr.msk.bf16.vlgmr.msra.gmra.mrb[144].mxu0 %vm1116_vm2, %v9904_v54  ;;  %8481 = vmatmul.mubr.msk.bf16.vlgmr.msra.gmra.mrb[144].mxu1 %vm1116_vm2, %v9904_v54 }
 0x1d2   : > { %4672 = vmatpush1.bf16.msra.mxu0 %v1566_v33  ;;  %4713 = vmatpush1.bf16.msra.mxu1 %v1572_v34 }
 0x1d3   : > { %4703 = vmatprep.mubr.bf16.mxu0 %v9194_v7  ;;  %4744 = vmatprep.mubr.bf16.mxu1 %v9194_v7 }
 0x1d4   : > { %v2491_v42 = vpop.f32.mrb[40].mxu0  ;;  %v2532_v43 = vpop.f32.mrb[40].mxu1  ;;  %8486 = vmatprep.subr.msk.bf16.mxu0 %vm14628_vm1, %v8315_v35  ;;  %8488 = vmatprep.subr.msk.bf16.mxu1 %vm14628_vm1, %v8317_v36  ;;  %v682_v35 = vld [vmem:[%s9350_s5 + $0x290] sm:$0xff]  ;;  %v683_v36 = vld [vmem:[%s9350_s5 + $0x298] sm:$0xff] }
 0x1d5   : > { %v5203_v44 = vadd.f32 %v2491_v42, %v467_v37  ;;  %v5205_v45 = vadd.f32 %v2532_v43, %v469_v38  ;;  %v2493_v46 = vpop.f32.mrb[41].mxu0  ;;  %v2534_v47 = vpop.f32.mrb[41].mxu1  ;;  %v1602_v42 = vsel %vm14628_vm1, %v8322_v27, 0  ;;  %v1608_v43 = vsel %vm14628_vm1, %v8324_v28, 0 }
 0x1d6   : > { %v5204_v50 = vadd.f32 %v2493_v46, %v468_v18  ;;  %v5206_v51 = vadd.f32 %v2534_v47, %v470_v39  ;;  %v2495_v52 = vpop.f32.mrb[42].mxu0  ;;  %v2536_v53 = vpop.f32.mrb[42].mxu1  ;;  %v479_v46 = vld [vmem:[#allocation2 + $0x1a0] sm:$0xff]  ;;  %v481_v47 = vld [vmem:[#allocation2 + $0x1b0] sm:$0xff] }
 0x1d7   : > { %5375 = vst [vmem:[#allocation2 + $0x140] sm:$0xff] %v5203_v44  ;;  %5377 = vst [vmem:[#allocation2 + $0x150] sm:$0xff] %v5205_v45  ;;  %v2496_v55 = vpop.f32.mrb[43].mxu0  ;;  %v2537_v56 = vpop.f32.mrb[43].mxu1  ;;  %v8327_v44 = vcombine.high %v682_v35, %v682_v35  ;;  %v8329_v45 = vcombine.high %v683_v36, %v683_v36 }
 0x1d8   : > { %5376 = vst [vmem:[#allocation2 + $0x148] sm:$0xff] %v5204_v50  ;;  %5378 = vst [vmem:[#allocation2 + $0x158] sm:$0xff] %v5206_v51  ;;  %v8326_v50 = vcombine.low %v682_v35, %v682_v35  ;;  %v8328_v51 = vcombine.low %v683_v36, %v683_v36 }
 0x1d9   : > { %8483 = vmatmul.mubr.msk.bf16.vlgmr.msra.gmra.mrb[148].mxu0 %vm1116_vm2, %v9904_v54  ;;  %8485 = vmatmul.mubr.msk.bf16.vlgmr.msra.gmra.mrb[148].mxu1 %vm1116_vm2, %v9904_v54 }
 0x1da   : > { %4754 = vmatpush1.bf16.msra.mxu0 %v1578_v57  ;;  %4795 = vmatpush1.bf16.msra.mxu1 %v1584_v58 }
 0x1db   : > { %4785 = vmatprep.mubr.bf16.mxu0 %v9194_v7  ;;  %4826 = vmatprep.mubr.bf16.mxu1 %v9194_v7 }
 0x1dc   : > { %v2573_v3 = vpop.f32.mrb[44].mxu0  ;;  %v2614_v4 = vpop.f32.mrb[44].mxu1  ;;  %8490 = vmatprep.subr.msk.bf16.mxu0 %vm14628_vm1, %v8319_v59  ;;  %8492 = vmatprep.subr.msk.bf16.mxu1 %vm14628_vm1, %v8321_v60  ;;  %v684_v59 = vld [vmem:[%s9350_s5 + $0x2a0] sm:$0xff]  ;;  %v685_v60 = vld [vmem:[%s9350_s5 + $0x2a8] sm:$0xff] }
 0x1dd   : > { %v5207_v5 = vadd.f32 %v2573_v3, %v471_v61  ;;  %v5209_v6 = vadd.f32 %v2614_v4, %v473_v62  ;;  %v2575_v8 = vpop.f32.mrb[45].mxu0  ;;  %v2616_v9 = vpop.f32.mrb[45].mxu1  ;;  %v1614_v3 = vsel %vm14628_vm1, %v8326_v50, 0  ;;  %v1620_v4 = vsel %vm14628_vm1, %v8328_v51, 0 }
 0x1de   : > { %v5208_v12 = vadd.f32 %v2575_v8, %v472_v63  ;;  %v5210_v13 = vadd.f32 %v2616_v9, %v474_v0  ;;  %v2577_v14 = vpop.f32.mrb[46].mxu0  ;;  %v2618_v15 = vpop.f32.mrb[46].mxu1  ;;  %v483_v8 = vld [vmem:[#allocation2 + $0x1c0] sm:$0xff]  ;;  %v485_v9 = vld [vmem:[#allocation2 + $0x1d0] sm:$0xff] }
 0x1df   : > { %5379 = vst [vmem:[#allocation2 + $0x160] sm:$0xff] %v5207_v5  ;;  %5381 = vst [vmem:[#allocation2 + $0x170] sm:$0xff] %v5209_v6  ;;  %v2578_v16 = vpop.f32.mrb[47].mxu0  ;;  %v2619_v17 = vpop.f32.mrb[47].mxu1  ;;  %v8331_v5 = vcombine.high %v684_v59, %v684_v59  ;;  %v8333_v6 = vcombine.high %v685_v60, %v685_v60 }
 0x1e0   : > { %5380 = vst [vmem:[#allocation2 + $0x168] sm:$0xff] %v5208_v12  ;;  %5382 = vst [vmem:[#allocation2 + $0x178] sm:$0xff] %v5210_v13  ;;  %v8330_v12 = vcombine.low %v684_v59, %v684_v59  ;;  %v8332_v13 = vcombine.low %v685_v60, %v685_v60  ;;  %v497_v60 = vld [vmem:[#allocation2 + $0x230] sm:$0xff] }
 0x1e1   : > { %8487 = vmatmul.mubr.msk.bf16.vlgmr.msra.gmra.mrb[152].mxu0 %vm1116_vm2, %v9904_v54  ;;  %8489 = vmatmul.mubr.msk.bf16.vlgmr.msra.gmra.mrb[152].mxu1 %vm1116_vm2, %v9904_v54 }
 0x1e2   : > { %4836 = vmatpush1.bf16.msra.mxu0 %v1590_v19  ;;  %4877 = vmatpush1.bf16.msra.mxu1 %v1596_v20  ;;  %v1626_v27 = vsel %vm14628_vm1, %v8330_v12, 0  ;;  %v1632_v28 = vsel %vm14628_vm1, %v8332_v13, 0  ;;  %v499_v12 = vld [vmem:[#allocation2 + $0x240] sm:$0xff]  ;;  %v501_v13 = vld [vmem:[#allocation2 + $0x250] sm:$0xff] }
 0x1e3   : > { %4867 = vmatprep.mubr.bf16.mxu0 %v9194_v7  ;;  %4908 = vmatprep.mubr.bf16.mxu1 %v9194_v7 }
 0x1e4   : > { %v2655_v29 = vpop.f32.mrb[48].mxu0  ;;  %v2696_v30 = vpop.f32.mrb[48].mxu1  ;;  %8494 = vmatprep.subr.msk.bf16.mxu0 %vm14628_vm1, %v8323_v21  ;;  %8496 = vmatprep.subr.msk.bf16.mxu1 %vm14628_vm1, %v8325_v22 }
 0x1e5   : > { %v5211_v31 = vadd.f32 %v2655_v29, %v475_v23  ;;  %v5213_v32 = vadd.f32 %v2696_v30, %v477_v24  ;;  %v2657_v33 = vpop.f32.mrb[49].mxu0  ;;  %v2698_v34 = vpop.f32.mrb[49].mxu1  ;;  %v487_v29 = vld [vmem:[#allocation2 + $0x1e0] sm:$0xff]  ;;  %v489_v30 = vld [vmem:[#allocation2 + $0x1f0] sm:$0xff] }
 0x1e6   : > { %v5212_v37 = vadd.f32 %v2657_v33, %v476_v25  ;;  %v5214_v38 = vadd.f32 %v2698_v34, %v478_v26  ;;  %v2659_v18 = vpop.f32.mrb[50].mxu0  ;;  %v2700_v39 = vpop.f32.mrb[50].mxu1 }
 0x1e7   : > { %5383 = vst [vmem:[#allocation2 + $0x180] sm:$0xff] %v5211_v31  ;;  %5385 = vst [vmem:[#allocation2 + $0x190] sm:$0xff] %v5213_v32  ;;  %v2660_v40 = vpop.f32.mrb[51].mxu0  ;;  %v2701_v41 = vpop.f32.mrb[51].mxu1  ;;  %v488_v31 = vld [vmem:[#allocation2 + $0x1e8] sm:$0xff]  ;;  %v490_v32 = vld [vmem:[#allocation2 + $0x1f8] sm:$0xff] }
 0x1e8   : > { %5384 = vst [vmem:[#allocation2 + $0x188] sm:$0xff] %v5212_v37  ;;  %5386 = vst [vmem:[#allocation2 + $0x198] sm:$0xff] %v5214_v38 }
 0x1e9   : > { %8491 = vmatmul.mubr.msk.bf16.vlgmr.msra.gmra.mrb[156].mxu0 %vm1116_vm2, %v9904_v54  ;;  %8493 = vmatmul.mubr.msk.bf16.vlgmr.msra.gmra.mrb[156].mxu1 %vm1116_vm2, %v9904_v54 }
 0x1ea   : > { %4918 = vmatpush1.bf16.msra.mxu0 %v1602_v42  ;;  %4959 = vmatpush1.bf16.msra.mxu1 %v1608_v43 }
 0x1eb   : > { %4949 = vmatprep.mubr.bf16.mxu0 %v9194_v7  ;;  %4990 = vmatprep.mubr.bf16.mxu1 %v9194_v7 }
 0x1ec   : > { %v2737_v52 = vpop.f32.mrb[52].mxu0  ;;  %v2778_v53 = vpop.f32.mrb[52].mxu1  ;;  %8498 = vmatprep.subr.msk.bf16.mxu0 %vm14628_vm1, %v8327_v44  ;;  %8500 = vmatprep.subr.msk.bf16.mxu1 %vm14628_vm1, %v8329_v45  ;;  %v493_v44 = vld [vmem:[#allocation2 + $0x210] sm:$0xff]  ;;  %v492_v45 = vld [vmem:[#allocation2 + $0x208] sm:$0xff] }
 0x1ed   : > { %v5215_v55 = vadd.f32 %v2737_v52, %v479_v46  ;;  %v5217_v56 = vadd.f32 %v2778_v53, %v481_v47  ;;  %v2739_v57 = vpop.f32.mrb[53].mxu0  ;;  %v2780_v58 = vpop.f32.mrb[53].mxu1  ;;  %v494_v46 = vld [vmem:[#allocation2 + $0x218] sm:$0xff] }
 0x1ee   : > { %v5216_v61 = vadd.f32 %v2739_v57, %v480_v48  ;;  %v5218_v62 = vadd.f32 %v2780_v58, %v482_v49  ;;  %v2741_v63 = vpop.f32.mrb[54].mxu0  ;;  %v2782_v0 = vpop.f32.mrb[54].mxu1 }
 0x1ef   : > { %5387 = vst [vmem:[#allocation2 + $0x1a0] sm:$0xff] %v5215_v55  ;;  %5389 = vst [vmem:[#allocation2 + $0x1b0] sm:$0xff] %v5217_v56  ;;  %v2742_v1 = vpop.f32.mrb[55].mxu0  ;;  %v2783_v2 = vpop.f32.mrb[55].mxu1 }
 0x1f0   : > { %5388 = vst [vmem:[#allocation2 + $0x1a8] sm:$0xff] %v5216_v61  ;;  %5390 = vst [vmem:[#allocation2 + $0x1b8] sm:$0xff] %v5218_v62  ;;  %v496_v61 = vld [vmem:[#allocation2 + $0x228] sm:$0xff]  ;;  %v498_v62 = vld [vmem:[#allocation2 + $0x238] sm:$0xff] }
 0x1f1   : > { %8495 = vmatmul.mubr.msk.bf16.vlgmr.msra.gmra.mrb[160].mxu0 %vm1116_vm2, %v9904_v54  ;;  %8497 = vmatmul.mubr.msk.bf16.vlgmr.msra.gmra.mrb[160].mxu1 %vm1116_vm2, %v9904_v54 }
 0x1f2   : > { %5000 = vmatpush1.bf16.msra.mxu0 %v1614_v3  ;;  %5041 = vmatpush1.bf16.msra.mxu1 %v1620_v4 }
 0x1f3   : > { %5031 = vmatprep.mubr.bf16.mxu0 %v9194_v7  ;;  %5072 = vmatprep.mubr.bf16.mxu1 %v9194_v7 }
 0x1f4   : > { %v2819_v14 = vpop.f32.mrb[56].mxu0  ;;  %v2860_v15 = vpop.f32.mrb[56].mxu1  ;;  %8502 = vmatprep.subr.msk.bf16.mxu0 %vm14628_vm1, %v8331_v5  ;;  %8504 = vmatprep.subr.msk.bf16.mxu1 %vm14628_vm1, %v8333_v6 }
 0x1f5   : > { %v5219_v16 = vadd.f32 %v2819_v14, %v483_v8  ;;  %v5221_v17 = vadd.f32 %v2860_v15, %v485_v9  ;;  %v2821_v19 = vpop.f32.mrb[57].mxu0  ;;  %v2862_v20 = vpop.f32.mrb[57].mxu1  ;;  %v500_v14 = vld [vmem:[#allocation2 + $0x248] sm:$0xff]  ;;  %v502_v15 = vld [vmem:[#allocation2 + $0x258] sm:$0xff] }
 0x1f6   : > { %v5220_v21 = vadd.f32 %v2821_v19, %v484_v10  ;;  %v5222_v22 = vadd.f32 %v2862_v20, %v486_v11  ;;  %v2823_v23 = vpop.f32.mrb[58].mxu0  ;;  %v2864_v24 = vpop.f32.mrb[58].mxu1 }
 0x1f7   : > { %5391 = vst [vmem:[#allocation2 + $0x1c0] sm:$0xff] %v5219_v16  ;;  %5393 = vst [vmem:[#allocation2 + $0x1d0] sm:$0xff] %v5221_v17  ;;  %v2824_v25 = vpop.f32.mrb[59].mxu0  ;;  %v2865_v26 = vpop.f32.mrb[59].mxu1 }
 0x1f8   : > { %5392 = vst [vmem:[#allocation2 + $0x1c8] sm:$0xff] %v5220_v21  ;;  %5394 = vst [vmem:[#allocation2 + $0x1d8] sm:$0xff] %v5222_v22 }
 0x1f9   : > { %8499 = vmatmul.mubr.msk.bf16.vlgmr.msra.gmra.mrb[164].mxu0 %vm1116_vm2, %v9904_v54  ;;  %8501 = vmatmul.mubr.msk.bf16.vlgmr.msra.gmra.mrb[164].mxu1 %vm1116_vm2, %v9904_v54 }
 0x1fa   : > { %5082 = vmatpush1.bf16.msra.mxu0 %v1626_v27  ;;  %5123 = vmatpush1.bf16.msra.mxu1 %v1632_v28 }
 0x1fb   : > { %5113 = vmatprep.mubr.bf16.mxu0 %v9194_v7  ;;  %5154 = vmatprep.mubr.bf16.mxu1 %v9194_v7  ;;  %v491_v7 = vld [vmem:[#allocation2 + $0x200] sm:$0xff] }
 0x1fc   : > { %v2901_v33 = vpop.f32.mrb[60].mxu0  ;;  %v2942_v34 = vpop.f32.mrb[60].mxu1 }
 0x1fd   : > { %v5223_v35 = vadd.f32 %v2901_v33, %v487_v29  ;;  %v5225_v36 = vadd.f32 %v2942_v34, %v489_v30  ;;  %v2903_v37 = vpop.f32.mrb[61].mxu0  ;;  %v2944_v38 = vpop.f32.mrb[61].mxu1  ;;  %v503_v29 = vld [vmem:[#allocation2 + $0x260] sm:$0xff]  ;;  %v505_v30 = vld [vmem:[#allocation2 + $0x270] sm:$0xff] }
 0x1fe   : > { %v5224_v18 = vadd.f32 %v2903_v37, %v488_v31  ;;  %v5226_v39 = vadd.f32 %v2944_v38, %v490_v32  ;;  %v2905_v40 = vpop.f32.mrb[62].mxu0  ;;  %v2946_v41 = vpop.f32.mrb[62].mxu1  ;;  %v504_v31 = vld [vmem:[#allocation2 + $0x268] sm:$0xff]  ;;  %v506_v32 = vld [vmem:[#allocation2 + $0x278] sm:$0xff] }
 0x1ff   : > { %5395 = vst [vmem:[#allocation2 + $0x1e0] sm:$0xff] %v5223_v35  ;;  %5397 = vst [vmem:[#allocation2 + $0x1f0] sm:$0xff] %v5225_v36  ;;  %v2906_v42 = vpop.f32.mrb[63].mxu0  ;;  %v2947_v43 = vpop.f32.mrb[63].mxu1 }
 0x200   : > { %5396 = vst [vmem:[#allocation2 + $0x1e8] sm:$0xff] %v5224_v18  ;;  %5398 = vst [vmem:[#allocation2 + $0x1f8] sm:$0xff] %v5226_v39 }
 0x201   : > { %8503 = vmatmul.mubr.msk.bf16.vlgmr.msra.gmra.mrb[168].mxu0 %vm1116_vm2, %v9904_v54  ;;  %8505 = vmatmul.mubr.msk.bf16.vlgmr.msra.gmra.mrb[168].mxu1 %vm1116_vm2, %v9904_v54  ;;  %v495_v54 = vld [vmem:[#allocation2 + $0x220] sm:$0xff] }
 0x204   : > { %v2983_v47 = vpop.f32.mrb[64].mxu0  ;;  %v3024_v48 = vpop.f32.mrb[64].mxu1 }
 0x205   : > { %v5227_v49 = vadd.f32 %v2983_v47, %v491_v7  ;;  %v5229_v50 = vadd.f32 %v3024_v48, %v493_v44  ;;  %v2985_v51 = vpop.f32.mrb[65].mxu0  ;;  %v3026_v52 = vpop.f32.mrb[65].mxu1  ;;  %v507_v7 = vld [vmem:[#allocation2 + $0x280] sm:$0xff]  ;;  %v509_v44 = vld [vmem:[#allocation2 + $0x290] sm:$0xff] }
 0x206   : > { %v5228_v53 = vadd.f32 %v2985_v51, %v492_v45  ;;  %v5230_v55 = vadd.f32 %v3026_v52, %v494_v46  ;;  %v2987_v56 = vpop.f32.mrb[66].mxu0  ;;  %v3028_v57 = vpop.f32.mrb[66].mxu1  ;;  %v508_v45 = vld [vmem:[#allocation2 + $0x288] sm:$0xff]  ;;  %v510_v46 = vld [vmem:[#allocation2 + $0x298] sm:$0xff] }
 0x207   : > { %5399 = vst [vmem:[#allocation2 + $0x200] sm:$0xff] %v5227_v49  ;;  %5401 = vst [vmem:[#allocation2 + $0x210] sm:$0xff] %v5229_v50  ;;  %v2988_v58 = vpop.f32.mrb[67].mxu0  ;;  %v3029_v59 = vpop.f32.mrb[67].mxu1 }
 0x208   : > { %5400 = vst [vmem:[#allocation2 + $0x208] sm:$0xff] %v5228_v53  ;;  %5402 = vst [vmem:[#allocation2 + $0x218] sm:$0xff] %v5230_v55 }
 0x20c   : > { %v3065_v63 = vpop.f32.mrb[68].mxu0  ;;  %v3106_v0 = vpop.f32.mrb[68].mxu1 }
 0x20d   : > { %v5231_v1 = vadd.f32 %v3065_v63, %v495_v54  ;;  %v5233_v2 = vadd.f32 %v3106_v0, %v497_v60  ;;  %v3067_v3 = vpop.f32.mrb[69].mxu0  ;;  %v3108_v4 = vpop.f32.mrb[69].mxu1  ;;  %v511_v54 = vld [vmem:[#allocation2 + $0x2a0] sm:$0xff]  ;;  %v513_v60 = vld [vmem:[#allocation2 + $0x2b0] sm:$0xff] }
 0x20e   : > { %v5232_v5 = vadd.f32 %v3067_v3, %v496_v61  ;;  %v5234_v6 = vadd.f32 %v3108_v4, %v498_v62  ;;  %v3069_v8 = vpop.f32.mrb[70].mxu0  ;;  %v3110_v9 = vpop.f32.mrb[70].mxu1  ;;  %v512_v61 = vld [vmem:[#allocation2 + $0x2a8] sm:$0xff]  ;;  %v514_v62 = vld [vmem:[#allocation2 + $0x2b8] sm:$0xff] }
 0x20f   : > { %5403 = vst [vmem:[#allocation2 + $0x220] sm:$0xff] %v5231_v1  ;;  %5405 = vst [vmem:[#allocation2 + $0x230] sm:$0xff] %v5233_v2  ;;  %v3070_v10 = vpop.f32.mrb[71].mxu0  ;;  %v3111_v11 = vpop.f32.mrb[71].mxu1 }
 0x210   : > { %5404 = vst [vmem:[#allocation2 + $0x228] sm:$0xff] %v5232_v5  ;;  %5406 = vst [vmem:[#allocation2 + $0x238] sm:$0xff] %v5234_v6 }
 0x214   : > { %v3147_v16 = vpop.f32.mrb[72].mxu0  ;;  %v3188_v17 = vpop.f32.mrb[72].mxu1 }
 0x215   : > { %v5235_v19 = vadd.f32 %v3147_v16, %v499_v12  ;;  %v5237_v20 = vadd.f32 %v3188_v17, %v501_v13  ;;  %v3149_v21 = vpop.f32.mrb[73].mxu0  ;;  %v3190_v22 = vpop.f32.mrb[73].mxu1  ;;  %v515_v12 = vld [vmem:[#allocation2 + $0x2c0] sm:$0xff]  ;;  %v517_v13 = vld [vmem:[#allocation2 + $0x2d0] sm:$0xff] }
 0x216   : > { %v5236_v23 = vadd.f32 %v3149_v21, %v500_v14  ;;  %v5238_v24 = vadd.f32 %v3190_v22, %v502_v15  ;;  %v3151_v25 = vpop.f32.mrb[74].mxu0  ;;  %v3192_v26 = vpop.f32.mrb[74].mxu1  ;;  %v516_v14 = vld [vmem:[#allocation2 + $0x2c8] sm:$0xff]  ;;  %v518_v15 = vld [vmem:[#allocation2 + $0x2d8] sm:$0xff] }
 0x217   : > { %5407 = vst [vmem:[#allocation2 + $0x240] sm:$0xff] %v5235_v19  ;;  %5409 = vst [vmem:[#allocation2 + $0x250] sm:$0xff] %v5237_v20  ;;  %v3152_v27 = vpop.f32.mrb[75].mxu0  ;;  %v3193_v28 = vpop.f32.mrb[75].mxu1 }
 0x218   : > { %5408 = vst [vmem:[#allocation2 + $0x248] sm:$0xff] %v5236_v23  ;;  %5410 = vst [vmem:[#allocation2 + $0x258] sm:$0xff] %v5238_v24 }
 0x21c   : > { %v3229_v33 = vpop.f32.mrb[76].mxu0  ;;  %v3270_v34 = vpop.f32.mrb[76].mxu1 }
 0x21d   : > { %v5239_v35 = vadd.f32 %v3229_v33, %v503_v29  ;;  %v5241_v36 = vadd.f32 %v3270_v34, %v505_v30  ;;  %v3231_v37 = vpop.f32.mrb[77].mxu0  ;;  %v3272_v38 = vpop.f32.mrb[77].mxu1  ;;  %v519_v29 = vld [vmem:[#allocation2 + $0x2e0] sm:$0xff]  ;;  %v521_v30 = vld [vmem:[#allocation2 + $0x2f0] sm:$0xff] }
 0x21e   : > { %v5240_v18 = vadd.f32 %v3231_v37, %v504_v31  ;;  %v5242_v39 = vadd.f32 %v3272_v38, %v506_v32  ;;  %v3233_v40 = vpop.f32.mrb[78].mxu0  ;;  %v3274_v41 = vpop.f32.mrb[78].mxu1  ;;  %v520_v31 = vld [vmem:[#allocation2 + $0x2e8] sm:$0xff]  ;;  %v522_v32 = vld [vmem:[#allocation2 + $0x2f8] sm:$0xff] }
 0x21f   : > { %5411 = vst [vmem:[#allocation2 + $0x260] sm:$0xff] %v5239_v35  ;;  %5413 = vst [vmem:[#allocation2 + $0x270] sm:$0xff] %v5241_v36  ;;  %v3234_v42 = vpop.f32.mrb[79].mxu0  ;;  %v3275_v43 = vpop.f32.mrb[79].mxu1 }
 0x220   : > { %5412 = vst [vmem:[#allocation2 + $0x268] sm:$0xff] %v5240_v18  ;;  %5414 = vst [vmem:[#allocation2 + $0x278] sm:$0xff] %v5242_v39 }
 0x224   : > { %v3311_v47 = vpop.f32.mrb[80].mxu0  ;;  %v3352_v48 = vpop.f32.mrb[80].mxu1 }
 0x225   : > { %v5243_v49 = vadd.f32 %v3311_v47, %v507_v7  ;;  %v5245_v50 = vadd.f32 %v3352_v48, %v509_v44  ;;  %v3313_v51 = vpop.f32.mrb[81].mxu0  ;;  %v3354_v52 = vpop.f32.mrb[81].mxu1  ;;  %v523_v7 = vld [vmem:[#allocation2 + $0x300] sm:$0xff]  ;;  %v525_v44 = vld [vmem:[#allocation2 + $0x310] sm:$0xff] }
 0x226   : > { %v5244_v53 = vadd.f32 %v3313_v51, %v508_v45  ;;  %v5246_v55 = vadd.f32 %v3354_v52, %v510_v46  ;;  %v3315_v56 = vpop.f32.mrb[82].mxu0  ;;  %v3356_v57 = vpop.f32.mrb[82].mxu1  ;;  %v524_v45 = vld [vmem:[#allocation2 + $0x308] sm:$0xff]  ;;  %v526_v46 = vld [vmem:[#allocation2 + $0x318] sm:$0xff] }
 0x227   : > { %5415 = vst [vmem:[#allocation2 + $0x280] sm:$0xff] %v5243_v49  ;;  %5417 = vst [vmem:[#allocation2 + $0x290] sm:$0xff] %v5245_v50  ;;  %v3316_v58 = vpop.f32.mrb[83].mxu0  ;;  %v3357_v59 = vpop.f32.mrb[83].mxu1 }
 0x228   : > { %5416 = vst [vmem:[#allocation2 + $0x288] sm:$0xff] %v5244_v53  ;;  %5418 = vst [vmem:[#allocation2 + $0x298] sm:$0xff] %v5246_v55 }
 0x22c   : > { %v3393_v63 = vpop.f32.mrb[84].mxu0  ;;  %v3434_v0 = vpop.f32.mrb[84].mxu1 }
 0x22d   : > { %v5247_v1 = vadd.f32 %v3393_v63, %v511_v54  ;;  %v5249_v2 = vadd.f32 %v3434_v0, %v513_v60  ;;  %v3395_v3 = vpop.f32.mrb[85].mxu0  ;;  %v3436_v4 = vpop.f32.mrb[85].mxu1  ;;  %v527_v54 = vld [vmem:[#allocation2 + $0x320] sm:$0xff]  ;;  %v529_v60 = vld [vmem:[#allocation2 + $0x330] sm:$0xff] }
 0x22e   : > { %v5248_v5 = vadd.f32 %v3395_v3, %v512_v61  ;;  %v5250_v6 = vadd.f32 %v3436_v4, %v514_v62  ;;  %v3397_v8 = vpop.f32.mrb[86].mxu0  ;;  %v3438_v9 = vpop.f32.mrb[86].mxu1  ;;  %v528_v61 = vld [vmem:[#allocation2 + $0x328] sm:$0xff]  ;;  %v530_v62 = vld [vmem:[#allocation2 + $0x338] sm:$0xff] }
 0x22f   : > { %5419 = vst [vmem:[#allocation2 + $0x2a0] sm:$0xff] %v5247_v1  ;;  %5421 = vst [vmem:[#allocation2 + $0x2b0] sm:$0xff] %v5249_v2  ;;  %v3398_v10 = vpop.f32.mrb[87].mxu0  ;;  %v3439_v11 = vpop.f32.mrb[87].mxu1 }
 0x230   : > { %5420 = vst [vmem:[#allocation2 + $0x2a8] sm:$0xff] %v5248_v5  ;;  %5422 = vst [vmem:[#allocation2 + $0x2b8] sm:$0xff] %v5250_v6 }
 0x234   : > { %v3475_v16 = vpop.f32.mrb[88].mxu0  ;;  %v3516_v17 = vpop.f32.mrb[88].mxu1 }
 0x235   : > { %v5251_v19 = vadd.f32 %v3475_v16, %v515_v12  ;;  %v5253_v20 = vadd.f32 %v3516_v17, %v517_v13  ;;  %v3477_v21 = vpop.f32.mrb[89].mxu0  ;;  %v3518_v22 = vpop.f32.mrb[89].mxu1  ;;  %v531_v12 = vld [vmem:[#allocation2 + $0x340] sm:$0xff]  ;;  %v533_v13 = vld [vmem:[#allocation2 + $0x350] sm:$0xff] }
 0x236   : > { %v5252_v23 = vadd.f32 %v3477_v21, %v516_v14  ;;  %v5254_v24 = vadd.f32 %v3518_v22, %v518_v15  ;;  %v3479_v25 = vpop.f32.mrb[90].mxu0  ;;  %v3520_v26 = vpop.f32.mrb[90].mxu1  ;;  %v532_v14 = vld [vmem:[#allocation2 + $0x348] sm:$0xff]  ;;  %v534_v15 = vld [vmem:[#allocation2 + $0x358] sm:$0xff] }
 0x237   : > { %5423 = vst [vmem:[#allocation2 + $0x2c0] sm:$0xff] %v5251_v19  ;;  %5425 = vst [vmem:[#allocation2 + $0x2d0] sm:$0xff] %v5253_v20  ;;  %v3480_v27 = vpop.f32.mrb[91].mxu0  ;;  %v3521_v28 = vpop.f32.mrb[91].mxu1 }
 0x238   : > { %5424 = vst [vmem:[#allocation2 + $0x2c8] sm:$0xff] %v5252_v23  ;;  %5426 = vst [vmem:[#allocation2 + $0x2d8] sm:$0xff] %v5254_v24 }
 0x23c   : > { %v3557_v33 = vpop.f32.mrb[92].mxu0  ;;  %v3598_v34 = vpop.f32.mrb[92].mxu1 }
 0x23d   : > { %v5255_v35 = vadd.f32 %v3557_v33, %v519_v29  ;;  %v5257_v36 = vadd.f32 %v3598_v34, %v521_v30  ;;  %v3559_v37 = vpop.f32.mrb[93].mxu0  ;;  %v3600_v38 = vpop.f32.mrb[93].mxu1  ;;  %v535_v29 = vld [vmem:[#allocation2 + $0x360] sm:$0xff]  ;;  %v537_v30 = vld [vmem:[#allocation2 + $0x370] sm:$0xff] }
 0x23e   : > { %v5256_v18 = vadd.f32 %v3559_v37, %v520_v31  ;;  %v5258_v39 = vadd.f32 %v3600_v38, %v522_v32  ;;  %v3561_v40 = vpop.f32.mrb[94].mxu0  ;;  %v3602_v41 = vpop.f32.mrb[94].mxu1  ;;  %v536_v31 = vld [vmem:[#allocation2 + $0x368] sm:$0xff]  ;;  %v538_v32 = vld [vmem:[#allocation2 + $0x378] sm:$0xff] }
 0x23f   : > { %5427 = vst [vmem:[#allocation2 + $0x2e0] sm:$0xff] %v5255_v35  ;;  %5429 = vst [vmem:[#allocation2 + $0x2f0] sm:$0xff] %v5257_v36  ;;  %v3562_v42 = vpop.f32.mrb[95].mxu0  ;;  %v3603_v43 = vpop.f32.mrb[95].mxu1 }
 0x240   : > { %5428 = vst [vmem:[#allocation2 + $0x2e8] sm:$0xff] %v5256_v18  ;;  %5430 = vst [vmem:[#allocation2 + $0x2f8] sm:$0xff] %v5258_v39 }
 0x244   : > { %v3639_v47 = vpop.f32.mrb[96].mxu0  ;;  %v3680_v48 = vpop.f32.mrb[96].mxu1 }
 0x245   : > { %v5259_v49 = vadd.f32 %v3639_v47, %v523_v7  ;;  %v5261_v50 = vadd.f32 %v3680_v48, %v525_v44  ;;  %v3641_v51 = vpop.f32.mrb[97].mxu0  ;;  %v3682_v52 = vpop.f32.mrb[97].mxu1  ;;  %v539_v7 = vld [vmem:[#allocation2 + $0x380] sm:$0xff]  ;;  %v541_v44 = vld [vmem:[#allocation2 + $0x390] sm:$0xff] }
 0x246   : > { %v5260_v53 = vadd.f32 %v3641_v51, %v524_v45  ;;  %v5262_v55 = vadd.f32 %v3682_v52, %v526_v46  ;;  %v3643_v56 = vpop.f32.mrb[98].mxu0  ;;  %v3684_v57 = vpop.f32.mrb[98].mxu1  ;;  %v540_v45 = vld [vmem:[#allocation2 + $0x388] sm:$0xff]  ;;  %v542_v46 = vld [vmem:[#allocation2 + $0x398] sm:$0xff] }
 0x247   : > { %5431 = vst [vmem:[#allocation2 + $0x300] sm:$0xff] %v5259_v49  ;;  %5433 = vst [vmem:[#allocation2 + $0x310] sm:$0xff] %v5261_v50  ;;  %v3644_v58 = vpop.f32.mrb[99].mxu0  ;;  %v3685_v59 = vpop.f32.mrb[99].mxu1 }
 0x248   : > { %5432 = vst [vmem:[#allocation2 + $0x308] sm:$0xff] %v5260_v53  ;;  %5434 = vst [vmem:[#allocation2 + $0x318] sm:$0xff] %v5262_v55 }
 0x24c   : > { %v3721_v63 = vpop.f32.mrb[100].mxu0  ;;  %v3762_v0 = vpop.f32.mrb[100].mxu1 }
 0x24d   : > { %v5263_v1 = vadd.f32 %v3721_v63, %v527_v54  ;;  %v5265_v2 = vadd.f32 %v3762_v0, %v529_v60  ;;  %v3723_v3 = vpop.f32.mrb[101].mxu0  ;;  %v3764_v4 = vpop.f32.mrb[101].mxu1  ;;  %v543_v54 = vld [vmem:[#allocation2 + $0x3a0] sm:$0xff]  ;;  %v545_v60 = vld [vmem:[#allocation2 + $0x3b0] sm:$0xff] }
 0x24e   : > { %v5264_v5 = vadd.f32 %v3723_v3, %v528_v61  ;;  %v5266_v6 = vadd.f32 %v3764_v4, %v530_v62  ;;  %v3725_v8 = vpop.f32.mrb[102].mxu0  ;;  %v3766_v9 = vpop.f32.mrb[102].mxu1  ;;  %v544_v61 = vld [vmem:[#allocation2 + $0x3a8] sm:$0xff]  ;;  %v546_v62 = vld [vmem:[#allocation2 + $0x3b8] sm:$0xff] }
 0x24f   : > { %5435 = vst [vmem:[#allocation2 + $0x320] sm:$0xff] %v5263_v1  ;;  %5437 = vst [vmem:[#allocation2 + $0x330] sm:$0xff] %v5265_v2  ;;  %v3726_v10 = vpop.f32.mrb[103].mxu0  ;;  %v3767_v11 = vpop.f32.mrb[103].mxu1 }
 0x250   : > { %5436 = vst [vmem:[#allocation2 + $0x328] sm:$0xff] %v5264_v5  ;;  %5438 = vst [vmem:[#allocation2 + $0x338] sm:$0xff] %v5266_v6 }
 0x254   : > { %v3803_v16 = vpop.f32.mrb[104].mxu0  ;;  %v3844_v17 = vpop.f32.mrb[104].mxu1 }
 0x255   : > { %v5267_v19 = vadd.f32 %v3803_v16, %v531_v12  ;;  %v5269_v20 = vadd.f32 %v3844_v17, %v533_v13  ;;  %v3805_v21 = vpop.f32.mrb[105].mxu0  ;;  %v3846_v22 = vpop.f32.mrb[105].mxu1  ;;  %v547_v12 = vld [vmem:[#allocation2 + $0x3c0] sm:$0xff]  ;;  %v549_v13 = vld [vmem:[#allocation2 + $0x3d0] sm:$0xff] }
 0x256   : > { %v5268_v23 = vadd.f32 %v3805_v21, %v532_v14  ;;  %v5270_v24 = vadd.f32 %v3846_v22, %v534_v15  ;;  %v3807_v25 = vpop.f32.mrb[106].mxu0  ;;  %v3848_v26 = vpop.f32.mrb[106].mxu1  ;;  %v548_v14 = vld [vmem:[#allocation2 + $0x3c8] sm:$0xff]  ;;  %v550_v15 = vld [vmem:[#allocation2 + $0x3d8] sm:$0xff] }
 0x257   : > { %5439 = vst [vmem:[#allocation2 + $0x340] sm:$0xff] %v5267_v19  ;;  %5441 = vst [vmem:[#allocation2 + $0x350] sm:$0xff] %v5269_v20  ;;  %v3808_v27 = vpop.f32.mrb[107].mxu0  ;;  %v3849_v28 = vpop.f32.mrb[107].mxu1 }
 0x258   : > { %5440 = vst [vmem:[#allocation2 + $0x348] sm:$0xff] %v5268_v23  ;;  %5442 = vst [vmem:[#allocation2 + $0x358] sm:$0xff] %v5270_v24 }
 0x25c   : > { %v3885_v33 = vpop.f32.mrb[108].mxu0  ;;  %v3926_v34 = vpop.f32.mrb[108].mxu1 }
 0x25d   : > { %v5271_v35 = vadd.f32 %v3885_v33, %v535_v29  ;;  %v5273_v36 = vadd.f32 %v3926_v34, %v537_v30  ;;  %v3887_v37 = vpop.f32.mrb[109].mxu0  ;;  %v3928_v38 = vpop.f32.mrb[109].mxu1  ;;  %v551_v29 = vld [vmem:[#allocation2 + $0x3e0] sm:$0xff]  ;;  %v553_v30 = vld [vmem:[#allocation2 + $0x3f0] sm:$0xff] }
 0x25e   : > { %v5272_v18 = vadd.f32 %v3887_v37, %v536_v31  ;;  %v5274_v39 = vadd.f32 %v3928_v38, %v538_v32  ;;  %v3889_v40 = vpop.f32.mrb[110].mxu0  ;;  %v3930_v41 = vpop.f32.mrb[110].mxu1  ;;  %v552_v31 = vld [vmem:[#allocation2 + $0x3e8] sm:$0xff]  ;;  %v554_v32 = vld [vmem:[#allocation2 + $0x3f8] sm:$0xff] }
 0x25f   : > { %5443 = vst [vmem:[#allocation2 + $0x360] sm:$0xff] %v5271_v35  ;;  %5445 = vst [vmem:[#allocation2 + $0x370] sm:$0xff] %v5273_v36  ;;  %v3890_v42 = vpop.f32.mrb[111].mxu0  ;;  %v3931_v43 = vpop.f32.mrb[111].mxu1 }
 0x260   : > { %5444 = vst [vmem:[#allocation2 + $0x368] sm:$0xff] %v5272_v18  ;;  %5446 = vst [vmem:[#allocation2 + $0x378] sm:$0xff] %v5274_v39 }
 0x264   : > { %v3967_v47 = vpop.f32.mrb[112].mxu0  ;;  %v4008_v48 = vpop.f32.mrb[112].mxu1 }
 0x265   : > { %v5275_v49 = vadd.f32 %v3967_v47, %v539_v7  ;;  %v5277_v50 = vadd.f32 %v4008_v48, %v541_v44  ;;  %v3969_v51 = vpop.f32.mrb[113].mxu0  ;;  %v4010_v52 = vpop.f32.mrb[113].mxu1  ;;  %v555_v7 = vld [vmem:[#allocation2 + $0x400] sm:$0xff]  ;;  %v557_v44 = vld [vmem:[#allocation2 + $0x410] sm:$0xff] }
 0x266   : > { %v5276_v53 = vadd.f32 %v3969_v51, %v540_v45  ;;  %v5278_v55 = vadd.f32 %v4010_v52, %v542_v46  ;;  %v3971_v56 = vpop.f32.mrb[114].mxu0  ;;  %v4012_v57 = vpop.f32.mrb[114].mxu1  ;;  %v556_v45 = vld [vmem:[#allocation2 + $0x408] sm:$0xff]  ;;  %v558_v46 = vld [vmem:[#allocation2 + $0x418] sm:$0xff] }
 0x267   : > { %5447 = vst [vmem:[#allocation2 + $0x380] sm:$0xff] %v5275_v49  ;;  %5449 = vst [vmem:[#allocation2 + $0x390] sm:$0xff] %v5277_v50  ;;  %v3972_v58 = vpop.f32.mrb[115].mxu0  ;;  %v4013_v59 = vpop.f32.mrb[115].mxu1 }
 0x268   : > { %5448 = vst [vmem:[#allocation2 + $0x388] sm:$0xff] %v5276_v53  ;;  %5450 = vst [vmem:[#allocation2 + $0x398] sm:$0xff] %v5278_v55 }
 0x26c   : > { %v4049_v63 = vpop.f32.mrb[116].mxu0  ;;  %v4090_v0 = vpop.f32.mrb[116].mxu1 }
 0x26d   : > { %v5279_v1 = vadd.f32 %v4049_v63, %v543_v54  ;;  %v5281_v2 = vadd.f32 %v4090_v0, %v545_v60  ;;  %v4051_v3 = vpop.f32.mrb[117].mxu0  ;;  %v4092_v4 = vpop.f32.mrb[117].mxu1  ;;  %v559_v54 = vld [vmem:[#allocation2 + $0x420] sm:$0xff]  ;;  %v561_v60 = vld [vmem:[#allocation2 + $0x430] sm:$0xff] }
 0x26e   : > { %v5280_v5 = vadd.f32 %v4051_v3, %v544_v61  ;;  %v5282_v6 = vadd.f32 %v4092_v4, %v546_v62  ;;  %v4053_v8 = vpop.f32.mrb[118].mxu0  ;;  %v4094_v9 = vpop.f32.mrb[118].mxu1  ;;  %v560_v61 = vld [vmem:[#allocation2 + $0x428] sm:$0xff]  ;;  %v562_v62 = vld [vmem:[#allocation2 + $0x438] sm:$0xff] }
 0x26f   : > { %5451 = vst [vmem:[#allocation2 + $0x3a0] sm:$0xff] %v5279_v1  ;;  %5453 = vst [vmem:[#allocation2 + $0x3b0] sm:$0xff] %v5281_v2  ;;  %v4054_v10 = vpop.f32.mrb[119].mxu0  ;;  %v4095_v11 = vpop.f32.mrb[119].mxu1 }
 0x270   : > { %5452 = vst [vmem:[#allocation2 + $0x3a8] sm:$0xff] %v5280_v5  ;;  %5454 = vst [vmem:[#allocation2 + $0x3b8] sm:$0xff] %v5282_v6 }
 0x274   : > { %v4131_v16 = vpop.f32.mrb[120].mxu0  ;;  %v4172_v17 = vpop.f32.mrb[120].mxu1 }
 0x275   : > { %v5283_v19 = vadd.f32 %v4131_v16, %v547_v12  ;;  %v5285_v20 = vadd.f32 %v4172_v17, %v549_v13  ;;  %v4133_v21 = vpop.f32.mrb[121].mxu0  ;;  %v4174_v22 = vpop.f32.mrb[121].mxu1  ;;  %v563_v12 = vld [vmem:[#allocation2 + $0x440] sm:$0xff]  ;;  %v565_v13 = vld [vmem:[#allocation2 + $0x450] sm:$0xff] }
 0x276   : > { %v5284_v23 = vadd.f32 %v4133_v21, %v548_v14  ;;  %v5286_v24 = vadd.f32 %v4174_v22, %v550_v15  ;;  %v4135_v25 = vpop.f32.mrb[122].mxu0  ;;  %v4176_v26 = vpop.f32.mrb[122].mxu1  ;;  %v564_v14 = vld [vmem:[#allocation2 + $0x448] sm:$0xff]  ;;  %v566_v15 = vld [vmem:[#allocation2 + $0x458] sm:$0xff] }
 0x277   : > { %5455 = vst [vmem:[#allocation2 + $0x3c0] sm:$0xff] %v5283_v19  ;;  %5457 = vst [vmem:[#allocation2 + $0x3d0] sm:$0xff] %v5285_v20  ;;  %v4136_v27 = vpop.f32.mrb[123].mxu0  ;;  %v4177_v28 = vpop.f32.mrb[123].mxu1 }
 0x278   : > { %5456 = vst [vmem:[#allocation2 + $0x3c8] sm:$0xff] %v5284_v23  ;;  %5458 = vst [vmem:[#allocation2 + $0x3d8] sm:$0xff] %v5286_v24 }
 0x27c   : > { %v4213_v33 = vpop.f32.mrb[124].mxu0  ;;  %v4254_v34 = vpop.f32.mrb[124].mxu1 }
 0x27d   : > { %v5287_v35 = vadd.f32 %v4213_v33, %v551_v29  ;;  %v5289_v36 = vadd.f32 %v4254_v34, %v553_v30  ;;  %v4215_v37 = vpop.f32.mrb[125].mxu0  ;;  %v4256_v38 = vpop.f32.mrb[125].mxu1  ;;  %v567_v29 = vld [vmem:[#allocation2 + $0x460] sm:$0xff]  ;;  %v569_v30 = vld [vmem:[#allocation2 + $0x470] sm:$0xff] }
 0x27e   : > { %v5288_v18 = vadd.f32 %v4215_v37, %v552_v31  ;;  %v5290_v39 = vadd.f32 %v4256_v38, %v554_v32  ;;  %v4217_v40 = vpop.f32.mrb[126].mxu0  ;;  %v4258_v41 = vpop.f32.mrb[126].mxu1  ;;  %v568_v31 = vld [vmem:[#allocation2 + $0x468] sm:$0xff]  ;;  %v570_v32 = vld [vmem:[#allocation2 + $0x478] sm:$0xff] }
 0x27f   : > { %5459 = vst [vmem:[#allocation2 + $0x3e0] sm:$0xff] %v5287_v35  ;;  %5461 = vst [vmem:[#allocation2 + $0x3f0] sm:$0xff] %v5289_v36  ;;  %v4218_v42 = vpop.f32.mrb[127].mxu0  ;;  %v4259_v43 = vpop.f32.mrb[127].mxu1 }
 0x280   : > { %5460 = vst [vmem:[#allocation2 + $0x3e8] sm:$0xff] %v5288_v18  ;;  %5462 = vst [vmem:[#allocation2 + $0x3f8] sm:$0xff] %v5290_v39 }
 0x284   : > { %v4295_v47 = vpop.f32.mrb[128].mxu0  ;;  %v4336_v48 = vpop.f32.mrb[128].mxu1 }
 0x285   : > { %v5291_v49 = vadd.f32 %v4295_v47, %v555_v7  ;;  %v5293_v50 = vadd.f32 %v4336_v48, %v557_v44  ;;  %v4297_v51 = vpop.f32.mrb[129].mxu0  ;;  %v4338_v52 = vpop.f32.mrb[129].mxu1  ;;  %v571_v7 = vld [vmem:[#allocation2 + $0x480] sm:$0xff]  ;;  %v573_v44 = vld [vmem:[#allocation2 + $0x490] sm:$0xff] }
 0x286   : > { %v5292_v53 = vadd.f32 %v4297_v51, %v556_v45  ;;  %v5294_v55 = vadd.f32 %v4338_v52, %v558_v46  ;;  %v4299_v56 = vpop.f32.mrb[130].mxu0  ;;  %v4340_v57 = vpop.f32.mrb[130].mxu1  ;;  %v572_v45 = vld [vmem:[#allocation2 + $0x488] sm:$0xff]  ;;  %v574_v46 = vld [vmem:[#allocation2 + $0x498] sm:$0xff] }
 0x287   : > { %5463 = vst [vmem:[#allocation2 + $0x400] sm:$0xff] %v5291_v49  ;;  %5465 = vst [vmem:[#allocation2 + $0x410] sm:$0xff] %v5293_v50  ;;  %v4300_v58 = vpop.f32.mrb[131].mxu0  ;;  %v4341_v59 = vpop.f32.mrb[131].mxu1 }
 0x288   : > { %5464 = vst [vmem:[#allocation2 + $0x408] sm:$0xff] %v5292_v53  ;;  %5466 = vst [vmem:[#allocation2 + $0x418] sm:$0xff] %v5294_v55 }
 0x28c   : > { %v4377_v63 = vpop.f32.mrb[132].mxu0  ;;  %v4418_v0 = vpop.f32.mrb[132].mxu1 }
 0x28d   : > { %v5295_v1 = vadd.f32 %v4377_v63, %v559_v54  ;;  %v5297_v2 = vadd.f32 %v4418_v0, %v561_v60  ;;  %v4379_v3 = vpop.f32.mrb[133].mxu0  ;;  %v4420_v4 = vpop.f32.mrb[133].mxu1  ;;  %v575_v54 = vld [vmem:[#allocation2 + $0x4a0] sm:$0xff]  ;;  %v577_v60 = vld [vmem:[#allocation2 + $0x4b0] sm:$0xff] }
 0x28e   : > { %v5296_v5 = vadd.f32 %v4379_v3, %v560_v61  ;;  %v5298_v6 = vadd.f32 %v4420_v4, %v562_v62  ;;  %v4381_v8 = vpop.f32.mrb[134].mxu0  ;;  %v4422_v9 = vpop.f32.mrb[134].mxu1  ;;  %v576_v61 = vld [vmem:[#allocation2 + $0x4a8] sm:$0xff]  ;;  %v578_v62 = vld [vmem:[#allocation2 + $0x4b8] sm:$0xff] }
 0x28f   : > { %5467 = vst [vmem:[#allocation2 + $0x420] sm:$0xff] %v5295_v1  ;;  %5469 = vst [vmem:[#allocation2 + $0x430] sm:$0xff] %v5297_v2  ;;  %v4382_v10 = vpop.f32.mrb[135].mxu0  ;;  %v4423_v11 = vpop.f32.mrb[135].mxu1 }
 0x290   : > { %5468 = vst [vmem:[#allocation2 + $0x428] sm:$0xff] %v5296_v5  ;;  %5470 = vst [vmem:[#allocation2 + $0x438] sm:$0xff] %v5298_v6 }
 0x294   : > { %v4459_v16 = vpop.f32.mrb[136].mxu0  ;;  %v4500_v17 = vpop.f32.mrb[136].mxu1 }
 0x295   : > { %v5299_v19 = vadd.f32 %v4459_v16, %v563_v12  ;;  %v5301_v20 = vadd.f32 %v4500_v17, %v565_v13  ;;  %v4461_v21 = vpop.f32.mrb[137].mxu0  ;;  %v4502_v22 = vpop.f32.mrb[137].mxu1  ;;  %v579_v12 = vld [vmem:[#allocation2 + $0x4c0] sm:$0xff]  ;;  %v581_v13 = vld [vmem:[#allocation2 + $0x4d0] sm:$0xff] }
 0x296   : > { %v5300_v23 = vadd.f32 %v4461_v21, %v564_v14  ;;  %v5302_v24 = vadd.f32 %v4502_v22, %v566_v15  ;;  %v4463_v25 = vpop.f32.mrb[138].mxu0  ;;  %v4504_v26 = vpop.f32.mrb[138].mxu1  ;;  %v580_v14 = vld [vmem:[#allocation2 + $0x4c8] sm:$0xff]  ;;  %v582_v15 = vld [vmem:[#allocation2 + $0x4d8] sm:$0xff] }
 0x297   : > { %5471 = vst [vmem:[#allocation2 + $0x440] sm:$0xff] %v5299_v19  ;;  %5473 = vst [vmem:[#allocation2 + $0x450] sm:$0xff] %v5301_v20  ;;  %v4464_v27 = vpop.f32.mrb[139].mxu0  ;;  %v4505_v28 = vpop.f32.mrb[139].mxu1 }
 0x298   : > { %5472 = vst [vmem:[#allocation2 + $0x448] sm:$0xff] %v5300_v23  ;;  %5474 = vst [vmem:[#allocation2 + $0x458] sm:$0xff] %v5302_v24 }
 0x29c   : > { %v4541_v33 = vpop.f32.mrb[140].mxu0  ;;  %v4582_v34 = vpop.f32.mrb[140].mxu1 }
 0x29d   : > { %v5303_v35 = vadd.f32 %v4541_v33, %v567_v29  ;;  %v5305_v36 = vadd.f32 %v4582_v34, %v569_v30  ;;  %v4543_v37 = vpop.f32.mrb[141].mxu0  ;;  %v4584_v38 = vpop.f32.mrb[141].mxu1  ;;  %v583_v29 = vld [vmem:[#allocation2 + $0x4e0] sm:$0xff]  ;;  %v585_v30 = vld [vmem:[#allocation2 + $0x4f0] sm:$0xff] }
 0x29e   : > { %v5304_v18 = vadd.f32 %v4543_v37, %v568_v31  ;;  %v5306_v39 = vadd.f32 %v4584_v38, %v570_v32  ;;  %v4545_v40 = vpop.f32.mrb[142].mxu0  ;;  %v4586_v41 = vpop.f32.mrb[142].mxu1  ;;  %v584_v31 = vld [vmem:[#allocation2 + $0x4e8] sm:$0xff]  ;;  %v586_v32 = vld [vmem:[#allocation2 + $0x4f8] sm:$0xff] }
 0x29f   : > { %5475 = vst [vmem:[#allocation2 + $0x460] sm:$0xff] %v5303_v35  ;;  %5477 = vst [vmem:[#allocation2 + $0x470] sm:$0xff] %v5305_v36  ;;  %v4546_v42 = vpop.f32.mrb[143].mxu0  ;;  %v4587_v43 = vpop.f32.mrb[143].mxu1 }
 0x2a0   : > { %5476 = vst [vmem:[#allocation2 + $0x468] sm:$0xff] %v5304_v18  ;;  %5478 = vst [vmem:[#allocation2 + $0x478] sm:$0xff] %v5306_v39 }
 0x2a4   : > { %v4623_v47 = vpop.f32.mrb[144].mxu0  ;;  %v4664_v48 = vpop.f32.mrb[144].mxu1 }
 0x2a5   : > { %v5307_v49 = vadd.f32 %v4623_v47, %v571_v7  ;;  %v5309_v50 = vadd.f32 %v4664_v48, %v573_v44  ;;  %v4625_v51 = vpop.f32.mrb[145].mxu0  ;;  %v4666_v52 = vpop.f32.mrb[145].mxu1  ;;  %v587_v7 = vld [vmem:[#allocation2 + $0x500] sm:$0xff]  ;;  %v589_v44 = vld [vmem:[#allocation2 + $0x510] sm:$0xff] }
 0x2a6   : > { %v5308_v53 = vadd.f32 %v4625_v51, %v572_v45  ;;  %v5310_v55 = vadd.f32 %v4666_v52, %v574_v46  ;;  %v4627_v56 = vpop.f32.mrb[146].mxu0  ;;  %v4668_v57 = vpop.f32.mrb[146].mxu1  ;;  %v588_v45 = vld [vmem:[#allocation2 + $0x508] sm:$0xff]  ;;  %v590_v46 = vld [vmem:[#allocation2 + $0x518] sm:$0xff] }
 0x2a7   : > { %5479 = vst [vmem:[#allocation2 + $0x480] sm:$0xff] %v5307_v49  ;;  %5481 = vst [vmem:[#allocation2 + $0x490] sm:$0xff] %v5309_v50  ;;  %v4628_v58 = vpop.f32.mrb[147].mxu0  ;;  %v4669_v59 = vpop.f32.mrb[147].mxu1 }
 0x2a8   : > { %5480 = vst [vmem:[#allocation2 + $0x488] sm:$0xff] %v5308_v53  ;;  %5482 = vst [vmem:[#allocation2 + $0x498] sm:$0xff] %v5310_v55 }
 0x2ac   : > { %v4705_v63 = vpop.f32.mrb[148].mxu0  ;;  %v4746_v0 = vpop.f32.mrb[148].mxu1 }
 0x2ad   : > { %v5311_v1 = vadd.f32 %v4705_v63, %v575_v54  ;;  %v5313_v2 = vadd.f32 %v4746_v0, %v577_v60  ;;  %v4707_v3 = vpop.f32.mrb[149].mxu0  ;;  %v4748_v4 = vpop.f32.mrb[149].mxu1  ;;  %v591_v54 = vld [vmem:[#allocation2 + $0x520] sm:$0xff]  ;;  %v593_v60 = vld [vmem:[#allocation2 + $0x530] sm:$0xff] }
 0x2ae   : > { %v5312_v5 = vadd.f32 %v4707_v3, %v576_v61  ;;  %v5314_v6 = vadd.f32 %v4748_v4, %v578_v62  ;;  %v4709_v8 = vpop.f32.mrb[150].mxu0  ;;  %v4750_v9 = vpop.f32.mrb[150].mxu1  ;;  %v592_v61 = vld [vmem:[#allocation2 + $0x528] sm:$0xff]  ;;  %v594_v62 = vld [vmem:[#allocation2 + $0x538] sm:$0xff] }
 0x2af   : > { %5483 = vst [vmem:[#allocation2 + $0x4a0] sm:$0xff] %v5311_v1  ;;  %5485 = vst [vmem:[#allocation2 + $0x4b0] sm:$0xff] %v5313_v2  ;;  %v4710_v10 = vpop.f32.mrb[151].mxu0  ;;  %v4751_v11 = vpop.f32.mrb[151].mxu1 }
 0x2b0   : > { %5484 = vst [vmem:[#allocation2 + $0x4a8] sm:$0xff] %v5312_v5  ;;  %5486 = vst [vmem:[#allocation2 + $0x4b8] sm:$0xff] %v5314_v6 }
 0x2b4   : > { %v4787_v16 = vpop.f32.mrb[152].mxu0  ;;  %v4828_v17 = vpop.f32.mrb[152].mxu1 }
 0x2b5   : > { %v5315_v19 = vadd.f32 %v4787_v16, %v579_v12  ;;  %v5317_v20 = vadd.f32 %v4828_v17, %v581_v13  ;;  %v4789_v21 = vpop.f32.mrb[153].mxu0  ;;  %v4830_v22 = vpop.f32.mrb[153].mxu1  ;;  %v595_v12 = vld [vmem:[#allocation2 + $0x540] sm:$0xff]  ;;  %v597_v13 = vld [vmem:[#allocation2 + $0x550] sm:$0xff] }
 0x2b6   : > { %v5316_v23 = vadd.f32 %v4789_v21, %v580_v14  ;;  %v5318_v24 = vadd.f32 %v4830_v22, %v582_v15  ;;  %v4791_v25 = vpop.f32.mrb[154].mxu0  ;;  %v4832_v26 = vpop.f32.mrb[154].mxu1  ;;  %v596_v14 = vld [vmem:[#allocation2 + $0x548] sm:$0xff]  ;;  %v598_v15 = vld [vmem:[#allocation2 + $0x558] sm:$0xff] }
 0x2b7   : > { %5487 = vst [vmem:[#allocation2 + $0x4c0] sm:$0xff] %v5315_v19  ;;  %5489 = vst [vmem:[#allocation2 + $0x4d0] sm:$0xff] %v5317_v20  ;;  %v4792_v27 = vpop.f32.mrb[155].mxu0  ;;  %v4833_v28 = vpop.f32.mrb[155].mxu1 }
 0x2b8   : > { %5488 = vst [vmem:[#allocation2 + $0x4c8] sm:$0xff] %v5316_v23  ;;  %5490 = vst [vmem:[#allocation2 + $0x4d8] sm:$0xff] %v5318_v24 }
 0x2bc   : > { %v4869_v33 = vpop.f32.mrb[156].mxu0  ;;  %v4910_v34 = vpop.f32.mrb[156].mxu1 }
 0x2bd   : > { %v5319_v35 = vadd.f32 %v4869_v33, %v583_v29  ;;  %v5321_v36 = vadd.f32 %v4910_v34, %v585_v30  ;;  %v4871_v37 = vpop.f32.mrb[157].mxu0  ;;  %v4912_v38 = vpop.f32.mrb[157].mxu1 }
 0x2be   : > { %v5320_v18 = vadd.f32 %v4871_v37, %v584_v31  ;;  %v5322_v39 = vadd.f32 %v4912_v38, %v586_v32  ;;  %v4873_v40 = vpop.f32.mrb[158].mxu0  ;;  %v4914_v41 = vpop.f32.mrb[158].mxu1 }
 0x2bf   : > { %5491 = vst [vmem:[#allocation2 + $0x4e0] sm:$0xff] %v5319_v35  ;;  %5493 = vst [vmem:[#allocation2 + $0x4f0] sm:$0xff] %v5321_v36  ;;  %v4874_v42 = vpop.f32.mrb[159].mxu0  ;;  %v4915_v43 = vpop.f32.mrb[159].mxu1 }
 0x2c0   : > { %5492 = vst [vmem:[#allocation2 + $0x4e8] sm:$0xff] %v5320_v18  ;;  %5494 = vst [vmem:[#allocation2 + $0x4f8] sm:$0xff] %v5322_v39 }
 0x2c4   : > { %v4951_v47 = vpop.f32.mrb[160].mxu0  ;;  %v4992_v48 = vpop.f32.mrb[160].mxu1 }
 0x2c5   : > { %v5323_v49 = vadd.f32 %v4951_v47, %v587_v7  ;;  %v5325_v50 = vadd.f32 %v4992_v48, %v589_v44  ;;  %v4953_v51 = vpop.f32.mrb[161].mxu0  ;;  %v4994_v52 = vpop.f32.mrb[161].mxu1 }
 0x2c6   : > { %v5324_v53 = vadd.f32 %v4953_v51, %v588_v45  ;;  %v5326_v55 = vadd.f32 %v4994_v52, %v590_v46  ;;  %v4955_v56 = vpop.f32.mrb[162].mxu0  ;;  %v4996_v57 = vpop.f32.mrb[162].mxu1 }
 0x2c7   : > { %5495 = vst [vmem:[#allocation2 + $0x500] sm:$0xff] %v5323_v49  ;;  %5497 = vst [vmem:[#allocation2 + $0x510] sm:$0xff] %v5325_v50  ;;  %v4956_v58 = vpop.f32.mrb[163].mxu0  ;;  %v4997_v59 = vpop.f32.mrb[163].mxu1 }
 0x2c8   : > { %5496 = vst [vmem:[#allocation2 + $0x508] sm:$0xff] %v5324_v53  ;;  %5498 = vst [vmem:[#allocation2 + $0x518] sm:$0xff] %v5326_v55 }
 0x2cc   : > { %v5033_v63 = vpop.f32.mrb[164].mxu0  ;;  %v5074_v0 = vpop.f32.mrb[164].mxu1 }
 0x2cd   : > { %v5327_v1 = vadd.f32 %v5033_v63, %v591_v54  ;;  %v5329_v2 = vadd.f32 %v5074_v0, %v593_v60  ;;  %v5035_v3 = vpop.f32.mrb[165].mxu0  ;;  %v5076_v4 = vpop.f32.mrb[165].mxu1 }
 0x2ce   : > { %v5328_v5 = vadd.f32 %v5035_v3, %v592_v61  ;;  %v5330_v6 = vadd.f32 %v5076_v4, %v594_v62  ;;  %v5037_v8 = vpop.f32.mrb[166].mxu0  ;;  %v5078_v9 = vpop.f32.mrb[166].mxu1 }
 0x2cf   : > { %5499 = vst [vmem:[#allocation2 + $0x520] sm:$0xff] %v5327_v1  ;;  %5501 = vst [vmem:[#allocation2 + $0x530] sm:$0xff] %v5329_v2  ;;  %v5038_v10 = vpop.f32.mrb[167].mxu0  ;;  %v5079_v11 = vpop.f32.mrb[167].mxu1 }
 0x2d0   : > { %5500 = vst [vmem:[#allocation2 + $0x528] sm:$0xff] %v5328_v5  ;;  %5502 = vst [vmem:[#allocation2 + $0x538] sm:$0xff] %v5330_v6 }
 0x2d2   : > { %5511 = sbr.rel (%p8506_p9) target bundleno = 1996 (0x7cc), region = 48 }
 0x2d4   : > { %v5115_v16 = vpop.f32.mrb[168].mxu0  ;;  %v5156_v17 = vpop.f32.mrb[168].mxu1 }
 0x2d5   : > { %v5331_v19 = vadd.f32 %v5115_v16, %v595_v12  ;;  %v5333_v20 = vadd.f32 %v5156_v17, %v597_v13  ;;  %v5117_v21 = vpop.f32.mrb[169].mxu0  ;;  %v5158_v22 = vpop.f32.mrb[169].mxu1 }
 0x2d6   : > { %v5332_v23 = vadd.f32 %v5117_v21, %v596_v14  ;;  %v5334_v24 = vadd.f32 %v5158_v22, %v598_v15  ;;  %v5119_v25 = vpop.f32.mrb[170].mxu0  ;;  %v5160_v26 = vpop.f32.mrb[170].mxu1 }
 0x2d7   : > { %5503 = vst [vmem:[#allocation2 + $0x540] sm:$0xff] %v5331_v19  ;;  %5505 = vst [vmem:[#allocation2 + $0x550] sm:$0xff] %v5333_v20  ;;  %v5120_v27 = vpop.f32.mrb[171].mxu0  ;;  %v5161_v28 = vpop.f32.mrb[171].mxu1 }
 0x2d8   : > { %5504 = vst [vmem:[#allocation2 + $0x548] sm:$0xff] %v5332_v23  ;;  %5507 = vst.msk [vmem:[#allocation2 + $0x558] sm:$0xff] %vm5506_vm3, %v5334_v24 }
 0x2d9   : > { %v5512_v29 = vld [vmem:[#allocation2] sm:$0xff]  ;;  %v9195_v30 = vmov 0   ;;  %v5513_v32 = vld [vmem:[#allocation2 + $0x8] sm:$0xff]  ;;  %v5514_v35 = vld [vmem:[#allocation2 + $0x10] sm:$0xff]  ;;  %s9197_s27 = smov 1  }
 0x2da   : > { %8931 = vset.pattern.permute.xlu0 %v9195_v30  ;;  %8932 = vset.pattern.permute.xlu1 %v9195_v30  ;;  %v5515_v36 = vld [vmem:[#allocation2 + $0x18] sm:$0xff]  ;;  %v5516_v18 = vld [vmem:[#allocation2 + $0x20] sm:$0xff]  ;;  %v5517_v41 = vld [vmem:[#allocation2 + $0x28] sm:$0xff] }
 0x2db   : > { %5686 = vperm.xlu0 %8931, %v5512_v29   ;;  %v5518_v7 = vld [vmem:[#allocation2 + $0x30] sm:$0xff]  ;;  %v5519_v46 = vld [vmem:[#allocation2 + $0x38] sm:$0xff]  ;;  %v5520_v49 = vld [vmem:[#allocation2 + $0x40] sm:$0xff] }
 0x2dc   : > { %v5521_v52 = vld [vmem:[#allocation2 + $0x48] sm:$0xff]  ;;  %v5522_v56 = vld [vmem:[#allocation2 + $0x50] sm:$0xff]  ;;  %v5523_v59 = vld [vmem:[#allocation2 + $0x58] sm:$0xff] }
 0x2dd   : > { %v5524_v61 = vld [vmem:[#allocation2 + $0x60] sm:$0xff]  ;;  %v5525_v0 = vld [vmem:[#allocation2 + $0x68] sm:$0xff]  ;;  %v5526_v3 = vld [vmem:[#allocation2 + $0x70] sm:$0xff] }
 0x2de   : > { %v5527_v6 = vld [vmem:[#allocation2 + $0x78] sm:$0xff]  ;;  %v5528_v10 = vld [vmem:[#allocation2 + $0x80] sm:$0xff]  ;;  %v5529_v13 = vld [vmem:[#allocation2 + $0x88] sm:$0xff] }
 0x2df   : > { %v5530_v16 = vld [vmem:[#allocation2 + $0x90] sm:$0xff]  ;;  %v5531_v20 = vld [vmem:[#allocation2 + $0x98] sm:$0xff]  ;;  %v5532_v23 = vld [vmem:[#allocation2 + $0xa0] sm:$0xff] }
 0x2e0   : > { %v5533_v26 = vld [vmem:[#allocation2 + $0xa8] sm:$0xff] }
 0x35a   : > { %v10060_v31 = vpop.permute.xlu0 %5686 }
 0x35b   : > { %v10063_v33 = vsub.f32 %v5512_v29, %v10060_v31  ;;  %v10066_v34 = vsub.f32 %v5513_v32, %v10060_v31  ;;  %v10069_v37 = vsub.f32 %v5514_v35, %v10060_v31  ;;  %v10074_v39 = vsub.f32 %v5515_v36, %v10060_v31  ;;  %v5534_v29 = vld [vmem:[#allocation2 + $0xb0] sm:$0xff]  ;;  %v5535_v35 = vld [vmem:[#allocation2 + $0xb8] sm:$0xff] }
 0x35c   : > { %v10078_v42 = vsub.f32 %v5516_v18, %v10060_v31  ;;  %v10082_v44 = vsub.f32 %v5517_v41, %v10060_v31  ;;  %v10086_v47 = vsub.f32 %v5518_v7, %v10060_v31  ;;  %v10090_v50 = vsub.f32 %v5519_v46, %v10060_v31  ;;  %v5536_v18 = vld [vmem:[#allocation2 + $0xc0] sm:$0xff]  ;;  %v5538_v46 = vld [vmem:[#allocation2 + $0xd0] sm:$0xff] }
 0x35d   : > { %v5861_v38 = vadd.f32 %v10066_v34, %v10063_v33  ;;  %v10094_v53 = vsub.f32 %v5520_v49, %v10060_v31  ;;  %v10098_v57 = vsub.f32 %v5521_v52, %v10060_v31  ;;  %v10102_v54 = vsub.f32 %v5522_v56, %v10060_v31 }
 0x35e   : > { %v10106_v62 = vsub.f32 %v5523_v59, %v10060_v31  ;;  %v10110_v1 = vsub.f32 %v5524_v61, %v10060_v31  ;;  %v10114_v4 = vsub.f32 %v5525_v0, %v10060_v31  ;;  %v10118_v8 = vsub.f32 %v5526_v3, %v10060_v31  ;;  %v5540_v59 = vld [vmem:[#allocation2 + $0xe0] sm:$0xff] }
 0x35f   : > { %v5862_v40 = vadd.f32 %v5861_v38, %v10069_v37  ;;  %v10122_v11 = vsub.f32 %v5527_v6, %v10060_v31  ;;  %v10126_v14 = vsub.f32 %v5528_v10, %v10060_v31  ;;  %v10130_v17 = vsub.f32 %v5529_v13, %v10060_v31  ;;  %v5542_v6 = vld [vmem:[#allocation2 + $0xf0] sm:$0xff]  ;;  %v5543_v13 = vld [vmem:[#allocation2 + $0xf8] sm:$0xff] }
 0x360   : > { %v10134_v21 = vsub.f32 %v5530_v16, %v10060_v31  ;;  %v10138_v24 = vsub.f32 %v5531_v20, %v10060_v31  ;;  %v10142_v27 = vsub.f32 %v5532_v23, %v10060_v31  ;;  %v10146_v30 = vsub.f32 %v5533_v26, %v10060_v31  ;;  %v5544_v20 = vld [vmem:[#allocation2 + $0x100] sm:$0xff]  ;;  %v5545_v26 = vld [vmem:[#allocation2 + $0x108] sm:$0xff] }
 0x361   : > { %v5863_v43 = vadd.f32 %v5862_v40, %v10074_v39  ;;  %v10150_v36 = vsub.f32 %v5534_v29, %v10060_v31  ;;  %v10154_v40 = vsub.f32 %v5535_v35, %v10060_v31  ;;  %v10158_v7 = vsub.f32 %v5536_v18, %v10060_v31  ;;  %v5546_v35 = vld [vmem:[#allocation2 + $0x110] sm:$0xff] }
 0x362   : > { %v6037_v49 = vmul.f32 %v10066_v34, %v10066_v34  ;;  %v10170_v56 = vsub.f32 %v5538_v46, %v10060_v31  ;;  %v6039_v0 = vmul.f32 %v10074_v39, %v10074_v39  ;;  %v10182_v3 = vsub.f32 %v5540_v59, %v10060_v31  ;;  %v5549_v59 = vld [vmem:[#allocation2 + $0x128] sm:$0xff] }
 0x363   : > { %v5864_v45 = vadd.f32 %v5863_v43, %v10078_v42  ;;  %v5537_v43 = vld [vmem:[#allocation2 + $0xc8] sm:$0xff]  ;;  %v6041_v39 = vmul.f32 %v10082_v44, %v10082_v44  ;;  %v10194_v16 = vsub.f32 %v5542_v6, %v10060_v31  ;;  %v10200_v23 = vsub.f32 %v5543_v13, %v10060_v31  ;;  %v5551_v6 = vld [vmem:[#allocation2 + $0x138] sm:$0xff]  ;;  %v5552_v13 = vld [vmem:[#allocation2 + $0x140] sm:$0xff] }
 0x364   : > { %v10206_v29 = vsub.f32 %v5544_v20, %v10060_v31  ;;  %v10212_v18 = vsub.f32 %v5545_v26, %v10060_v31  ;;  %v10218_v46 = vsub.f32 %v5546_v35, %v10060_v31  ;;  %v5553_v20 = vld [vmem:[#allocation2 + $0x148] sm:$0xff]  ;;  %v5554_v26 = vld [vmem:[#allocation2 + $0x150] sm:$0xff]  ;;  %v5555_v35 = vld [vmem:[#allocation2 + $0x158] sm:$0xff] }
 0x365   : > { %v5865_v48 = vadd.f32 %v5864_v45, %v10082_v44  ;;  %v6043_v44 = vmul.f32 %v10090_v50, %v10090_v50 }
 0x367   : > { %v5866_v51 = vadd.f32 %v5865_v48, %v10086_v47  ;;  %v6036_v48 = vmul.f32 %v10063_v33, %v10063_v33 }
 0x369   : > { %v5867_v55 = vadd.f32 %v5866_v51, %v10090_v50  ;;  %v10166_v51 = vsub.f32 %v5537_v43, %v10060_v31  ;;  %v6208_v61 = vadd.f32 %v6037_v49, %v6036_v48  ;;  %v5547_v43 = vld [vmem:[#allocation2 + $0x118] sm:$0xff]  ;;  %v6045_v50 = vmul.f32 %v10098_v57, %v10098_v57  ;;  %v5548_v49 = vld [vmem:[#allocation2 + $0x120] sm:$0xff] }
 0x36b   : > { %v5868_v58 = vadd.f32 %v5867_v55, %v10094_v53  ;;  %v5539_v55 = vld [vmem:[#allocation2 + $0xd8] sm:$0xff] }
 0x36c   : > { %v10176_v33 = vsub.f32 %v5539_v55, %v10060_v31  ;;  %v10224_v55 = vsub.f32 %v5547_v43, %v10060_v31  ;;  %v5556_v43 = vld [vmem:[#allocation2 + $0x160] sm:$0xff] }
 0x36d   : > { %v5869_v60 = vadd.f32 %v5868_v58, %v10098_v57  ;;  %v6047_v57 = vmul.f32 %v10106_v62, %v10106_v62 }
 0x36f   : > { %v5870_v63 = vadd.f32 %v5869_v60, %v10102_v54  ;;  %v6038_v60 = vmul.f32 %v10069_v37, %v10069_v37  ;;  %v6040_v37 = vmul.f32 %v10078_v42, %v10078_v42  ;;  %v6042_v42 = vmul.f32 %v10086_v47, %v10086_v47 }
 0x370   : > { %v6044_v47 = vmul.f32 %v10094_v53, %v10094_v53  ;;  %v6046_v53 = vmul.f32 %v10102_v54, %v10102_v54  ;;  %v6048_v54 = vmul.f32 %v10110_v1, %v10110_v1 }
 0x371   : > { %v5871_v2 = vadd.f32 %v5870_v63, %v10106_v62  ;;  %v5541_v63 = vld [vmem:[#allocation2 + $0xe8] sm:$0xff]  ;;  %v6049_v62 = vmul.f32 %v10114_v4, %v10114_v4 }
 0x372   : > { %v10188_v10 = vsub.f32 %v5541_v63, %v10060_v31  ;;  %v5550_v63 = vld [vmem:[#allocation2 + $0x130] sm:$0xff] }
 0x373   : > { %v5872_v5 = vadd.f32 %v5871_v2, %v10110_v1  ;;  %v6209_v2 = vadd.f32 %v6208_v61, %v6038_v60  ;;  %v10230_v61 = vsub.f32 %v5548_v49, %v10060_v31  ;;  %v6050_v1 = vmul.f32 %v10118_v8, %v10118_v8  ;;  %v5557_v49 = vld [vmem:[#allocation2 + $0x168] sm:$0xff] }
 0x375   : > { %v5873_v9 = vadd.f32 %v5872_v5, %v10114_v4  ;;  %v6051_v4 = vmul.f32 %v10122_v11, %v10122_v11 }
 0x377   : > { %v5874_v12 = vadd.f32 %v5873_v9, %v10118_v8  ;;  %v6210_v9 = vadd.f32 %v6209_v2, %v6039_v0  ;;  %v10236_v2 = vsub.f32 %v5549_v59, %v10060_v31  ;;  %v6052_v8 = vmul.f32 %v10126_v14, %v10126_v14  ;;  %v5558_v59 = vld [vmem:[#allocation2 + $0x170] sm:$0xff] }
 0x379   : > { %v5875_v15 = vadd.f32 %v5874_v12, %v10122_v11  ;;  %v6053_v11 = vmul.f32 %v10130_v17, %v10130_v17 }
 0x37b   : > { %v5876_v19 = vadd.f32 %v5875_v15, %v10126_v14  ;;  %v6211_v15 = vadd.f32 %v6210_v9, %v6040_v37  ;;  %v10242_v9 = vsub.f32 %v5550_v63, %v10060_v31  ;;  %v6054_v14 = vmul.f32 %v10134_v21, %v10134_v21  ;;  %v5559_v63 = vld [vmem:[#allocation2 + $0x178] sm:$0xff] }
 0x37d   : > { %v5877_v22 = vadd.f32 %v5876_v19, %v10130_v17  ;;  %v6055_v17 = vmul.f32 %v10138_v24, %v10138_v24 }
 0x37f   : > { %v5878_v25 = vadd.f32 %v5877_v22, %v10134_v21  ;;  %v6212_v22 = vadd.f32 %v6211_v15, %v6041_v39  ;;  %v10248_v15 = vsub.f32 %v5551_v6, %v10060_v31  ;;  %v6056_v21 = vmul.f32 %v10142_v27, %v10142_v27  ;;  %v5560_v6 = vld [vmem:[#allocation2 + $0x180] sm:$0xff] }
 0x381   : > { %v5879_v28 = vadd.f32 %v5878_v25, %v10138_v24  ;;  %v6057_v24 = vmul.f32 %v10146_v30, %v10146_v30 }
 0x383   : > { %v5880_v32 = vadd.f32 %v5879_v28, %v10142_v27  ;;  %v6213_v28 = vadd.f32 %v6212_v22, %v6042_v42  ;;  %v10254_v22 = vsub.f32 %v5552_v13, %v10060_v31  ;;  %v6058_v27 = vmul.f32 %v10150_v36, %v10150_v36  ;;  %v5561_v13 = vld [vmem:[#allocation2 + $0x188] sm:$0xff] }
 0x385   : > { %v5881_v38 = vadd.f32 %v5880_v32, %v10146_v30  ;;  %v6059_v30 = vmul.f32 %v10154_v40, %v10154_v40 }
 0x387   : > { %v5882_v41 = vadd.f32 %v5881_v38, %v10150_v36  ;;  %v6214_v38 = vadd.f32 %v6213_v28, %v6043_v44  ;;  %v10260_v28 = vsub.f32 %v5553_v20, %v10060_v31  ;;  %v5562_v20 = vld [vmem:[#allocation2 + $0x190] sm:$0xff]  ;;  %v6060_v36 = vmul.f32 %v10158_v7, %v10158_v7 }
 0x389   : > { %v5883_v45 = vadd.f32 %v5882_v41, %v10154_v40  ;;  %v6061_v40 = vmul.f32 %v10166_v51, %v10166_v51 }
 0x38b   : > { %v5884_v52 = vadd.f32 %v5883_v45, %v10158_v7  ;;  %v6215_v45 = vadd.f32 %v6214_v38, %v6044_v47  ;;  %v10266_v38 = vsub.f32 %v5554_v26, %v10060_v31  ;;  %v5563_v26 = vld [vmem:[#allocation2 + $0x198] sm:$0xff]  ;;  %v6062_v7 = vmul.f32 %v10170_v56, %v10170_v56 }
 0x38d   : > { %v5885_v58 = vadd.f32 %v5884_v52, %v10166_v51  ;;  %v6216_v52 = vadd.f32 %v6215_v45, %v6045_v50  ;;  %v10272_v45 = vsub.f32 %v5555_v35, %v10060_v31  ;;  %v5564_v35 = vld [vmem:[#allocation2 + $0x1a0] sm:$0xff]  ;;  %v6063_v51 = vmul.f32 %v10176_v33, %v10176_v33 }
 0x38f   : > { %v5886_v34 = vadd.f32 %v5885_v58, %v10170_v56  ;;  %v6217_v60 = vadd.f32 %v6216_v52, %v6046_v53  ;;  %v10278_v52 = vsub.f32 %v5556_v43, %v10060_v31  ;;  %v5565_v43 = vld [vmem:[#allocation2 + $0x1a8] sm:$0xff]  ;;  %v6064_v56 = vmul.f32 %v10182_v3, %v10182_v3 }
 0x391   : > { %v5887_v5 = vadd.f32 %v5886_v34, %v10176_v33  ;;  %v6218_v0 = vadd.f32 %v6217_v60, %v6047_v57  ;;  %v10284_v60 = vsub.f32 %v5557_v49, %v10060_v31  ;;  %v5566_v49 = vld [vmem:[#allocation2 + $0x1b0] sm:$0xff]  ;;  %v6065_v33 = vmul.f32 %v10188_v10, %v10188_v10 }
 0x393   : > { %v5888_v12 = vadd.f32 %v5887_v5, %v10182_v3  ;;  %v6219_v37 = vadd.f32 %v6218_v0, %v6048_v54  ;;  %v10290_v0 = vsub.f32 %v5558_v59, %v10060_v31  ;;  %v5567_v59 = vld [vmem:[#allocation2 + $0x1b8] sm:$0xff]  ;;  %v6066_v3 = vmul.f32 %v10194_v16, %v10194_v16 }
 0x395   : > { %v5889_v19 = vadd.f32 %v5888_v12, %v10188_v10  ;;  %v6220_v39 = vadd.f32 %v6219_v37, %v6049_v62  ;;  %v10296_v37 = vsub.f32 %v5559_v63, %v10060_v31  ;;  %v5568_v63 = vld [vmem:[#allocation2 + $0x1c0] sm:$0xff]  ;;  %v6067_v10 = vmul.f32 %v10200_v23, %v10200_v23 }
 0x397   : > { %v5890_v25 = vadd.f32 %v5889_v19, %v10194_v16  ;;  %v6221_v42 = vadd.f32 %v6220_v39, %v6050_v1  ;;  %v10302_v39 = vsub.f32 %v5560_v6, %v10060_v31  ;;  %v5569_v6 = vld [vmem:[#allocation2 + $0x1c8] sm:$0xff]  ;;  %v6068_v16 = vmul.f32 %v10206_v29, %v10206_v29 }
 0x399   : > { %v5891_v32 = vadd.f32 %v5890_v25, %v10200_v23  ;;  %v6222_v44 = vadd.f32 %v6221_v42, %v6051_v4  ;;  %v10308_v42 = vsub.f32 %v5561_v13, %v10060_v31  ;;  %v5570_v13 = vld [vmem:[#allocation2 + $0x1d0] sm:$0xff]  ;;  %v6069_v23 = vmul.f32 %v10212_v18, %v10212_v18 }
 0x39b   : > { %v5892_v41 = vadd.f32 %v5891_v32, %v10206_v29  ;;  %v6223_v47 = vadd.f32 %v6222_v44, %v6052_v8  ;;  %v10314_v44 = vsub.f32 %v5562_v20, %v10060_v31  ;;  %v5571_v20 = vld [vmem:[#allocation2 + $0x1d8] sm:$0xff]  ;;  %v6070_v29 = vmul.f32 %v10218_v46, %v10218_v46 }
 0x39d   : > { %v5893_v48 = vadd.f32 %v5892_v41, %v10212_v18  ;;  %v6224_v50 = vadd.f32 %v6223_v47, %v6053_v11  ;;  %v10320_v47 = vsub.f32 %v5563_v26, %v10060_v31  ;;  %v5572_v26 = vld [vmem:[#allocation2 + $0x1e0] sm:$0xff]  ;;  %v6071_v18 = vmul.f32 %v10224_v55, %v10224_v55 }
 0x39f   : > { %v5894_v58 = vadd.f32 %v5893_v48, %v10218_v46  ;;  %v6225_v53 = vadd.f32 %v6224_v50, %v6054_v14  ;;  %v10326_v50 = vsub.f32 %v5564_v35, %v10060_v31  ;;  %v5573_v35 = vld [vmem:[#allocation2 + $0x1e8] sm:$0xff]  ;;  %v6072_v46 = vmul.f32 %v10230_v61, %v10230_v61 }
 0x3a1   : > { %v5895_v34 = vadd.f32 %v5894_v58, %v10224_v55  ;;  %v6226_v57 = vadd.f32 %v6225_v53, %v6055_v17  ;;  %v10332_v53 = vsub.f32 %v5565_v43, %v10060_v31  ;;  %v5574_v43 = vld [vmem:[#allocation2 + $0x1f0] sm:$0xff]  ;;  %v6073_v55 = vmul.f32 %v10236_v2, %v10236_v2 }
 0x3a3   : > { %v5896_v5 = vadd.f32 %v5895_v34, %v10230_v61  ;;  %v6227_v54 = vadd.f32 %v6226_v57, %v6056_v21  ;;  %v10338_v57 = vsub.f32 %v5566_v49, %v10060_v31  ;;  %v5575_v49 = vld [vmem:[#allocation2 + $0x1f8] sm:$0xff]  ;;  %v6074_v61 = vmul.f32 %v10242_v9, %v10242_v9 }
 0x3a5   : > { %v5897_v12 = vadd.f32 %v5896_v5, %v10236_v2  ;;  %v6228_v62 = vadd.f32 %v6227_v54, %v6057_v24  ;;  %v10344_v54 = vsub.f32 %v5567_v59, %v10060_v31  ;;  %v5576_v59 = vld [vmem:[#allocation2 + $0x200] sm:$0xff]  ;;  %v6075_v2 = vmul.f32 %v10248_v15, %v10248_v15 }
 0x3a7   : > { %v5898_v19 = vadd.f32 %v5897_v12, %v10242_v9  ;;  %v6229_v1 = vadd.f32 %v6228_v62, %v6058_v27  ;;  %v10350_v62 = vsub.f32 %v5568_v63, %v10060_v31  ;;  %v5577_v63 = vld [vmem:[#allocation2 + $0x208] sm:$0xff]  ;;  %v6076_v9 = vmul.f32 %v10254_v22, %v10254_v22 }
 0x3a9   : > { %v5899_v25 = vadd.f32 %v5898_v19, %v10248_v15  ;;  %v6230_v4 = vadd.f32 %v6229_v1, %v6059_v30  ;;  %v10356_v1 = vsub.f32 %v5569_v6, %v10060_v31  ;;  %v5578_v6 = vld [vmem:[#allocation2 + $0x210] sm:$0xff]  ;;  %v6077_v15 = vmul.f32 %v10260_v28, %v10260_v28 }
 0x3ab   : > { %v5900_v32 = vadd.f32 %v5899_v25, %v10254_v22  ;;  %v6231_v8 = vadd.f32 %v6230_v4, %v6060_v36  ;;  %v10362_v4 = vsub.f32 %v5570_v13, %v10060_v31  ;;  %v5579_v13 = vld [vmem:[#allocation2 + $0x218] sm:$0xff]  ;;  %v6078_v22 = vmul.f32 %v10266_v38, %v10266_v38 }
 0x3ad   : > { %v5901_v41 = vadd.f32 %v5900_v32, %v10260_v28  ;;  %v6232_v11 = vadd.f32 %v6231_v8, %v6061_v40  ;;  %v10368_v8 = vsub.f32 %v5571_v20, %v10060_v31  ;;  %v5580_v20 = vld [vmem:[#allocation2 + $0x220] sm:$0xff]  ;;  %v6079_v28 = vmul.f32 %v10272_v45, %v10272_v45 }
 0x3af   : > { %v5902_v48 = vadd.f32 %v5901_v41, %v10266_v38  ;;  %v6233_v14 = vadd.f32 %v6232_v11, %v6062_v7  ;;  %v10374_v11 = vsub.f32 %v5572_v26, %v10060_v31  ;;  %v5581_v26 = vld [vmem:[#allocation2 + $0x228] sm:$0xff]  ;;  %v6080_v38 = vmul.f32 %v10278_v52, %v10278_v52 }
 0x3b1   : > { %v5903_v58 = vadd.f32 %v5902_v48, %v10272_v45  ;;  %v6234_v17 = vadd.f32 %v6233_v14, %v6063_v51  ;;  %v10380_v14 = vsub.f32 %v5573_v35, %v10060_v31  ;;  %v5582_v35 = vld [vmem:[#allocation2 + $0x230] sm:$0xff]  ;;  %v6081_v45 = vmul.f32 %v10284_v60, %v10284_v60 }
 0x3b3   : > { %v5904_v34 = vadd.f32 %v5903_v58, %v10278_v52  ;;  %v6235_v21 = vadd.f32 %v6234_v17, %v6064_v56  ;;  %v10386_v17 = vsub.f32 %v5574_v43, %v10060_v31  ;;  %v5583_v43 = vld [vmem:[#allocation2 + $0x238] sm:$0xff]  ;;  %v6082_v52 = vmul.f32 %v10290_v0, %v10290_v0 }
 0x3b5   : > { %v5905_v5 = vadd.f32 %v5904_v34, %v10284_v60  ;;  %v6236_v24 = vadd.f32 %v6235_v21, %v6065_v33  ;;  %v10392_v21 = vsub.f32 %v5575_v49, %v10060_v31  ;;  %v5584_v49 = vld [vmem:[#allocation2 + $0x240] sm:$0xff]  ;;  %v6083_v60 = vmul.f32 %v10296_v37, %v10296_v37 }
 0x3b7   : > { %v5906_v12 = vadd.f32 %v5905_v5, %v10290_v0  ;;  %v6237_v27 = vadd.f32 %v6236_v24, %v6066_v3  ;;  %v10398_v24 = vsub.f32 %v5576_v59, %v10060_v31  ;;  %v5585_v59 = vld [vmem:[#allocation2 + $0x248] sm:$0xff]  ;;  %v6084_v0 = vmul.f32 %v10302_v39, %v10302_v39 }
 0x3b9   : > { %v5907_v19 = vadd.f32 %v5906_v12, %v10296_v37  ;;  %v6238_v30 = vadd.f32 %v6237_v27, %v6067_v10  ;;  %v10404_v27 = vsub.f32 %v5577_v63, %v10060_v31  ;;  %v5586_v63 = vld [vmem:[#allocation2 + $0x250] sm:$0xff]  ;;  %v6085_v37 = vmul.f32 %v10308_v42, %v10308_v42 }
 0x3bb   : > { %v5908_v25 = vadd.f32 %v5907_v19, %v10302_v39  ;;  %v6239_v36 = vadd.f32 %v6238_v30, %v6068_v16  ;;  %v10410_v30 = vsub.f32 %v5578_v6, %v10060_v31  ;;  %v5587_v6 = vld [vmem:[#allocation2 + $0x258] sm:$0xff]  ;;  %v6086_v39 = vmul.f32 %v10314_v44, %v10314_v44 }
 0x3bd   : > { %v5909_v32 = vadd.f32 %v5908_v25, %v10308_v42  ;;  %v6240_v40 = vadd.f32 %v6239_v36, %v6069_v23  ;;  %v10416_v36 = vsub.f32 %v5579_v13, %v10060_v31  ;;  %v5588_v13 = vld [vmem:[#allocation2 + $0x260] sm:$0xff]  ;;  %v6087_v42 = vmul.f32 %v10320_v47, %v10320_v47 }
 0x3bf   : > { %v5910_v41 = vadd.f32 %v5909_v32, %v10314_v44  ;;  %v6241_v7 = vadd.f32 %v6240_v40, %v6070_v29  ;;  %v10422_v40 = vsub.f32 %v5580_v20, %v10060_v31  ;;  %v5589_v20 = vld [vmem:[#allocation2 + $0x268] sm:$0xff]  ;;  %v6088_v44 = vmul.f32 %v10326_v50, %v10326_v50 }
 0x3c1   : > { %v5911_v48 = vadd.f32 %v5910_v41, %v10320_v47  ;;  %v6242_v51 = vadd.f32 %v6241_v7, %v6071_v18  ;;  %v10428_v7 = vsub.f32 %v5581_v26, %v10060_v31  ;;  %v5590_v26 = vld [vmem:[#allocation2 + $0x270] sm:$0xff]  ;;  %v6089_v47 = vmul.f32 %v10332_v53, %v10332_v53 }
 0x3c3   : > { %v5912_v58 = vadd.f32 %v5911_v48, %v10326_v50  ;;  %v6243_v56 = vadd.f32 %v6242_v51, %v6072_v46  ;;  %v10434_v51 = vsub.f32 %v5582_v35, %v10060_v31  ;;  %v5591_v35 = vld [vmem:[#allocation2 + $0x278] sm:$0xff]  ;;  %v6090_v50 = vmul.f32 %v10338_v57, %v10338_v57 }
 0x3c5   : > { %v5913_v34 = vadd.f32 %v5912_v58, %v10332_v53  ;;  %v6244_v33 = vadd.f32 %v6243_v56, %v6073_v55  ;;  %v10440_v56 = vsub.f32 %v5583_v43, %v10060_v31  ;;  %v5592_v43 = vld [vmem:[#allocation2 + $0x280] sm:$0xff]  ;;  %v6091_v53 = vmul.f32 %v10344_v54, %v10344_v54 }
 0x3c7   : > { %v5914_v5 = vadd.f32 %v5913_v34, %v10338_v57  ;;  %v6245_v3 = vadd.f32 %v6244_v33, %v6074_v61  ;;  %v10446_v33 = vsub.f32 %v5584_v49, %v10060_v31  ;;  %v5593_v49 = vld [vmem:[#allocation2 + $0x288] sm:$0xff]  ;;  %v6092_v57 = vmul.f32 %v10350_v62, %v10350_v62 }
 0x3c9   : > { %v5915_v12 = vadd.f32 %v5914_v5, %v10344_v54  ;;  %v6246_v10 = vadd.f32 %v6245_v3, %v6075_v2  ;;  %v10452_v3 = vsub.f32 %v5585_v59, %v10060_v31  ;;  %v5594_v59 = vld [vmem:[#allocation2 + $0x290] sm:$0xff]  ;;  %v6093_v54 = vmul.f32 %v10356_v1, %v10356_v1 }
 0x3cb   : > { %v5916_v19 = vadd.f32 %v5915_v12, %v10350_v62  ;;  %v6247_v16 = vadd.f32 %v6246_v10, %v6076_v9  ;;  %v10458_v10 = vsub.f32 %v5586_v63, %v10060_v31  ;;  %v5595_v63 = vld [vmem:[#allocation2 + $0x298] sm:$0xff]  ;;  %v6094_v62 = vmul.f32 %v10362_v4, %v10362_v4 }
 0x3cd   : > { %v5917_v25 = vadd.f32 %v5916_v19, %v10356_v1  ;;  %v6248_v23 = vadd.f32 %v6247_v16, %v6077_v15  ;;  %v10464_v16 = vsub.f32 %v5587_v6, %v10060_v31  ;;  %v5596_v6 = vld [vmem:[#allocation2 + $0x2a0] sm:$0xff]  ;;  %v6095_v1 = vmul.f32 %v10368_v8, %v10368_v8 }
 0x3cf   : > { %v5918_v32 = vadd.f32 %v5917_v25, %v10362_v4  ;;  %v6249_v29 = vadd.f32 %v6248_v23, %v6078_v22  ;;  %v10470_v23 = vsub.f32 %v5588_v13, %v10060_v31  ;;  %v5597_v13 = vld [vmem:[#allocation2 + $0x2a8] sm:$0xff]  ;;  %v6096_v4 = vmul.f32 %v10374_v11, %v10374_v11 }
 0x3d1   : > { %v5919_v41 = vadd.f32 %v5918_v32, %v10368_v8  ;;  %v6250_v18 = vadd.f32 %v6249_v29, %v6079_v28  ;;  %v10476_v29 = vsub.f32 %v5589_v20, %v10060_v31  ;;  %v5598_v20 = vld [vmem:[#allocation2 + $0x2b0] sm:$0xff]  ;;  %v6097_v8 = vmul.f32 %v10380_v14, %v10380_v14 }
 0x3d3   : > { %v5920_v48 = vadd.f32 %v5919_v41, %v10374_v11  ;;  %v6251_v46 = vadd.f32 %v6250_v18, %v6080_v38  ;;  %v10482_v18 = vsub.f32 %v5590_v26, %v10060_v31  ;;  %v5599_v26 = vld [vmem:[#allocation2 + $0x2b8] sm:$0xff]  ;;  %v6098_v11 = vmul.f32 %v10386_v17, %v10386_v17 }
 0x3d5   : > { %v5921_v58 = vadd.f32 %v5920_v48, %v10380_v14  ;;  %v6252_v55 = vadd.f32 %v6251_v46, %v6081_v45  ;;  %v10488_v46 = vsub.f32 %v5591_v35, %v10060_v31  ;;  %v5600_v35 = vld [vmem:[#allocation2 + $0x2c0] sm:$0xff]  ;;  %v6099_v14 = vmul.f32 %v10392_v21, %v10392_v21 }
 0x3d7   : > { %v5922_v34 = vadd.f32 %v5921_v58, %v10386_v17  ;;  %v6253_v61 = vadd.f32 %v6252_v55, %v6082_v52  ;;  %v10494_v55 = vsub.f32 %v5592_v43, %v10060_v31  ;;  %v5601_v43 = vld [vmem:[#allocation2 + $0x2c8] sm:$0xff]  ;;  %v6100_v17 = vmul.f32 %v10398_v24, %v10398_v24 }
 0x3d9   : > { %v5923_v5 = vadd.f32 %v5922_v34, %v10392_v21  ;;  %v6254_v2 = vadd.f32 %v6253_v61, %v6083_v60  ;;  %v10500_v61 = vsub.f32 %v5593_v49, %v10060_v31  ;;  %v5602_v49 = vld [vmem:[#allocation2 + $0x2d0] sm:$0xff]  ;;  %v6101_v21 = vmul.f32 %v10404_v27, %v10404_v27 }
 0x3db   : > { %v5924_v12 = vadd.f32 %v5923_v5, %v10398_v24  ;;  %v6255_v9 = vadd.f32 %v6254_v2, %v6084_v0  ;;  %v10506_v2 = vsub.f32 %v5594_v59, %v10060_v31  ;;  %v5603_v59 = vld [vmem:[#allocation2 + $0x2d8] sm:$0xff]  ;;  %v6102_v24 = vmul.f32 %v10410_v30, %v10410_v30 }
 0x3dd   : > { %v5925_v19 = vadd.f32 %v5924_v12, %v10404_v27  ;;  %v6256_v15 = vadd.f32 %v6255_v9, %v6085_v37  ;;  %v10512_v9 = vsub.f32 %v5595_v63, %v10060_v31  ;;  %v5604_v63 = vld [vmem:[#allocation2 + $0x2e0] sm:$0xff]  ;;  %v6103_v27 = vmul.f32 %v10416_v36, %v10416_v36 }
 0x3df   : > { %v5926_v25 = vadd.f32 %v5925_v19, %v10410_v30  ;;  %v6257_v22 = vadd.f32 %v6256_v15, %v6086_v39  ;;  %v10518_v15 = vsub.f32 %v5596_v6, %v10060_v31  ;;  %v5605_v6 = vld [vmem:[#allocation2 + $0x2e8] sm:$0xff]  ;;  %v6104_v30 = vmul.f32 %v10422_v40, %v10422_v40 }
 0x3e1   : > { %v5927_v32 = vadd.f32 %v5926_v25, %v10416_v36  ;;  %v6258_v28 = vadd.f32 %v6257_v22, %v6087_v42  ;;  %v10524_v22 = vsub.f32 %v5597_v13, %v10060_v31  ;;  %v5606_v13 = vld [vmem:[#allocation2 + $0x2f0] sm:$0xff]  ;;  %v6105_v36 = vmul.f32 %v10428_v7, %v10428_v7 }
 0x3e3   : > { %v5928_v41 = vadd.f32 %v5927_v32, %v10422_v40  ;;  %v6259_v38 = vadd.f32 %v6258_v28, %v6088_v44  ;;  %v10530_v28 = vsub.f32 %v5598_v20, %v10060_v31  ;;  %v5607_v20 = vld [vmem:[#allocation2 + $0x2f8] sm:$0xff]  ;;  %v6106_v40 = vmul.f32 %v10434_v51, %v10434_v51 }
 0x3e5   : > { %v5929_v48 = vadd.f32 %v5928_v41, %v10428_v7  ;;  %v6260_v45 = vadd.f32 %v6259_v38, %v6089_v47  ;;  %v10536_v38 = vsub.f32 %v5599_v26, %v10060_v31  ;;  %v5608_v26 = vld [vmem:[#allocation2 + $0x300] sm:$0xff]  ;;  %v6107_v7 = vmul.f32 %v10440_v56, %v10440_v56 }
 0x3e7   : > { %v5930_v58 = vadd.f32 %v5929_v48, %v10434_v51  ;;  %v6261_v52 = vadd.f32 %v6260_v45, %v6090_v50  ;;  %v10542_v45 = vsub.f32 %v5600_v35, %v10060_v31  ;;  %v5609_v35 = vld [vmem:[#allocation2 + $0x308] sm:$0xff]  ;;  %v6108_v51 = vmul.f32 %v10446_v33, %v10446_v33 }
 0x3e9   : > { %v5931_v34 = vadd.f32 %v5930_v58, %v10440_v56  ;;  %v6262_v60 = vadd.f32 %v6261_v52, %v6091_v53  ;;  %v10548_v52 = vsub.f32 %v5601_v43, %v10060_v31  ;;  %v5610_v43 = vld [vmem:[#allocation2 + $0x310] sm:$0xff]  ;;  %v6109_v56 = vmul.f32 %v10452_v3, %v10452_v3 }
 0x3eb   : > { %v5932_v5 = vadd.f32 %v5931_v34, %v10446_v33  ;;  %v6263_v0 = vadd.f32 %v6262_v60, %v6092_v57  ;;  %v10554_v60 = vsub.f32 %v5602_v49, %v10060_v31  ;;  %v5611_v49 = vld [vmem:[#allocation2 + $0x318] sm:$0xff]  ;;  %v6110_v33 = vmul.f32 %v10458_v10, %v10458_v10 }
 0x3ed   : > { %v5933_v12 = vadd.f32 %v5932_v5, %v10452_v3  ;;  %v6264_v37 = vadd.f32 %v6263_v0, %v6093_v54  ;;  %v10560_v0 = vsub.f32 %v5603_v59, %v10060_v31  ;;  %v5612_v59 = vld [vmem:[#allocation2 + $0x320] sm:$0xff]  ;;  %v6111_v3 = vmul.f32 %v10464_v16, %v10464_v16 }
 0x3ef   : > { %v5934_v19 = vadd.f32 %v5933_v12, %v10458_v10  ;;  %v6265_v39 = vadd.f32 %v6264_v37, %v6094_v62  ;;  %v10566_v37 = vsub.f32 %v5604_v63, %v10060_v31  ;;  %v5613_v63 = vld [vmem:[#allocation2 + $0x328] sm:$0xff]  ;;  %v6112_v10 = vmul.f32 %v10470_v23, %v10470_v23 }
 0x3f1   : > { %v5935_v25 = vadd.f32 %v5934_v19, %v10464_v16  ;;  %v6266_v42 = vadd.f32 %v6265_v39, %v6095_v1  ;;  %v10572_v39 = vsub.f32 %v5605_v6, %v10060_v31  ;;  %v5614_v6 = vld [vmem:[#allocation2 + $0x330] sm:$0xff]  ;;  %v6113_v16 = vmul.f32 %v10476_v29, %v10476_v29 }
 0x3f3   : > { %v5936_v32 = vadd.f32 %v5935_v25, %v10470_v23  ;;  %v6267_v44 = vadd.f32 %v6266_v42, %v6096_v4  ;;  %v10578_v42 = vsub.f32 %v5606_v13, %v10060_v31  ;;  %v5615_v13 = vld [vmem:[#allocation2 + $0x338] sm:$0xff]  ;;  %v6114_v23 = vmul.f32 %v10482_v18, %v10482_v18 }
 0x3f5   : > { %v5937_v41 = vadd.f32 %v5936_v32, %v10476_v29  ;;  %v6268_v47 = vadd.f32 %v6267_v44, %v6097_v8  ;;  %v10584_v44 = vsub.f32 %v5607_v20, %v10060_v31  ;;  %v5616_v20 = vld [vmem:[#allocation2 + $0x340] sm:$0xff]  ;;  %v6115_v29 = vmul.f32 %v10488_v46, %v10488_v46 }
 0x3f7   : > { %v5938_v48 = vadd.f32 %v5937_v41, %v10482_v18  ;;  %v6269_v50 = vadd.f32 %v6268_v47, %v6098_v11  ;;  %v10590_v47 = vsub.f32 %v5608_v26, %v10060_v31  ;;  %v5617_v26 = vld [vmem:[#allocation2 + $0x348] sm:$0xff]  ;;  %v6116_v18 = vmul.f32 %v10494_v55, %v10494_v55 }
 0x3f9   : > { %v5939_v58 = vadd.f32 %v5938_v48, %v10488_v46  ;;  %v6270_v53 = vadd.f32 %v6269_v50, %v6099_v14  ;;  %v10596_v50 = vsub.f32 %v5609_v35, %v10060_v31  ;;  %v5618_v35 = vld [vmem:[#allocation2 + $0x350] sm:$0xff]  ;;  %v6117_v46 = vmul.f32 %v10500_v61, %v10500_v61 }
 0x3fb   : > { %v5940_v34 = vadd.f32 %v5939_v58, %v10494_v55  ;;  %v6271_v57 = vadd.f32 %v6270_v53, %v6100_v17  ;;  %v10602_v53 = vsub.f32 %v5610_v43, %v10060_v31  ;;  %v5619_v43 = vld [vmem:[#allocation2 + $0x358] sm:$0xff]  ;;  %v6118_v55 = vmul.f32 %v10506_v2, %v10506_v2 }
 0x3fd   : > { %v5941_v5 = vadd.f32 %v5940_v34, %v10500_v61  ;;  %v6272_v54 = vadd.f32 %v6271_v57, %v6101_v21  ;;  %v10608_v57 = vsub.f32 %v5611_v49, %v10060_v31  ;;  %v10653_v49 = vld [vmem:[#allocation2 + $0x360] sm:$0xff]  ;;  %v6119_v61 = vmul.f32 %v10512_v9, %v10512_v9 }
 0x3ff   : > { %v5942_v12 = vadd.f32 %v5941_v5, %v10506_v2  ;;  %v6273_v62 = vadd.f32 %v6272_v54, %v6102_v24  ;;  %v10614_v54 = vsub.f32 %v5612_v59, %v10060_v31  ;;  %v10661_v59 = vld [vmem:[#allocation2 + $0x368] sm:$0xff]  ;;  %v6120_v2 = vmul.f32 %v10518_v15, %v10518_v15 }
 0x401   : > { %v5943_v19 = vadd.f32 %v5942_v12, %v10512_v9  ;;  %v6274_v1 = vadd.f32 %v6273_v62, %v6103_v27  ;;  %v10620_v62 = vsub.f32 %v5613_v63, %v10060_v31  ;;  %v10670_v63 = vld [vmem:[#allocation2 + $0x370] sm:$0xff]  ;;  %v10679_v9 = vld [vmem:[#allocation2 + $0x378] sm:$0xff] }
 0x403   : > { %v5944_v25 = vadd.f32 %v5943_v19, %v10518_v15  ;;  %v6275_v4 = vadd.f32 %v6274_v1, %v6104_v30  ;;  %v10626_v1 = vsub.f32 %v5614_v6, %v10060_v31  ;;  %v6121_v6 = vmul.f32 %v10524_v22, %v10524_v22  ;;  %v10688_v15 = vld [vmem:[#allocation2 + $0x380] sm:$0xff] }
 0x405   : > { %v5945_v32 = vadd.f32 %v5944_v25, %v10524_v22  ;;  %v6276_v8 = vadd.f32 %v6275_v4, %v6105_v36  ;;  %v10632_v4 = vsub.f32 %v5615_v13, %v10060_v31  ;;  %v6122_v13 = vmul.f32 %v10530_v28, %v10530_v28  ;;  %v10697_v22 = vld [vmem:[#allocation2 + $0x388] sm:$0xff] }
 0x407   : > { %v5946_v41 = vadd.f32 %v5945_v32, %v10530_v28  ;;  %v6277_v11 = vadd.f32 %v6276_v8, %v6106_v40  ;;  %v10638_v8 = vsub.f32 %v5616_v20, %v10060_v31  ;;  %v6123_v20 = vmul.f32 %v10536_v38, %v10536_v38  ;;  %v10706_v28 = vld [vmem:[#allocation2 + $0x390] sm:$0xff] }
 0x409   : > { %v5947_v48 = vadd.f32 %v5946_v41, %v10536_v38  ;;  %v6278_v14 = vadd.f32 %v6277_v11, %v6107_v7  ;;  %v10644_v11 = vsub.f32 %v5617_v26, %v10060_v31  ;;  %v6124_v26 = vmul.f32 %v10542_v45, %v10542_v45  ;;  %v10715_v38 = vld [vmem:[#allocation2 + $0x398] sm:$0xff] }
 0x40b   : > { %v5948_v58 = vadd.f32 %v5947_v48, %v10542_v45  ;;  %v6279_v17 = vadd.f32 %v6278_v14, %v6108_v51  ;;  %v10650_v14 = vsub.f32 %v5618_v35, %v10060_v31  ;;  %v6125_v35 = vmul.f32 %v10548_v52, %v10548_v52  ;;  %v10724_v45 = vld [vmem:[#allocation2 + $0x3a0] sm:$0xff] }
 0x40d   : > { %v5949_v34 = vadd.f32 %v5948_v58, %v10548_v52  ;;  %v6280_v21 = vadd.f32 %v6279_v17, %v6109_v56  ;;  %v10658_v17 = vsub.f32 %v5619_v43, %v10060_v31  ;;  %v6126_v43 = vmul.f32 %v10554_v60, %v10554_v60  ;;  %v10733_v52 = vld [vmem:[#allocation2 + $0x3a8] sm:$0xff] }
 0x40f   : > { %v5950_v5 = vadd.f32 %v5949_v34, %v10554_v60  ;;  %v6281_v24 = vadd.f32 %v6280_v21, %v6110_v33  ;;  %v10667_v21 = vsub.f32 %v10653_v49, %v10060_v31  ;;  %v10742_v60 = vld [vmem:[#allocation2 + $0x3b0] sm:$0xff] }
 0x411   : > { %v5951_v12 = vadd.f32 %v5950_v5, %v10560_v0  ;;  %v6282_v27 = vadd.f32 %v6281_v24, %v6111_v3  ;;  %v10676_v24 = vsub.f32 %v10661_v59, %v10060_v31 }
 0x413   : > { %v5952_v19 = vadd.f32 %v5951_v12, %v10566_v37  ;;  %v6283_v30 = vadd.f32 %v6282_v27, %v6112_v10  ;;  %v10685_v27 = vsub.f32 %v10670_v63, %v10060_v31 }
 0x415   : > { %v5953_v25 = vadd.f32 %v5952_v19, %v10572_v39  ;;  %v6284_v36 = vadd.f32 %v6283_v30, %v6113_v16  ;;  %v10694_v30 = vsub.f32 %v10679_v9, %v10060_v31 }
 0x417   : > { %v5954_v32 = vadd.f32 %v5953_v25, %v10578_v42  ;;  %v6285_v40 = vadd.f32 %v6284_v36, %v6114_v23  ;;  %v10703_v36 = vsub.f32 %v10688_v15, %v10060_v31 }
 0x419   : > { %v5955_v41 = vadd.f32 %v5954_v32, %v10584_v44  ;;  %v6286_v7 = vadd.f32 %v6285_v40, %v6115_v29  ;;  %v10712_v40 = vsub.f32 %v10697_v22, %v10060_v31 }
 0x41b   : > { %v5956_v48 = vadd.f32 %v5955_v41, %v10590_v47  ;;  %v6287_v51 = vadd.f32 %v6286_v7, %v6116_v18  ;;  %v10721_v7 = vsub.f32 %v10706_v28, %v10060_v31 }
 0x41d   : > { %v5957_v58 = vadd.f32 %v5956_v48, %v10596_v50  ;;  %v6288_v56 = vadd.f32 %v6287_v51, %v6117_v46  ;;  %v10730_v51 = vsub.f32 %v10715_v38, %v10060_v31 }
 0x41f   : > { %v5958_v34 = vadd.f32 %v5957_v58, %v10602_v53  ;;  %v6289_v33 = vadd.f32 %v6288_v56, %v6118_v55  ;;  %v6127_v55 = vmul.f32 %v10560_v0, %v10560_v0  ;;  %v10751_v0 = vld [vmem:[#allocation2 + $0x3b8] sm:$0xff] }
 0x421   : > { %v5959_v5 = vadd.f32 %v5958_v34, %v10608_v57  ;;  %v6290_v3 = vadd.f32 %v6289_v33, %v6119_v61  ;;  %v6128_v33 = vmul.f32 %v10566_v37, %v10566_v37  ;;  %v10760_v37 = vld [vmem:[#allocation2 + $0x3c0] sm:$0xff] }
 0x423   : > { %v5960_v12 = vadd.f32 %v5959_v5, %v10614_v54  ;;  %v6291_v10 = vadd.f32 %v6290_v3, %v6120_v2  ;;  %v10748_v2 = vsub.f32 %v10733_v52, %v10060_v31 }
 0x425   : > { %v5961_v19 = vadd.f32 %v5960_v12, %v10620_v62  ;;  %v6292_v16 = vadd.f32 %v6291_v10, %v6121_v6  ;;  %v10757_v10 = vsub.f32 %v10742_v60, %v10060_v31 }
 0x427   : > { %v5962_v25 = vadd.f32 %v5961_v19, %v10626_v1  ;;  %v6293_v23 = vadd.f32 %v6292_v16, %v6122_v13  ;;  %v6130_v13 = vmul.f32 %v10578_v42, %v10578_v42  ;;  %v10778_v42 = vld [vmem:[#allocation2 + $0x3d0] sm:$0xff] }
 0x429   : > { %v5963_v32 = vadd.f32 %v5962_v25, %v10632_v4  ;;  %v6294_v29 = vadd.f32 %v6293_v23, %v6123_v20  ;;  %v6131_v23 = vmul.f32 %v10584_v44, %v10584_v44  ;;  %v10787_v44 = vld [vmem:[#allocation2 + $0x3d8] sm:$0xff] }
 0x42b   : > { %v5964_v41 = vadd.f32 %v5963_v32, %v10638_v8  ;;  %v6295_v18 = vadd.f32 %v6294_v29, %v6124_v26  ;;  %v10775_v26 = vsub.f32 %v10760_v37, %v10060_v31 }
 0x42d   : > { %v5965_v48 = vadd.f32 %v5964_v41, %v10644_v11  ;;  %v6296_v46 = vadd.f32 %v6295_v18, %v6125_v35 }
 0x42f   : > { %v5966_v58 = vadd.f32 %v5965_v48, %v10650_v14  ;;  %v6297_v56 = vadd.f32 %v6296_v46, %v6126_v43  ;;  %v6133_v43 = vmul.f32 %v10596_v50, %v10596_v50  ;;  %v10805_v50 = vld [vmem:[#allocation2 + $0x3e8] sm:$0xff] }
 0x431   : > { %v5967_v34 = vadd.f32 %v5966_v58, %v10658_v17  ;;  %v10739_v58 = vsub.f32 %v10724_v45, %v10060_v31 }
 0x433   : > { %v5968_v5 = vadd.f32 %v5967_v34, %v10667_v21  ;;  %v6298_v34 = vadd.f32 %v6297_v56, %v6127_v55  ;;  %v6134_v56 = vmul.f32 %v10602_v53, %v10602_v53  ;;  %v10814_v53 = vld [vmem:[#allocation2 + $0x3f0] sm:$0xff] }
 0x435   : > { %v5969_v12 = vadd.f32 %v5968_v5, %v10676_v24  ;;  %v6129_v5 = vmul.f32 %v10572_v39, %v10572_v39  ;;  %v6299_v6 = vadd.f32 %v6298_v34, %v6128_v33  ;;  %v10769_v39 = vld [vmem:[#allocation2 + $0x3c8] sm:$0xff]  ;;  %v10802_v33 = vsub.f32 %v10787_v44, %v10060_v31 }
 0x436   : > { %v10784_v18 = vsub.f32 %v10769_v39, %v10060_v31 }
 0x437   : > { %v5970_v19 = vadd.f32 %v5969_v12, %v10685_v27  ;;  %v6300_v16 = vadd.f32 %v6299_v6, %v6129_v5 }
 0x439   : > { %v5971_v25 = vadd.f32 %v5970_v19, %v10694_v30  ;;  %v10766_v19 = vsub.f32 %v10751_v0, %v10060_v31 }
 0x43b   : > { %v5972_v32 = vadd.f32 %v5971_v25, %v10703_v36  ;;  %v6301_v25 = vadd.f32 %v6300_v16, %v6130_v13  ;;  %v6136_v13 = vmul.f32 %v10614_v54, %v10614_v54  ;;  %v10832_v54 = vld [vmem:[#allocation2 + $0x400] sm:$0xff] }
 0x43d   : > { %v5973_v41 = vadd.f32 %v5972_v32, %v10712_v40  ;;  %v6132_v32 = vmul.f32 %v10590_v47, %v10590_v47  ;;  %v6302_v35 = vadd.f32 %v6301_v25, %v6131_v23  ;;  %v10796_v47 = vld [vmem:[#allocation2 + $0x3e0] sm:$0xff]  ;;  %v6137_v25 = vmul.f32 %v10620_v62, %v10620_v62  ;;  %v10841_v62 = vld [vmem:[#allocation2 + $0x408] sm:$0xff] }
 0x43e   : > { %v10811_v6 = vsub.f32 %v10796_v47, %v10060_v31 }
 0x43f   : > { %v5974_v48 = vadd.f32 %v5973_v41, %v10721_v7  ;;  %v6303_v46 = vadd.f32 %v6302_v35, %v6132_v32  ;;  %v10829_v32 = vsub.f32 %v10814_v53, %v10060_v31 }
 0x441   : > { %v5975_v61 = vadd.f32 %v5974_v48, %v10730_v51  ;;  %v10793_v48 = vsub.f32 %v10778_v42, %v10060_v31 }
 0x443   : > { %v5976_v3 = vadd.f32 %v5975_v61, %v10739_v58  ;;  %v6304_v61 = vadd.f32 %v6303_v46, %v6133_v43 }
 0x445   : > { %v5977_v12 = vadd.f32 %v5976_v3, %v10748_v2  ;;  %v6135_v3 = vmul.f32 %v10608_v57, %v10608_v57  ;;  %v6305_v5 = vadd.f32 %v6304_v61, %v6134_v56  ;;  %v10823_v57 = vld [vmem:[#allocation2 + $0x3f8] sm:$0xff]  ;;  %v6139_v56 = vmul.f32 %v10632_v4, %v10632_v4 }
 0x446   : > { %v10838_v46 = vsub.f32 %v10823_v57, %v10060_v31  ;;  %v10859_v4 = vld [vmem:[#allocation2 + $0x418] sm:$0xff] }
 0x447   : > { %v5978_v20 = vadd.f32 %v5977_v12, %v10757_v10  ;;  %v6306_v16 = vadd.f32 %v6305_v5, %v6135_v3  ;;  %v6140_v5 = vmul.f32 %v10638_v8, %v10638_v8  ;;  %14637 = vst [vmem:[#allocation13_spill] sm:$0xff] %v10859_v4  ;;  %v10868_v8 = vld [vmem:[#allocation2 + $0x420] sm:$0xff] }
 0x448   : > { %14638 = vst [vmem:[#allocation14_spill] sm:$0xff] %v10868_v8 }
 0x449   : > { %v5979_v29 = vadd.f32 %v5978_v20, %v10766_v19  ;;  %v10820_v20 = vsub.f32 %v10805_v50, %v10060_v31 }
 0x44b   : > { %v5980_v41 = vadd.f32 %v5979_v29, %v10775_v26  ;;  %v6307_v29 = vadd.f32 %v6306_v16, %v6136_v13  ;;  %v10856_v13 = vsub.f32 %v10841_v62, %v10060_v31 }
 0x44d   : > { %v5981_v55 = vadd.f32 %v5980_v41, %v10784_v18  ;;  %v6138_v41 = vmul.f32 %v10626_v1, %v10626_v1  ;;  %v6308_v43 = vadd.f32 %v6307_v29, %v6137_v25  ;;  %v10850_v1 = vld [vmem:[#allocation2 + $0x410] sm:$0xff] }
 0x44e   : > { %14636 = vst [vmem:[#allocation12_spill] sm:$0xff] %v10850_v1  ;;  %v10865_v29 = vsub.f32 %v10850_v1, %v10060_v31 }
 0x44f   : > { %v5982_v34 = vadd.f32 %v5981_v55, %v10793_v48  ;;  %v6309_v61 = vadd.f32 %v6308_v43, %v6138_v41  ;;  %v6142_v41 = vmul.f32 %v10650_v14, %v10650_v14  ;;  %v10886_v14 = vld [vmem:[#allocation2 + $0x430] sm:$0xff] }
 0x450   : > { %14640 = vst [vmem:[#allocation16_spill] sm:$0xff] %v10886_v14 }
 0x451   : > { %v5983_v12 = vadd.f32 %v5982_v34, %v10802_v33  ;;  %v10847_v34 = vsub.f32 %v10832_v54, %v10060_v31 }
 0x453   : > { %v5984_v23 = vadd.f32 %v5983_v12, %v10811_v6  ;;  %v6310_v12 = vadd.f32 %v6309_v61, %v6139_v56  ;;  %v6143_v61 = vmul.f32 %v10658_v17, %v10658_v17  ;;  %v10895_v17 = vld [vmem:[#allocation2 + $0x438] sm:$0xff] }
 0x454   : > { %14641 = vst [vmem:[#allocation17_spill] sm:$0xff] %v10895_v17 }
 0x455   : > { %v5985_v35 = vadd.f32 %v5984_v23, %v10820_v20  ;;  %v6141_v23 = vmul.f32 %v10644_v11, %v10644_v11  ;;  %v6311_v25 = vadd.f32 %v6310_v12, %v6140_v5  ;;  %v10877_v11 = vld [vmem:[#allocation2 + $0x428] sm:$0xff]  ;;  %v10883_v5 = vsub.f32 %v10868_v8, %v10060_v31 }
 0x456   : > { %14639 = vst [vmem:[#allocation15_spill] sm:$0xff] %v10877_v11 }
 0x457   : > { %v5986_v55 = vadd.f32 %v5985_v35, %v10829_v32  ;;  %v6312_v43 = vadd.f32 %v6311_v25, %v6141_v23  ;;  %v10892_v25 = vsub.f32 %v10877_v11, %v10060_v31 }
 0x459   : > { %v5987_v3 = vadd.f32 %v5986_v55, %v10838_v46  ;;  %v10874_v55 = vsub.f32 %v10859_v4, %v10060_v31 }
 0x45b   : > { %v5988_v16 = vadd.f32 %v5987_v3, %v10847_v34  ;;  %v6313_v3 = vadd.f32 %v6312_v43, %v6142_v41  ;;  %v6145_v41 = vmul.f32 %v10676_v24, %v10676_v24  ;;  %v10913_v24 = vld [vmem:[#allocation2 + $0x448] sm:$0xff] }
 0x45c   : > { %14643 = vst [vmem:[#allocation19_spill] sm:$0xff] %v10913_v24 }
 0x45d   : > { %v5989_v35 = vadd.f32 %v5988_v16, %v10856_v13  ;;  %v6144_v16 = vmul.f32 %v10667_v21, %v10667_v21  ;;  %v6314_v23 = vadd.f32 %v6313_v3, %v6143_v61  ;;  %v10904_v21 = vld [vmem:[#allocation2 + $0x440] sm:$0xff]  ;;  %v6146_v61 = vmul.f32 %v10685_v27, %v10685_v27  ;;  %v10922_v27 = vld [vmem:[#allocation2 + $0x450] sm:$0xff] }
 0x45e   : > { %14642 = vst [vmem:[#allocation18_spill] sm:$0xff] %v10904_v21  ;;  %14644 = vst [vmem:[#allocation20_spill] sm:$0xff] %v10922_v27 }
 0x45f   : > { %v5990_v56 = vadd.f32 %v5989_v35, %v10865_v29  ;;  %v6315_v43 = vadd.f32 %v6314_v23, %v6144_v16  ;;  %v6147_v16 = vmul.f32 %v10694_v30, %v10694_v30  ;;  %v10931_v30 = vld [vmem:[#allocation2 + $0x458] sm:$0xff] }
 0x460   : > { %14645 = vst [vmem:[#allocation21_spill] sm:$0xff] %v10931_v30 }
 0x461   : > { %v5991_v12 = vadd.f32 %v5990_v56, %v10874_v55  ;;  %v10901_v56 = vsub.f32 %v10886_v14, %v10060_v31  ;;  %v6316_v3 = vadd.f32 %v6315_v43, %v6145_v41  ;;  %v6148_v41 = vmul.f32 %v10703_v36, %v10703_v36  ;;  %v10940_v36 = vld [vmem:[#allocation2 + $0x460] sm:$0xff] }
 0x462   : > { %14646 = vst [vmem:[#allocation22_spill] sm:$0xff] %v10940_v36 }
 0x463   : > { %v5992_v35 = vadd.f32 %v5991_v12, %v10883_v5  ;;  %v10910_v12 = vsub.f32 %v10895_v17, %v10060_v31  ;;  %v6317_v23 = vadd.f32 %v6316_v3, %v6146_v61  ;;  %v6149_v61 = vmul.f32 %v10712_v40, %v10712_v40  ;;  %v10949_v40 = vld [vmem:[#allocation2 + $0x468] sm:$0xff] }
 0x464   : > { %14647 = vst [vmem:[#allocation23_spill] sm:$0xff] %v10949_v40 }
 0x465   : > { %v5993_v8 = vadd.f32 %v5992_v35, %v10892_v25  ;;  %v10919_v35 = vsub.f32 %v10904_v21, %v10060_v31  ;;  %v6318_v43 = vadd.f32 %v6317_v23, %v6147_v16  ;;  %v6150_v16 = vmul.f32 %v10721_v7, %v10721_v7  ;;  %v10958_v7 = vld [vmem:[#allocation2 + $0x470] sm:$0xff] }
 0x466   : > { %14648 = vst [vmem:[#allocation24_spill] sm:$0xff] %v10958_v7 }
 0x467   : > { %v5994_v11 = vadd.f32 %v5993_v8, %v10901_v56  ;;  %v10928_v8 = vsub.f32 %v10913_v24, %v10060_v31  ;;  %v6319_v3 = vadd.f32 %v6318_v43, %v6148_v41  ;;  %v6151_v41 = vmul.f32 %v10730_v51, %v10730_v51  ;;  %v10967_v51 = vld [vmem:[#allocation2 + $0x478] sm:$0xff] }
 0x468   : > { %14649 = vst [vmem:[#allocation25_spill] sm:$0xff] %v10967_v51 }
 0x469   : > { %v5995_v14 = vadd.f32 %v5994_v11, %v10910_v12  ;;  %v10937_v11 = vsub.f32 %v10922_v27, %v10060_v31  ;;  %v6320_v23 = vadd.f32 %v6319_v3, %v6149_v61  ;;  %v6152_v61 = vmul.f32 %v10739_v58, %v10739_v58  ;;  %v10976_v58 = vld [vmem:[#allocation2 + $0x480] sm:$0xff] }
 0x46a   : > { %14650 = vst [vmem:[#allocation26_spill] sm:$0xff] %v10976_v58 }
 0x46b   : > { %v5996_v17 = vadd.f32 %v5995_v14, %v10919_v35  ;;  %v10946_v14 = vsub.f32 %v10931_v30, %v10060_v31  ;;  %v6321_v43 = vadd.f32 %v6320_v23, %v6150_v16  ;;  %v6153_v16 = vmul.f32 %v10748_v2, %v10748_v2  ;;  %v10985_v2 = vld [vmem:[#allocation2 + $0x488] sm:$0xff] }
 0x46c   : > { %14651 = vst [vmem:[#allocation27_spill] sm:$0xff] %v10985_v2 }
 0x46d   : > { %v5997_v21 = vadd.f32 %v5996_v17, %v10928_v8  ;;  %v10955_v17 = vsub.f32 %v10940_v36, %v10060_v31  ;;  %v6322_v3 = vadd.f32 %v6321_v43, %v6151_v41  ;;  %v6154_v41 = vmul.f32 %v10757_v10, %v10757_v10  ;;  %v10994_v10 = vld [vmem:[#allocation2 + $0x490] sm:$0xff] }
 0x46e   : > { %14652 = vst [vmem:[#allocation28_spill] sm:$0xff] %v10994_v10 }
 0x46f   : > { %v5998_v24 = vadd.f32 %v5997_v21, %v10937_v11  ;;  %v10964_v21 = vsub.f32 %v10949_v40, %v10060_v31  ;;  %v6323_v23 = vadd.f32 %v6322_v3, %v6152_v61  ;;  %v6155_v61 = vmul.f32 %v10766_v19, %v10766_v19  ;;  %v11003_v19 = vld [vmem:[#allocation2 + $0x498] sm:$0xff] }
 0x470   : > { %14653 = vst [vmem:[#allocation29_spill] sm:$0xff] %v11003_v19 }
 0x471   : > { %v5999_v27 = vadd.f32 %v5998_v24, %v10946_v14  ;;  %v10973_v24 = vsub.f32 %v10958_v7, %v10060_v31  ;;  %v6324_v43 = vadd.f32 %v6323_v23, %v6153_v16  ;;  %v6156_v16 = vmul.f32 %v10775_v26, %v10775_v26  ;;  %v11012_v26 = vld [vmem:[#allocation2 + $0x4a0] sm:$0xff] }
 0x472   : > { %14654 = vst [vmem:[#allocation30_spill] sm:$0xff] %v11012_v26 }
 0x473   : > { %v6000_v30 = vadd.f32 %v5999_v27, %v10955_v17  ;;  %v10982_v27 = vsub.f32 %v10967_v51, %v10060_v31  ;;  %v6325_v3 = vadd.f32 %v6324_v43, %v6154_v41  ;;  %v6157_v41 = vmul.f32 %v10784_v18, %v10784_v18  ;;  %v11021_v18 = vld [vmem:[#allocation2 + $0x4a8] sm:$0xff] }
 0x474   : > { %14655 = vst [vmem:[#allocation31_spill] sm:$0xff] %v11021_v18 }
 0x475   : > { %v6001_v36 = vadd.f32 %v6000_v30, %v10964_v21  ;;  %v10991_v30 = vsub.f32 %v10976_v58, %v10060_v31  ;;  %v6326_v23 = vadd.f32 %v6325_v3, %v6155_v61  ;;  %v6158_v61 = vmul.f32 %v10793_v48, %v10793_v48  ;;  %v11030_v48 = vld [vmem:[#allocation2 + $0x4b0] sm:$0xff] }
 0x476   : > { %14656 = vst [vmem:[#allocation32_spill] sm:$0xff] %v11030_v48 }
 0x477   : > { %v6002_v40 = vadd.f32 %v6001_v36, %v10973_v24  ;;  %v11000_v36 = vsub.f32 %v10985_v2, %v10060_v31  ;;  %v6327_v43 = vadd.f32 %v6326_v23, %v6156_v16  ;;  %v6159_v16 = vmul.f32 %v10802_v33, %v10802_v33  ;;  %v11039_v33 = vld [vmem:[#allocation2 + $0x4b8] sm:$0xff] }
 0x478   : > { %14657 = vst [vmem:[#allocation33_spill] sm:$0xff] %v11039_v33 }
 0x479   : > { %v6003_v7 = vadd.f32 %v6002_v40, %v10982_v27  ;;  %v11009_v40 = vsub.f32 %v10994_v10, %v10060_v31  ;;  %v6328_v3 = vadd.f32 %v6327_v43, %v6157_v41  ;;  %v6160_v41 = vmul.f32 %v10811_v6, %v10811_v6  ;;  %v11048_v6 = vld [vmem:[#allocation2 + $0x4c0] sm:$0xff] }
 0x47a   : > { %14658 = vst [vmem:[#allocation34_spill] sm:$0xff] %v11048_v6 }
 0x47b   : > { %v6004_v51 = vadd.f32 %v6003_v7, %v10991_v30  ;;  %v11018_v7 = vsub.f32 %v11003_v19, %v10060_v31  ;;  %v6329_v23 = vadd.f32 %v6328_v3, %v6158_v61  ;;  %v6161_v61 = vmul.f32 %v10820_v20, %v10820_v20  ;;  %v11057_v20 = vld [vmem:[#allocation2 + $0x4c8] sm:$0xff] }
 0x47c   : > { %14659 = vst [vmem:[#allocation35_spill] sm:$0xff] %v11057_v20  ;;  %v6182_v1 = vmul.f32 %v11009_v40, %v11009_v40 }
 0x47d   : > { %v6005_v58 = vadd.f32 %v6004_v51, %v11000_v36  ;;  %v11027_v51 = vsub.f32 %v11012_v26, %v10060_v31  ;;  %v6330_v43 = vadd.f32 %v6329_v23, %v6159_v16  ;;  %v6162_v16 = vmul.f32 %v10829_v32, %v10829_v32  ;;  %v11066_v32 = vld [vmem:[#allocation2 + $0x4d0] sm:$0xff] }
 0x47e   : > { %14660 = vst [vmem:[#allocation36_spill] sm:$0xff] %v11066_v32 }
 0x47f   : > { %v6006_v2 = vadd.f32 %v6005_v58, %v11009_v40  ;;  %v11036_v58 = vsub.f32 %v11021_v18, %v10060_v31  ;;  %v6331_v3 = vadd.f32 %v6330_v43, %v6160_v41  ;;  %v6163_v41 = vmul.f32 %v10838_v46, %v10838_v46  ;;  %v11075_v46 = vld [vmem:[#allocation2 + $0x4d8] sm:$0xff] }
 0x480   : > { %14661 = vst [vmem:[#allocation37_spill] sm:$0xff] %v11075_v46 }
 0x481   : > { %v6007_v10 = vadd.f32 %v6006_v2, %v11018_v7  ;;  %v11045_v2 = vsub.f32 %v11030_v48, %v10060_v31  ;;  %v6332_v23 = vadd.f32 %v6331_v3, %v6161_v61  ;;  %v6164_v61 = vmul.f32 %v10847_v34, %v10847_v34  ;;  %v11084_v34 = vld [vmem:[#allocation2 + $0x4e0] sm:$0xff] }
 0x482   : > { %14662 = vst [vmem:[#allocation38_spill] sm:$0xff] %v11084_v34 }
 0x483   : > { %v6008_v19 = vadd.f32 %v6007_v10, %v11027_v51  ;;  %v11054_v10 = vsub.f32 %v11039_v33, %v10060_v31  ;;  %v6333_v43 = vadd.f32 %v6332_v23, %v6162_v16  ;;  %v6165_v16 = vmul.f32 %v10856_v13, %v10856_v13  ;;  %v11093_v13 = vld [vmem:[#allocation2 + $0x4e8] sm:$0xff] }
 0x484   : > { %14663 = vst [vmem:[#allocation39_spill] sm:$0xff] %v11093_v13  ;;  %v6186_v40 = vmul.f32 %v11045_v2, %v11045_v2 }
 0x485   : > { %v6009_v26 = vadd.f32 %v6008_v19, %v11036_v58  ;;  %v11063_v19 = vsub.f32 %v11048_v6, %v10060_v31  ;;  %v6334_v3 = vadd.f32 %v6333_v43, %v6163_v41  ;;  %v6166_v41 = vmul.f32 %v10865_v29, %v10865_v29  ;;  %v11102_v29 = vld [vmem:[#allocation2 + $0x4f0] sm:$0xff] }
 0x486   : > { %14664 = vst [vmem:[#allocation40_spill] sm:$0xff] %v11102_v29 }
 0x487   : > { %v6010_v18 = vadd.f32 %v6009_v26, %v11045_v2  ;;  %v11072_v26 = vsub.f32 %v11057_v20, %v10060_v31  ;;  %v6335_v23 = vadd.f32 %v6334_v3, %v6164_v61  ;;  %v6167_v61 = vmul.f32 %v10874_v55, %v10874_v55  ;;  %v11111_v55 = vld [vmem:[#allocation2 + $0x4f8] sm:$0xff] }
 0x488   : > { %14665 = vst [vmem:[#allocation41_spill] sm:$0xff] %v11111_v55 }
 0x489   : > { %v6011_v48 = vadd.f32 %v6010_v18, %v11054_v10  ;;  %v11081_v18 = vsub.f32 %v11066_v32, %v10060_v31  ;;  %v6336_v43 = vadd.f32 %v6335_v23, %v6165_v16  ;;  %v6168_v16 = vmul.f32 %v10883_v5, %v10883_v5  ;;  %v11120_v5 = vld [vmem:[#allocation2 + $0x500] sm:$0xff] }
 0x48a   : > { %14666 = vst [vmem:[#allocation42_spill] sm:$0xff] %v11120_v5 }
 0x48b   : > { %v6012_v33 = vadd.f32 %v6011_v48, %v11063_v19  ;;  %v11090_v48 = vsub.f32 %v11075_v46, %v10060_v31  ;;  %v6337_v3 = vadd.f32 %v6336_v43, %v6166_v41  ;;  %v6169_v41 = vmul.f32 %v10892_v25, %v10892_v25  ;;  %v11129_v25 = vld [vmem:[#allocation2 + $0x508] sm:$0xff] }
 0x48c   : > { %14667 = vst [vmem:[#allocation43_spill] sm:$0xff] %v11129_v25 }
 0x48d   : > { %v6013_v6 = vadd.f32 %v6012_v33, %v11072_v26  ;;  %v11099_v33 = vsub.f32 %v11084_v34, %v10060_v31  ;;  %v6338_v23 = vadd.f32 %v6337_v3, %v6167_v61  ;;  %v6170_v61 = vmul.f32 %v10901_v56, %v10901_v56  ;;  %v11138_v56 = vld [vmem:[#allocation2 + $0x510] sm:$0xff] }
 0x48e   : > { %14668 = vst [vmem:[#allocation44_spill] sm:$0xff] %v11138_v56  ;;  %v6191_v2 = vmul.f32 %v11090_v48, %v11090_v48 }
 0x48f   : > { %v6014_v20 = vadd.f32 %v6013_v6, %v11081_v18  ;;  %v11108_v6 = vsub.f32 %v11093_v13, %v10060_v31  ;;  %v6339_v43 = vadd.f32 %v6338_v23, %v6168_v16  ;;  %v6171_v16 = vmul.f32 %v10910_v12, %v10910_v12  ;;  %v11147_v12 = vld [vmem:[#allocation2 + $0x518] sm:$0xff] }
 0x490   : > { %14669 = vst [vmem:[#allocation45_spill] sm:$0xff] %v11147_v12 }
 0x491   : > { %v6015_v32 = vadd.f32 %v6014_v20, %v11090_v48  ;;  %v11117_v20 = vsub.f32 %v11102_v29, %v10060_v31  ;;  %v6340_v3 = vadd.f32 %v6339_v43, %v6169_v41  ;;  %v6172_v41 = vmul.f32 %v10919_v35, %v10919_v35  ;;  %v11156_v35 = vld [vmem:[#allocation2 + $0x520] sm:$0xff] }
 0x492   : > { %14670 = vst [vmem:[#allocation46_spill] sm:$0xff] %v11156_v35 }
 0x493   : > { %v6016_v46 = vadd.f32 %v6015_v32, %v11099_v33  ;;  %v11126_v32 = vsub.f32 %v11111_v55, %v10060_v31  ;;  %v6341_v23 = vadd.f32 %v6340_v3, %v6170_v61  ;;  %v6173_v61 = vmul.f32 %v10928_v8, %v10928_v8  ;;  %v11165_v8 = vld [vmem:[#allocation2 + $0x528] sm:$0xff] }
 0x494   : > { %14671 = vst [vmem:[#allocation47_spill] sm:$0xff] %v11165_v8 }
 0x495   : > { %v6017_v34 = vadd.f32 %v6016_v46, %v11108_v6  ;;  %v11135_v46 = vsub.f32 %v11120_v5, %v10060_v31  ;;  %v6342_v43 = vadd.f32 %v6341_v23, %v6171_v16  ;;  %v6174_v16 = vmul.f32 %v10937_v11, %v10937_v11  ;;  %v11174_v11 = vld [vmem:[#allocation2 + $0x530] sm:$0xff] }
 0x496   : > { %14672 = vst [vmem:[#allocation48_spill] sm:$0xff] %v11174_v11 }
 0x497   : > { %v6018_v13 = vadd.f32 %v6017_v34, %v11117_v20  ;;  %v11144_v34 = vsub.f32 %v11129_v25, %v10060_v31  ;;  %v6343_v3 = vadd.f32 %v6342_v43, %v6172_v41  ;;  %v6175_v41 = vmul.f32 %v10946_v14, %v10946_v14  ;;  %v11183_v14 = vld [vmem:[#allocation2 + $0x538] sm:$0xff] }
 0x498   : > { %14673 = vst [vmem:[#allocation49_spill] sm:$0xff] %v11183_v14  ;;  %v6196_v48 = vmul.f32 %v11135_v46, %v11135_v46 }
 0x499   : > { %v6019_v29 = vadd.f32 %v6018_v13, %v11126_v32  ;;  %v11153_v13 = vsub.f32 %v11138_v56, %v10060_v31  ;;  %v6344_v23 = vadd.f32 %v6343_v3, %v6173_v61  ;;  %v6176_v61 = vmul.f32 %v10955_v17, %v10955_v17  ;;  %v11192_v17 = vld [vmem:[#allocation2 + $0x540] sm:$0xff] }
 0x49a   : > { %14674 = vst [vmem:[#allocation50_spill] sm:$0xff] %v11192_v17 }
 0x49b   : > { %v6020_v55 = vadd.f32 %v6019_v29, %v11135_v46  ;;  %v11162_v29 = vsub.f32 %v11147_v12, %v10060_v31  ;;  %v6345_v43 = vadd.f32 %v6344_v23, %v6174_v16  ;;  %v6177_v16 = vmul.f32 %v10964_v21, %v10964_v21  ;;  %v11201_v21 = vld [vmem:[#allocation2 + $0x548] sm:$0xff] }
 0x49c   : > { %14675 = vst [vmem:[#allocation51_spill] sm:$0xff] %v11201_v21 }
 0x49d   : > { %v6021_v5 = vadd.f32 %v6020_v55, %v11144_v34  ;;  %v11171_v55 = vsub.f32 %v11156_v35, %v10060_v31  ;;  %v6346_v3 = vadd.f32 %v6345_v43, %v6175_v41  ;;  %v6178_v41 = vmul.f32 %v10973_v24, %v10973_v24 }
 0x49f   : > { %v6022_v25 = vadd.f32 %v6021_v5, %v11153_v13  ;;  %v11180_v5 = vsub.f32 %v11165_v8, %v10060_v31  ;;  %v6347_v23 = vadd.f32 %v6346_v3, %v6176_v61  ;;  %v6179_v61 = vmul.f32 %v10982_v27, %v10982_v27 }
 0x4a1   : > { %v6023_v56 = vadd.f32 %v6022_v25, %v11162_v29  ;;  %v11189_v25 = vsub.f32 %v11174_v11, %v10060_v31  ;;  %v6348_v43 = vadd.f32 %v6347_v23, %v6177_v16  ;;  %v11205_v11 = vld [vmem:[#allocation2 + $0x558] sm:$0xff]  ;;  %v11210_v16 = vld [vmem:[#allocation2 + $0x550] sm:$0xff]  ;;  %v6180_v23 = vmul.f32 %v10991_v30, %v10991_v30 }
 0x4a2   : > { %14676 = vst [vmem:[#allocation52_spill] sm:$0xff] %v11205_v11  ;;  %v5860_v27 = vsub.f32 %v11205_v11, %v10060_v31  ;;  %v6201_v46 = vmul.f32 %v11180_v5, %v11180_v5 }
 0x4a3   : > { %v6024_v12 = vadd.f32 %v6023_v56, %v11171_v55  ;;  %v11198_v56 = vsub.f32 %v11183_v14, %v10060_v31  ;;  %v6349_v3 = vadd.f32 %v6348_v43, %v6178_v41  ;;  %v6181_v41 = vmul.f32 %v11000_v36, %v11000_v36 }
 0x4a4   : > { %v6184_v36 = vmul.f32 %v11027_v51, %v11027_v51  ;;  %v6189_v51 = vmul.f32 %v11072_v26, %v11072_v26  ;;  %v6194_v26 = vmul.f32 %v11117_v20, %v11117_v20  ;;  %v6199_v20 = vmul.f32 %v11162_v29, %v11162_v29 }
 0x4a5   : > { %v6025_v35 = vadd.f32 %v6024_v12, %v11180_v5  ;;  %v5857_v12 = vsub.f32 %v11192_v17, %v10060_v31  ;;  %v6350_v14 = vadd.f32 %v6349_v3, %v6179_v61  ;;  %v6031_v3 = vsel %vm5506_vm3, %v5860_v27, 0.0 }
 0x4a7   : > { %v6026_v8 = vadd.f32 %v6025_v35, %v11189_v25  ;;  %v5858_v35 = vsub.f32 %v11201_v21, %v10060_v31  ;;  %v6351_v43 = vadd.f32 %v6350_v14, %v6180_v23  ;;  %v6187_v23 = vmul.f32 %v11054_v10, %v11054_v10 }
 0x4a8   : > { %v6192_v10 = vmul.f32 %v11099_v33, %v11099_v33  ;;  %v6197_v33 = vmul.f32 %v11144_v34, %v11144_v34  ;;  %v6202_v34 = vmul.f32 %v11189_v25, %v11189_v25 }
 0x4a9   : > { %v6027_v24 = vadd.f32 %v6026_v8, %v11198_v56  ;;  %v5859_v8 = vsub.f32 %v11210_v16, %v10060_v31  ;;  %v6352_v30 = vadd.f32 %v6351_v43, %v6181_v41  ;;  %v6185_v31 = vmul.f32 %v11036_v58, %v11036_v58 }
 0x4aa   : > { %v6190_v58 = vmul.f32 %v11081_v18, %v11081_v18  ;;  %v6195_v18 = vmul.f32 %v11126_v32, %v11126_v32  ;;  %v6200_v32 = vmul.f32 %v11171_v55, %v11171_v55  ;;  %v6205_v29 = vmul.f32 %v5858_v35, %v5858_v35 }
 0x4ab   : > { %v6028_v4 = vadd.f32 %v6027_v24, %v5857_v12  ;;  %v6183_v24 = vmul.f32 %v11018_v7, %v11018_v7  ;;  %v6353_v21 = vadd.f32 %v6352_v30, %v6182_v1  ;;  %v6188_v1 = vmul.f32 %v11063_v19, %v11063_v19 }
 0x4ac   : > { %v6193_v19 = vmul.f32 %v11108_v6, %v11108_v6  ;;  %v6198_v6 = vmul.f32 %v11153_v13, %v11153_v13  ;;  %v6203_v13 = vmul.f32 %v11198_v56, %v11198_v56 }
 0x4ad   : > { %v6029_v17 = vadd.f32 %v6028_v4, %v5858_v35  ;;  %v6354_v14 = vadd.f32 %v6353_v21, %v6183_v24  ;;  %v6386_v35 = vld [vmem:[%s14439_s2] sm:$0xff] }
 0x4af   : > { %v6030_v61 = vadd.f32 %v6029_v17, %v5859_v8  ;;  %v6355_v4 = vadd.f32 %v6354_v14, %v6184_v36 }
 0x4b1   : > { %v6032_v11 = vadd.f32 %v6031_v3, %v6030_v61  ;;  %v6356_v17 = vadd.f32 %v6355_v4, %v6185_v31 }
 0x4b3   : > { %6033 = vadd.xlane.f32.xlu0 %v6032_v11  ;;  %v6357_v41 = vadd.f32 %v6356_v17, %v6186_v40 }
 0x4b5   : > { %v6358_v7 = vadd.f32 %v6357_v41, %v6187_v23 }
 0x4b7   : > { %v6359_v11 = vadd.f32 %v6358_v7, %v6188_v1  ;;  %v6204_v1 = vmul.f32 %v5857_v12, %v5857_v12  ;;  %v9196_v12 = vmov 1  }
 0x4b8   : > { %8934 = vset.pattern.permute.xlu0 %v9196_v12 }
 0x4b9   : > { %v6360_v21 = vadd.f32 %v6359_v11, %v6189_v51  ;;  %v6207_v11 = vmul.f32 %v5860_v27, %v5860_v27 }
 0x4bb   : > { %v6361_v43 = vadd.f32 %v6360_v21, %v6190_v58  ;;  %v6206_v58 = vmul.f32 %v5859_v8, %v5859_v8  ;;  %v8937_v8 = vld [vmem:[#allocation2] sm:$0xff] }
 0x4bd   : > { %v6362_v30 = vadd.f32 %v6361_v43, %v6191_v2  ;;  %v6378_v2 = vsel %vm5506_vm3, %v6207_v11, 0.0 }
 0x4bf   : > { %v6363_v61 = vadd.f32 %v6362_v30, %v6192_v10 }
 0x4c1   : > { %v6364_v3 = vadd.f32 %v6363_v61, %v6193_v19 }
 0x4c3   : > { %v6365_v24 = vadd.f32 %v6364_v3, %v6194_v26 }
 0x4c5   : > { %v6366_v36 = vadd.f32 %v6365_v24, %v6195_v18 }
 0x4c7   : > { %v6367_v14 = vadd.f32 %v6366_v36, %v6196_v48 }
 0x4c9   : > { %v6368_v31 = vadd.f32 %v6367_v14, %v6197_v33  ;;  %v8938_v14 = vld [vmem:[#allocation2 + $0x8] sm:$0xff] }
 0x4cb   : > { %v6369_v4 = vadd.f32 %v6368_v31, %v6198_v6  ;;  %v8939_v31 = vld [vmem:[#allocation2 + $0x10] sm:$0xff] }
 0x4cd   : > { %v6370_v40 = vadd.f32 %v6369_v4, %v6199_v20  ;;  %v8940_v4 = vld [vmem:[#allocation2 + $0x18] sm:$0xff] }
 0x4cf   : > { %v6371_v17 = vadd.f32 %v6370_v40, %v6200_v32  ;;  %v8941_v40 = vld [vmem:[#allocation2 + $0x20] sm:$0xff] }
 0x4d1   : > { %v6372_v23 = vadd.f32 %v6371_v17, %v6201_v46  ;;  %v8942_v17 = vld [vmem:[#allocation2 + $0x28] sm:$0xff] }
 0x4d3   : > { %v6373_v41 = vadd.f32 %v6372_v23, %v6202_v34  ;;  %v8943_v23 = vld [vmem:[#allocation2 + $0x30] sm:$0xff] }
 0x4d5   : > { %v6374_v7 = vadd.f32 %v6373_v41, %v6203_v13  ;;  %v8944_v41 = vld [vmem:[#allocation2 + $0x38] sm:$0xff] }
 0x4d7   : > { %v6375_v51 = vadd.f32 %v6374_v7, %v6204_v1  ;;  %v8945_v7 = vld [vmem:[#allocation2 + $0x40] sm:$0xff] }
 0x4d9   : > { %v6376_v55 = vadd.f32 %v6375_v51, %v6205_v29  ;;  %v8946_v51 = vld [vmem:[#allocation2 + $0x48] sm:$0xff] }
 0x4db   : > { %v6377_v21 = vadd.f32 %v6376_v55, %v6206_v58  ;;  %v8947_v58 = vld [vmem:[#allocation2 + $0x50] sm:$0xff] }
 0x4dd   : > { %v6379_v5 = vadd.f32 %v6378_v2, %v6377_v21  ;;  %v8948_v21 = vld [vmem:[#allocation2 + $0x58] sm:$0xff] }
 0x4df   : > { %6380 = vadd.xlane.f32.xlu1 %v6379_v5  ;;  %v8949_v5 = vld [vmem:[#allocation2 + $0x60] sm:$0xff] }
 0x540   : > { %v6034_v43 = vpop.xlane.xlu0 %6033 }
 0x541   : > { %v6035_v10 = vmul.f32 4.5553938e-05, %v6034_v43 }
 0x543   : > { %v6383_v25 = vmul.f32 %v6035_v10, %v6035_v10  ;;  %v6385_v26 = vadd.f32 %v8937_v8, %v6035_v10  ;;  %v8950_v10 = vld [vmem:[#allocation2 + $0x68] sm:$0xff] }
 0x56c   : > { %v6381_v30 = vpop.xlane.xlu1 %6380 }
 0x56d   : > { %v6382_v19 = vmul.f32 4.5553938e-05, %v6381_v30  ;;  %v8951_v30 = vld [vmem:[#allocation2 + $0x70] sm:$0xff] }
 0x56f   : > { %v6384_v61 = vsub.f32 %v6382_v19, %v6383_v25 }
 0x571   : > { %v6387_v56 = vadd.f32 1e-05, %v6384_v61  ;;  %v8952_v61 = vld [vmem:[#allocation2 + $0x78] sm:$0xff] }
 0x573   : > { %8935 = vrsqrt.f32 %v6387_v56 }
 0x57d   : > { %v8936_v27 = vpop.eup %8935 }
 0x57e   : > { %v6389_v3 = vmul.f32 %v8936_v27, %v6386_v35  ;;  %v8954_v27 = vld [vmem:[#allocation2 + $0x88] sm:$0xff] }
 0x580   : > { %v6390_v18 = vmul.f32 %v6389_v3, %v6385_v26  ;;  %v8955_v26 = vld [vmem:[#allocation2 + $0x90] sm:$0xff] }
 0x582   : > { %6392 = vrot.lane.b32.xlu1 %v6390_v18, %s9197_s27  ;;  %v8956_v18 = vld [vmem:[#allocation2 + $0x98] sm:$0xff] }
 0x586   : > { %6398 = vperm.xlu1 %8932, %v6389_v3  }
 0x58a   : > { %8933 = vset.pattern.permute.xlu1 %v9196_v12  ;;  %v8953_v12 = vld [vmem:[#allocation2 + $0x80] sm:$0xff] }
 0x5f4   : > { %v6393_v24 = vpop.permute.xlu1 %6392 }
 0x5f5   : > { %v6395_v48 = vsub.f32 %v6386_v35, %v6393_v24 }
 0x5f7   : > { %6575 = vperm.xlu1 %8933, %v6395_v48   ;;  %v8957_v48 = vld [vmem:[#allocation2 + $0xa0] sm:$0xff] }
 0x605   : > { %v11271_v36 = vpop.permute.xlu1 %6398 }
 0x606   : > { %v11274_v33 = vmul.f32 %v8937_v8, %v11271_v36  ;;  %v11277_v6 = vmul.f32 %v8938_v14, %v11271_v36  ;;  %v11280_v20 = vmul.f32 %v8939_v31, %v11271_v36  ;;  %v11283_v32 = vmul.f32 %v8940_v4, %v11271_v36  ;;  %v8958_v31 = vld [vmem:[#allocation2 + $0xa8] sm:$0xff] }
 0x607   : > { %v11286_v46 = vmul.f32 %v8941_v40, %v11271_v36  ;;  %v11289_v34 = vmul.f32 %v8942_v17, %v11271_v36  ;;  %v11292_v13 = vmul.f32 %v8943_v23, %v11271_v36  ;;  %v11295_v1 = vmul.f32 %v8944_v41, %v11271_v36  ;;  %v8959_v40 = vld [vmem:[#allocation2 + $0xb0] sm:$0xff]  ;;  %v8960_v23 = vld [vmem:[#allocation2 + $0xb8] sm:$0xff] }
 0x608   : > { %v11298_v29 = vmul.f32 %v8945_v7, %v11271_v36  ;;  %v11301_v11 = vmul.f32 %v8946_v51, %v11271_v36  ;;  %v11304_v55 = vmul.f32 %v8947_v58, %v11271_v36  ;;  %v11307_v2 = vmul.f32 %v8948_v21, %v11271_v36  ;;  %v8961_v7 = vld [vmem:[#allocation2 + $0xc0] sm:$0xff]  ;;  %v8962_v58 = vld [vmem:[#allocation2 + $0xc8] sm:$0xff] }
 0x609   : > { %v11310_v43 = vmul.f32 %v8949_v5, %v11271_v36  ;;  %v11313_v25 = vmul.f32 %v8950_v10, %v11271_v36  ;;  %v11316_v19 = vmul.f32 %v8951_v30, %v11271_v36  ;;  %v11319_v56 = vmul.f32 %v8952_v61, %v11271_v36  ;;  %v8963_v5 = vld [vmem:[#allocation2 + $0xd0] sm:$0xff]  ;;  %v8964_v30 = vld [vmem:[#allocation2 + $0xd8] sm:$0xff] }
 0x60a   : > { %v11322_v35 = vmul.f32 %v8953_v12, %v11271_v36  ;;  %v11325_v8 = vmul.f32 %v8954_v27, %v11271_v36  ;;  %v11328_v3 = vmul.f32 %v8955_v26, %v11271_v36  ;;  %v11331_v24 = vmul.f32 %v8956_v18, %v11271_v36  ;;  %v8965_v12 = vld [vmem:[#allocation2 + $0xe0] sm:$0xff]  ;;  %v8966_v26 = vld [vmem:[#allocation2 + $0xe8] sm:$0xff] }
 0x60b   : > { %v11334_v14 = vmul.f32 %v8957_v48, %v11271_v36  ;;  %v11337_v4 = vmul.f32 %v8958_v31, %v11271_v36  ;;  %v11340_v17 = vmul.f32 %v8959_v40, %v11271_v36  ;;  %v11343_v41 = vmul.f32 %v8960_v23, %v11271_v36  ;;  %v8967_v48 = vld [vmem:[#allocation2 + $0xf0] sm:$0xff]  ;;  %v8968_v40 = vld [vmem:[#allocation2 + $0xf8] sm:$0xff] }
 0x60c   : > { %v11346_v51 = vmul.f32 %v8961_v7, %v11271_v36  ;;  %v11349_v21 = vmul.f32 %v8962_v58, %v11271_v36  ;;  %v11352_v10 = vmul.f32 %v8963_v5, %v11271_v36  ;;  %v11355_v61 = vmul.f32 %v8964_v30, %v11271_v36  ;;  %v8969_v7 = vld [vmem:[#allocation2 + $0x100] sm:$0xff]  ;;  %v8970_v5 = vld [vmem:[#allocation2 + $0x108] sm:$0xff] }
 0x60d   : > { %v11358_v27 = vmul.f32 %v8965_v12, %v11271_v36  ;;  %v11361_v18 = vmul.f32 %v8966_v26, %v11271_v36  ;;  %v11364_v31 = vmul.f32 %v8967_v48, %v11271_v36  ;;  %v11367_v23 = vmul.f32 %v8968_v40, %v11271_v36  ;;  %v8971_v12 = vld [vmem:[#allocation2 + $0x110] sm:$0xff] }
 0x60e   : > { %v11370_v58 = vmul.f32 %v8969_v7, %v11271_v36  ;;  %v11373_v30 = vmul.f32 %v8970_v5, %v11271_v36  ;;  %v11376_v26 = vmul.f32 %v8971_v12, %v11271_v36 }
 0x60f   : > { %14677 = vst [vmem:[#allocation53_spill] sm:$0xff] %v11361_v18  ;;  %14678 = vst [vmem:[#allocation54_spill] sm:$0xff] %v11364_v31  ;;  %v8972_v18 = vld [vmem:[#allocation2 + $0x118] sm:$0xff]  ;;  %v8973_v31 = vld [vmem:[#allocation2 + $0x120] sm:$0xff] }
 0x610   : > { %14679 = vst [vmem:[#allocation55_spill] sm:$0xff] %v11367_v23  ;;  %14680 = vst [vmem:[#allocation56_spill] sm:$0xff] %v11370_v58  ;;  %v11379_v48 = vmul.f32 %v8972_v18, %v11271_v36  ;;  %v11382_v40 = vmul.f32 %v8973_v31, %v11271_v36  ;;  %v8974_v23 = vld [vmem:[#allocation2 + $0x128] sm:$0xff]  ;;  %v8975_v58 = vld [vmem:[#allocation2 + $0x130] sm:$0xff] }
 0x611   : > { %14681 = vst [vmem:[#allocation57_spill] sm:$0xff] %v11373_v30  ;;  %14682 = vst [vmem:[#allocation58_spill] sm:$0xff] %v11376_v26  ;;  %v11385_v7 = vmul.f32 %v8974_v23, %v11271_v36  ;;  %v11388_v5 = vmul.f32 %v8975_v58, %v11271_v36  ;;  %v8976_v30 = vld [vmem:[#allocation2 + $0x138] sm:$0xff]  ;;  %v8977_v26 = vld [vmem:[#allocation2 + $0x140] sm:$0xff] }
 0x612   : > { %14683 = vst [vmem:[#allocation59_spill] sm:$0xff] %v11379_v48  ;;  %14684 = vst [vmem:[#allocation60_spill] sm:$0xff] %v11382_v40  ;;  %v11391_v12 = vmul.f32 %v8976_v30, %v11271_v36  ;;  %v11394_v18 = vmul.f32 %v8977_v26, %v11271_v36  ;;  %v8978_v48 = vld [vmem:[#allocation2 + $0x148] sm:$0xff]  ;;  %v8979_v40 = vld [vmem:[#allocation2 + $0x150] sm:$0xff] }
 0x613   : > { %14685 = vst [vmem:[#allocation61_spill] sm:$0xff] %v11385_v7  ;;  %14686 = vst [vmem:[#allocation62_spill] sm:$0xff] %v11388_v5  ;;  %v11397_v31 = vmul.f32 %v8978_v48, %v11271_v36  ;;  %v11400_v23 = vmul.f32 %v8979_v40, %v11271_v36  ;;  %v8980_v7 = vld [vmem:[#allocation2 + $0x158] sm:$0xff]  ;;  %v8981_v5 = vld [vmem:[#allocation2 + $0x160] sm:$0xff] }
 0x614   : > { %14687 = vst [vmem:[#allocation63_spill] sm:$0xff] %v11391_v12  ;;  %14688 = vst [vmem:[#allocation64_spill] sm:$0xff] %v11394_v18  ;;  %v11403_v58 = vmul.f32 %v8980_v7, %v11271_v36  ;;  %v11406_v30 = vmul.f32 %v8981_v5, %v11271_v36  ;;  %v8982_v12 = vld [vmem:[#allocation2 + $0x168] sm:$0xff]  ;;  %v8983_v18 = vld [vmem:[#allocation2 + $0x170] sm:$0xff] }
 0x615   : > { %14689 = vst [vmem:[#allocation65_spill] sm:$0xff] %v11397_v31  ;;  %14690 = vst [vmem:[#allocation66_spill] sm:$0xff] %v11400_v23  ;;  %v11409_v26 = vmul.f32 %v8982_v12, %v11271_v36  ;;  %v11412_v48 = vmul.f32 %v8983_v18, %v11271_v36  ;;  %v8984_v31 = vld [vmem:[#allocation2 + $0x178] sm:$0xff]  ;;  %v8985_v23 = vld [vmem:[#allocation2 + $0x180] sm:$0xff] }
 0x616   : > { %14691 = vst [vmem:[#allocation67_spill] sm:$0xff] %v11403_v58  ;;  %14692 = vst [vmem:[#allocation68_spill] sm:$0xff] %v11406_v30  ;;  %v11415_v40 = vmul.f32 %v8984_v31, %v11271_v36  ;;  %v11418_v7 = vmul.f32 %v8985_v23, %v11271_v36  ;;  %v8986_v58 = vld [vmem:[#allocation2 + $0x188] sm:$0xff]  ;;  %v8987_v30 = vld [vmem:[#allocation2 + $0x190] sm:$0xff] }
 0x617   : > { %14693 = vst [vmem:[#allocation69_spill] sm:$0xff] %v11409_v26  ;;  %14694 = vst [vmem:[#allocation70_spill] sm:$0xff] %v11412_v48  ;;  %v11421_v5 = vmul.f32 %v8986_v58, %v11271_v36  ;;  %v11424_v12 = vmul.f32 %v8987_v30, %v11271_v36  ;;  %v8988_v26 = vld [vmem:[#allocation2 + $0x198] sm:$0xff]  ;;  %v8989_v48 = vld [vmem:[#allocation2 + $0x1a0] sm:$0xff] }
 0x618   : > { %14695 = vst [vmem:[#allocation71_spill] sm:$0xff] %v11415_v40  ;;  %14696 = vst [vmem:[#allocation72_spill] sm:$0xff] %v11418_v7  ;;  %v11427_v18 = vmul.f32 %v8988_v26, %v11271_v36  ;;  %v11430_v31 = vmul.f32 %v8989_v48, %v11271_v36  ;;  %v8990_v40 = vld [vmem:[#allocation2 + $0x1a8] sm:$0xff]  ;;  %v8991_v7 = vld [vmem:[#allocation2 + $0x1b0] sm:$0xff] }
 0x619   : > { %14697 = vst [vmem:[#allocation73_spill] sm:$0xff] %v11421_v5  ;;  %14698 = vst [vmem:[#allocation74_spill] sm:$0xff] %v11424_v12  ;;  %v11433_v23 = vmul.f32 %v8990_v40, %v11271_v36  ;;  %v11436_v58 = vmul.f32 %v8991_v7, %v11271_v36  ;;  %v8992_v5 = vld [vmem:[#allocation2 + $0x1b8] sm:$0xff]  ;;  %v8993_v12 = vld [vmem:[#allocation2 + $0x1c0] sm:$0xff] }
 0x61a   : > { %14699 = vst [vmem:[#allocation75_spill] sm:$0xff] %v11427_v18  ;;  %14700 = vst [vmem:[#allocation76_spill] sm:$0xff] %v11430_v31  ;;  %v11439_v30 = vmul.f32 %v8992_v5, %v11271_v36  ;;  %v11442_v26 = vmul.f32 %v8993_v12, %v11271_v36  ;;  %v8994_v18 = vld [vmem:[#allocation2 + $0x1c8] sm:$0xff]  ;;  %v8995_v31 = vld [vmem:[#allocation2 + $0x1d0] sm:$0xff] }
 0x61b   : > { %14701 = vst [vmem:[#allocation77_spill] sm:$0xff] %v11433_v23  ;;  %14702 = vst [vmem:[#allocation78_spill] sm:$0xff] %v11436_v58  ;;  %v11445_v48 = vmul.f32 %v8994_v18, %v11271_v36  ;;  %v11448_v40 = vmul.f32 %v8995_v31, %v11271_v36  ;;  %v8996_v23 = vld [vmem:[#allocation2 + $0x1d8] sm:$0xff]  ;;  %v8997_v58 = vld [vmem:[#allocation2 + $0x1e0] sm:$0xff] }
 0x61c   : > { %14703 = vst [vmem:[#allocation79_spill] sm:$0xff] %v11439_v30  ;;  %14704 = vst [vmem:[#allocation80_spill] sm:$0xff] %v11442_v26  ;;  %v11451_v7 = vmul.f32 %v8996_v23, %v11271_v36  ;;  %v11454_v5 = vmul.f32 %v8997_v58, %v11271_v36  ;;  %v8998_v30 = vld [vmem:[#allocation2 + $0x1e8] sm:$0xff]  ;;  %v8999_v26 = vld [vmem:[#allocation2 + $0x1f0] sm:$0xff] }
 0x61d   : > { %14705 = vst [vmem:[#allocation81_spill] sm:$0xff] %v11445_v48  ;;  %14706 = vst [vmem:[#allocation82_spill] sm:$0xff] %v11448_v40  ;;  %v11457_v12 = vmul.f32 %v8998_v30, %v11271_v36  ;;  %v11460_v18 = vmul.f32 %v8999_v26, %v11271_v36  ;;  %v9000_v48 = vld [vmem:[#allocation2 + $0x1f8] sm:$0xff]  ;;  %v9001_v40 = vld [vmem:[#allocation2 + $0x200] sm:$0xff] }
 0x61e   : > { %14707 = vst [vmem:[#allocation83_spill] sm:$0xff] %v11451_v7  ;;  %14708 = vst [vmem:[#allocation84_spill] sm:$0xff] %v11454_v5  ;;  %v11463_v31 = vmul.f32 %v9000_v48, %v11271_v36  ;;  %v11466_v23 = vmul.f32 %v9001_v40, %v11271_v36  ;;  %v9002_v7 = vld [vmem:[#allocation2 + $0x208] sm:$0xff]  ;;  %v9003_v5 = vld [vmem:[#allocation2 + $0x210] sm:$0xff] }
 0x61f   : > { %14709 = vst [vmem:[#allocation85_spill] sm:$0xff] %v11457_v12  ;;  %14710 = vst [vmem:[#allocation86_spill] sm:$0xff] %v11460_v18  ;;  %v11469_v58 = vmul.f32 %v9002_v7, %v11271_v36  ;;  %v11472_v30 = vmul.f32 %v9003_v5, %v11271_v36  ;;  %v9004_v12 = vld [vmem:[#allocation2 + $0x218] sm:$0xff]  ;;  %v9005_v18 = vld [vmem:[#allocation2 + $0x220] sm:$0xff] }
 0x620   : > { %14711 = vst [vmem:[#allocation87_spill] sm:$0xff] %v11463_v31  ;;  %14712 = vst [vmem:[#allocation88_spill] sm:$0xff] %v11466_v23  ;;  %v11475_v26 = vmul.f32 %v9004_v12, %v11271_v36  ;;  %v11478_v48 = vmul.f32 %v9005_v18, %v11271_v36  ;;  %v9006_v31 = vld [vmem:[#allocation2 + $0x228] sm:$0xff]  ;;  %v9007_v23 = vld [vmem:[#allocation2 + $0x230] sm:$0xff] }
 0x621   : > { %14713 = vst [vmem:[#allocation89_spill] sm:$0xff] %v11469_v58  ;;  %14714 = vst [vmem:[#allocation90_spill] sm:$0xff] %v11472_v30  ;;  %v11481_v40 = vmul.f32 %v9006_v31, %v11271_v36  ;;  %v11484_v7 = vmul.f32 %v9007_v23, %v11271_v36  ;;  %v9008_v58 = vld [vmem:[#allocation2 + $0x238] sm:$0xff]  ;;  %v9009_v30 = vld [vmem:[#allocation2 + $0x240] sm:$0xff] }
 0x622   : > { %14715 = vst [vmem:[#allocation91_spill] sm:$0xff] %v11475_v26  ;;  %14716 = vst [vmem:[#allocation92_spill] sm:$0xff] %v11478_v48  ;;  %v11487_v5 = vmul.f32 %v9008_v58, %v11271_v36  ;;  %v11490_v12 = vmul.f32 %v9009_v30, %v11271_v36  ;;  %v9010_v26 = vld [vmem:[#allocation2 + $0x248] sm:$0xff]  ;;  %v9011_v48 = vld [vmem:[#allocation2 + $0x250] sm:$0xff] }
 0x623   : > { %14717 = vst [vmem:[#allocation93_spill] sm:$0xff] %v11481_v40  ;;  %14718 = vst [vmem:[#allocation94_spill] sm:$0xff] %v11484_v7  ;;  %v11493_v18 = vmul.f32 %v9010_v26, %v11271_v36  ;;  %v11496_v31 = vmul.f32 %v9011_v48, %v11271_v36  ;;  %v9012_v40 = vld [vmem:[#allocation2 + $0x258] sm:$0xff]  ;;  %v9013_v7 = vld [vmem:[#allocation2 + $0x260] sm:$0xff] }
 0x624   : > { %14719 = vst [vmem:[#allocation95_spill] sm:$0xff] %v11487_v5  ;;  %14720 = vst [vmem:[#allocation96_spill] sm:$0xff] %v11490_v12  ;;  %v11499_v23 = vmul.f32 %v9012_v40, %v11271_v36  ;;  %v11502_v58 = vmul.f32 %v9013_v7, %v11271_v36  ;;  %v9014_v5 = vld [vmem:[#allocation2 + $0x268] sm:$0xff]  ;;  %v9015_v12 = vld [vmem:[#allocation2 + $0x270] sm:$0xff] }
 0x625   : > { %14721 = vst [vmem:[#allocation97_spill] sm:$0xff] %v11493_v18  ;;  %14722 = vst [vmem:[#allocation98_spill] sm:$0xff] %v11496_v31  ;;  %v11505_v30 = vmul.f32 %v9014_v5, %v11271_v36  ;;  %v11508_v26 = vmul.f32 %v9015_v12, %v11271_v36  ;;  %v9016_v18 = vld [vmem:[#allocation2 + $0x278] sm:$0xff]  ;;  %v9017_v31 = vld [vmem:[#allocation2 + $0x280] sm:$0xff] }
 0x626   : > { %14723 = vst [vmem:[#allocation99_spill] sm:$0xff] %v11499_v23  ;;  %14724 = vst [vmem:[#allocation100_spill] sm:$0xff] %v11502_v58  ;;  %v11511_v48 = vmul.f32 %v9016_v18, %v11271_v36  ;;  %v11514_v40 = vmul.f32 %v9017_v31, %v11271_v36  ;;  %v9018_v23 = vld [vmem:[#allocation2 + $0x288] sm:$0xff]  ;;  %v9019_v58 = vld [vmem:[#allocation2 + $0x290] sm:$0xff] }
 0x627   : > { %14725 = vst [vmem:[#allocation101_spill] sm:$0xff] %v11505_v30  ;;  %14726 = vst [vmem:[#allocation102_spill] sm:$0xff] %v11508_v26  ;;  %v11517_v7 = vmul.f32 %v9018_v23, %v11271_v36  ;;  %v11520_v5 = vmul.f32 %v9019_v58, %v11271_v36  ;;  %v9020_v30 = vld [vmem:[#allocation2 + $0x298] sm:$0xff]  ;;  %v9021_v26 = vld [vmem:[#allocation2 + $0x2a0] sm:$0xff] }
 0x628   : > { %14727 = vst [vmem:[#allocation103_spill] sm:$0xff] %v11511_v48  ;;  %14728 = vst [vmem:[#allocation104_spill] sm:$0xff] %v11514_v40  ;;  %v11523_v12 = vmul.f32 %v9020_v30, %v11271_v36  ;;  %v11526_v18 = vmul.f32 %v9021_v26, %v11271_v36  ;;  %v9022_v48 = vld [vmem:[#allocation2 + $0x2a8] sm:$0xff]  ;;  %v9023_v40 = vld [vmem:[#allocation2 + $0x2b0] sm:$0xff] }
 0x629   : > { %14729 = vst [vmem:[#allocation105_spill] sm:$0xff] %v11517_v7  ;;  %14730 = vst [vmem:[#allocation106_spill] sm:$0xff] %v11520_v5  ;;  %v11529_v31 = vmul.f32 %v9022_v48, %v11271_v36  ;;  %v11532_v23 = vmul.f32 %v9023_v40, %v11271_v36  ;;  %v9024_v7 = vld [vmem:[#allocation2 + $0x2b8] sm:$0xff]  ;;  %v9025_v5 = vld [vmem:[#allocation2 + $0x2c0] sm:$0xff] }
 0x62a   : > { %14731 = vst [vmem:[#allocation107_spill] sm:$0xff] %v11523_v12  ;;  %14732 = vst [vmem:[#allocation108_spill] sm:$0xff] %v11526_v18  ;;  %v11535_v58 = vmul.f32 %v9024_v7, %v11271_v36  ;;  %v11538_v30 = vmul.f32 %v9025_v5, %v11271_v36  ;;  %v9026_v12 = vld [vmem:[#allocation2 + $0x2c8] sm:$0xff]  ;;  %v9027_v18 = vld [vmem:[#allocation2 + $0x2d0] sm:$0xff] }
 0x62b   : > { %14733 = vst [vmem:[#allocation109_spill] sm:$0xff] %v11529_v31  ;;  %14734 = vst [vmem:[#allocation110_spill] sm:$0xff] %v11532_v23  ;;  %v11541_v26 = vmul.f32 %v9026_v12, %v11271_v36  ;;  %v11544_v48 = vmul.f32 %v9027_v18, %v11271_v36  ;;  %v9028_v31 = vld [vmem:[#allocation2 + $0x2d8] sm:$0xff]  ;;  %v9029_v23 = vld [vmem:[#allocation2 + $0x2e0] sm:$0xff] }
 0x62c   : > { %14735 = vst [vmem:[#allocation111_spill] sm:$0xff] %v11535_v58  ;;  %14736 = vst [vmem:[#allocation112_spill] sm:$0xff] %v11538_v30  ;;  %v11547_v40 = vmul.f32 %v9028_v31, %v11271_v36  ;;  %v11550_v7 = vmul.f32 %v9029_v23, %v11271_v36  ;;  %v9030_v58 = vld [vmem:[#allocation2 + $0x2e8] sm:$0xff]  ;;  %v9031_v30 = vld [vmem:[#allocation2 + $0x2f0] sm:$0xff] }
 0x62d   : > { %14737 = vst [vmem:[#allocation113_spill] sm:$0xff] %v11541_v26  ;;  %14738 = vst [vmem:[#allocation114_spill] sm:$0xff] %v11544_v48  ;;  %v11553_v5 = vmul.f32 %v9030_v58, %v11271_v36  ;;  %v11556_v12 = vmul.f32 %v9031_v30, %v11271_v36  ;;  %v9032_v26 = vld [vmem:[#allocation2 + $0x2f8] sm:$0xff]  ;;  %v9033_v48 = vld [vmem:[#allocation2 + $0x300] sm:$0xff] }
 0x62e   : > { %14739 = vst [vmem:[#allocation115_spill] sm:$0xff] %v11547_v40  ;;  %14740 = vst [vmem:[#allocation116_spill] sm:$0xff] %v11550_v7  ;;  %v11559_v18 = vmul.f32 %v9032_v26, %v11271_v36  ;;  %v11562_v31 = vmul.f32 %v9033_v48, %v11271_v36  ;;  %v9034_v40 = vld [vmem:[#allocation2 + $0x308] sm:$0xff]  ;;  %v9035_v7 = vld [vmem:[#allocation2 + $0x310] sm:$0xff] }
 0x62f   : > { %14741 = vst [vmem:[#allocation117_spill] sm:$0xff] %v11553_v5  ;;  %14742 = vst [vmem:[#allocation118_spill] sm:$0xff] %v11556_v12  ;;  %v11565_v23 = vmul.f32 %v9034_v40, %v11271_v36  ;;  %v11568_v58 = vmul.f32 %v9035_v7, %v11271_v36  ;;  %v9036_v5 = vld [vmem:[#allocation2 + $0x318] sm:$0xff]  ;;  %v9037_v12 = vld [vmem:[#allocation2 + $0x320] sm:$0xff] }
 0x630   : > { %14743 = vst [vmem:[#allocation119_spill] sm:$0xff] %v11559_v18  ;;  %14744 = vst [vmem:[#allocation120_spill] sm:$0xff] %v11562_v31  ;;  %v11571_v30 = vmul.f32 %v9036_v5, %v11271_v36  ;;  %v11574_v26 = vmul.f32 %v9037_v12, %v11271_v36  ;;  %v9038_v18 = vld [vmem:[#allocation2 + $0x328] sm:$0xff]  ;;  %v9039_v31 = vld [vmem:[#allocation2 + $0x330] sm:$0xff] }
 0x631   : > { %14745 = vst [vmem:[#allocation121_spill] sm:$0xff] %v11565_v23  ;;  %14746 = vst [vmem:[#allocation122_spill] sm:$0xff] %v11568_v58  ;;  %v11577_v48 = vmul.f32 %v9038_v18, %v11271_v36  ;;  %v11580_v40 = vmul.f32 %v9039_v31, %v11271_v36  ;;  %v9040_v23 = vld [vmem:[#allocation2 + $0x338] sm:$0xff]  ;;  %v9041_v58 = vld [vmem:[#allocation2 + $0x340] sm:$0xff] }
 0x632   : > { %14747 = vst [vmem:[#allocation123_spill] sm:$0xff] %v11571_v30  ;;  %14748 = vst [vmem:[#allocation124_spill] sm:$0xff] %v11574_v26  ;;  %v11583_v7 = vmul.f32 %v9040_v23, %v11271_v36  ;;  %v11586_v5 = vmul.f32 %v9041_v58, %v11271_v36  ;;  %v9042_v30 = vld [vmem:[#allocation2 + $0x348] sm:$0xff]  ;;  %v9043_v26 = vld [vmem:[#allocation2 + $0x350] sm:$0xff]  ;;  %v11599_v23 = vmul.f32 %v11271_v36, %v10653_v49 }
 0x633   : > { %14749 = vst [vmem:[#allocation125_spill] sm:$0xff] %v11577_v48  ;;  %v11589_v12 = vmul.f32 %v9042_v30, %v11271_v36  ;;  %v11592_v18 = vmul.f32 %v9043_v26, %v11271_v36  ;;  %v9044_v48 = vld [vmem:[#allocation2 + $0x358] sm:$0xff]  ;;  %v11603_v58 = vmul.f32 %v11271_v36, %v10661_v59  ;;  %v11607_v30 = vmul.f32 %v11271_v36, %v10670_v63 }
 0x634   : > { %v11595_v31 = vmul.f32 %v9044_v48, %v11271_v36  ;;  %v11611_v26 = vmul.f32 %v11271_v36, %v10679_v9  ;;  %v11615_v48 = vmul.f32 %v11271_v36, %v10688_v15  ;;  %v11619_v49 = vmul.f32 %v11271_v36, %v10697_v22 }
 0x635   : > { %v11623_v59 = vmul.f32 %v11271_v36, %v10706_v28  ;;  %v11627_v63 = vmul.f32 %v11271_v36, %v10715_v38  ;;  %v11631_v9 = vmul.f32 %v11271_v36, %v10724_v45  ;;  %v11635_v15 = vmul.f32 %v11271_v36, %v10733_v52 }
 0x636   : > { %v11639_v22 = vmul.f32 %v11271_v36, %v10742_v60  ;;  %v11643_v28 = vmul.f32 %v11271_v36, %v10751_v0  ;;  %v11647_v38 = vmul.f32 %v11271_v36, %v10760_v37  ;;  %v11651_v45 = vmul.f32 %v11271_v36, %v10769_v39 }
 0x637   : > { %v11655_v52 = vmul.f32 %v11271_v36, %v10778_v42  ;;  %v11659_v60 = vmul.f32 %v11271_v36, %v10787_v44  ;;  %v11663_v0 = vmul.f32 %v11271_v36, %v10796_v47  ;;  %v11667_v37 = vmul.f32 %v11271_v36, %v10805_v50 }
 0x638   : > { %v11671_v39 = vmul.f32 %v11271_v36, %v10814_v53  ;;  %v11675_v42 = vmul.f32 %v11271_v36, %v10823_v57  ;;  %v11679_v44 = vmul.f32 %v11271_v36, %v10832_v54  ;;  %v11683_v47 = vmul.f32 %v11271_v36, %v10841_v62 }
 0x639   : > { %14750 = vst [vmem:[#allocation126_spill] sm:$0xff] %v11659_v60  ;;  %14751 = vst [vmem:[#allocation127_spill] sm:$0xff] %v11663_v0  ;;  %v14757_v0 = vld [vmem:[#allocation12_spill] sm:$0xff]  ;;  %v14825_v60 = vld [vmem:[#allocation46_spill] sm:$0xff] }
 0x63a   : > { %14752 = vst [vmem:[#allocation128_spill] sm:$0xff] %v11667_v37  ;;  %14753 = vst [vmem:[#allocation129_spill] sm:$0xff] %v11671_v39  ;;  %v11687_v50 = vmul.f32 %v11271_v36, %v14757_v0  ;;  %v14759_v37 = vld [vmem:[#allocation13_spill] sm:$0xff]  ;;  %v14761_v39 = vld [vmem:[#allocation14_spill] sm:$0xff] }
 0x63b   : > { %14754 = vst [vmem:[#allocation130_spill] sm:$0xff] %v11675_v42  ;;  %14755 = vst [vmem:[#allocation131_spill] sm:$0xff] %v11679_v44  ;;  %v11691_v53 = vmul.f32 %v11271_v36, %v14759_v37  ;;  %v11695_v57 = vmul.f32 %v11271_v36, %v14761_v39  ;;  %v14763_v42 = vld [vmem:[#allocation15_spill] sm:$0xff]  ;;  %v14765_v44 = vld [vmem:[#allocation16_spill] sm:$0xff] }
 0x63c   : > { %14756 = vst [vmem:[#allocation132_spill] sm:$0xff] %v11683_v47  ;;  %14758 = vst [vmem:[#allocation12_spill] sm:$0xff] %v11687_v50  ;;  %v11699_v54 = vmul.f32 %v11271_v36, %v14763_v42  ;;  %v11703_v62 = vmul.f32 %v11271_v36, %v14765_v44  ;;  %v14767_v47 = vld [vmem:[#allocation17_spill] sm:$0xff]  ;;  %v14769_v50 = vld [vmem:[#allocation18_spill] sm:$0xff] }
 0x63d   : > { %14760 = vst [vmem:[#allocation13_spill] sm:$0xff] %v11691_v53  ;;  %14762 = vst [vmem:[#allocation14_spill] sm:$0xff] %v11695_v57  ;;  %v11707_v0 = vmul.f32 %v11271_v36, %v14767_v47  ;;  %v11711_v37 = vmul.f32 %v11271_v36, %v14769_v50  ;;  %v14771_v53 = vld [vmem:[#allocation19_spill] sm:$0xff]  ;;  %v14773_v57 = vld [vmem:[#allocation20_spill] sm:$0xff] }
 0x63e   : > { %14764 = vst [vmem:[#allocation15_spill] sm:$0xff] %v11699_v54  ;;  %14766 = vst [vmem:[#allocation16_spill] sm:$0xff] %v11703_v62  ;;  %v11715_v39 = vmul.f32 %v11271_v36, %v14771_v53  ;;  %v11719_v42 = vmul.f32 %v11271_v36, %v14773_v57  ;;  %v14775_v54 = vld [vmem:[#allocation21_spill] sm:$0xff]  ;;  %v14777_v62 = vld [vmem:[#allocation22_spill] sm:$0xff] }
 0x63f   : > { %14768 = vst [vmem:[#allocation17_spill] sm:$0xff] %v11707_v0  ;;  %14770 = vst [vmem:[#allocation18_spill] sm:$0xff] %v11711_v37  ;;  %v11723_v44 = vmul.f32 %v11271_v36, %v14775_v54  ;;  %v11727_v47 = vmul.f32 %v11271_v36, %v14777_v62  ;;  %v14779_v0 = vld [vmem:[#allocation23_spill] sm:$0xff]  ;;  %v14781_v37 = vld [vmem:[#allocation24_spill] sm:$0xff] }
 0x640   : > { %14772 = vst [vmem:[#allocation19_spill] sm:$0xff] %v11715_v39  ;;  %14774 = vst [vmem:[#allocation20_spill] sm:$0xff] %v11719_v42  ;;  %v11731_v50 = vmul.f32 %v11271_v36, %v14779_v0  ;;  %v11735_v53 = vmul.f32 %v11271_v36, %v14781_v37  ;;  %v14783_v39 = vld [vmem:[#allocation25_spill] sm:$0xff]  ;;  %v14785_v42 = vld [vmem:[#allocation26_spill] sm:$0xff] }
 0x641   : > { %14776 = vst [vmem:[#allocation21_spill] sm:$0xff] %v11723_v44  ;;  %14778 = vst [vmem:[#allocation22_spill] sm:$0xff] %v11727_v47  ;;  %v11739_v57 = vmul.f32 %v11271_v36, %v14783_v39  ;;  %v11743_v54 = vmul.f32 %v11271_v36, %v14785_v42  ;;  %v14787_v44 = vld [vmem:[#allocation27_spill] sm:$0xff]  ;;  %v14789_v47 = vld [vmem:[#allocation28_spill] sm:$0xff] }
 0x642   : > { %14780 = vst [vmem:[#allocation23_spill] sm:$0xff] %v11731_v50  ;;  %14782 = vst [vmem:[#allocation24_spill] sm:$0xff] %v11735_v53  ;;  %v11747_v62 = vmul.f32 %v11271_v36, %v14787_v44  ;;  %v11751_v0 = vmul.f32 %v11271_v36, %v14789_v47  ;;  %v14791_v50 = vld [vmem:[#allocation29_spill] sm:$0xff]  ;;  %v14793_v53 = vld [vmem:[#allocation30_spill] sm:$0xff] }
 0x643   : > { %14784 = vst [vmem:[#allocation25_spill] sm:$0xff] %v11739_v57  ;;  %14786 = vst [vmem:[#allocation26_spill] sm:$0xff] %v11743_v54  ;;  %v11755_v37 = vmul.f32 %v11271_v36, %v14791_v50  ;;  %v11759_v39 = vmul.f32 %v11271_v36, %v14793_v53  ;;  %v14795_v57 = vld [vmem:[#allocation31_spill] sm:$0xff]  ;;  %v14797_v54 = vld [vmem:[#allocation32_spill] sm:$0xff] }
 0x644   : > { %14788 = vst [vmem:[#allocation27_spill] sm:$0xff] %v11747_v62  ;;  %14790 = vst [vmem:[#allocation28_spill] sm:$0xff] %v11751_v0  ;;  %v11763_v42 = vmul.f32 %v11271_v36, %v14795_v57  ;;  %v11767_v44 = vmul.f32 %v11271_v36, %v14797_v54  ;;  %v14799_v62 = vld [vmem:[#allocation33_spill] sm:$0xff]  ;;  %v14801_v0 = vld [vmem:[#allocation34_spill] sm:$0xff] }
 0x645   : > { %14792 = vst [vmem:[#allocation29_spill] sm:$0xff] %v11755_v37  ;;  %14794 = vst [vmem:[#allocation30_spill] sm:$0xff] %v11759_v39  ;;  %v11771_v47 = vmul.f32 %v11271_v36, %v14799_v62  ;;  %v11775_v50 = vmul.f32 %v11271_v36, %v14801_v0  ;;  %v14803_v37 = vld [vmem:[#allocation35_spill] sm:$0xff]  ;;  %v14805_v39 = vld [vmem:[#allocation36_spill] sm:$0xff] }
 0x646   : > { %14796 = vst [vmem:[#allocation31_spill] sm:$0xff] %v11763_v42  ;;  %14798 = vst [vmem:[#allocation32_spill] sm:$0xff] %v11767_v44  ;;  %v11779_v53 = vmul.f32 %v11271_v36, %v14803_v37  ;;  %v11783_v57 = vmul.f32 %v11271_v36, %v14805_v39  ;;  %v14807_v42 = vld [vmem:[#allocation37_spill] sm:$0xff]  ;;  %v14809_v44 = vld [vmem:[#allocation38_spill] sm:$0xff] }
 0x647   : > { %14800 = vst [vmem:[#allocation33_spill] sm:$0xff] %v11771_v47  ;;  %14802 = vst [vmem:[#allocation34_spill] sm:$0xff] %v11775_v50  ;;  %v11787_v54 = vmul.f32 %v11271_v36, %v14807_v42  ;;  %v11791_v62 = vmul.f32 %v11271_v36, %v14809_v44  ;;  %v14811_v47 = vld [vmem:[#allocation39_spill] sm:$0xff]  ;;  %v14813_v50 = vld [vmem:[#allocation40_spill] sm:$0xff] }
 0x648   : > { %14804 = vst [vmem:[#allocation35_spill] sm:$0xff] %v11779_v53  ;;  %14806 = vst [vmem:[#allocation36_spill] sm:$0xff] %v11783_v57  ;;  %v11795_v0 = vmul.f32 %v11271_v36, %v14811_v47  ;;  %v11799_v37 = vmul.f32 %v11271_v36, %v14813_v50  ;;  %v14815_v39 = vld [vmem:[#allocation41_spill] sm:$0xff]  ;;  %v14817_v42 = vld [vmem:[#allocation42_spill] sm:$0xff] }
 0x649   : > { %14808 = vst [vmem:[#allocation37_spill] sm:$0xff] %v11787_v54  ;;  %14810 = vst [vmem:[#allocation38_spill] sm:$0xff] %v11791_v62  ;;  %v11805_v57 = vmul.f32 %v11271_v36, %v14815_v39  ;;  %v11809_v54 = vmul.f32 %v11271_v36, %v14817_v42  ;;  %v14819_v44 = vld [vmem:[#allocation43_spill] sm:$0xff]  ;;  %v14821_v47 = vld [vmem:[#allocation44_spill] sm:$0xff]  ;;  %v11825_v39 = vmul.f32 %v11271_v36, %v14825_v60 }
 0x64a   : > { %14812 = vst [vmem:[#allocation39_spill] sm:$0xff] %v11795_v0  ;;  %14814 = vst [vmem:[#allocation40_spill] sm:$0xff] %v11799_v37  ;;  %v11813_v62 = vmul.f32 %v11271_v36, %v14819_v44  ;;  %v11817_v0 = vmul.f32 %v11271_v36, %v14821_v47  ;;  %v14823_v50 = vld [vmem:[#allocation45_spill] sm:$0xff] }
 0x64b   : > { %14816 = vst [vmem:[#allocation41_spill] sm:$0xff] %v11805_v57  ;;  %14818 = vst [vmem:[#allocation42_spill] sm:$0xff] %v11809_v54  ;;  %v11821_v37 = vmul.f32 %v11271_v36, %v14823_v50  ;;  %v14826_v57 = vld [vmem:[#allocation47_spill] sm:$0xff]  ;;  %v14828_v54 = vld [vmem:[#allocation48_spill] sm:$0xff] }
 0x64c   : > { %14820 = vst [vmem:[#allocation43_spill] sm:$0xff] %v11813_v62  ;;  %14822 = vst [vmem:[#allocation44_spill] sm:$0xff] %v11817_v0  ;;  %v11829_v42 = vmul.f32 %v11271_v36, %v14826_v57  ;;  %v11833_v44 = vmul.f32 %v11271_v36, %v14828_v54  ;;  %v14829_v62 = vld [vmem:[#allocation49_spill] sm:$0xff]  ;;  %v14830_v0 = vld [vmem:[#allocation50_spill] sm:$0xff]  ;;  %v11849_v57 = vmul.f32 %v11271_v36, %v11210_v16 }
 0x64d   : > { %14824 = vst [vmem:[#allocation45_spill] sm:$0xff] %v11821_v37  ;;  %v11837_v47 = vmul.f32 %v11271_v36, %v14829_v62  ;;  %v11841_v50 = vmul.f32 %v11271_v36, %v14830_v0  ;;  %v14831_v37 = vld [vmem:[#allocation51_spill] sm:$0xff] }
 0x64e   : > { %14827 = vst [vmem:[#allocation46_spill] sm:$0xff] %v11829_v42  ;;  %v11845_v60 = vmul.f32 %v11271_v36, %v14831_v37  ;;  %v14832_v42 = vld [vmem:[#allocation52_spill] sm:$0xff] }
 0x64f   : > { %v11853_v54 = vmul.f32 %v11271_v36, %v14832_v42  ;;  %v14838_v42 = vld [vmem:[#allocation53_spill] sm:$0xff] }
 0x676   : > { %v11801_v53 = vpop.permute.xlu1 %6575 }
 0x677   : > { %v11857_v62 = vadd.f32 %v11801_v53, %v11274_v33  ;;  %v11861_v0 = vadd.f32 %v11801_v53, %v11277_v6  ;;  %v11865_v37 = vadd.f32 %v11801_v53, %v11280_v20  ;;  %v11869_v16 = vadd.f32 %v11801_v53, %v11283_v32 }
 0x678   : > { %v11873_v36 = vadd.f32 %v11801_v53, %v11286_v46  ;;  %v11877_v33 = vadd.f32 %v11801_v53, %v11289_v34  ;;  %v11881_v6 = vadd.f32 %v11801_v53, %v11292_v13  ;;  %v11885_v20 = vadd.f32 %v11801_v53, %v11295_v1 }
 0x679   : > { %v11889_v32 = vadd.f32 %v11801_v53, %v11298_v29  ;;  %v11893_v46 = vadd.f32 %v11801_v53, %v11301_v11  ;;  %v11897_v34 = vadd.f32 %v11801_v53, %v11304_v55  ;;  %v11901_v13 = vadd.f32 %v11801_v53, %v11307_v2 }
 0x67a   : > { %v11905_v1 = vadd.f32 %v11801_v53, %v11310_v43  ;;  %v11909_v29 = vadd.f32 %v11801_v53, %v11313_v25  ;;  %v11913_v11 = vadd.f32 %v11801_v53, %v11316_v19  ;;  %v11917_v55 = vadd.f32 %v11801_v53, %v11319_v56 }
 0x67b   : > { %v11921_v2 = vadd.f32 %v11801_v53, %v11322_v35  ;;  %v11925_v43 = vadd.f32 %v11801_v53, %v11325_v8  ;;  %v11929_v25 = vadd.f32 %v11801_v53, %v11328_v3  ;;  %v11933_v19 = vadd.f32 %v11801_v53, %v11331_v24 }
 0x67c   : > { %v11937_v56 = vadd.f32 %v11801_v53, %v11334_v14  ;;  %v11941_v35 = vadd.f32 %v11801_v53, %v11337_v4  ;;  %v11945_v8 = vadd.f32 %v11801_v53, %v11340_v17  ;;  %v11949_v3 = vadd.f32 %v11801_v53, %v11343_v41 }
 0x67d   : > { %v11953_v24 = vadd.f32 %v11801_v53, %v11346_v51  ;;  %v11957_v14 = vadd.f32 %v11801_v53, %v11349_v21  ;;  %v11961_v4 = vadd.f32 %v11801_v53, %v11352_v10  ;;  %v11965_v17 = vadd.f32 %v11801_v53, %v11355_v61 }
 0x67e   : > { %v11969_v41 = vadd.f32 %v11801_v53, %v11358_v27  ;;  %v11973_v51 = vadd.f32 %v11801_v53, %v14838_v42  ;;  %vm6750_vm4 = vcmp.ge.f32.partialorder %v11857_v62, 0.0  ;;  %vm6751_vm5 = vcmp.ge.f32.partialorder %v11861_v0, 0.0 }
 0x67f   : > { %14833 = vst [vmem:[#allocation47_spill] sm:$0xff] %v11953_v24  ;;  %14834 = vst [vmem:[#allocation48_spill] sm:$0xff] %v11957_v14  ;;  %v14840_v24 = vld [vmem:[#allocation54_spill] sm:$0xff]  ;;  %v14842_v14 = vld [vmem:[#allocation55_spill] sm:$0xff]  ;;  %vm6752_vm6 = vcmp.ge.f32.partialorder %v11865_v37, 0.0  ;;  %vm6753_vm7 = vcmp.ge.f32.partialorder %v11869_v16, 0.0 }
 0x680   : > { %14835 = vst [vmem:[#allocation49_spill] sm:$0xff] %v11961_v4  ;;  %14836 = vst [vmem:[#allocation50_spill] sm:$0xff] %v11965_v17  ;;  %v11977_v21 = vadd.f32 %v11801_v53, %v14840_v24  ;;  %v11981_v10 = vadd.f32 %v11801_v53, %v14842_v14  ;;  %v14844_v4 = vld [vmem:[#allocation56_spill] sm:$0xff]  ;;  %v14846_v17 = vld [vmem:[#allocation57_spill] sm:$0xff]  ;;  %vm6754_vm8 = vcmp.ge.f32.partialorder %v11873_v36, 0.0  ;;  %vm6755_vm9 = vcmp.ge.f32.partialorder %v11877_v33, 0.0 }
 0x681   : > { %14837 = vst [vmem:[#allocation51_spill] sm:$0xff] %v11969_v41  ;;  %14839 = vst [vmem:[#allocation52_spill] sm:$0xff] %v11973_v51  ;;  %v11985_v61 = vadd.f32 %v11801_v53, %v14844_v4  ;;  %v11989_v27 = vadd.f32 %v11801_v53, %v14846_v17  ;;  %v14848_v41 = vld [vmem:[#allocation58_spill] sm:$0xff]  ;;  %v14850_v51 = vld [vmem:[#allocation59_spill] sm:$0xff]  ;;  %vm6756_vm10 = vcmp.ge.f32.partialorder %v11881_v6, 0.0  ;;  %vm6757_vm11 = vcmp.ge.f32.partialorder %v11885_v20, 0.0 }
 0x682   : > { %14841 = vst [vmem:[#allocation53_spill] sm:$0xff] %v11977_v21  ;;  %14843 = vst [vmem:[#allocation54_spill] sm:$0xff] %v11981_v10  ;;  %v11993_v42 = vadd.f32 %v11801_v53, %v14848_v41  ;;  %v11997_v24 = vadd.f32 %v11801_v53, %v14850_v51  ;;  %v14852_v21 = vld [vmem:[#allocation60_spill] sm:$0xff]  ;;  %v14854_v10 = vld [vmem:[#allocation61_spill] sm:$0xff]  ;;  %vm6758_vm12 = vcmp.ge.f32.partialorder %v11889_v32, 0.0  ;;  %vm6759_vm13 = vcmp.ge.f32.partialorder %v11893_v46, 0.0 }
 0x683   : > { %14845 = vst [vmem:[#allocation55_spill] sm:$0xff] %v11985_v61  ;;  %14847 = vst [vmem:[#allocation56_spill] sm:$0xff] %v11989_v27  ;;  %v12001_v14 = vadd.f32 %v11801_v53, %v14852_v21  ;;  %v12005_v4 = vadd.f32 %v11801_v53, %v14854_v10  ;;  %v14856_v61 = vld [vmem:[#allocation62_spill] sm:$0xff]  ;;  %v14858_v27 = vld [vmem:[#allocation63_spill] sm:$0xff]  ;;  %vm6760_vm14 = vcmp.ge.f32.partialorder %v11897_v34, 0.0  ;;  %vm6761_vm15 = vcmp.ge.f32.partialorder %v11901_v13, 0.0 }
 0x684   : > { %14849 = vst [vmem:[#allocation57_spill] sm:$0xff] %v11993_v42  ;;  %14851 = vst [vmem:[#allocation58_spill] sm:$0xff] %v11997_v24  ;;  %v12009_v17 = vadd.f32 %v11801_v53, %v14856_v61  ;;  %v12013_v41 = vadd.f32 %v11801_v53, %v14858_v27  ;;  %v14860_v42 = vld [vmem:[#allocation64_spill] sm:$0xff]  ;;  %v14862_v24 = vld [vmem:[#allocation65_spill] sm:$0xff]  ;;  %vm6762_vm0 = vcmp.ge.f32.partialorder %v11905_v1, 0.0  ;;  %vm6763_vm2 = vcmp.ge.f32.partialorder %v11909_v29, 0.0 }
 0x685   : > { %14853 = vst [vmem:[#allocation59_spill] sm:$0xff] %v12001_v14  ;;  %14855 = vst [vmem:[#allocation60_spill] sm:$0xff] %v12005_v4  ;;  %v12017_v51 = vadd.f32 %v11801_v53, %v14860_v42  ;;  %v12021_v21 = vadd.f32 %v11801_v53, %v14862_v24  ;;  %v14864_v14 = vld [vmem:[#allocation66_spill] sm:$0xff]  ;;  %v14866_v4 = vld [vmem:[#allocation67_spill] sm:$0xff]  ;;  %vm6764_vm3 = vcmp.ge.f32.partialorder %v11913_v11, 0.0 }
 0x686   : > { %14857 = vst [vmem:[#allocation61_spill] sm:$0xff] %v12009_v17  ;;  %14859 = vst [vmem:[#allocation62_spill] sm:$0xff] %v12013_v41  ;;  %v12025_v10 = vadd.f32 %v11801_v53, %v14864_v14  ;;  %v12029_v61 = vadd.f32 %v11801_v53, %v14866_v4  ;;  %v14868_v17 = vld [vmem:[#allocation68_spill] sm:$0xff]  ;;  %v14870_v41 = vld [vmem:[#allocation69_spill] sm:$0xff] }
 0x687   : > { %14861 = vst [vmem:[#allocation63_spill] sm:$0xff] %v12017_v51  ;;  %14863 = vst [vmem:[#allocation64_spill] sm:$0xff] %v12021_v21  ;;  %v12033_v27 = vadd.f32 %v11801_v53, %v14868_v17  ;;  %v12037_v42 = vadd.f32 %v11801_v53, %v14870_v41  ;;  %v14872_v51 = vld [vmem:[#allocation70_spill] sm:$0xff]  ;;  %v14874_v21 = vld [vmem:[#allocation71_spill] sm:$0xff] }
 0x688   : > { %14865 = vst [vmem:[#allocation65_spill] sm:$0xff] %v12025_v10  ;;  %14867 = vst [vmem:[#allocation66_spill] sm:$0xff] %v12029_v61  ;;  %v12041_v24 = vadd.f32 %v11801_v53, %v14872_v51  ;;  %v12045_v14 = vadd.f32 %v11801_v53, %v14874_v21  ;;  %v14876_v10 = vld [vmem:[#allocation72_spill] sm:$0xff]  ;;  %v14878_v61 = vld [vmem:[#allocation73_spill] sm:$0xff] }
 0x689   : > { %14869 = vst [vmem:[#allocation67_spill] sm:$0xff] %v12033_v27  ;;  %14871 = vst [vmem:[#allocation68_spill] sm:$0xff] %v12037_v42  ;;  %v12049_v4 = vadd.f32 %v11801_v53, %v14876_v10  ;;  %v12053_v17 = vadd.f32 %v11801_v53, %v14878_v61  ;;  %v14880_v27 = vld [vmem:[#allocation74_spill] sm:$0xff]  ;;  %v14882_v42 = vld [vmem:[#allocation75_spill] sm:$0xff] }
 0x68a   : > { %14873 = vst [vmem:[#allocation69_spill] sm:$0xff] %v12041_v24  ;;  %14875 = vst [vmem:[#allocation70_spill] sm:$0xff] %v12045_v14  ;;  %v12057_v41 = vadd.f32 %v11801_v53, %v14880_v27  ;;  %v12061_v51 = vadd.f32 %v11801_v53, %v14882_v42  ;;  %v14884_v24 = vld [vmem:[#allocation76_spill] sm:$0xff]  ;;  %v14886_v14 = vld [vmem:[#allocation77_spill] sm:$0xff] }
 0x68b   : > { %14877 = vst [vmem:[#allocation71_spill] sm:$0xff] %v12049_v4  ;;  %14879 = vst [vmem:[#allocation72_spill] sm:$0xff] %v12053_v17  ;;  %v12065_v21 = vadd.f32 %v11801_v53, %v14884_v24  ;;  %v12069_v10 = vadd.f32 %v11801_v53, %v14886_v14  ;;  %v14888_v4 = vld [vmem:[#allocation78_spill] sm:$0xff]  ;;  %v14890_v17 = vld [vmem:[#allocation79_spill] sm:$0xff] }
 0x68c   : > { %14881 = vst [vmem:[#allocation73_spill] sm:$0xff] %v12057_v41  ;;  %14883 = vst [vmem:[#allocation74_spill] sm:$0xff] %v12061_v51  ;;  %v12073_v61 = vadd.f32 %v11801_v53, %v14888_v4  ;;  %v12077_v27 = vadd.f32 %v11801_v53, %v14890_v17  ;;  %v14892_v41 = vld [vmem:[#allocation80_spill] sm:$0xff]  ;;  %v14894_v51 = vld [vmem:[#allocation81_spill] sm:$0xff] }
 0x68d   : > { %14885 = vst [vmem:[#allocation75_spill] sm:$0xff] %v12065_v21  ;;  %14887 = vst [vmem:[#allocation76_spill] sm:$0xff] %v12069_v10  ;;  %v12081_v42 = vadd.f32 %v11801_v53, %v14892_v41  ;;  %v12085_v24 = vadd.f32 %v11801_v53, %v14894_v51  ;;  %v14896_v21 = vld [vmem:[#allocation82_spill] sm:$0xff]  ;;  %v14898_v10 = vld [vmem:[#allocation83_spill] sm:$0xff] }
 0x68e   : > { %14889 = vst [vmem:[#allocation77_spill] sm:$0xff] %v12073_v61  ;;  %14891 = vst [vmem:[#allocation78_spill] sm:$0xff] %v12077_v27  ;;  %v12089_v14 = vadd.f32 %v11801_v53, %v14896_v21  ;;  %v12093_v4 = vadd.f32 %v11801_v53, %v14898_v10  ;;  %v14900_v61 = vld [vmem:[#allocation84_spill] sm:$0xff]  ;;  %v14902_v27 = vld [vmem:[#allocation85_spill] sm:$0xff] }
 0x68f   : > { %14893 = vst [vmem:[#allocation79_spill] sm:$0xff] %v12081_v42  ;;  %14895 = vst [vmem:[#allocation80_spill] sm:$0xff] %v12085_v24  ;;  %v12097_v17 = vadd.f32 %v11801_v53, %v14900_v61  ;;  %v12101_v41 = vadd.f32 %v11801_v53, %v14902_v27  ;;  %v14904_v42 = vld [vmem:[#allocation86_spill] sm:$0xff]  ;;  %v14906_v24 = vld [vmem:[#allocation87_spill] sm:$0xff] }
 0x690   : > { %14897 = vst [vmem:[#allocation81_spill] sm:$0xff] %v12089_v14  ;;  %14899 = vst [vmem:[#allocation82_spill] sm:$0xff] %v12093_v4  ;;  %v12105_v51 = vadd.f32 %v11801_v53, %v14904_v42  ;;  %v12109_v21 = vadd.f32 %v11801_v53, %v14906_v24  ;;  %v14908_v14 = vld [vmem:[#allocation88_spill] sm:$0xff]  ;;  %v14910_v4 = vld [vmem:[#allocation89_spill] sm:$0xff] }
 0x691   : > { %14901 = vst [vmem:[#allocation83_spill] sm:$0xff] %v12097_v17  ;;  %14903 = vst [vmem:[#allocation84_spill] sm:$0xff] %v12101_v41  ;;  %v12113_v10 = vadd.f32 %v11801_v53, %v14908_v14  ;;  %v12117_v61 = vadd.f32 %v11801_v53, %v14910_v4  ;;  %v14912_v17 = vld [vmem:[#allocation90_spill] sm:$0xff]  ;;  %v14914_v41 = vld [vmem:[#allocation91_spill] sm:$0xff] }
 0x692   : > { %14905 = vst [vmem:[#allocation85_spill] sm:$0xff] %v12105_v51  ;;  %14907 = vst [vmem:[#allocation86_spill] sm:$0xff] %v12109_v21  ;;  %v12121_v27 = vadd.f32 %v11801_v53, %v14912_v17  ;;  %v12125_v42 = vadd.f32 %v11801_v53, %v14914_v41  ;;  %v14916_v51 = vld [vmem:[#allocation92_spill] sm:$0xff]  ;;  %v14918_v21 = vld [vmem:[#allocation93_spill] sm:$0xff] }
 0x693   : > { %14909 = vst [vmem:[#allocation87_spill] sm:$0xff] %v12113_v10  ;;  %14911 = vst [vmem:[#allocation88_spill] sm:$0xff] %v12117_v61  ;;  %v12129_v24 = vadd.f32 %v11801_v53, %v14916_v51  ;;  %v12133_v14 = vadd.f32 %v11801_v53, %v14918_v21  ;;  %v14920_v10 = vld [vmem:[#allocation94_spill] sm:$0xff]  ;;  %v14922_v61 = vld [vmem:[#allocation95_spill] sm:$0xff] }
 0x694   : > { %14913 = vst [vmem:[#allocation89_spill] sm:$0xff] %v12121_v27  ;;  %14915 = vst [vmem:[#allocation90_spill] sm:$0xff] %v12125_v42  ;;  %v12137_v4 = vadd.f32 %v11801_v53, %v14920_v10  ;;  %v12141_v17 = vadd.f32 %v11801_v53, %v14922_v61  ;;  %v14924_v27 = vld [vmem:[#allocation96_spill] sm:$0xff]  ;;  %v14926_v42 = vld [vmem:[#allocation97_spill] sm:$0xff] }
 0x695   : > { %14917 = vst [vmem:[#allocation91_spill] sm:$0xff] %v12129_v24  ;;  %14919 = vst [vmem:[#allocation92_spill] sm:$0xff] %v12133_v14  ;;  %v12145_v41 = vadd.f32 %v11801_v53, %v14924_v27  ;;  %v12149_v51 = vadd.f32 %v11801_v53, %v14926_v42  ;;  %v14928_v24 = vld [vmem:[#allocation98_spill] sm:$0xff]  ;;  %v14930_v14 = vld [vmem:[#allocation99_spill] sm:$0xff] }
 0x696   : > { %14921 = vst [vmem:[#allocation93_spill] sm:$0xff] %v12137_v4  ;;  %14923 = vst [vmem:[#allocation94_spill] sm:$0xff] %v12141_v17  ;;  %v12153_v21 = vadd.f32 %v11801_v53, %v14928_v24  ;;  %v12157_v10 = vadd.f32 %v11801_v53, %v14930_v14  ;;  %v14932_v4 = vld [vmem:[#allocation100_spill] sm:$0xff]  ;;  %v14934_v17 = vld [vmem:[#allocation101_spill] sm:$0xff] }
 0x697   : > { %14925 = vst [vmem:[#allocation95_spill] sm:$0xff] %v12145_v41  ;;  %14927 = vst [vmem:[#allocation96_spill] sm:$0xff] %v12149_v51  ;;  %v12161_v61 = vadd.f32 %v11801_v53, %v14932_v4  ;;  %v12165_v27 = vadd.f32 %v11801_v53, %v14934_v17  ;;  %v14936_v41 = vld [vmem:[#allocation102_spill] sm:$0xff]  ;;  %v14938_v51 = vld [vmem:[#allocation103_spill] sm:$0xff] }
 0x698   : > { %14929 = vst [vmem:[#allocation97_spill] sm:$0xff] %v12153_v21  ;;  %14931 = vst [vmem:[#allocation98_spill] sm:$0xff] %v12157_v10  ;;  %v12169_v42 = vadd.f32 %v11801_v53, %v14936_v41  ;;  %v12173_v24 = vadd.f32 %v11801_v53, %v14938_v51  ;;  %v14940_v21 = vld [vmem:[#allocation104_spill] sm:$0xff]  ;;  %v14942_v10 = vld [vmem:[#allocation105_spill] sm:$0xff] }
 0x699   : > { %14933 = vst [vmem:[#allocation99_spill] sm:$0xff] %v12161_v61  ;;  %14935 = vst [vmem:[#allocation100_spill] sm:$0xff] %v12165_v27  ;;  %v12177_v14 = vadd.f32 %v11801_v53, %v14940_v21  ;;  %v12181_v4 = vadd.f32 %v11801_v53, %v14942_v10  ;;  %v14944_v61 = vld [vmem:[#allocation106_spill] sm:$0xff]  ;;  %v14946_v27 = vld [vmem:[#allocation107_spill] sm:$0xff] }
 0x69a   : > { %14937 = vst [vmem:[#allocation101_spill] sm:$0xff] %v12169_v42  ;;  %14939 = vst [vmem:[#allocation102_spill] sm:$0xff] %v12173_v24  ;;  %v12185_v17 = vadd.f32 %v11801_v53, %v14944_v61  ;;  %v12189_v41 = vadd.f32 %v11801_v53, %v14946_v27  ;;  %v14948_v42 = vld [vmem:[#allocation108_spill] sm:$0xff]  ;;  %v14950_v24 = vld [vmem:[#allocation109_spill] sm:$0xff] }
 0x69b   : > { %14941 = vst [vmem:[#allocation103_spill] sm:$0xff] %v12177_v14  ;;  %14943 = vst [vmem:[#allocation104_spill] sm:$0xff] %v12181_v4  ;;  %v12193_v51 = vadd.f32 %v11801_v53, %v14948_v42  ;;  %v12197_v21 = vadd.f32 %v11801_v53, %v14950_v24  ;;  %v14952_v14 = vld [vmem:[#allocation110_spill] sm:$0xff]  ;;  %v14954_v4 = vld [vmem:[#allocation111_spill] sm:$0xff] }
 0x69c   : > { %14945 = vst [vmem:[#allocation105_spill] sm:$0xff] %v12185_v17  ;;  %14947 = vst [vmem:[#allocation106_spill] sm:$0xff] %v12189_v41  ;;  %v12201_v10 = vadd.f32 %v11801_v53, %v14952_v14  ;;  %v12205_v61 = vadd.f32 %v11801_v53, %v14954_v4  ;;  %v14956_v17 = vld [vmem:[#allocation112_spill] sm:$0xff]  ;;  %v14958_v41 = vld [vmem:[#allocation113_spill] sm:$0xff] }
 0x69d   : > { %14949 = vst [vmem:[#allocation107_spill] sm:$0xff] %v12193_v51  ;;  %14951 = vst [vmem:[#allocation108_spill] sm:$0xff] %v12197_v21  ;;  %v12209_v27 = vadd.f32 %v11801_v53, %v14956_v17  ;;  %v12213_v42 = vadd.f32 %v11801_v53, %v14958_v41  ;;  %v14960_v51 = vld [vmem:[#allocation114_spill] sm:$0xff]  ;;  %v14962_v21 = vld [vmem:[#allocation115_spill] sm:$0xff] }
 0x69e   : > { %14953 = vst [vmem:[#allocation109_spill] sm:$0xff] %v12201_v10  ;;  %14955 = vst [vmem:[#allocation110_spill] sm:$0xff] %v12205_v61  ;;  %v12217_v24 = vadd.f32 %v11801_v53, %v14960_v51  ;;  %v12221_v14 = vadd.f32 %v11801_v53, %v14962_v21  ;;  %v14964_v10 = vld [vmem:[#allocation116_spill] sm:$0xff]  ;;  %v14966_v61 = vld [vmem:[#allocation117_spill] sm:$0xff] }
 0x69f   : > { %14957 = vst [vmem:[#allocation111_spill] sm:$0xff] %v12209_v27  ;;  %14959 = vst [vmem:[#allocation112_spill] sm:$0xff] %v12213_v42  ;;  %v12225_v4 = vadd.f32 %v11801_v53, %v14964_v10  ;;  %v12229_v17 = vadd.f32 %v11801_v53, %v14966_v61  ;;  %v14968_v27 = vld [vmem:[#allocation118_spill] sm:$0xff]  ;;  %v14970_v42 = vld [vmem:[#allocation119_spill] sm:$0xff] }
 0x6a0   : > { %14961 = vst [vmem:[#allocation113_spill] sm:$0xff] %v12217_v24  ;;  %14963 = vst [vmem:[#allocation114_spill] sm:$0xff] %v12221_v14  ;;  %v12233_v41 = vadd.f32 %v11801_v53, %v14968_v27  ;;  %v12237_v51 = vadd.f32 %v11801_v53, %v14970_v42  ;;  %v14972_v24 = vld [vmem:[#allocation120_spill] sm:$0xff]  ;;  %v14973_v14 = vld [vmem:[#allocation121_spill] sm:$0xff] }
 0x6a1   : > { %14965 = vst [vmem:[#allocation115_spill] sm:$0xff] %v12225_v4  ;;  %14967 = vst [vmem:[#allocation116_spill] sm:$0xff] %v12229_v17  ;;  %v12241_v21 = vadd.f32 %v11801_v53, %v14972_v24  ;;  %v12245_v10 = vadd.f32 %v11801_v53, %v14973_v14  ;;  %v14974_v4 = vld [vmem:[#allocation122_spill] sm:$0xff]  ;;  %v14975_v17 = vld [vmem:[#allocation123_spill] sm:$0xff]  ;;  %v12265_v14 = vadd.f32 %v11801_v53, %v11580_v40 }
 0x6a2   : > { %14969 = vst [vmem:[#allocation117_spill] sm:$0xff] %v12233_v41  ;;  %14971 = vst [vmem:[#allocation118_spill] sm:$0xff] %v12237_v51  ;;  %v12249_v61 = vadd.f32 %v11801_v53, %v14974_v4  ;;  %v12253_v27 = vadd.f32 %v11801_v53, %v14975_v17  ;;  %v14977_v41 = vld [vmem:[#allocation124_spill] sm:$0xff]  ;;  %v14979_v51 = vld [vmem:[#allocation125_spill] sm:$0xff]  ;;  %v12269_v4 = vadd.f32 %v11801_v53, %v11583_v7 }
 0x6a3   : > { %v12257_v42 = vadd.f32 %v11801_v53, %v14977_v41  ;;  %v12261_v24 = vadd.f32 %v11801_v53, %v14979_v51  ;;  %14981 = vst [vmem:[#allocation122_spill] sm:$0xff] %v12265_v14  ;;  %v12273_v17 = vadd.f32 %v11801_v53, %v11586_v5  ;;  %v12277_v41 = vadd.f32 %v11801_v53, %v11589_v12 }
 0x6a4   : > { %14976 = vst [vmem:[#allocation119_spill] sm:$0xff] %v12253_v27  ;;  %14982 = vst [vmem:[#allocation123_spill] sm:$0xff] %v12269_v4  ;;  %v12281_v51 = vadd.f32 %v11801_v53, %v11592_v18  ;;  %v12285_v40 = vadd.f32 %v11801_v53, %v11595_v31  ;;  %v12289_v7 = vadd.f32 %v11801_v53, %v11599_v23 }
 0x6a5   : > { %14978 = vst [vmem:[#allocation120_spill] sm:$0xff] %v12257_v42  ;;  %14980 = vst [vmem:[#allocation121_spill] sm:$0xff] %v12261_v24  ;;  %v12293_v5 = vadd.f32 %v11801_v53, %v11603_v58  ;;  %v12297_v12 = vadd.f32 %v11801_v53, %v11607_v30  ;;  %v12301_v18 = vadd.f32 %v11801_v53, %v11611_v26 }
 0x6a6   : > { %14983 = vst [vmem:[#allocation124_spill] sm:$0xff] %v12273_v17  ;;  %14984 = vst [vmem:[#allocation125_spill] sm:$0xff] %v12277_v41  ;;  %v12305_v31 = vadd.f32 %v11801_v53, %v11615_v48  ;;  %v12309_v23 = vadd.f32 %v11801_v53, %v11619_v49  ;;  %v12313_v58 = vadd.f32 %v11801_v53, %v11623_v59  ;;  %v15117_v17 = vld [vmem:[#allocation58_spill] sm:$0xff] }
 0x6a7   : > { %14985 = vst [vmem:[#allocation133_spill] sm:$0xff] %v12281_v51  ;;  %14986 = vst [vmem:[#allocation134_spill] sm:$0xff] %v12285_v40  ;;  %v12317_v30 = vadd.f32 %v11801_v53, %v11627_v63  ;;  %v12321_v26 = vadd.f32 %v11801_v53, %v11631_v9  ;;  %v12325_v48 = vadd.f32 %v11801_v53, %v11635_v15  ;;  %v12685_v4 = vmul.f32 0.2, %v15117_v17 }
 0x6a8   : > { %14987 = vst [vmem:[#allocation135_spill] sm:$0xff] %v12289_v7  ;;  %14988 = vst [vmem:[#allocation136_spill] sm:$0xff] %v12293_v5  ;;  %v12329_v49 = vadd.f32 %v11801_v53, %v11639_v22  ;;  %v12333_v59 = vadd.f32 %v11801_v53, %v11643_v28  ;;  %v12337_v63 = vadd.f32 %v11801_v53, %v11647_v38  ;;  %v15110_v7 = vld [vmem:[#allocation55_spill] sm:$0xff] }
 0x6a9   : > { %14989 = vst [vmem:[#allocation137_spill] sm:$0xff] %v12297_v12  ;;  %14990 = vst [vmem:[#allocation138_spill] sm:$0xff] %v12301_v18  ;;  %v12341_v9 = vadd.f32 %v11801_v53, %v11651_v45  ;;  %v12345_v15 = vadd.f32 %v11801_v53, %v11655_v52  ;;  %v12670_v40 = vmul.f32 0.2, %v15110_v7 }
 0x6aa   : > { %14991 = vst [vmem:[#allocation139_spill] sm:$0xff] %v12305_v31  ;;  %14992 = vst [vmem:[#allocation140_spill] sm:$0xff] %v12309_v23  ;;  %v15105_v31 = vld [vmem:[#allocation52_spill] sm:$0xff] }
 0x6ab   : > { %14993 = vst [vmem:[#allocation141_spill] sm:$0xff] %v12313_v58  ;;  %14994 = vst [vmem:[#allocation142_spill] sm:$0xff] %v12317_v30  ;;  %v12655_v18 = vmul.f32 0.2, %v15105_v31 }
 0x6ac   : > { %14995 = vst [vmem:[#allocation143_spill] sm:$0xff] %v12321_v26  ;;  %14996 = vst [vmem:[#allocation144_spill] sm:$0xff] %v12325_v48  ;;  %v15002_v48 = vld [vmem:[#allocation126_spill] sm:$0xff]  ;;  %v15101_v26 = vld [vmem:[#allocation49_spill] sm:$0xff] }
 0x6ad   : > { %14997 = vst [vmem:[#allocation145_spill] sm:$0xff] %v12329_v49  ;;  %14998 = vst [vmem:[#allocation146_spill] sm:$0xff] %v12333_v59  ;;  %v12349_v22 = vadd.f32 %v11801_v53, %v15002_v48  ;;  %v15004_v49 = vld [vmem:[#allocation127_spill] sm:$0xff]  ;;  %v15006_v59 = vld [vmem:[#allocation128_spill] sm:$0xff]  ;;  %v12640_v30 = vmul.f32 0.2, %v15101_v26 }
 0x6ae   : > { %14999 = vst [vmem:[#allocation147_spill] sm:$0xff] %v12337_v63  ;;  %15000 = vst [vmem:[#allocation148_spill] sm:$0xff] %v12341_v9  ;;  %v12353_v28 = vadd.f32 %v11801_v53, %v15004_v49  ;;  %v12357_v38 = vadd.f32 %v11801_v53, %v15006_v59  ;;  %v15008_v63 = vld [vmem:[#allocation129_spill] sm:$0xff]  ;;  %v15010_v9 = vld [vmem:[#allocation130_spill] sm:$0xff] }
 0x6af   : > { %15001 = vst [vmem:[#allocation149_spill] sm:$0xff] %v12345_v15  ;;  %15003 = vst [vmem:[#allocation126_spill] sm:$0xff] %v12349_v22  ;;  %v12361_v45 = vadd.f32 %v11801_v53, %v15008_v63  ;;  %v12365_v52 = vadd.f32 %v11801_v53, %v15010_v9  ;;  %v15012_v15 = vld [vmem:[#allocation131_spill] sm:$0xff]  ;;  %v15014_v22 = vld [vmem:[#allocation132_spill] sm:$0xff] }
 0x6b0   : > { %15005 = vst [vmem:[#allocation127_spill] sm:$0xff] %v12353_v28  ;;  %15007 = vst [vmem:[#allocation128_spill] sm:$0xff] %v12357_v38  ;;  %v12369_v48 = vadd.f32 %v11801_v53, %v15012_v15  ;;  %v12373_v49 = vadd.f32 %v11801_v53, %v15014_v22  ;;  %v15016_v28 = vld [vmem:[#allocation12_spill] sm:$0xff]  ;;  %v15018_v38 = vld [vmem:[#allocation13_spill] sm:$0xff] }
 0x6b1   : > { %15009 = vst [vmem:[#allocation129_spill] sm:$0xff] %v12361_v45  ;;  %15011 = vst [vmem:[#allocation130_spill] sm:$0xff] %v12365_v52  ;;  %v12377_v59 = vadd.f32 %v11801_v53, %v15016_v28  ;;  %v12381_v63 = vadd.f32 %v11801_v53, %v15018_v38  ;;  %v15020_v45 = vld [vmem:[#allocation14_spill] sm:$0xff]  ;;  %v15022_v52 = vld [vmem:[#allocation15_spill] sm:$0xff] }
 0x6b2   : > { %15013 = vst [vmem:[#allocation131_spill] sm:$0xff] %v12369_v48  ;;  %15015 = vst [vmem:[#allocation132_spill] sm:$0xff] %v12373_v49  ;;  %v12385_v9 = vadd.f32 %v11801_v53, %v15020_v45  ;;  %v12389_v15 = vadd.f32 %v11801_v53, %v15022_v52  ;;  %v15024_v48 = vld [vmem:[#allocation16_spill] sm:$0xff]  ;;  %v15026_v49 = vld [vmem:[#allocation17_spill] sm:$0xff] }
 0x6b3   : > { %15017 = vst [vmem:[#allocation12_spill] sm:$0xff] %v12377_v59  ;;  %15019 = vst [vmem:[#allocation13_spill] sm:$0xff] %v12381_v63  ;;  %v12393_v22 = vadd.f32 %v11801_v53, %v15024_v48  ;;  %v12397_v28 = vadd.f32 %v11801_v53, %v15026_v49  ;;  %v15028_v59 = vld [vmem:[#allocation18_spill] sm:$0xff]  ;;  %v15030_v63 = vld [vmem:[#allocation19_spill] sm:$0xff] }
 0x6b4   : > { %15021 = vst [vmem:[#allocation14_spill] sm:$0xff] %v12385_v9  ;;  %15023 = vst [vmem:[#allocation15_spill] sm:$0xff] %v12389_v15  ;;  %v12401_v38 = vadd.f32 %v11801_v53, %v15028_v59  ;;  %v12405_v45 = vadd.f32 %v11801_v53, %v15030_v63  ;;  %v15032_v9 = vld [vmem:[#allocation20_spill] sm:$0xff]  ;;  %v15034_v15 = vld [vmem:[#allocation21_spill] sm:$0xff] }
 0x6b5   : > { %15025 = vst [vmem:[#allocation16_spill] sm:$0xff] %v12393_v22  ;;  %15027 = vst [vmem:[#allocation17_spill] sm:$0xff] %v12397_v28  ;;  %v12409_v52 = vadd.f32 %v11801_v53, %v15032_v9  ;;  %v12413_v48 = vadd.f32 %v11801_v53, %v15034_v15  ;;  %v15036_v22 = vld [vmem:[#allocation22_spill] sm:$0xff]  ;;  %v15038_v28 = vld [vmem:[#allocation23_spill] sm:$0xff] }
 0x6b6   : > { %15029 = vst [vmem:[#allocation18_spill] sm:$0xff] %v12401_v38  ;;  %15031 = vst [vmem:[#allocation19_spill] sm:$0xff] %v12405_v45  ;;  %v12417_v49 = vadd.f32 %v11801_v53, %v15036_v22  ;;  %v12421_v59 = vadd.f32 %v11801_v53, %v15038_v28  ;;  %v15040_v38 = vld [vmem:[#allocation24_spill] sm:$0xff]  ;;  %v15042_v45 = vld [vmem:[#allocation25_spill] sm:$0xff] }
 0x6b7   : > { %15033 = vst [vmem:[#allocation20_spill] sm:$0xff] %v12409_v52  ;;  %15035 = vst [vmem:[#allocation21_spill] sm:$0xff] %v12413_v48  ;;  %v12425_v63 = vadd.f32 %v11801_v53, %v15040_v38  ;;  %v12429_v9 = vadd.f32 %v11801_v53, %v15042_v45  ;;  %v15044_v52 = vld [vmem:[#allocation26_spill] sm:$0xff]  ;;  %v15046_v48 = vld [vmem:[#allocation27_spill] sm:$0xff] }
 0x6b8   : > { %15037 = vst [vmem:[#allocation22_spill] sm:$0xff] %v12417_v49  ;;  %15039 = vst [vmem:[#allocation23_spill] sm:$0xff] %v12421_v59  ;;  %v12433_v15 = vadd.f32 %v11801_v53, %v15044_v52  ;;  %v12437_v22 = vadd.f32 %v11801_v53, %v15046_v48  ;;  %v15048_v49 = vld [vmem:[#allocation28_spill] sm:$0xff]  ;;  %v15050_v59 = vld [vmem:[#allocation29_spill] sm:$0xff] }
 0x6b9   : > { %15041 = vst [vmem:[#allocation24_spill] sm:$0xff] %v12425_v63  ;;  %15043 = vst [vmem:[#allocation25_spill] sm:$0xff] %v12429_v9  ;;  %v12441_v28 = vadd.f32 %v11801_v53, %v15048_v49  ;;  %v12445_v38 = vadd.f32 %v11801_v53, %v15050_v59  ;;  %v15052_v63 = vld [vmem:[#allocation30_spill] sm:$0xff]  ;;  %v15054_v9 = vld [vmem:[#allocation31_spill] sm:$0xff] }
 0x6ba   : > { %15045 = vst [vmem:[#allocation26_spill] sm:$0xff] %v12433_v15  ;;  %15047 = vst [vmem:[#allocation27_spill] sm:$0xff] %v12437_v22  ;;  %v12449_v45 = vadd.f32 %v11801_v53, %v15052_v63  ;;  %v12453_v52 = vadd.f32 %v11801_v53, %v15054_v9  ;;  %v15056_v15 = vld [vmem:[#allocation32_spill] sm:$0xff]  ;;  %v15058_v22 = vld [vmem:[#allocation33_spill] sm:$0xff] }
 0x6bb   : > { %15049 = vst [vmem:[#allocation28_spill] sm:$0xff] %v12441_v28  ;;  %15051 = vst [vmem:[#allocation29_spill] sm:$0xff] %v12445_v38  ;;  %v12457_v48 = vadd.f32 %v11801_v53, %v15056_v15  ;;  %v12461_v49 = vadd.f32 %v11801_v53, %v15058_v22  ;;  %v15060_v28 = vld [vmem:[#allocation34_spill] sm:$0xff]  ;;  %v15062_v38 = vld [vmem:[#allocation35_spill] sm:$0xff] }
 0x6bc   : > { %15053 = vst [vmem:[#allocation30_spill] sm:$0xff] %v12449_v45  ;;  %15055 = vst [vmem:[#allocation31_spill] sm:$0xff] %v12453_v52  ;;  %v12465_v59 = vadd.f32 %v11801_v53, %v15060_v28  ;;  %v12469_v63 = vadd.f32 %v11801_v53, %v15062_v38  ;;  %v15064_v45 = vld [vmem:[#allocation36_spill] sm:$0xff]  ;;  %v15066_v52 = vld [vmem:[#allocation37_spill] sm:$0xff] }
 0x6bd   : > { %15057 = vst [vmem:[#allocation32_spill] sm:$0xff] %v12457_v48  ;;  %15059 = vst [vmem:[#allocation33_spill] sm:$0xff] %v12461_v49  ;;  %v12473_v9 = vadd.f32 %v11801_v53, %v15064_v45  ;;  %v12477_v15 = vadd.f32 %v11801_v53, %v15066_v52  ;;  %v15068_v48 = vld [vmem:[#allocation38_spill] sm:$0xff]  ;;  %v15070_v49 = vld [vmem:[#allocation39_spill] sm:$0xff] }
 0x6be   : > { %15061 = vst [vmem:[#allocation34_spill] sm:$0xff] %v12465_v59  ;;  %15063 = vst [vmem:[#allocation35_spill] sm:$0xff] %v12469_v63  ;;  %v12481_v22 = vadd.f32 %v11801_v53, %v15068_v48  ;;  %v12485_v28 = vadd.f32 %v11801_v53, %v15070_v49  ;;  %v15072_v59 = vld [vmem:[#allocation40_spill] sm:$0xff]  ;;  %v15074_v63 = vld [vmem:[#allocation41_spill] sm:$0xff] }
 0x6bf   : > { %15065 = vst [vmem:[#allocation36_spill] sm:$0xff] %v12473_v9  ;;  %15067 = vst [vmem:[#allocation37_spill] sm:$0xff] %v12477_v15  ;;  %v12489_v38 = vadd.f32 %v11801_v53, %v15072_v59  ;;  %v12493_v45 = vadd.f32 %v11801_v53, %v15074_v63  ;;  %v15076_v9 = vld [vmem:[#allocation42_spill] sm:$0xff]  ;;  %v15078_v15 = vld [vmem:[#allocation43_spill] sm:$0xff]  ;;  %v12513_v63 = vadd.f32 %v11801_v53, %v11825_v39 }
 0x6c0   : > { %15069 = vst [vmem:[#allocation38_spill] sm:$0xff] %v12481_v22  ;;  %15071 = vst [vmem:[#allocation39_spill] sm:$0xff] %v12485_v28  ;;  %v12497_v52 = vadd.f32 %v11801_v53, %v15076_v9  ;;  %v12501_v48 = vadd.f32 %v11801_v53, %v15078_v15  ;;  %v15080_v22 = vld [vmem:[#allocation44_spill] sm:$0xff]  ;;  %v15082_v28 = vld [vmem:[#allocation45_spill] sm:$0xff]  ;;  %v12521_v15 = vadd.f32 %v11801_v53, %v11833_v44 }
 0x6c1   : > { %15073 = vst [vmem:[#allocation40_spill] sm:$0xff] %v12489_v38  ;;  %15075 = vst [vmem:[#allocation41_spill] sm:$0xff] %v12493_v45  ;;  %v12505_v49 = vadd.f32 %v11801_v53, %v15080_v22  ;;  %v12509_v59 = vadd.f32 %v11801_v53, %v15082_v28  ;;  %v15085_v45 = vld [vmem:[#allocation46_spill] sm:$0xff]  ;;  %v12525_v22 = vadd.f32 %v11801_v53, %v11837_v47  ;;  %v6922_v47 = vmul.f32 0.2, %v11857_v62 }
 0x6c2   : > { %15077 = vst [vmem:[#allocation42_spill] sm:$0xff] %v12497_v52  ;;  %15079 = vst [vmem:[#allocation43_spill] sm:$0xff] %v12501_v48  ;;  %v12517_v9 = vadd.f32 %v11801_v53, %v15085_v45  ;;  %v12529_v28 = vadd.f32 %v11801_v53, %v11841_v50  ;;  %v12533_v39 = vadd.f32 %v11801_v53, %v11845_v60  ;;  %v6923_v50 = vmul.f32 0.2, %v11861_v0 }
 0x6c3   : > { %15081 = vst [vmem:[#allocation44_spill] sm:$0xff] %v12505_v49  ;;  %15083 = vst [vmem:[#allocation45_spill] sm:$0xff] %v12509_v59  ;;  %v12546_v44 = vadd.f32 %v11801_v53, %v11849_v57  ;;  %v6924_v60 = vmul.f32 0.2, %v11865_v37  ;;  %v12554_v45 = vadd.f32 %v11801_v53, %v11853_v54  ;;  %v6927_v57 = vmul.f32 0.2, %v11877_v33 }
 0x6c4   : > { %15084 = vst [vmem:[#allocation150_spill] sm:$0xff] %v12513_v63  ;;  %15086 = vst [vmem:[#allocation46_spill] sm:$0xff] %v12517_v9  ;;  %v12567_v53 = vsel %vm6750_vm4, %v11857_v62, %v6922_v47  ;;  %v6931_v54 = vmul.f32 0.2, %v11893_v46  ;;  %v6933_v9 = vmul.f32 0.2, %v11901_v13  ;;  %v12576_v63 = vsel %vm6751_vm5, %v11861_v0, %v6923_v50 }
 0x6c5   : > { %15087 = vst [vmem:[#allocation151_spill] sm:$0xff] %v12521_v15  ;;  %15088 = vst [vmem:[#allocation152_spill] sm:$0xff] %v12525_v22  ;;  %v6929_v22 = vmul.f32 0.2, %v11885_v20  ;;  %v6930_v15 = vmul.f32 0.2, %v11889_v32  ;;  %v12630_v52 = vsel %vm6755_vm9, %v11877_v33, %v6927_v57 }
 0x6c6   : > { %15089 = vst [vmem:[#allocation153_spill] sm:$0xff] %v12529_v28  ;;  %15090 = vst [vmem:[#allocation154_spill] sm:$0xff] %v12533_v39  ;;  %v6925_v39 = vmul.f32 0.2, %v11869_v16  ;;  %v6926_v28 = vmul.f32 0.2, %v11873_v36 }
 0x6c7   : > { %15091 = vst [vmem:[#allocation155_spill] sm:$0xff] %v12546_v44  ;;  %15092 = vst [vmem:[#allocation156_spill] sm:$0xff] %v12554_v45  ;;  %v6928_v44 = vmul.f32 0.2, %v11881_v6  ;;  %v6932_v45 = vmul.f32 0.2, %v11897_v34  ;;  %v12660_v12 = vsel %vm6757_vm11, %v11885_v20, %v6929_v22  ;;  %v12675_v51 = vsel %vm6758_vm12, %v11889_v32, %v6930_v15 }
 0x6c8   : > { %15093 = vst [vmem:[#allocation157_spill] sm:$0xff] %v12567_v53  ;;  %15094 = vst [vmem:[#allocation158_spill] sm:$0xff] %v12576_v63  ;;  %v6934_v59 = vmul.f32 0.2, %v11905_v1  ;;  %v6935_v62 = vmul.f32 0.2, %v11909_v29  ;;  %v12585_v53 = vsel %vm6752_vm6, %v11865_v37, %v6924_v60  ;;  %v12600_v63 = vsel %vm6753_vm7, %v11869_v16, %v6925_v39 }
 0x6c9   : > { %v6936_v47 = vmul.f32 0.2, %v11913_v11  ;;  %15095 = vst [vmem:[#allocation159_spill] sm:$0xff] %v12585_v53  ;;  %v12589_v49 = vmul.f32 0.2, %v11917_v55  ;;  %15096 = vst [vmem:[#allocation160_spill] sm:$0xff] %v12600_v63  ;;  %v12615_v48 = vsel %vm6754_vm8, %v11873_v36, %v6926_v28  ;;  %v12645_v58 = vsel %vm6756_vm10, %v11881_v6, %v6928_v44 }
 0x6ca   : > { %v12592_v0 = vmul.f32 0.2, %v11921_v2  ;;  %v12595_v50 = vmul.f32 0.2, %v11925_v43  ;;  %vm6765_vm4 = vcmp.ge.f32.partialorder %v11917_v55, 0.0  ;;  %15097 = vst [vmem:[#allocation161_spill] sm:$0xff] %v12615_v48 }
 0x6cb   : > { %v12604_v37 = vmul.f32 0.2, %v11929_v25  ;;  %v12607_v60 = vmul.f32 0.2, %v11933_v19  ;;  %v12610_v53 = vmul.f32 0.2, %v11937_v56 }
 0x6cc   : > { %vm6766_vm5 = vcmp.ge.f32.partialorder %v11921_v2, 0.0  ;;  %v12619_v16 = vmul.f32 0.2, %v11941_v35  ;;  %v12622_v39 = vmul.f32 0.2, %v11945_v8  ;;  %15098 = vst [vmem:[#allocation162_spill] sm:$0xff] %v12630_v52 }
 0x6cd   : > { %v12625_v63 = vmul.f32 0.2, %v11949_v3  ;;  %vm6767_vm6 = vcmp.ge.f32.partialorder %v11925_v43, 0.0  ;;  %v15099_v36 = vld [vmem:[#allocation47_spill] sm:$0xff]  ;;  %v15100_v48 = vld [vmem:[#allocation48_spill] sm:$0xff]  ;;  %vm6768_vm7 = vcmp.ge.f32.partialorder %v11929_v25, 0.0 }
 0x6ce   : > { %v12634_v28 = vmul.f32 0.2, %v15099_v36  ;;  %v12637_v38 = vmul.f32 0.2, %v15100_v48  ;;  %15102 = vst [vmem:[#allocation47_spill] sm:$0xff] %v12645_v58  ;;  %v15103_v33 = vld [vmem:[#allocation50_spill] sm:$0xff] }
 0x6cf   : > { %v12649_v57 = vmul.f32 0.2, %v15103_v33  ;;  %v15104_v52 = vld [vmem:[#allocation51_spill] sm:$0xff]  ;;  %15106 = vst [vmem:[#allocation48_spill] sm:$0xff] %v12660_v12  ;;  %vm6769_vm8 = vcmp.ge.f32.partialorder %v11933_v19, 0.0  ;;  %v15107_v6 = vld [vmem:[#allocation53_spill] sm:$0xff] }
 0x6d0   : > { %v12652_v23 = vmul.f32 0.2, %v15104_v52  ;;  %v12664_v44 = vmul.f32 0.2, %v15107_v6  ;;  %v15108_v58 = vld [vmem:[#allocation54_spill] sm:$0xff]  ;;  %15111 = vst [vmem:[#allocation50_spill] sm:$0xff] %v12670_v40  ;;  %v12690_v40 = vsel %vm6759_vm13, %v11893_v46, %v6931_v54 }
 0x6d1   : > { %v12667_v5 = vmul.f32 0.2, %v15108_v58  ;;  %15112 = vst [vmem:[#allocation51_spill] sm:$0xff] %v12675_v51  ;;  %vm6770_vm9 = vcmp.ge.f32.partialorder %v11937_v56, 0.0  ;;  %v15113_v20 = vld [vmem:[#allocation56_spill] sm:$0xff]  ;;  %v15115_v12 = vld [vmem:[#allocation57_spill] sm:$0xff] }
 0x6d2   : > { %v12679_v22 = vmul.f32 0.2, %v15113_v20  ;;  %v12682_v41 = vmul.f32 0.2, %v15115_v12  ;;  %15118 = vst [vmem:[#allocation54_spill] sm:$0xff] %v12685_v4  ;;  %15119 = vst [vmem:[#allocation55_spill] sm:$0xff] %v12690_v40  ;;  %v12705_v4 = vsel %vm6760_vm14, %v11897_v34, %v6932_v45 }
 0x6d3   : > { %15109 = vst [vmem:[#allocation49_spill] sm:$0xff] %v12667_v5  ;;  %vm6771_vm10 = vcmp.ge.f32.partialorder %v11941_v35, 0.0  ;;  %v15120_v32 = vld [vmem:[#allocation59_spill] sm:$0xff]  ;;  %v15122_v51 = vld [vmem:[#allocation60_spill] sm:$0xff]  ;;  %vm6772_vm11 = vcmp.ge.f32.partialorder %v11945_v8, 0.0  ;;  %v15127_v46 = vld [vmem:[#allocation62_spill] sm:$0xff] }
 0x6d4   : > { %15114 = vst [vmem:[#allocation52_spill] sm:$0xff] %v12679_v22  ;;  %15116 = vst [vmem:[#allocation53_spill] sm:$0xff] %v12682_v41  ;;  %v12694_v15 = vmul.f32 0.2, %v15120_v32  ;;  %v12697_v14 = vmul.f32 0.2, %v15122_v51 }
 0x6d5   : > { %v15124_v22 = vld [vmem:[#allocation61_spill] sm:$0xff]  ;;  %15126 = vst [vmem:[#allocation59_spill] sm:$0xff] %v12705_v4  ;;  %v12709_v54 = vmul.f32 0.2, %v15127_v46  ;;  %v15129_v40 = vld [vmem:[#allocation63_spill] sm:$0xff]  ;;  %vm6773_vm12 = vcmp.ge.f32.partialorder %v11949_v3, 0.0 }
 0x6d6   : > { %15121 = vst [vmem:[#allocation56_spill] sm:$0xff] %v12694_v15  ;;  %15123 = vst [vmem:[#allocation57_spill] sm:$0xff] %v12697_v14  ;;  %v12700_v5 = vmul.f32 0.2, %v15124_v22  ;;  %v12712_v41 = vmul.f32 0.2, %v15129_v40 }
 0x6d7   : > { %15128 = vst [vmem:[#allocation60_spill] sm:$0xff] %v12709_v54  ;;  %v15131_v15 = vld [vmem:[#allocation64_spill] sm:$0xff]  ;;  %v15134_v34 = vld [vmem:[#allocation65_spill] sm:$0xff]  ;;  %v15136_v4 = vld [vmem:[#allocation66_spill] sm:$0xff]  ;;  %vm6774_vm13 = vcmp.ge.f32.partialorder %v15099_v36, 0.0  ;;  %vm6775_vm14 = vcmp.ge.f32.partialorder %v15100_v48, 0.0 }
 0x6d8   : > { %15125 = vst [vmem:[#allocation58_spill] sm:$0xff] %v12700_v5  ;;  %15130 = vst [vmem:[#allocation61_spill] sm:$0xff] %v12712_v41  ;;  %v12715_v24 = vmul.f32 0.2, %v15131_v15  ;;  %v12720_v5 = vsel %vm6761_vm15, %v11901_v13, %v6933_v9  ;;  %v12724_v45 = vmul.f32 0.2, %v15134_v34 }
 0x6d9   : > { %15133 = vst [vmem:[#allocation63_spill] sm:$0xff] %v12720_v5  ;;  %v12727_v14 = vmul.f32 0.2, %v15136_v4  ;;  %v15138_v54 = vld [vmem:[#allocation67_spill] sm:$0xff]  ;;  %v15141_v13 = vld [vmem:[#allocation68_spill] sm:$0xff]  ;;  %v15143_v5 = vld [vmem:[#allocation69_spill] sm:$0xff] }
 0x6da   : > { %15132 = vst [vmem:[#allocation62_spill] sm:$0xff] %v12715_v24  ;;  %15135 = vst [vmem:[#allocation64_spill] sm:$0xff] %v12724_v45  ;;  %v12730_v42 = vmul.f32 0.2, %v15138_v54  ;;  %v12735_v24 = vsel %vm6762_vm0, %v11905_v1, %v6934_v59  ;;  %v12739_v9 = vmul.f32 0.2, %v15141_v13 }
 0x6db   : > { %15137 = vst [vmem:[#allocation65_spill] sm:$0xff] %v12727_v14  ;;  %15140 = vst [vmem:[#allocation67_spill] sm:$0xff] %v12735_v24  ;;  %v12742_v41 = vmul.f32 0.2, %v15143_v5  ;;  %v15145_v45 = vld [vmem:[#allocation70_spill] sm:$0xff]  ;;  %v15148_v1 = vld [vmem:[#allocation71_spill] sm:$0xff] }
 0x6dc   : > { %15139 = vst [vmem:[#allocation66_spill] sm:$0xff] %v12730_v42  ;;  %15142 = vst [vmem:[#allocation163_spill] sm:$0xff] %v12739_v9  ;;  %v12745_v27 = vmul.f32 0.2, %v15145_v45  ;;  %v12750_v42 = vsel %vm6763_vm2, %v11909_v29, %v6935_v62  ;;  %v12754_v59 = vmul.f32 0.2, %v15148_v1 }
 0x6dd   : > { %15144 = vst [vmem:[#allocation69_spill] sm:$0xff] %v12742_v41  ;;  %15147 = vst [vmem:[#allocation164_spill] sm:$0xff] %v12750_v42  ;;  %v15150_v24 = vld [vmem:[#allocation72_spill] sm:$0xff]  ;;  %v15152_v9 = vld [vmem:[#allocation73_spill] sm:$0xff]  ;;  %vm6776_vm15 = vcmp.ge.f32.partialorder %v15101_v26, 0.0  ;;  %vm6777_vm0 = vcmp.ge.f32.partialorder %v15103_v33, 0.0 }
 0x6de   : > { %15146 = vst [vmem:[#allocation70_spill] sm:$0xff] %v12745_v27  ;;  %15149 = vst [vmem:[#allocation165_spill] sm:$0xff] %v12754_v59  ;;  %v12757_v14 = vmul.f32 0.2, %v15150_v24  ;;  %v12760_v13 = vmul.f32 0.2, %v15152_v9  ;;  %v12765_v27 = vsel %vm6764_vm3, %v11913_v11, %v6936_v47 }
 0x6df   : > { %15154 = vst [vmem:[#allocation166_spill] sm:$0xff] %v12765_v27  ;;  %v15155_v29 = vld [vmem:[#allocation74_spill] sm:$0xff]  ;;  %v15157_v42 = vld [vmem:[#allocation75_spill] sm:$0xff]  ;;  %v15159_v59 = vld [vmem:[#allocation76_spill] sm:$0xff]  ;;  %vm6778_vm2 = vcmp.ge.f32.partialorder %v15104_v52, 0.0  ;;  %vm6779_vm3 = vcmp.ge.f32.partialorder %v15105_v31, 0.0 }
 0x6e0   : > { %15151 = vst [vmem:[#allocation72_spill] sm:$0xff] %v12757_v14  ;;  %15153 = vst [vmem:[#allocation73_spill] sm:$0xff] %v12760_v13  ;;  %v12769_v62 = vmul.f32 0.2, %v15155_v29  ;;  %v12772_v41 = vmul.f32 0.2, %v15157_v42  ;;  %v12781_v13 = vsel %vm6765_vm4, %v11917_v55, %v12589_v49 }
 0x6e1   : > { %v12775_v1 = vmul.f32 0.2, %v15159_v59  ;;  %15161 = vst [vmem:[#allocation168_spill] sm:$0xff] %v12781_v13  ;;  %v15162_v11 = vld [vmem:[#allocation77_spill] sm:$0xff]  ;;  %v15164_v27 = vld [vmem:[#allocation78_spill] sm:$0xff]  ;;  %v15169_v55 = vld [vmem:[#allocation80_spill] sm:$0xff] }
 0x6e2   : > { %15156 = vst [vmem:[#allocation74_spill] sm:$0xff] %v12769_v62  ;;  %15158 = vst [vmem:[#allocation167_spill] sm:$0xff] %v12772_v41  ;;  %v12785_v47 = vmul.f32 0.2, %v15162_v11  ;;  %v12788_v14 = vmul.f32 0.2, %v15164_v27 }
 0x6e3   : > { %15160 = vst [vmem:[#allocation76_spill] sm:$0xff] %v12775_v1  ;;  %v15166_v62 = vld [vmem:[#allocation79_spill] sm:$0xff]  ;;  %v12797_v1 = vsel %vm6766_vm5, %v11921_v2, %v12592_v0  ;;  %v12801_v49 = vmul.f32 0.2, %v15169_v55  ;;  %v15171_v13 = vld [vmem:[#allocation81_spill] sm:$0xff]  ;;  %vm6780_vm4 = vcmp.ge.f32.partialorder %v15107_v6, 0.0 }
 0x6e4   : > { %15163 = vst [vmem:[#allocation77_spill] sm:$0xff] %v12785_v47  ;;  %15165 = vst [vmem:[#allocation169_spill] sm:$0xff] %v12788_v14  ;;  %v12791_v42 = vmul.f32 0.2, %v15166_v62  ;;  %v12804_v41 = vmul.f32 0.2, %v15171_v13 }
 0x6e5   : > { %15168 = vst [vmem:[#allocation170_spill] sm:$0xff] %v12797_v1  ;;  %15170 = vst [vmem:[#allocation80_spill] sm:$0xff] %v12801_v49  ;;  %v15173_v47 = vld [vmem:[#allocation82_spill] sm:$0xff]  ;;  %v15176_v2 = vld [vmem:[#allocation83_spill] sm:$0xff]  ;;  %vm6781_vm5 = vcmp.ge.f32.partialorder %v15108_v58, 0.0 }
 0x6e6   : > { %15167 = vst [vmem:[#allocation79_spill] sm:$0xff] %v12791_v42  ;;  %15172 = vst [vmem:[#allocation171_spill] sm:$0xff] %v12804_v41  ;;  %v12807_v27 = vmul.f32 0.2, %v15173_v47  ;;  %v12813_v42 = vsel %vm6767_vm6, %v11925_v43, %v12595_v50  ;;  %v12817_v0 = vmul.f32 0.2, %v15176_v2 }
 0x6e7   : > { %15175 = vst [vmem:[#allocation172_spill] sm:$0xff] %v12813_v42  ;;  %v15178_v1 = vld [vmem:[#allocation84_spill] sm:$0xff]  ;;  %v15180_v49 = vld [vmem:[#allocation85_spill] sm:$0xff]  ;;  %v15183_v43 = vld [vmem:[#allocation86_spill] sm:$0xff]  ;;  %vm6782_vm6 = vcmp.ge.f32.partialorder %v15110_v7, 0.0 }
 0x6e8   : > { %15174 = vst [vmem:[#allocation82_spill] sm:$0xff] %v12807_v27  ;;  %15177 = vst [vmem:[#allocation83_spill] sm:$0xff] %v12817_v0  ;;  %v12820_v14 = vmul.f32 0.2, %v15178_v1  ;;  %v12823_v13 = vmul.f32 0.2, %v15180_v49  ;;  %v12829_v27 = vsel %vm6768_vm7, %v11929_v25, %v12604_v37 }
 0x6e9   : > { %15182 = vst [vmem:[#allocation174_spill] sm:$0xff] %v12829_v27  ;;  %v12833_v50 = vmul.f32 0.2, %v15183_v43  ;;  %v15185_v42 = vld [vmem:[#allocation87_spill] sm:$0xff]  ;;  %v15187_v0 = vld [vmem:[#allocation88_spill] sm:$0xff]  ;;  %v15190_v25 = vld [vmem:[#allocation89_spill] sm:$0xff] }
 0x6ea   : > { %15179 = vst [vmem:[#allocation173_spill] sm:$0xff] %v12820_v14  ;;  %15181 = vst [vmem:[#allocation85_spill] sm:$0xff] %v12823_v13  ;;  %v12836_v41 = vmul.f32 0.2, %v15185_v42  ;;  %v12839_v1 = vmul.f32 0.2, %v15187_v0  ;;  %v12845_v13 = vsel %vm6769_vm8, %v11933_v19, %v12607_v60 }
 0x6eb   : > { %15184 = vst [vmem:[#allocation86_spill] sm:$0xff] %v12833_v50  ;;  %15189 = vst [vmem:[#allocation176_spill] sm:$0xff] %v12845_v13  ;;  %v12849_v37 = vmul.f32 0.2, %v15190_v25  ;;  %v15192_v27 = vld [vmem:[#allocation90_spill] sm:$0xff]  ;;  %v15194_v50 = vld [vmem:[#allocation91_spill] sm:$0xff] }
 0x6ec   : > { %15186 = vst [vmem:[#allocation175_spill] sm:$0xff] %v12836_v41  ;;  %15188 = vst [vmem:[#allocation88_spill] sm:$0xff] %v12839_v1  ;;  %v12852_v14 = vmul.f32 0.2, %v15192_v27  ;;  %v12855_v42 = vmul.f32 0.2, %v15194_v50  ;;  %v12861_v1 = vsel %vm6770_vm9, %v11937_v56, %v12610_v53 }
 0x6ed   : > { %15191 = vst [vmem:[#allocation89_spill] sm:$0xff] %v12849_v37  ;;  %15196 = vst [vmem:[#allocation178_spill] sm:$0xff] %v12861_v1  ;;  %v15197_v19 = vld [vmem:[#allocation92_spill] sm:$0xff]  ;;  %v15199_v13 = vld [vmem:[#allocation93_spill] sm:$0xff]  ;;  %vm6783_vm7 = vcmp.ge.f32.partialorder %v15113_v20, 0.0  ;;  %vm6784_vm8 = vcmp.ge.f32.partialorder %v15115_v12, 0.0 }
 0x6ee   : > { %15193 = vst [vmem:[#allocation177_spill] sm:$0xff] %v12852_v14  ;;  %15195 = vst [vmem:[#allocation91_spill] sm:$0xff] %v12855_v42  ;;  %v12865_v60 = vmul.f32 0.2, %v15197_v19  ;;  %v12868_v41 = vmul.f32 0.2, %v15199_v13  ;;  %v12877_v42 = vsel %vm6771_vm10, %v11941_v35, %v12619_v16 }
 0x6ef   : > { %v15201_v37 = vld [vmem:[#allocation94_spill] sm:$0xff]  ;;  %15203 = vst [vmem:[#allocation180_spill] sm:$0xff] %v12877_v42  ;;  %v15204_v56 = vld [vmem:[#allocation95_spill] sm:$0xff]  ;;  %v15206_v1 = vld [vmem:[#allocation96_spill] sm:$0xff]  ;;  %vm6785_vm9 = vcmp.ge.f32.partialorder %v15117_v17, 0.0  ;;  %vm6786_vm10 = vcmp.ge.f32.partialorder %v15120_v32, 0.0 }
 0x6f0   : > { %15198 = vst [vmem:[#allocation92_spill] sm:$0xff] %v12865_v60  ;;  %15200 = vst [vmem:[#allocation179_spill] sm:$0xff] %v12868_v41  ;;  %v12871_v27 = vmul.f32 0.2, %v15201_v37  ;;  %v12881_v53 = vmul.f32 0.2, %v15204_v56 }
 0x6f1   : > { %v12884_v14 = vmul.f32 0.2, %v15206_v1  ;;  %v15208_v60 = vld [vmem:[#allocation97_spill] sm:$0xff]  ;;  %v15211_v35 = vld [vmem:[#allocation98_spill] sm:$0xff]  ;;  %v15213_v42 = vld [vmem:[#allocation99_spill] sm:$0xff] }
 0x6f2   : > { %15202 = vst [vmem:[#allocation94_spill] sm:$0xff] %v12871_v27  ;;  %15205 = vst [vmem:[#allocation95_spill] sm:$0xff] %v12881_v53  ;;  %v12887_v13 = vmul.f32 0.2, %v15208_v60  ;;  %v12893_v27 = vsel %vm6772_vm11, %v11945_v8, %v12622_v39  ;;  %v12897_v16 = vmul.f32 0.2, %v15211_v35 }
 0x6f3   : > { %15207 = vst [vmem:[#allocation181_spill] sm:$0xff] %v12884_v14  ;;  %15210 = vst [vmem:[#allocation182_spill] sm:$0xff] %v12893_v27  ;;  %v12900_v41 = vmul.f32 0.2, %v15213_v42  ;;  %v15215_v53 = vld [vmem:[#allocation100_spill] sm:$0xff]  ;;  %v15218_v8 = vld [vmem:[#allocation101_spill] sm:$0xff] }
 0x6f4   : > { %15209 = vst [vmem:[#allocation97_spill] sm:$0xff] %v12887_v13  ;;  %15212 = vst [vmem:[#allocation98_spill] sm:$0xff] %v12897_v16  ;;  %v12903_v1 = vmul.f32 0.2, %v15215_v53  ;;  %v12909_v13 = vsel %vm6773_vm12, %v11949_v3, %v12625_v63  ;;  %v12913_v39 = vmul.f32 0.2, %v15218_v8 }
 0x6f5   : > { %15214 = vst [vmem:[#allocation183_spill] sm:$0xff] %v12900_v41  ;;  %15217 = vst [vmem:[#allocation184_spill] sm:$0xff] %v12909_v13  ;;  %v15220_v27 = vld [vmem:[#allocation102_spill] sm:$0xff]  ;;  %v15222_v16 = vld [vmem:[#allocation103_spill] sm:$0xff]  ;;  %vm6787_vm11 = vcmp.ge.f32.partialorder %v15122_v51, 0.0  ;;  %vm6788_vm12 = vcmp.ge.f32.partialorder %v15124_v22, 0.0 }
 0x6f6   : > { %15216 = vst [vmem:[#allocation100_spill] sm:$0xff] %v12903_v1  ;;  %15219 = vst [vmem:[#allocation101_spill] sm:$0xff] %v12913_v39  ;;  %v12916_v14 = vmul.f32 0.2, %v15220_v27  ;;  %v12919_v42 = vmul.f32 0.2, %v15222_v16  ;;  %v12925_v1 = vsel %vm6774_vm13, %v15099_v36, %v12634_v28 }
 0x6f7   : > { %15224 = vst [vmem:[#allocation186_spill] sm:$0xff] %v12925_v1  ;;  %v15225_v3 = vld [vmem:[#allocation104_spill] sm:$0xff]  ;;  %v15227_v13 = vld [vmem:[#allocation105_spill] sm:$0xff]  ;;  %v15229_v39 = vld [vmem:[#allocation106_spill] sm:$0xff]  ;;  %vm6789_vm13 = vcmp.ge.f32.partialorder %v15127_v46, 0.0 }
 0x6f8   : > { %15221 = vst [vmem:[#allocation185_spill] sm:$0xff] %v12916_v14  ;;  %15223 = vst [vmem:[#allocation103_spill] sm:$0xff] %v12919_v42  ;;  %v12929_v63 = vmul.f32 0.2, %v15225_v3  ;;  %v12932_v41 = vmul.f32 0.2, %v15227_v13  ;;  %v12941_v42 = vsel %vm6775_vm14, %v15100_v48, %v12637_v38 }
 0x6f9   : > { %v12935_v27 = vmul.f32 0.2, %v15229_v39  ;;  %15231 = vst [vmem:[#allocation188_spill] sm:$0xff] %v12941_v42  ;;  %v15232_v36 = vld [vmem:[#allocation107_spill] sm:$0xff]  ;;  %v15234_v1 = vld [vmem:[#allocation108_spill] sm:$0xff]  ;;  %v15239_v38 = vld [vmem:[#allocation110_spill] sm:$0xff] }
 0x6fa   : > { %15226 = vst [vmem:[#allocation104_spill] sm:$0xff] %v12929_v63  ;;  %15228 = vst [vmem:[#allocation187_spill] sm:$0xff] %v12932_v41  ;;  %v12945_v28 = vmul.f32 0.2, %v15232_v36  ;;  %v12948_v14 = vmul.f32 0.2, %v15234_v1 }
 0x6fb   : > { %15230 = vst [vmem:[#allocation106_spill] sm:$0xff] %v12935_v27  ;;  %v15236_v63 = vld [vmem:[#allocation109_spill] sm:$0xff]  ;;  %v12957_v27 = vsel %vm6776_vm15, %v15101_v26, %v12640_v30  ;;  %v12961_v48 = vmul.f32 0.2, %v15239_v38  ;;  %v15241_v42 = vld [vmem:[#allocation111_spill] sm:$0xff]  ;;  %vm6790_vm14 = vcmp.ge.f32.partialorder %v15129_v40, 0.0 }
 0x6fc   : > { %15233 = vst [vmem:[#allocation107_spill] sm:$0xff] %v12945_v28  ;;  %15235 = vst [vmem:[#allocation189_spill] sm:$0xff] %v12948_v14  ;;  %v12951_v13 = vmul.f32 0.2, %v15236_v63  ;;  %v12964_v41 = vmul.f32 0.2, %v15241_v42 }
 0x6fd   : > { %15238 = vst [vmem:[#allocation190_spill] sm:$0xff] %v12957_v27  ;;  %15240 = vst [vmem:[#allocation110_spill] sm:$0xff] %v12961_v48  ;;  %v15243_v28 = vld [vmem:[#allocation112_spill] sm:$0xff]  ;;  %v15246_v30 = vld [vmem:[#allocation113_spill] sm:$0xff]  ;;  %vm6791_vm15 = vcmp.ge.f32.partialorder %v15131_v15, 0.0 }
 0x6fe   : > { %15237 = vst [vmem:[#allocation109_spill] sm:$0xff] %v12951_v13  ;;  %15242 = vst [vmem:[#allocation191_spill] sm:$0xff] %v12964_v41  ;;  %v12967_v1 = vmul.f32 0.2, %v15243_v28  ;;  %v12973_v13 = vsel %vm6777_vm0, %v15103_v33, %v12649_v57  ;;  %v12977_v26 = vmul.f32 0.2, %v15246_v30 }
 0x6ff   : > { %15245 = vst [vmem:[#allocation192_spill] sm:$0xff] %v12973_v13  ;;  %v15248_v27 = vld [vmem:[#allocation114_spill] sm:$0xff]  ;;  %v15250_v48 = vld [vmem:[#allocation115_spill] sm:$0xff]  ;;  %v15253_v33 = vld [vmem:[#allocation116_spill] sm:$0xff]  ;;  %vm6792_vm0 = vcmp.ge.f32.partialorder %v15134_v34, 0.0 }
 0x700   : > { %15244 = vst [vmem:[#allocation112_spill] sm:$0xff] %v12967_v1  ;;  %15247 = vst [vmem:[#allocation113_spill] sm:$0xff] %v12977_v26  ;;  %v12980_v14 = vmul.f32 0.2, %v15248_v27  ;;  %v12983_v42 = vmul.f32 0.2, %v15250_v48  ;;  %v12989_v1 = vsel %vm6778_vm2, %v15104_v52, %v12652_v23 }
 0x701   : > { %15252 = vst [vmem:[#allocation194_spill] sm:$0xff] %v12989_v1  ;;  %v12993_v57 = vmul.f32 0.2, %v15253_v33  ;;  %v15255_v13 = vld [vmem:[#allocation117_spill] sm:$0xff]  ;;  %v15257_v26 = vld [vmem:[#allocation118_spill] sm:$0xff]  ;;  %vm6793_vm2 = vcmp.ge.f32.partialorder %v15136_v4, 0.0 }
 0x702   : > { %15249 = vst [vmem:[#allocation193_spill] sm:$0xff] %v12980_v14  ;;  %15251 = vst [vmem:[#allocation115_spill] sm:$0xff] %v12983_v42  ;;  %v12996_v41 = vmul.f32 0.2, %v15255_v13  ;;  %v12999_v27 = vmul.f32 0.2, %v15257_v26  ;;  %v13005_v42 = vsel %vm6779_vm3, %v15105_v31, %v12655_v18 }
 0x703   : > { %15254 = vst [vmem:[#allocation116_spill] sm:$0xff] %v12993_v57  ;;  %15259 = vst [vmem:[#allocation195_spill] sm:$0xff] %v13005_v42  ;;  %v13009_v23 = vmul.f32 0.2, %v12241_v21  ;;  %v13012_v52 = vmul.f32 0.2, %v12245_v10 }
 0x704   : > { %15256 = vst [vmem:[#allocation117_spill] sm:$0xff] %v12996_v41  ;;  %15258 = vst [vmem:[#allocation118_spill] sm:$0xff] %v12999_v27  ;;  %v13015_v1 = vmul.f32 0.2, %v12249_v61  ;;  %v13021_v27 = vsel %vm6780_vm4, %v15107_v6, %v12664_v44  ;;  %v15264_v18 = vld [vmem:[#allocation119_spill] sm:$0xff]  ;;  %v15266_v42 = vld [vmem:[#allocation120_spill] sm:$0xff] }
 0x705   : > { %15260 = vst [vmem:[#allocation196_spill] sm:$0xff] %v13009_v23  ;;  %15261 = vst [vmem:[#allocation197_spill] sm:$0xff] %v13012_v52  ;;  %v13025_v31 = vmul.f32 0.2, %v15264_v18  ;;  %v13028_v41 = vmul.f32 0.2, %v15266_v42 }
 0x706   : > { %15262 = vst [vmem:[#allocation198_spill] sm:$0xff] %v13015_v1  ;;  %15263 = vst [vmem:[#allocation199_spill] sm:$0xff] %v13021_v27  ;;  %v15268_v23 = vld [vmem:[#allocation121_spill] sm:$0xff]  ;;  %v15272_v6 = vld [vmem:[#allocation122_spill] sm:$0xff]  ;;  %vm6794_vm3 = vcmp.ge.f32.partialorder %v15138_v54, 0.0 }
 0x707   : > { %15265 = vst [vmem:[#allocation119_spill] sm:$0xff] %v13025_v31  ;;  %15267 = vst [vmem:[#allocation200_spill] sm:$0xff] %v13028_v41  ;;  %v13031_v57 = vmul.f32 0.2, %v15268_v23  ;;  %v15270_v52 = vld [vmem:[#allocation49_spill] sm:$0xff]  ;;  %v15274_v27 = vld [vmem:[#allocation123_spill] sm:$0xff] }
 0x708   : > { %v13037_v1 = vsel %vm6781_vm5, %v15108_v58, %v15270_v52  ;;  %v13041_v44 = vmul.f32 0.2, %v15272_v6  ;;  %v13044_v14 = vmul.f32 0.2, %v15274_v27  ;;  %v15276_v31 = vld [vmem:[#allocation124_spill] sm:$0xff]  ;;  %v15278_v41 = vld [vmem:[#allocation50_spill] sm:$0xff] }
 0x709   : > { %15269 = vst [vmem:[#allocation121_spill] sm:$0xff] %v13031_v57  ;;  %15271 = vst [vmem:[#allocation49_spill] sm:$0xff] %v13037_v1  ;;  %v13047_v42 = vmul.f32 0.2, %v15276_v31  ;;  %v13053_v57 = vsel %vm6782_vm6, %v15110_v7, %v15278_v41  ;;  %v15280_v58 = vld [vmem:[#allocation125_spill] sm:$0xff]  ;;  %v15288_v31 = vld [vmem:[#allocation68_spill] sm:$0xff] }
 0x70a   : > { %15273 = vst [vmem:[#allocation201_spill] sm:$0xff] %v13041_v44  ;;  %15275 = vst [vmem:[#allocation202_spill] sm:$0xff] %v13044_v14  ;;  %v13057_v52 = vmul.f32 0.2, %v15280_v58  ;;  %v15282_v1 = vld [vmem:[#allocation133_spill] sm:$0xff]  ;;  %v15284_v44 = vld [vmem:[#allocation134_spill] sm:$0xff] }
 0x70b   : > { %15277 = vst [vmem:[#allocation203_spill] sm:$0xff] %v13047_v42  ;;  %15279 = vst [vmem:[#allocation50_spill] sm:$0xff] %v13053_v57  ;;  %v13060_v6 = vmul.f32 0.2, %v15282_v1  ;;  %v13063_v27 = vmul.f32 0.2, %v15284_v44 }
 0x70c   : > { %15281 = vst [vmem:[#allocation204_spill] sm:$0xff] %v13057_v52  ;;  %v15286_v14 = vld [vmem:[#allocation52_spill] sm:$0xff]  ;;  %vm6795_vm4 = vcmp.ge.f32.partialorder %v15288_v31, 0.0  ;;  %v15289_v41 = vld [vmem:[#allocation135_spill] sm:$0xff]  ;;  %v15293_v52 = vld [vmem:[#allocation137_spill] sm:$0xff]  ;;  %vm6796_vm5 = vcmp.ge.f32.partialorder %v15143_v5, 0.0 }
 0x70d   : > { %15283 = vst [vmem:[#allocation205_spill] sm:$0xff] %v13060_v6  ;;  %15285 = vst [vmem:[#allocation134_spill] sm:$0xff] %v13063_v27  ;;  %v13069_v42 = vsel %vm6783_vm7, %v15113_v20, %v15286_v14  ;;  %v13073_v7 = vmul.f32 0.2, %v15289_v41  ;;  %v15291_v57 = vld [vmem:[#allocation136_spill] sm:$0xff]  ;;  %v15295_v6 = vld [vmem:[#allocation53_spill] sm:$0xff] }
 0x70e   : > { %15287 = vst [vmem:[#allocation52_spill] sm:$0xff] %v13069_v42  ;;  %v13076_v58 = vmul.f32 0.2, %v15291_v57  ;;  %v13079_v1 = vmul.f32 0.2, %v15293_v52  ;;  %v13085_v27 = vsel %vm6784_vm8, %v15115_v12, %v15295_v6  ;;  %v15297_v14 = vld [vmem:[#allocation138_spill] sm:$0xff] }
 0x70f   : > { %15290 = vst [vmem:[#allocation68_spill] sm:$0xff] %v13073_v7  ;;  %15296 = vst [vmem:[#allocation53_spill] sm:$0xff] %v13085_v27  ;;  %v13089_v20 = vmul.f32 0.2, %v15297_v14  ;;  %v15299_v42 = vld [vmem:[#allocation139_spill] sm:$0xff]  ;;  %v15301_v7 = vld [vmem:[#allocation140_spill] sm:$0xff] }
 0x710   : > { %15292 = vst [vmem:[#allocation206_spill] sm:$0xff] %v13076_v58  ;;  %15294 = vst [vmem:[#allocation137_spill] sm:$0xff] %v13079_v1  ;;  %v13092_v41 = vmul.f32 0.2, %v15299_v42  ;;  %v13095_v57 = vmul.f32 0.2, %v15301_v7 }
 0x711   : > { %15298 = vst [vmem:[#allocation207_spill] sm:$0xff] %v13089_v20  ;;  %v15303_v58 = vld [vmem:[#allocation54_spill] sm:$0xff]  ;;  %vm6797_vm6 = vcmp.ge.f32.partialorder %v15145_v45, 0.0  ;;  %v15305_v12 = vld [vmem:[#allocation141_spill] sm:$0xff]  ;;  %v15309_v20 = vld [vmem:[#allocation143_spill] sm:$0xff]  ;;  %vm6799_vm8 = vcmp.ge.f32.partialorder %v15150_v24, 0.0 }
 0x712   : > { %15300 = vst [vmem:[#allocation208_spill] sm:$0xff] %v13092_v41  ;;  %15302 = vst [vmem:[#allocation209_spill] sm:$0xff] %v13095_v57  ;;  %v13101_v1 = vsel %vm6785_vm9, %v15117_v17, %v15303_v58  ;;  %v13105_v6 = vmul.f32 0.2, %v15305_v12  ;;  %v15307_v27 = vld [vmem:[#allocation142_spill] sm:$0xff]  ;;  %v15311_v41 = vld [vmem:[#allocation56_spill] sm:$0xff] }
 0x713   : > { %15304 = vst [vmem:[#allocation54_spill] sm:$0xff] %v13101_v1  ;;  %v13108_v14 = vmul.f32 0.2, %v15307_v27  ;;  %v13111_v42 = vmul.f32 0.2, %v15309_v20  ;;  %v13117_v57 = vsel %vm6786_vm10, %v15120_v32, %v15311_v41  ;;  %v15313_v7 = vld [vmem:[#allocation71_spill] sm:$0xff] }
 0x714   : > { %15306 = vst [vmem:[#allocation210_spill] sm:$0xff] %v13105_v6  ;;  %15312 = vst [vmem:[#allocation56_spill] sm:$0xff] %v13117_v57  ;;  %vm6798_vm7 = vcmp.ge.f32.partialorder %v15313_v7, 0.0  ;;  %v15314_v17 = vld [vmem:[#allocation144_spill] sm:$0xff]  ;;  %v15316_v1 = vld [vmem:[#allocation145_spill] sm:$0xff]  ;;  %vm6800_vm9 = vcmp.ge.f32.partialorder %v15152_v9, 0.0 }
 0x715   : > { %15308 = vst [vmem:[#allocation211_spill] sm:$0xff] %v13108_v14  ;;  %15310 = vst [vmem:[#allocation143_spill] sm:$0xff] %v13111_v42  ;;  %v13121_v58 = vmul.f32 0.2, %v15314_v17  ;;  %v13124_v12 = vmul.f32 0.2, %v15316_v1 }
 0x716   : > { %v15318_v6 = vld [vmem:[#allocation146_spill] sm:$0xff]  ;;  %v15320_v14 = vld [vmem:[#allocation57_spill] sm:$0xff]  ;;  %v15322_v32 = vld [vmem:[#allocation147_spill] sm:$0xff]  ;;  %vm6801_vm10 = vcmp.ge.f32.partialorder %v15155_v29, 0.0 }
 0x717   : > { %15315 = vst [vmem:[#allocation71_spill] sm:$0xff] %v13121_v58  ;;  %15317 = vst [vmem:[#allocation212_spill] sm:$0xff] %v13124_v12  ;;  %v13127_v27 = vmul.f32 0.2, %v15318_v6  ;;  %v13133_v42 = vsel %vm6787_vm11, %v15122_v51, %v15320_v14  ;;  %v13137_v41 = vmul.f32 0.2, %v15322_v32 }
 0x718   : > { %15321 = vst [vmem:[#allocation57_spill] sm:$0xff] %v13133_v42  ;;  %v15324_v57 = vld [vmem:[#allocation148_spill] sm:$0xff]  ;;  %v15326_v58 = vld [vmem:[#allocation149_spill] sm:$0xff]  ;;  %v15328_v12 = vld [vmem:[#allocation58_spill] sm:$0xff] }
 0x719   : > { %15319 = vst [vmem:[#allocation146_spill] sm:$0xff] %v13127_v27  ;;  %15323 = vst [vmem:[#allocation213_spill] sm:$0xff] %v13137_v41  ;;  %v13140_v17 = vmul.f32 0.2, %v15324_v57  ;;  %v13143_v1 = vmul.f32 0.2, %v15326_v58  ;;  %v13149_v27 = vsel %vm6788_vm12, %v15124_v22, %v15328_v12 }
 0x71a   : > { %15329 = vst [vmem:[#allocation58_spill] sm:$0xff] %v13149_v27  ;;  %v15330_v51 = vld [vmem:[#allocation126_spill] sm:$0xff]  ;;  %v15332_v42 = vld [vmem:[#allocation127_spill] sm:$0xff]  ;;  %v15334_v41 = vld [vmem:[#allocation128_spill] sm:$0xff]  ;;  %vm6803_vm12 = vcmp.ge.f32.partialorder %v15159_v59, 0.0 }
 0x71b   : > { %15325 = vst [vmem:[#allocation214_spill] sm:$0xff] %v13140_v17  ;;  %15327 = vst [vmem:[#allocation149_spill] sm:$0xff] %v13143_v1  ;;  %v13153_v14 = vmul.f32 0.2, %v15330_v51  ;;  %v13156_v32 = vmul.f32 0.2, %v15332_v42 }
 0x71c   : > { %v13159_v57 = vmul.f32 0.2, %v15334_v41  ;;  %v15336_v17 = vld [vmem:[#allocation60_spill] sm:$0xff]  ;;  %v15338_v22 = vld [vmem:[#allocation129_spill] sm:$0xff]  ;;  %v15340_v27 = vld [vmem:[#allocation130_spill] sm:$0xff] }
 0x71d   : > { %15331 = vst [vmem:[#allocation215_spill] sm:$0xff] %v13153_v14  ;;  %15333 = vst [vmem:[#allocation216_spill] sm:$0xff] %v13156_v32  ;;  %v13165_v1 = vsel %vm6789_vm13, %v15127_v46, %v15336_v17  ;;  %v13169_v12 = vmul.f32 0.2, %v15338_v22  ;;  %v13172_v51 = vmul.f32 0.2, %v15340_v27 }
 0x71e   : > { %15335 = vst [vmem:[#allocation217_spill] sm:$0xff] %v13159_v57  ;;  %15337 = vst [vmem:[#allocation60_spill] sm:$0xff] %v13165_v1  ;;  %v15342_v14 = vld [vmem:[#allocation131_spill] sm:$0xff]  ;;  %v15344_v32 = vld [vmem:[#allocation61_spill] sm:$0xff]  ;;  %vm6804_vm13 = vcmp.ge.f32.partialorder %v15162_v11, 0.0 }
 0x71f   : > { %15339 = vst [vmem:[#allocation218_spill] sm:$0xff] %v13169_v12  ;;  %15341 = vst [vmem:[#allocation219_spill] sm:$0xff] %v13172_v51  ;;  %v13175_v42 = vmul.f32 0.2, %v15342_v14  ;;  %v13181_v57 = vsel %vm6790_vm14, %v15129_v40, %v15344_v32  ;;  %v15346_v41 = vld [vmem:[#allocation75_spill] sm:$0xff]  ;;  %v15347_v46 = vld [vmem:[#allocation132_spill] sm:$0xff] }
 0x720   : > { %15345 = vst [vmem:[#allocation61_spill] sm:$0xff] %v13181_v57  ;;  %vm6802_vm11 = vcmp.ge.f32.partialorder %v15346_v41, 0.0  ;;  %v13185_v17 = vmul.f32 0.2, %v15347_v46  ;;  %v15349_v1 = vld [vmem:[#allocation12_spill] sm:$0xff]  ;;  %v15351_v12 = vld [vmem:[#allocation13_spill] sm:$0xff] }
 0x721   : > { %15343 = vst [vmem:[#allocation131_spill] sm:$0xff] %v13175_v42  ;;  %v13188_v22 = vmul.f32 0.2, %v15349_v1  ;;  %v13191_v27 = vmul.f32 0.2, %v15351_v12  ;;  %v15353_v51 = vld [vmem:[#allocation62_spill] sm:$0xff] }
 0x722   : > { %15348 = vst [vmem:[#allocation75_spill] sm:$0xff] %v13185_v17  ;;  %v13197_v42 = vsel %vm6791_vm15, %v15131_v15, %v15353_v51  ;;  %v15355_v40 = vld [vmem:[#allocation14_spill] sm:$0xff]  ;;  %v15357_v57 = vld [vmem:[#allocation15_spill] sm:$0xff]  ;;  %v15359_v17 = vld [vmem:[#allocation16_spill] sm:$0xff]  ;;  %vm15481_vm15 = vcmp.ge.f32.partialorder %v15169_v55, 0.0 }
 0x723   : > { %15350 = vst [vmem:[#allocation220_spill] sm:$0xff] %v13188_v22  ;;  %15352 = vst [vmem:[#allocation221_spill] sm:$0xff] %v13191_v27  ;;  %v13201_v32 = vmul.f32 0.2, %v15355_v40  ;;  %v13204_v46 = vmul.f32 0.2, %v15357_v57 }
 0x724   : > { %15354 = vst [vmem:[#allocation62_spill] sm:$0xff] %v13197_v42  ;;  %v13207_v1 = vmul.f32 0.2, %v15359_v17  ;;  %v15361_v22 = vld [vmem:[#allocation64_spill] sm:$0xff]  ;;  %v15363_v15 = vld [vmem:[#allocation17_spill] sm:$0xff]  ;;  %v15365_v42 = vld [vmem:[#allocation18_spill] sm:$0xff] }
 0x725   : > { %15356 = vst [vmem:[#allocation222_spill] sm:$0xff] %v13201_v32  ;;  %15358 = vst [vmem:[#allocation223_spill] sm:$0xff] %v13204_v46  ;;  %v13213_v27 = vsel %vm6792_vm0, %v15134_v34, %v15361_v22  ;;  %v13217_v51 = vmul.f32 0.2, %v15363_v15  ;;  %v13220_v40 = vmul.f32 0.2, %v15365_v42 }
 0x726   : > { %15360 = vst [vmem:[#allocation224_spill] sm:$0xff] %v13207_v1  ;;  %15362 = vst [vmem:[#allocation64_spill] sm:$0xff] %v13213_v27  ;;  %v15367_v32 = vld [vmem:[#allocation19_spill] sm:$0xff]  ;;  %v15369_v46 = vld [vmem:[#allocation65_spill] sm:$0xff] }
 0x727   : > { %15364 = vst [vmem:[#allocation225_spill] sm:$0xff] %v13217_v51  ;;  %15366 = vst [vmem:[#allocation226_spill] sm:$0xff] %v13220_v40  ;;  %v13223_v57 = vmul.f32 0.2, %v15367_v32  ;;  %v13229_v1 = vsel %vm6793_vm2, %v15136_v4, %v15369_v46  ;;  %v15371_v17 = vld [vmem:[#allocation78_spill] sm:$0xff]  ;;  %v15372_v34 = vld [vmem:[#allocation20_spill] sm:$0xff] }
 0x728   : > { %15370 = vst [vmem:[#allocation65_spill] sm:$0xff] %v13229_v1  ;;  %vm6805_vm14 = vcmp.ge.f32.partialorder %v15371_v17, 0.0  ;;  %v13235_v22 = vmul.f32 0.2, %v15372_v34  ;;  %v15374_v27 = vld [vmem:[#allocation21_spill] sm:$0xff]  ;;  %v15376_v51 = vld [vmem:[#allocation22_spill] sm:$0xff] }
 0x729   : > { %15368 = vst [vmem:[#allocation227_spill] sm:$0xff] %v13223_v57  ;;  %v13238_v40 = vmul.f32 0.2, %v15374_v27  ;;  %v13241_v57 = vmul.f32 0.2, %v15376_v51  ;;  %v15378_v32 = vld [vmem:[#allocation66_spill] sm:$0xff] }
 0x72a   : > { %15373 = vst [vmem:[#allocation78_spill] sm:$0xff] %v13235_v22  ;;  %v13247_v4 = vsel %vm6794_vm3, %v15138_v54, %v15378_v32  ;;  %v15380_v46 = vld [vmem:[#allocation81_spill] sm:$0xff]  ;;  %v15381_v1 = vld [vmem:[#allocation84_spill] sm:$0xff]  ;;  %v15382_v22 = vld [vmem:[#allocation23_spill] sm:$0xff]  ;;  %vm6812_vm3 = vcmp.ge.f32.partialorder %v15180_v49, 0.0 }
 0x72b   : > { %15375 = vst [vmem:[#allocation228_spill] sm:$0xff] %v13238_v40  ;;  %15377 = vst [vmem:[#allocation229_spill] sm:$0xff] %v13241_v57  ;;  %vm6808_vm2 = vcmp.ge.f32.partialorder %v15380_v46, 0.0  ;;  %v13254_v27 = vmul.f32 0.2, %v15382_v22  ;;  %v15384_v40 = vld [vmem:[#allocation24_spill] sm:$0xff] }
 0x72c   : > { %15379 = vst [vmem:[#allocation66_spill] sm:$0xff] %v13247_v4  ;;  %v13257_v51 = vmul.f32 0.2, %v15384_v40  ;;  %v15386_v57 = vld [vmem:[#allocation25_spill] sm:$0xff]  ;;  %v15388_v42 = vld [vmem:[#allocation163_spill] sm:$0xff]  ;;  %v15391_v4 = vld [vmem:[#allocation26_spill] sm:$0xff] }
 0x72d   : > { %15383 = vst [vmem:[#allocation81_spill] sm:$0xff] %v13254_v27  ;;  %v13260_v34 = vmul.f32 0.2, %v15386_v57  ;;  %v13266_v54 = vsel %vm6795_vm4, %v15288_v31, %v15388_v42  ;;  %v15390_v32 = vld [vmem:[#allocation87_spill] sm:$0xff]  ;;  %v13273_v27 = vmul.f32 0.2, %v15391_v4 }
 0x72e   : > { %15385 = vst [vmem:[#allocation84_spill] sm:$0xff] %v13257_v51  ;;  %15389 = vst [vmem:[#allocation163_spill] sm:$0xff] %v13266_v54  ;;  %v15393_v51 = vld [vmem:[#allocation27_spill] sm:$0xff]  ;;  %v15397_v22 = vld [vmem:[#allocation69_spill] sm:$0xff]  ;;  %vm6816_vm4 = vcmp.ge.f32.partialorder %v15190_v25, 0.0 }
 0x72f   : > { %15387 = vst [vmem:[#allocation230_spill] sm:$0xff] %v13260_v34  ;;  %15392 = vst [vmem:[#allocation87_spill] sm:$0xff] %v13273_v27  ;;  %v13276_v57 = vmul.f32 0.2, %v15393_v51  ;;  %v15395_v34 = vld [vmem:[#allocation28_spill] sm:$0xff]  ;;  %v13285_v42 = vsel %vm6796_vm5, %v15143_v5, %v15397_v22  ;;  %v15399_v31 = vld [vmem:[#allocation90_spill] sm:$0xff] }
 0x730   : > { %v13279_v40 = vmul.f32 0.2, %v15395_v34  ;;  %15398 = vst [vmem:[#allocation69_spill] sm:$0xff] %v13285_v42  ;;  %v15400_v54 = vld [vmem:[#allocation29_spill] sm:$0xff]  ;;  %v15406_v4 = vld [vmem:[#allocation70_spill] sm:$0xff]  ;;  %v15409_v42 = vld [vmem:[#allocation96_spill] sm:$0xff] }
 0x731   : > { %15394 = vst [vmem:[#allocation231_spill] sm:$0xff] %v13276_v57  ;;  %v13292_v27 = vmul.f32 0.2, %v15400_v54  ;;  %v15402_v57 = vld [vmem:[#allocation30_spill] sm:$0xff]  ;;  %v13304_v5 = vsel %vm6797_vm6, %v15145_v45, %v15406_v4  ;;  %v15408_v22 = vld [vmem:[#allocation93_spill] sm:$0xff]  ;;  %vm6824_vm6 = vcmp.ge.f32.partialorder %v15208_v60, 0.0 }
 0x732   : > { %15396 = vst [vmem:[#allocation232_spill] sm:$0xff] %v13279_v40  ;;  %v13295_v34 = vmul.f32 0.2, %v15402_v57  ;;  %v15404_v40 = vld [vmem:[#allocation31_spill] sm:$0xff]  ;;  %15407 = vst [vmem:[#allocation70_spill] sm:$0xff] %v13304_v5  ;;  %vm6820_vm5 = vcmp.ge.f32.partialorder %v15408_v22, 0.0 }
 0x733   : > { %15401 = vst [vmem:[#allocation90_spill] sm:$0xff] %v13292_v27  ;;  %v13298_v51 = vmul.f32 0.2, %v15404_v40  ;;  %v15410_v27 = vld [vmem:[#allocation32_spill] sm:$0xff]  ;;  %v15416_v15 = vld [vmem:[#allocation165_spill] sm:$0xff]  ;;  %v15418_v4 = vld [vmem:[#allocation99_spill] sm:$0xff] }
 0x734   : > { %15403 = vst [vmem:[#allocation233_spill] sm:$0xff] %v13295_v34  ;;  %v13311_v57 = vmul.f32 0.2, %v15410_v27  ;;  %v15412_v34 = vld [vmem:[#allocation33_spill] sm:$0xff]  ;;  %v13323_v45 = vsel %vm6798_vm7, %v15313_v7, %v15416_v15  ;;  %v15419_v5 = vld [vmem:[#allocation35_spill] sm:$0xff]  ;;  %v15425_v27 = vld [vmem:[#allocation72_spill] sm:$0xff] }
 0x735   : > { %15405 = vst [vmem:[#allocation234_spill] sm:$0xff] %v13298_v51  ;;  %v13314_v40 = vmul.f32 0.2, %v15412_v34  ;;  %v15414_v51 = vld [vmem:[#allocation34_spill] sm:$0xff]  ;;  %15417 = vst [vmem:[#allocation165_spill] sm:$0xff] %v13323_v45  ;;  %v13342_v7 = vsel %vm6799_vm8, %v15150_v24, %v15425_v27  ;;  %vm6828_vm7 = vcmp.ge.f32.partialorder %v15218_v8, 0.0 }
 0x736   : > { %15411 = vst [vmem:[#allocation93_spill] sm:$0xff] %v13311_v57  ;;  %v13317_v54 = vmul.f32 0.2, %v15414_v51  ;;  %v13330_v57 = vmul.f32 0.2, %v15419_v5  ;;  %15426 = vst [vmem:[#allocation72_spill] sm:$0xff] %v13342_v7 }
 0x737   : > { %15413 = vst [vmem:[#allocation96_spill] sm:$0xff] %v13314_v40  ;;  %v15421_v40 = vld [vmem:[#allocation36_spill] sm:$0xff]  ;;  %v15427_v15 = vld [vmem:[#allocation102_spill] sm:$0xff]  ;;  %v15434_v5 = vld [vmem:[#allocation73_spill] sm:$0xff] }
 0x738   : > { %15415 = vst [vmem:[#allocation235_spill] sm:$0xff] %v13317_v54  ;;  %15420 = vst [vmem:[#allocation99_spill] sm:$0xff] %v13330_v57  ;;  %v13333_v51 = vmul.f32 0.2, %v15421_v40  ;;  %v15423_v54 = vld [vmem:[#allocation37_spill] sm:$0xff]  ;;  %v15428_v45 = vld [vmem:[#allocation38_spill] sm:$0xff]  ;;  %v13361_v27 = vsel %vm6800_vm9, %v15152_v9, %v15434_v5 }
 0x739   : > { %v13336_v34 = vmul.f32 0.2, %v15423_v54  ;;  %v13349_v57 = vmul.f32 0.2, %v15428_v45  ;;  %15435 = vst [vmem:[#allocation73_spill] sm:$0xff] %v13361_v27  ;;  %v15436_v24 = vld [vmem:[#allocation105_spill] sm:$0xff] }
 0x73a   : > { %15422 = vst [vmem:[#allocation236_spill] sm:$0xff] %v13333_v51  ;;  %v15430_v51 = vld [vmem:[#allocation39_spill] sm:$0xff]  ;;  %vm6832_vm8 = vcmp.ge.f32.partialorder %v15436_v24, 0.0  ;;  %v15437_v7 = vld [vmem:[#allocation108_spill] sm:$0xff]  ;;  %v15444_v12 = vld [vmem:[#allocation74_spill] sm:$0xff]  ;;  %vm6836_vm9 = vcmp.ge.f32.partialorder %v15236_v63, 0.0 }
 0x73b   : > { %15424 = vst [vmem:[#allocation237_spill] sm:$0xff] %v13336_v34  ;;  %15429 = vst [vmem:[#allocation102_spill] sm:$0xff] %v13349_v57  ;;  %v13352_v54 = vmul.f32 0.2, %v15430_v51  ;;  %v15432_v34 = vld [vmem:[#allocation40_spill] sm:$0xff]  ;;  %v15438_v57 = vld [vmem:[#allocation41_spill] sm:$0xff]  ;;  %v13380_v9 = vsel %vm6801_vm10, %v15155_v29, %v15444_v12 }
 0x73c   : > { %v13355_v40 = vmul.f32 0.2, %v15432_v34  ;;  %v13368_v51 = vmul.f32 0.2, %v15438_v57  ;;  %15445 = vst [vmem:[#allocation74_spill] sm:$0xff] %v13380_v9  ;;  %v15446_v5 = vld [vmem:[#allocation111_spill] sm:$0xff] }
 0x73d   : > { %15431 = vst [vmem:[#allocation238_spill] sm:$0xff] %v13352_v54  ;;  %v15440_v54 = vld [vmem:[#allocation42_spill] sm:$0xff]  ;;  %v15447_v27 = vld [vmem:[#allocation44_spill] sm:$0xff]  ;;  %v15453_v57 = vld [vmem:[#allocation167_spill] sm:$0xff]  ;;  %vm6840_vm10 = vcmp.ge.f32.partialorder %v15246_v30, 0.0 }
 0x73e   : > { %15433 = vst [vmem:[#allocation239_spill] sm:$0xff] %v13355_v40  ;;  %15439 = vst [vmem:[#allocation105_spill] sm:$0xff] %v13368_v51  ;;  %v13371_v34 = vmul.f32 0.2, %v15440_v54  ;;  %v15442_v40 = vld [vmem:[#allocation43_spill] sm:$0xff]  ;;  %v13399_v29 = vsel %vm6802_vm11, %v15346_v41, %v15453_v57  ;;  %v15455_v12 = vld [vmem:[#allocation114_spill] sm:$0xff] }
 0x73f   : > { %v13374_v45 = vmul.f32 0.2, %v15442_v40  ;;  %v13387_v51 = vmul.f32 0.2, %v15447_v27  ;;  %15454 = vst [vmem:[#allocation167_spill] sm:$0xff] %v13399_v29  ;;  %v15456_v9 = vld [vmem:[#allocation46_spill] sm:$0xff] }
 0x740   : > { %15441 = vst [vmem:[#allocation108_spill] sm:$0xff] %v13371_v34  ;;  %v15449_v34 = vld [vmem:[#allocation45_spill] sm:$0xff]  ;;  %v15462_v27 = vld [vmem:[#allocation76_spill] sm:$0xff]  ;;  %vm6844_vm11 = vcmp.ge.f32.partialorder %v15255_v13, 0.0 }
 0x741   : > { %15443 = vst [vmem:[#allocation240_spill] sm:$0xff] %v13374_v45  ;;  %15448 = vst [vmem:[#allocation111_spill] sm:$0xff] %v13387_v51  ;;  %v13390_v40 = vmul.f32 0.2, %v15449_v34  ;;  %v15451_v45 = vld [vmem:[#allocation150_spill] sm:$0xff]  ;;  %v13418_v57 = vsel %vm6803_vm12, %v15159_v59, %v15462_v27  ;;  %v15464_v41 = vld [vmem:[#allocation153_spill] sm:$0xff] }
 0x742   : > { %v13393_v54 = vmul.f32 0.2, %v15451_v45  ;;  %v13406_v51 = vmul.f32 0.2, %v15456_v9  ;;  %15463 = vst [vmem:[#allocation76_spill] sm:$0xff] %v13418_v57  ;;  %v15472_v27 = vld [vmem:[#allocation120_spill] sm:$0xff] }
 0x743   : > { %15450 = vst [vmem:[#allocation241_spill] sm:$0xff] %v13390_v40  ;;  %v15458_v40 = vld [vmem:[#allocation151_spill] sm:$0xff]  ;;  %v13425_v29 = vmul.f32 0.2, %v15464_v41  ;;  %v15473_v57 = vld [vmem:[#allocation156_spill] sm:$0xff] }
 0x744   : > { %15452 = vst [vmem:[#allocation242_spill] sm:$0xff] %v13393_v54  ;;  %15457 = vst [vmem:[#allocation114_spill] sm:$0xff] %v13406_v51  ;;  %v13409_v45 = vmul.f32 0.2, %v15458_v40  ;;  %v15460_v54 = vld [vmem:[#allocation152_spill] sm:$0xff]  ;;  %v15470_v40 = vld [vmem:[#allocation77_spill] sm:$0xff] }
 0x745   : > { %v13412_v34 = vmul.f32 0.2, %v15460_v54  ;;  %15465 = vst [vmem:[#allocation153_spill] sm:$0xff] %v13425_v29  ;;  %v13437_v59 = vsel %vm6804_vm13, %v15162_v11, %v15470_v40  ;;  %v13444_v29 = vmul.f32 0.2, %v15473_v57  ;;  %vm15478_vm13 = vcmp.ge.f32.partialorder %v15166_v62, 0.0 }
 0x746   : > { %15459 = vst [vmem:[#allocation46_spill] sm:$0xff] %v13409_v45  ;;  %v15466_v45 = vld [vmem:[#allocation154_spill] sm:$0xff]  ;;  %15471 = vst [vmem:[#allocation77_spill] sm:$0xff] %v13437_v59  ;;  %v15480_v40 = vld [vmem:[#allocation80_spill] sm:$0xff] }
 0x747   : > { %15461 = vst [vmem:[#allocation243_spill] sm:$0xff] %v13412_v34  ;;  %v13428_v51 = vmul.f32 0.2, %v15466_v45  ;;  %v15468_v34 = vld [vmem:[#allocation155_spill] sm:$0xff]  ;;  %15474 = vst [vmem:[#allocation120_spill] sm:$0xff] %v13444_v29  ;;  %v13462_v59 = vsel %vm15481_vm15, %v15169_v55, %v15480_v40  ;;  %v15483_v57 = vld [vmem:[#allocation122_spill] sm:$0xff] }
 0x748   : > { %v13431_v54 = vmul.f32 0.2, %v15468_v34  ;;  %v15477_v34 = vld [vmem:[#allocation79_spill] sm:$0xff]  ;;  %15482 = vst [vmem:[#allocation80_spill] sm:$0xff] %v13462_v59  ;;  %vm6852_vm1 = vcmp.ge.f32.partialorder %v15483_v57, 0.0  ;;  %v15485_v45 = vld [vmem:[#allocation124_spill] sm:$0xff] }
 0x749   : > { %15467 = vst [vmem:[#allocation244_spill] sm:$0xff] %v13428_v51  ;;  %v15475_v51 = vld [vmem:[#allocation169_spill] sm:$0xff]  ;;  %v13456_v11 = vsel %vm15478_vm13, %v15166_v62, %v15477_v34  ;;  %v15484_v29 = vld [vmem:[#allocation123_spill] sm:$0xff]  ;;  %v15488_v34 = vld [vmem:[#allocation82_spill] sm:$0xff]  ;;  %vm15489_vm13 = vcmp.ge.f32.partialorder %v15173_v47, 0.0  ;;  %vm15492_vm15 = vcmp.ge.f32.partialorder %v15176_v2, 0.0 }
 0x74a   : > { %15469 = vst [vmem:[#allocation245_spill] sm:$0xff] %v13431_v54  ;;  %v13450_v54 = vsel %vm6805_vm14, %v15371_v17, %v15475_v51  ;;  %15479 = vst [vmem:[#allocation79_spill] sm:$0xff] %v13456_v11  ;;  %v15486_v17 = vld [vmem:[#allocation125_spill] sm:$0xff]  ;;  %v15487_v51 = vld [vmem:[#allocation171_spill] sm:$0xff]  ;;  %v13478_v55 = vsel %vm15489_vm13, %v15173_v47, %v15488_v34  ;;  %vm15495_vm14 = vcmp.ge.f32.partialorder %v15381_v1, 0.0  ;;  %vm15508_vm13 = vcmp.ge.f32.partialorder %v15187_v0, 0.0 }
 0x74b   : > { %15476 = vst [vmem:[#allocation169_spill] sm:$0xff] %v13450_v54  ;;  %v13472_v62 = vsel %vm6808_vm2, %v15380_v46, %v15487_v51  ;;  %15490 = vst [vmem:[#allocation122_spill] sm:$0xff] %v13478_v55  ;;  %v15491_v40 = vld [vmem:[#allocation83_spill] sm:$0xff]  ;;  %v15494_v11 = vld [vmem:[#allocation173_spill] sm:$0xff] }
 0x74c   : > { %v13484_v59 = vsel %vm15492_vm15, %v15176_v2, %v15491_v40  ;;  %v13490_v54 = vsel %vm15495_vm14, %v15381_v1, %v15494_v11  ;;  %v15497_v46 = vld [vmem:[#allocation133_spill] sm:$0xff]  ;;  %v15498_v51 = vld [vmem:[#allocation135_spill] sm:$0xff]  ;;  %v15499_v47 = vld [vmem:[#allocation136_spill] sm:$0xff]  ;;  %vm15502_vm15 = vcmp.ge.f32.partialorder %v15183_v43, 0.0  ;;  %vm15505_vm14 = vcmp.ge.f32.partialorder %v15390_v32, 0.0 }
 0x74d   : > { %15493 = vst [vmem:[#allocation123_spill] sm:$0xff] %v13484_v59  ;;  %15496 = vst [vmem:[#allocation124_spill] sm:$0xff] %v13490_v54  ;;  %vm6856_vm2 = vcmp.ge.f32.partialorder %v15497_v46, 0.0  ;;  %v15500_v34 = vld [vmem:[#allocation85_spill] sm:$0xff]  ;;  %v15501_v40 = vld [vmem:[#allocation86_spill] sm:$0xff] }
 0x74e   : > { %v13500_v2 = vsel %vm6812_vm3, %v15180_v49, %v15500_v34  ;;  %v13506_v1 = vsel %vm15502_vm15, %v15183_v43, %v15501_v40  ;;  %v15504_v11 = vld [vmem:[#allocation175_spill] sm:$0xff]  ;;  %v15507_v59 = vld [vmem:[#allocation88_spill] sm:$0xff]  ;;  %vm6860_vm3 = vcmp.ge.f32.partialorder %v15293_v52, 0.0  ;;  %v15510_v49 = vld [vmem:[#allocation138_spill] sm:$0xff]  ;;  %vm15521_vm15 = vcmp.ge.f32.partialorder %v15197_v19, 0.0 }
 0x74f   : > { %15503 = vst [vmem:[#allocation125_spill] sm:$0xff] %v13506_v1  ;;  %v13512_v54 = vsel %vm15505_vm14, %v15390_v32, %v15504_v11  ;;  %v13518_v55 = vsel %vm15508_vm13, %v15187_v0, %v15507_v59  ;;  %v15511_v34 = vld [vmem:[#allocation139_spill] sm:$0xff]  ;;  %v15512_v43 = vld [vmem:[#allocation140_spill] sm:$0xff]  ;;  %v15513_v40 = vld [vmem:[#allocation89_spill] sm:$0xff]  ;;  %vm15515_vm14 = vcmp.ge.f32.partialorder %v15399_v31, 0.0  ;;  %vm15518_vm13 = vcmp.ge.f32.partialorder %v15194_v50, 0.0 }
 0x750   : > { %15506 = vst [vmem:[#allocation171_spill] sm:$0xff] %v13512_v54  ;;  %15509 = vst [vmem:[#allocation82_spill] sm:$0xff] %v13518_v55  ;;  %v13528_v32 = vsel %vm6816_vm4, %v15190_v25, %v15513_v40  ;;  %v15514_v11 = vld [vmem:[#allocation177_spill] sm:$0xff]  ;;  %v15517_v59 = vld [vmem:[#allocation91_spill] sm:$0xff] }
 0x751   : > { %v13534_v0 = vsel %vm15515_vm14, %v15399_v31, %v15514_v11  ;;  %v13540_v55 = vsel %vm15518_vm13, %v15194_v50, %v15517_v59  ;;  %v15520_v54 = vld [vmem:[#allocation92_spill] sm:$0xff]  ;;  %v15523_v25 = vld [vmem:[#allocation141_spill] sm:$0xff]  ;;  %v15524_v40 = vld [vmem:[#allocation142_spill] sm:$0xff]  ;;  %vm15528_vm13 = vcmp.ge.f32.partialorder %v15201_v37, 0.0  ;;  %vm15534_vm14 = vcmp.ge.f32.partialorder %v15409_v42, 0.0 }
 0x752   : > { %15516 = vst [vmem:[#allocation83_spill] sm:$0xff] %v13534_v0  ;;  %15519 = vst [vmem:[#allocation173_spill] sm:$0xff] %v13540_v55  ;;  %v13546_v1 = vsel %vm15521_vm15, %v15197_v19, %v15520_v54  ;;  %vm6864_vm4 = vcmp.ge.f32.partialorder %v15523_v25, 0.0  ;;  %v15525_v31 = vld [vmem:[#allocation144_spill] sm:$0xff]  ;;  %v15526_v11 = vld [vmem:[#allocation179_spill] sm:$0xff]  ;;  %vm15531_vm15 = vcmp.ge.f32.partialorder %v15204_v56, 0.0 }
 0x753   : > { %15522 = vst [vmem:[#allocation133_spill] sm:$0xff] %v13546_v1  ;;  %v13556_v50 = vsel %vm6820_vm5, %v15408_v22, %v15526_v11  ;;  %v15527_v59 = vld [vmem:[#allocation94_spill] sm:$0xff]  ;;  %v15530_v54 = vld [vmem:[#allocation95_spill] sm:$0xff]  ;;  %v15533_v55 = vld [vmem:[#allocation181_spill] sm:$0xff] }
 0x754   : > { %v13562_v19 = vsel %vm15528_vm13, %v15201_v37, %v15527_v59  ;;  %v13568_v1 = vsel %vm15531_vm15, %v15204_v56, %v15530_v54  ;;  %v13574_v0 = vsel %vm15534_vm14, %v15409_v42, %v15533_v55  ;;  %v15536_v22 = vld [vmem:[#allocation145_spill] sm:$0xff]  ;;  %v15537_v11 = vld [vmem:[#allocation147_spill] sm:$0xff]  ;;  %v15538_v37 = vld [vmem:[#allocation148_spill] sm:$0xff]  ;;  %vm15541_vm15 = vcmp.ge.f32.partialorder %v15211_v35, 0.0 }
 0x755   : > { %15529 = vst [vmem:[#allocation135_spill] sm:$0xff] %v13562_v19  ;;  %15532 = vst [vmem:[#allocation136_spill] sm:$0xff] %v13568_v1  ;;  %vm6868_vm5 = vcmp.ge.f32.partialorder %v15536_v22, 0.0  ;;  %v15539_v59 = vld [vmem:[#allocation97_spill] sm:$0xff]  ;;  %v15540_v54 = vld [vmem:[#allocation98_spill] sm:$0xff]  ;;  %vm15544_vm14 = vcmp.ge.f32.partialorder %v15418_v4, 0.0 }
 0x756   : > { %15535 = vst [vmem:[#allocation85_spill] sm:$0xff] %v13574_v0  ;;  %v13584_v56 = vsel %vm6824_vm6, %v15208_v60, %v15539_v59  ;;  %v13590_v42 = vsel %vm15541_vm15, %v15211_v35, %v15540_v54  ;;  %v15543_v55 = vld [vmem:[#allocation183_spill] sm:$0xff]  ;;  %v15546_v1 = vld [vmem:[#allocation100_spill] sm:$0xff]  ;;  %vm15547_vm13 = vcmp.ge.f32.partialorder %v15215_v53, 0.0  ;;  %vm6872_vm6 = vcmp.ge.f32.partialorder %v15326_v58, 0.0  ;;  %v15549_v60 = vld [vmem:[#allocation126_spill] sm:$0xff] }
 0x757   : > { %15542 = vst [vmem:[#allocation86_spill] sm:$0xff] %v13590_v42  ;;  %v13596_v0 = vsel %vm15544_vm14, %v15418_v4, %v15543_v55  ;;  %v13602_v19 = vsel %vm15547_vm13, %v15215_v53, %v15546_v1  ;;  %v15550_v59 = vld [vmem:[#allocation127_spill] sm:$0xff]  ;;  %v15551_v35 = vld [vmem:[#allocation128_spill] sm:$0xff]  ;;  %v15552_v54 = vld [vmem:[#allocation101_spill] sm:$0xff]  ;;  %vm15554_vm14 = vcmp.ge.f32.partialorder %v15427_v15, 0.0  ;;  %vm15557_vm13 = vcmp.ge.f32.partialorder %v15222_v16, 0.0 }
 0x758   : > { %15545 = vst [vmem:[#allocation175_spill] sm:$0xff] %v13596_v0  ;;  %15548 = vst [vmem:[#allocation88_spill] sm:$0xff] %v13602_v19  ;;  %v13612_v4 = vsel %vm6828_vm7, %v15218_v8, %v15552_v54  ;;  %v15553_v55 = vld [vmem:[#allocation185_spill] sm:$0xff]  ;;  %v15556_v1 = vld [vmem:[#allocation103_spill] sm:$0xff]  ;;  %vm15560_vm15 = vcmp.ge.f32.partialorder %v15225_v3, 0.0 }
 0x759   : > { %v13618_v53 = vsel %vm15554_vm14, %v15427_v15, %v15553_v55  ;;  %v13624_v19 = vsel %vm15557_vm13, %v15222_v16, %v15556_v1  ;;  %v15559_v0 = vld [vmem:[#allocation104_spill] sm:$0xff]  ;;  %v15562_v8 = vld [vmem:[#allocation129_spill] sm:$0xff]  ;;  %v15563_v54 = vld [vmem:[#allocation130_spill] sm:$0xff]  ;;  %vm15568_vm13 = vcmp.ge.f32.partialorder %v15229_v39, 0.0  ;;  %vm15574_vm14 = vcmp.ge.f32.partialorder %v15437_v7, 0.0 }
 0x75a   : > { %15555 = vst [vmem:[#allocation138_spill] sm:$0xff] %v13618_v53  ;;  %15558 = vst [vmem:[#allocation139_spill] sm:$0xff] %v13624_v19  ;;  %v13630_v42 = vsel %vm15560_vm15, %v15225_v3, %v15559_v0  ;;  %vm6876_vm7 = vcmp.ge.f32.partialorder %v15562_v8, 0.0  ;;  %v15564_v15 = vld [vmem:[#allocation132_spill] sm:$0xff]  ;;  %v15565_v55 = vld [vmem:[#allocation187_spill] sm:$0xff]  ;;  %vm15571_vm15 = vcmp.ge.f32.partialorder %v15232_v36, 0.0 }
 0x75b   : > { %15561 = vst [vmem:[#allocation140_spill] sm:$0xff] %v13630_v42  ;;  %v13640_v16 = vsel %vm6832_vm8, %v15436_v24, %v15565_v55  ;;  %v15567_v1 = vld [vmem:[#allocation106_spill] sm:$0xff]  ;;  %v15570_v0 = vld [vmem:[#allocation107_spill] sm:$0xff]  ;;  %v15573_v19 = vld [vmem:[#allocation189_spill] sm:$0xff] }
 0x75c   : > { %15566 = vst [vmem:[#allocation89_spill] sm:$0xff] %v13640_v16  ;;  %v13646_v3 = vsel %vm15568_vm13, %v15229_v39, %v15567_v1  ;;  %v13652_v42 = vsel %vm15571_vm15, %v15232_v36, %v15570_v0  ;;  %v13658_v53 = vsel %vm15574_vm14, %v15437_v7, %v15573_v19  ;;  %v15576_v24 = vld [vmem:[#allocation12_spill] sm:$0xff]  ;;  %v15577_v55 = vld [vmem:[#allocation13_spill] sm:$0xff]  ;;  %v15578_v16 = vld [vmem:[#allocation14_spill] sm:$0xff]  ;;  %vm15583_vm15 = vcmp.ge.f32.partialorder %v15239_v38, 0.0 }
 0x75d   : > { %15569 = vst [vmem:[#allocation177_spill] sm:$0xff] %v13646_v3  ;;  %15572 = vst [vmem:[#allocation91_spill] sm:$0xff] %v13652_v42  ;;  %vm6880_vm8 = vcmp.ge.f32.partialorder %v15576_v24, 0.0  ;;  %v15579_v39 = vld [vmem:[#allocation15_spill] sm:$0xff]  ;;  %v15580_v1 = vld [vmem:[#allocation109_spill] sm:$0xff]  ;;  %vm15586_vm14 = vcmp.ge.f32.partialorder %v15446_v5, 0.0 }
 0x75e   : > { %15575 = vst [vmem:[#allocation92_spill] sm:$0xff] %v13658_v53  ;;  %v13668_v36 = vsel %vm6836_vm9, %v15236_v63, %v15580_v1  ;;  %v15582_v0 = vld [vmem:[#allocation110_spill] sm:$0xff]  ;;  %v15585_v19 = vld [vmem:[#allocation191_spill] sm:$0xff]  ;;  %v15588_v42 = vld [vmem:[#allocation112_spill] sm:$0xff]  ;;  %vm15589_vm13 = vcmp.ge.f32.partialorder %v15243_v28, 0.0 }
 0x75f   : > { %15581 = vst [vmem:[#allocation141_spill] sm:$0xff] %v13668_v36  ;;  %v13674_v7 = vsel %vm15583_vm15, %v15239_v38, %v15582_v0  ;;  %v13680_v53 = vsel %vm15586_vm14, %v15446_v5, %v15585_v19  ;;  %v13686_v3 = vsel %vm15589_vm13, %v15243_v28, %v15588_v42  ;;  %v15591_v63 = vld [vmem:[#allocation16_spill] sm:$0xff]  ;;  %v15592_v1 = vld [vmem:[#allocation17_spill] sm:$0xff]  ;;  %v15593_v36 = vld [vmem:[#allocation18_spill] sm:$0xff]  ;;  %vm15598_vm14 = vcmp.ge.f32.partialorder %v15455_v12, 0.0 }
 0x760   : > { %15584 = vst [vmem:[#allocation142_spill] sm:$0xff] %v13674_v7  ;;  %15587 = vst [vmem:[#allocation144_spill] sm:$0xff] %v13680_v53  ;;  %vm6884_vm9 = vcmp.ge.f32.partialorder %v15591_v63, 0.0  ;;  %v15594_v38 = vld [vmem:[#allocation19_spill] sm:$0xff]  ;;  %v15595_v0 = vld [vmem:[#allocation113_spill] sm:$0xff]  ;;  %vm15601_vm13 = vcmp.ge.f32.partialorder %v15250_v48, 0.0 }
 0x761   : > { %15590 = vst [vmem:[#allocation179_spill] sm:$0xff] %v13686_v3  ;;  %v13696_v5 = vsel %vm6840_vm10, %v15246_v30, %v15595_v0  ;;  %v15597_v19 = vld [vmem:[#allocation193_spill] sm:$0xff]  ;;  %v15600_v42 = vld [vmem:[#allocation115_spill] sm:$0xff]  ;;  %v15603_v53 = vld [vmem:[#allocation116_spill] sm:$0xff]  ;;  %vm15604_vm15 = vcmp.ge.f32.partialorder %v15253_v33, 0.0  ;;  %vm15626_vm10 = vcmp.ge.f32.partialorder %v12249_v61, 0.0 }
 0x762   : > { %15596 = vst [vmem:[#allocation94_spill] sm:$0xff] %v13696_v5  ;;  %v13702_v28 = vsel %vm15598_vm14, %v15455_v12, %v15597_v19  ;;  %v13708_v3 = vsel %vm15601_vm13, %v15250_v48, %v15600_v42  ;;  %v13714_v7 = vsel %vm15604_vm15, %v15253_v33, %v15603_v53  ;;  %v15606_v30 = vld [vmem:[#allocation20_spill] sm:$0xff]  ;;  %v15607_v0 = vld [vmem:[#allocation21_spill] sm:$0xff]  ;;  %v15608_v5 = vld [vmem:[#allocation22_spill] sm:$0xff]  ;;  %vm15613_vm13 = vcmp.ge.f32.partialorder %v15257_v26, 0.0 }
 0x763   : > { %15599 = vst [vmem:[#allocation95_spill] sm:$0xff] %v13702_v28  ;;  %15602 = vst [vmem:[#allocation181_spill] sm:$0xff] %v13708_v3  ;;  %v15609_v12 = vld [vmem:[#allocation23_spill] sm:$0xff]  ;;  %v15610_v19 = vld [vmem:[#allocation117_spill] sm:$0xff]  ;;  %vm15616_vm15 = vcmp.ge.f32.partialorder %v12241_v21, 0.0  ;;  %vm15619_vm14 = vcmp.ge.f32.partialorder %v12245_v10, 0.0 }
 0x764   : > { %15605 = vst [vmem:[#allocation145_spill] sm:$0xff] %v13714_v7  ;;  %v13724_v48 = vsel %vm6844_vm11, %v15255_v13, %v15610_v19  ;;  %v15612_v42 = vld [vmem:[#allocation118_spill] sm:$0xff]  ;;  %v15615_v53 = vld [vmem:[#allocation196_spill] sm:$0xff]  ;;  %v15618_v3 = vld [vmem:[#allocation197_spill] sm:$0xff] }
 0x765   : > { %15611 = vst [vmem:[#allocation147_spill] sm:$0xff] %v13724_v48  ;;  %v13730_v33 = vsel %vm15613_vm13, %v15257_v26, %v15612_v42  ;;  %v13736_v7 = vsel %vm15616_vm15, %v12241_v21, %v15615_v53  ;;  %v13742_v28 = vsel %vm15619_vm14, %v12245_v10, %v15618_v3  ;;  %v15621_v13 = vld [vmem:[#allocation24_spill] sm:$0xff]  ;;  %v15622_v19 = vld [vmem:[#allocation25_spill] sm:$0xff]  ;;  %v15623_v48 = vld [vmem:[#allocation26_spill] sm:$0xff]  ;;  %vm15629_vm15 = vcmp.ge.f32.partialorder %v15264_v18, 0.0 }
 0x766   : > { %15614 = vst [vmem:[#allocation148_spill] sm:$0xff] %v13730_v33  ;;  %15617 = vst [vmem:[#allocation97_spill] sm:$0xff] %v13736_v7  ;;  %vm6892_vm11 = vcmp.ge.f32.partialorder %v15621_v13, 0.0  ;;  %v15624_v26 = vld [vmem:[#allocation27_spill] sm:$0xff]  ;;  %v15625_v42 = vld [vmem:[#allocation198_spill] sm:$0xff]  ;;  %vm15632_vm14 = vcmp.ge.f32.partialorder %v15472_v27, 0.0 }
 0x767   : > { %15620 = vst [vmem:[#allocation98_spill] sm:$0xff] %v13742_v28  ;;  %v13752_v21 = vsel %vm15626_vm10, %v12249_v61, %v15625_v42  ;;  %v15628_v53 = vld [vmem:[#allocation119_spill] sm:$0xff]  ;;  %v15631_v3 = vld [vmem:[#allocation200_spill] sm:$0xff]  ;;  %v15634_v7 = vld [vmem:[#allocation121_spill] sm:$0xff]  ;;  %vm15635_vm13 = vcmp.ge.f32.partialorder %v15268_v23, 0.0 }
 0x768   : > { %15627 = vst [vmem:[#allocation183_spill] sm:$0xff] %v13752_v21  ;;  %v13758_v10 = vsel %vm15629_vm15, %v15264_v18, %v15628_v53  ;;  %v13764_v28 = vsel %vm15632_vm14, %v15472_v27, %v15631_v3  ;;  %v13770_v33 = vsel %vm15635_vm13, %v15268_v23, %v15634_v7  ;;  %v15637_v61 = vld [vmem:[#allocation28_spill] sm:$0xff]  ;;  %v15638_v42 = vld [vmem:[#allocation29_spill] sm:$0xff]  ;;  %v15639_v21 = vld [vmem:[#allocation30_spill] sm:$0xff]  ;;  %vm15644_vm14 = vcmp.ge.f32.partialorder %v15484_v29, 0.0 }
 0x769   : > { %15630 = vst [vmem:[#allocation100_spill] sm:$0xff] %v13758_v10  ;;  %15633 = vst [vmem:[#allocation126_spill] sm:$0xff] %v13764_v28  ;;  %vm6896_vm10 = vcmp.ge.f32.partialorder %v15637_v61, 0.0  ;;  %v15640_v18 = vld [vmem:[#allocation31_spill] sm:$0xff]  ;;  %v15641_v53 = vld [vmem:[#allocation201_spill] sm:$0xff]  ;;  %vm15647_vm13 = vcmp.ge.f32.partialorder %v15485_v45, 0.0 }
 0x76a   : > { %15636 = vst [vmem:[#allocation127_spill] sm:$0xff] %v13770_v33  ;;  %v13780_v27 = vsel %vm6852_vm1, %v15483_v57, %v15641_v53  ;;  %v15643_v3 = vld [vmem:[#allocation202_spill] sm:$0xff]  ;;  %v15646_v7 = vld [vmem:[#allocation203_spill] sm:$0xff]  ;;  %v15649_v28 = vld [vmem:[#allocation204_spill] sm:$0xff]  ;;  %vm15650_vm15 = vcmp.ge.f32.partialorder %v15486_v17, 0.0 }
 0x76b   : > { %15642 = vst [vmem:[#allocation128_spill] sm:$0xff] %v13780_v27  ;;  %v13786_v23 = vsel %vm15644_vm14, %v15484_v29, %v15643_v3  ;;  %v13792_v33 = vsel %vm15647_vm13, %v15485_v45, %v15646_v7  ;;  %v13798_v10 = vsel %vm15650_vm15, %v15486_v17, %v15649_v28  ;;  %v15652_v57 = vld [vmem:[#allocation32_spill] sm:$0xff]  ;;  %v15653_v53 = vld [vmem:[#allocation33_spill] sm:$0xff]  ;;  %v15654_v27 = vld [vmem:[#allocation34_spill] sm:$0xff]  ;;  %vm15659_vm13 = vcmp.ge.f32.partialorder %v15284_v44, 0.0 }
 0x76c   : > { %15645 = vst [vmem:[#allocation101_spill] sm:$0xff] %v13786_v23  ;;  %15648 = vst [vmem:[#allocation185_spill] sm:$0xff] %v13792_v33  ;;  %vm6900_vm1 = vcmp.ge.f32.partialorder %v15652_v57, 0.0  ;;  %v15655_v29 = vld [vmem:[#allocation35_spill] sm:$0xff]  ;;  %v15656_v3 = vld [vmem:[#allocation205_spill] sm:$0xff]  ;;  %vm15662_vm15 = vcmp.ge.f32.partialorder %v15498_v51, 0.0 }
 0x76d   : > { %15651 = vst [vmem:[#allocation103_spill] sm:$0xff] %v13798_v10  ;;  %v13808_v45 = vsel %vm6856_vm2, %v15497_v46, %v15656_v3  ;;  %v15658_v7 = vld [vmem:[#allocation134_spill] sm:$0xff]  ;;  %v15661_v28 = vld [vmem:[#allocation68_spill] sm:$0xff]  ;;  %vm15665_vm14 = vcmp.ge.f32.partialorder %v15499_v47, 0.0  ;;  %v15668_v3 = vld [vmem:[#allocation37_spill] sm:$0xff] }
 0x76e   : > { %15657 = vst [vmem:[#allocation104_spill] sm:$0xff] %v13808_v45  ;;  %v13814_v17 = vsel %vm15659_vm13, %v15284_v44, %v15658_v7  ;;  %v13820_v10 = vsel %vm15662_vm15, %v15498_v51, %v15661_v28  ;;  %v15664_v33 = vld [vmem:[#allocation206_spill] sm:$0xff]  ;;  %v15667_v46 = vld [vmem:[#allocation36_spill] sm:$0xff]  ;;  %v15670_v44 = vld [vmem:[#allocation39_spill] sm:$0xff]  ;;  %vm15674_vm15 = vcmp.ge.f32.partialorder %v15510_v49, 0.0  ;;  %vm15680_vm13 = vcmp.ge.f32.partialorder %v15512_v43, 0.0 }
 0x76f   : > { %15660 = vst [vmem:[#allocation129_spill] sm:$0xff] %v13814_v17  ;;  %15663 = vst [vmem:[#allocation130_spill] sm:$0xff] %v13820_v10  ;;  %v13826_v23 = vsel %vm15665_vm14, %v15499_v47, %v15664_v33  ;;  %vm6904_vm2 = vcmp.ge.f32.partialorder %v15667_v46, 0.0  ;;  %v15669_v45 = vld [vmem:[#allocation38_spill] sm:$0xff]  ;;  %v15671_v7 = vld [vmem:[#allocation137_spill] sm:$0xff]  ;;  %vm15677_vm14 = vcmp.ge.f32.partialorder %v15511_v34, 0.0 }
 0x770   : > { %15666 = vst [vmem:[#allocation132_spill] sm:$0xff] %v13826_v23  ;;  %v13836_v51 = vsel %vm6860_vm3, %v15293_v52, %v15671_v7  ;;  %v15673_v28 = vld [vmem:[#allocation207_spill] sm:$0xff]  ;;  %v15676_v33 = vld [vmem:[#allocation208_spill] sm:$0xff]  ;;  %v15679_v10 = vld [vmem:[#allocation209_spill] sm:$0xff] }
 0x771   : > { %15672 = vst [vmem:[#allocation187_spill] sm:$0xff] %v13836_v51  ;;  %v13842_v47 = vsel %vm15674_vm15, %v15510_v49, %v15673_v28  ;;  %v13848_v23 = vsel %vm15677_vm14, %v15511_v34, %v15676_v33  ;;  %v13854_v17 = vsel %vm15680_vm13, %v15512_v43, %v15679_v10  ;;  %v15682_v52 = vld [vmem:[#allocation40_spill] sm:$0xff]  ;;  %v15683_v7 = vld [vmem:[#allocation41_spill] sm:$0xff]  ;;  %v15684_v51 = vld [vmem:[#allocation42_spill] sm:$0xff]  ;;  %vm15689_vm14 = vcmp.ge.f32.partialorder %v15524_v40, 0.0 }
 0x772   : > { %15675 = vst [vmem:[#allocation106_spill] sm:$0xff] %v13842_v47  ;;  %15678 = vst [vmem:[#allocation107_spill] sm:$0xff] %v13848_v23  ;;  %vm6908_vm3 = vcmp.ge.f32.partialorder %v15682_v52, 0.0  ;;  %v15685_v49 = vld [vmem:[#allocation43_spill] sm:$0xff]  ;;  %v15686_v28 = vld [vmem:[#allocation210_spill] sm:$0xff]  ;;  %vm15691_vm13 = vcmp.ge.f32.partialorder %v15309_v20, 0.0 }
 0x773   : > { %15681 = vst [vmem:[#allocation189_spill] sm:$0xff] %v13854_v17  ;;  %v13864_v34 = vsel %vm6864_vm4, %v15523_v25, %v15686_v28  ;;  %v15688_v33 = vld [vmem:[#allocation211_spill] sm:$0xff]  ;;  %vm15694_vm15 = vcmp.ge.f32.partialorder %v15525_v31, 0.0  ;;  %v15696_v25 = vld [vmem:[#allocation44_spill] sm:$0xff]  ;;  %v15697_v28 = vld [vmem:[#allocation45_spill] sm:$0xff] }
 0x774   : > { %15687 = vst [vmem:[#allocation12_spill] sm:$0xff] %v13864_v34  ;;  %v13870_v43 = vsel %vm15689_vm14, %v15524_v40, %v15688_v33  ;;  %v15690_v10 = vld [vmem:[#allocation143_spill] sm:$0xff]  ;;  %vm6912_vm4 = vcmp.ge.f32.partialorder %v15696_v25, 0.0  ;;  %v15698_v34 = vld [vmem:[#allocation150_spill] sm:$0xff]  ;;  %v15699_v40 = vld [vmem:[#allocation212_spill] sm:$0xff]  ;;  %vm15707_vm14 = vcmp.ge.f32.partialorder %v15538_v37, 0.0 }
 0x775   : > { %v13876_v17 = vsel %vm15691_vm13, %v15309_v20, %v15690_v10  ;;  %v15693_v23 = vld [vmem:[#allocation71_spill] sm:$0xff]  ;;  %v13892_v20 = vsel %vm6868_vm5, %v15536_v22, %v15699_v40  ;;  %v15700_v33 = vld [vmem:[#allocation146_spill] sm:$0xff]  ;;  %vm15701_vm13 = vcmp.ge.f32.partialorder %v15318_v6, 0.0  ;;  %v15710_v40 = vld [vmem:[#allocation152_spill] sm:$0xff] }
 0x776   : > { %15692 = vst [vmem:[#allocation13_spill] sm:$0xff] %v13876_v17  ;;  %v13882_v47 = vsel %vm15694_vm15, %v15525_v31, %v15693_v23  ;;  %v13898_v31 = vsel %vm15701_vm13, %v15318_v6, %v15700_v33  ;;  %v15703_v23 = vld [vmem:[#allocation213_spill] sm:$0xff]  ;;  %vm15704_vm15 = vcmp.ge.f32.partialorder %v15537_v11, 0.0  ;;  %v15709_v22 = vld [vmem:[#allocation151_spill] sm:$0xff]  ;;  %vm6917_vm0 = vcmp.ge.f32.partialorder %v15710_v40, 0.0  ;;  %v15711_v6 = vld [vmem:[#allocation154_spill] sm:$0xff] }
 0x777   : > { %15695 = vst [vmem:[#allocation14_spill] sm:$0xff] %v13882_v47  ;;  %15702 = vst [vmem:[#allocation15_spill] sm:$0xff] %v13898_v31  ;;  %v13904_v10 = vsel %vm15704_vm15, %v15537_v11, %v15703_v23  ;;  %v15706_v47 = vld [vmem:[#allocation214_spill] sm:$0xff]  ;;  %vm6916_vm5 = vcmp.ge.f32.partialorder %v15709_v22, 0.0  ;;  %v15712_v33 = vld [vmem:[#allocation149_spill] sm:$0xff]  ;;  %vm15715_vm15 = vcmp.ge.f32.partialorder %v15549_v60, 0.0 }
 0x778   : > { %15705 = vst [vmem:[#allocation109_spill] sm:$0xff] %v13904_v10  ;;  %v13910_v17 = vsel %vm15707_vm14, %v15538_v37, %v15706_v47  ;;  %v13920_v11 = vsel %vm6872_vm6, %v15326_v58, %v15712_v33  ;;  %v15714_v23 = vld [vmem:[#allocation215_spill] sm:$0xff]  ;;  %v15716_v47 = vld [vmem:[#allocation216_spill] sm:$0xff]  ;;  %vm15717_vm14 = vcmp.ge.f32.partialorder %v15550_v59, 0.0  ;;  %v15718_v10 = vld [vmem:[#allocation217_spill] sm:$0xff]  ;;  %vm15719_vm13 = vcmp.ge.f32.partialorder %v15551_v35, 0.0 }
 0x779   : > { %15708 = vst [vmem:[#allocation110_spill] sm:$0xff] %v13910_v17  ;;  %15713 = vst [vmem:[#allocation191_spill] sm:$0xff] %v13920_v11  ;;  %v13926_v37 = vsel %vm15715_vm15, %v15549_v60, %v15714_v23  ;;  %v13932_v17 = vsel %vm15717_vm14, %v15550_v59, %v15716_v47  ;;  %v13938_v31 = vsel %vm15719_vm13, %v15551_v35, %v15718_v10  ;;  %v15721_v58 = vld [vmem:[#allocation155_spill] sm:$0xff]  ;;  %v15722_v33 = vld [vmem:[#allocation156_spill] sm:$0xff]  ;;  %vm15725_vm15 = vcmp.ge.f32.partialorder %v15563_v54, 0.0 }
 0x77a   : > { %15720 = vst [vmem:[#allocation112_spill] sm:$0xff] %v13938_v31  ;;  %vm6920_vm6 = vcmp.ge.f32.partialorder %v15721_v58, 0.0  ;;  %vm6921_vm12 = vcmp.ge.f32.partialorder %v15722_v33, 0.0  ;;  %v15723_v11 = vld [vmem:[#allocation218_spill] sm:$0xff]  ;;  %v15724_v23 = vld [vmem:[#allocation219_spill] sm:$0xff]  ;;  %vm15727_vm13 = vcmp.ge.f32.partialorder %v15342_v14, 0.0 }
 0x77b   : > { %v13946_v60 = vsel %vm6876_vm7, %v15562_v8, %v15723_v11  ;;  %v13952_v59 = vsel %vm15725_vm15, %v15563_v54, %v15724_v23  ;;  %v15726_v47 = vld [vmem:[#allocation131_spill] sm:$0xff]  ;;  %vm15729_vm14 = vcmp.ge.f32.partialorder %v15564_v15, 0.0  ;;  %v15730_v8 = vld [vmem:[#allocation220_spill] sm:$0xff]  ;;  %v15731_v54 = vld [vmem:[#allocation221_spill] sm:$0xff]  ;;  %vm15732_vm7 = vcmp.ge.f32.partialorder %v15577_v55, 0.0 }
 0x77c   : > { %v13958_v35 = vsel %vm15727_vm13, %v15342_v14, %v15726_v47  ;;  %v15728_v10 = vld [vmem:[#allocation75_spill] sm:$0xff]  ;;  %v13970_v11 = vsel %vm6880_vm8, %v15576_v24, %v15730_v8  ;;  %v13976_v23 = vsel %vm15732_vm7, %v15577_v55, %v15731_v54  ;;  %v15733_v14 = vld [vmem:[#allocation222_spill] sm:$0xff]  ;;  %vm15734_vm15 = vcmp.ge.f32.partialorder %v15578_v16, 0.0  ;;  %v15737_v24 = vld [vmem:[#allocation224_spill] sm:$0xff] }
 0x77d   : > { %v13964_v31 = vsel %vm15729_vm14, %v15564_v15, %v15728_v10  ;;  %v13982_v47 = vsel %vm15734_vm15, %v15578_v16, %v15733_v14  ;;  %v15735_v15 = vld [vmem:[#allocation223_spill] sm:$0xff]  ;;  %vm15736_vm13 = vcmp.ge.f32.partialorder %v15579_v39, 0.0  ;;  %v13994_v8 = vsel %vm6884_vm9, %v15591_v63, %v15737_v24  ;;  %v15738_v55 = vld [vmem:[#allocation225_spill] sm:$0xff]  ;;  %v15740_v16 = vld [vmem:[#allocation226_spill] sm:$0xff] }
 0x77e   : > { %v13988_v10 = vsel %vm15736_vm13, %v15579_v39, %v15735_v15  ;;  %vm15739_vm8 = vcmp.ge.f32.partialorder %v15592_v1, 0.0  ;;  %vm15741_vm14 = vcmp.ge.f32.partialorder %v15593_v36, 0.0  ;;  %v15742_v39 = vld [vmem:[#allocation227_spill] sm:$0xff]  ;;  %vm15743_vm7 = vcmp.ge.f32.partialorder %v15594_v38, 0.0  ;;  %v15744_v63 = vld [vmem:[#allocation78_spill] sm:$0xff] }
 0x77f   : > { %v14000_v54 = vsel %vm15739_vm8, %v15592_v1, %v15738_v55  ;;  %v14006_v14 = vsel %vm15741_vm14, %v15593_v36, %v15740_v16  ;;  %v14012_v15 = vsel %vm15743_vm7, %v15594_v38, %v15742_v39  ;;  %vm15745_vm9 = vcmp.ge.f32.partialorder %v15606_v30, 0.0  ;;  %v15746_v1 = vld [vmem:[#allocation228_spill] sm:$0xff]  ;;  %v15748_v36 = vld [vmem:[#allocation229_spill] sm:$0xff] }
 0x780   : > { %v14018_v24 = vsel %vm15745_vm9, %v15606_v30, %v15744_v63  ;;  %vm15747_vm15 = vcmp.ge.f32.partialorder %v15607_v0, 0.0  ;;  %vm15749_vm13 = vcmp.ge.f32.partialorder %v15608_v5, 0.0  ;;  %v15750_v38 = vld [vmem:[#allocation81_spill] sm:$0xff]  ;;  %vm15751_vm8 = vcmp.ge.f32.partialorder %v15609_v12, 0.0  ;;  %v15752_v30 = vld [vmem:[#allocation84_spill] sm:$0xff] }
 0x781   : > { %v14024_v55 = vsel %vm15747_vm15, %v15607_v0, %v15746_v1  ;;  %v14030_v16 = vsel %vm15749_vm13, %v15608_v5, %v15748_v36  ;;  %v14036_v39 = vsel %vm15751_vm8, %v15609_v12, %v15750_v38  ;;  %v14042_v63 = vsel %vm6892_vm11, %v15621_v13, %v15752_v30  ;;  %v15753_v0 = vld [vmem:[#allocation230_spill] sm:$0xff]  ;;  %v15755_v5 = vld [vmem:[#allocation87_spill] sm:$0xff]  ;;  %v15759_v13 = vld [vmem:[#allocation232_spill] sm:$0xff] }
 0x782   : > { %vm15754_vm14 = vcmp.ge.f32.partialorder %v15622_v19, 0.0  ;;  %vm15756_vm7 = vcmp.ge.f32.partialorder %v15623_v48, 0.0  ;;  %v15757_v12 = vld [vmem:[#allocation231_spill] sm:$0xff]  ;;  %vm15758_vm9 = vcmp.ge.f32.partialorder %v15624_v26, 0.0  ;;  %v14066_v30 = vsel %vm6896_vm10, %v15637_v61, %v15759_v13  ;;  %v15766_v61 = vld [vmem:[#allocation93_spill] sm:$0xff] }
 0x783   : > { %v14048_v1 = vsel %vm15754_vm14, %v15622_v19, %v15753_v0  ;;  %v14054_v36 = vsel %vm15756_vm7, %v15623_v48, %v15755_v5  ;;  %v14060_v38 = vsel %vm15758_vm9, %v15624_v26, %v15757_v12  ;;  %v15760_v19 = vld [vmem:[#allocation90_spill] sm:$0xff]  ;;  %vm15761_vm11 = vcmp.ge.f32.partialorder %v15638_v42, 0.0  ;;  %v15762_v48 = vld [vmem:[#allocation233_spill] sm:$0xff] }
 0x784   : > { %v14072_v0 = vsel %vm15761_vm11, %v15638_v42, %v15760_v19  ;;  %vm15763_vm15 = vcmp.ge.f32.partialorder %v15639_v21, 0.0  ;;  %v15764_v26 = vld [vmem:[#allocation234_spill] sm:$0xff]  ;;  %vm15765_vm13 = vcmp.ge.f32.partialorder %v15640_v18, 0.0  ;;  %v14090_v13 = vsel %vm6900_vm1, %v15652_v57, %v15766_v61  ;;  %v15767_v42 = vld [vmem:[#allocation96_spill] sm:$0xff] }
 0x785   : > { %v14078_v5 = vsel %vm15763_vm15, %v15639_v21, %v15762_v48  ;;  %v14084_v12 = vsel %vm15765_vm13, %v15640_v18, %v15764_v26  ;;  %vm15768_vm10 = vcmp.ge.f32.partialorder %v15653_v53, 0.0  ;;  %v15769_v21 = vld [vmem:[#allocation235_spill] sm:$0xff]  ;;  %vm15770_vm8 = vcmp.ge.f32.partialorder %v15654_v27, 0.0  ;;  %v15775_v57 = vld [vmem:[#allocation236_spill] sm:$0xff] }
 0x786   : > { %v14096_v19 = vsel %vm15768_vm10, %v15653_v53, %v15767_v42  ;;  %v14102_v48 = vsel %vm15770_vm8, %v15654_v27, %v15769_v21  ;;  %v15772_v18 = vld [vmem:[#allocation99_spill] sm:$0xff]  ;;  %vm15773_vm14 = vcmp.ge.f32.partialorder %v15655_v29, 0.0  ;;  %v14114_v61 = vsel %vm6904_vm2, %v15667_v46, %v15775_v57  ;;  %v15777_v53 = vld [vmem:[#allocation237_spill] sm:$0xff]  ;;  %v15780_v27 = vld [vmem:[#allocation102_spill] sm:$0xff] }
 0x787   : > { %15771 = vst [vmem:[#allocation16_spill] sm:$0xff] %v14102_v48  ;;  %v14108_v26 = vsel %vm15773_vm14, %v15655_v29, %v15772_v18  ;;  %15776 = vst [vmem:[#allocation18_spill] sm:$0xff] %v14114_v61  ;;  %vm15778_vm1 = vcmp.ge.f32.partialorder %v15668_v3, 0.0  ;;  %vm15781_vm7 = vcmp.ge.f32.partialorder %v15669_v45, 0.0  ;;  %v15783_v29 = vld [vmem:[#allocation238_spill] sm:$0xff]  ;;  %vm15784_vm9 = vcmp.ge.f32.partialorder %v15670_v44, 0.0 }
 0x788   : > { %15774 = vst [vmem:[#allocation17_spill] sm:$0xff] %v14108_v26  ;;  %v14120_v42 = vsel %vm15778_vm1, %v15668_v3, %v15777_v53  ;;  %v14126_v21 = vsel %vm15781_vm7, %v15669_v45, %v15780_v27  ;;  %v14132_v18 = vsel %vm15784_vm9, %v15670_v44, %v15783_v29  ;;  %v15786_v46 = vld [vmem:[#allocation239_spill] sm:$0xff]  ;;  %v15788_v3 = vld [vmem:[#allocation105_spill] sm:$0xff]  ;;  %vm15789_vm2 = vcmp.ge.f32.partialorder %v15683_v7, 0.0  ;;  %v15791_v45 = vld [vmem:[#allocation108_spill] sm:$0xff] }
 0x789   : > { %15779 = vst [vmem:[#allocation19_spill] sm:$0xff] %v14120_v42  ;;  %15782 = vst [vmem:[#allocation113_spill] sm:$0xff] %v14126_v21  ;;  %v14138_v57 = vsel %vm6908_vm3, %v15682_v52, %v15786_v46  ;;  %v14144_v53 = vsel %vm15789_vm2, %v15683_v7, %v15788_v3  ;;  %vm15792_vm11 = vcmp.ge.f32.partialorder %v15684_v51, 0.0  ;;  %v15794_v44 = vld [vmem:[#allocation240_spill] sm:$0xff]  ;;  %vm15795_vm15 = vcmp.ge.f32.partialorder %v15685_v49, 0.0  ;;  %v15797_v52 = vld [vmem:[#allocation111_spill] sm:$0xff] }
 0x78a   : > { %15785 = vst [vmem:[#allocation193_spill] sm:$0xff] %v14132_v18  ;;  %15787 = vst [vmem:[#allocation115_spill] sm:$0xff] %v14138_v57  ;;  %v14150_v27 = vsel %vm15792_vm11, %v15684_v51, %v15791_v45  ;;  %v14156_v29 = vsel %vm15795_vm15, %v15685_v49, %v15794_v44  ;;  %v14162_v46 = vsel %vm6912_vm4, %v15696_v25, %v15797_v52  ;;  %v15799_v7 = vld [vmem:[#allocation241_spill] sm:$0xff]  ;;  %vm15800_vm3 = vcmp.ge.f32.partialorder %v15697_v28, 0.0  ;;  %v15802_v51 = vld [vmem:[#allocation242_spill] sm:$0xff] }
 0x78b   : > { %15790 = vst [vmem:[#allocation116_spill] sm:$0xff] %v14144_v53  ;;  %15793 = vst [vmem:[#allocation20_spill] sm:$0xff] %v14150_v27  ;;  %v14168_v3 = vsel %vm15800_vm3, %v15697_v28, %v15799_v7  ;;  %vm15803_vm13 = vcmp.ge.f32.partialorder %v15698_v34, 0.0  ;;  %v15805_v49 = vld [vmem:[#allocation114_spill] sm:$0xff]  ;;  %vm15806_vm10 = vcmp.ge.f32.partialorder %v15456_v9, 0.0  ;;  %v15810_v28 = vld [vmem:[#allocation243_spill] sm:$0xff] }
 0x78c   : > { %15796 = vst [vmem:[#allocation21_spill] sm:$0xff] %v14156_v29  ;;  %15798 = vst [vmem:[#allocation22_spill] sm:$0xff] %v14162_v46  ;;  %v14174_v45 = vsel %vm15803_vm13, %v15698_v34, %v15802_v51  ;;  %v14180_v44 = vsel %vm15806_vm10, %v15456_v9, %v15805_v49  ;;  %v15808_v25 = vld [vmem:[#allocation46_spill] sm:$0xff]  ;;  %v14192_v7 = vsel %vm6917_vm0, %v15710_v40, %v15810_v28  ;;  %v15812_v34 = vld [vmem:[#allocation153_spill] sm:$0xff]  ;;  %vm15813_vm4 = vcmp.ge.f32.partialorder %v15464_v41, 0.0 }
 0x78d   : > { %15801 = vst [vmem:[#allocation23_spill] sm:$0xff] %v14168_v3  ;;  %15804 = vst [vmem:[#allocation117_spill] sm:$0xff] %v14174_v45  ;;  %v14186_v52 = vsel %vm6916_vm5, %v15709_v22, %v15808_v25  ;;  %v14198_v51 = vsel %vm15813_vm4, %v15464_v41, %v15812_v34  ;;  %v15815_v9 = vld [vmem:[#allocation244_spill] sm:$0xff]  ;;  %vm15816_vm8 = vcmp.ge.f32.partialorder %v15711_v6, 0.0  ;;  %v15818_v22 = vld [vmem:[#allocation245_spill] sm:$0xff]  ;;  %vm8039_vm0 = vcmask 523268  }
 0x78e   : > { %15807 = vst [vmem:[#allocation118_spill] sm:$0xff] %v14180_v44  ;;  %15809 = vst [vmem:[#allocation196_spill] sm:$0xff] %v14186_v52  ;;  %v14204_v49 = vsel %vm15816_vm8, %v15711_v6, %v15815_v9  ;;  %v14210_v25 = vsel %vm6920_vm6, %v15721_v58, %v15818_v22  ;;  %v15820_v40 = vld [vmem:[#allocation120_spill] sm:$0xff]  ;;  %v15822_v41 = vld [vmem:[#allocation157_spill] sm:$0xff] }
 0x78f   : > { %15811 = vst [vmem:[#allocation197_spill] sm:$0xff] %v14192_v7  ;;  %15814 = vst [vmem:[#allocation24_spill] sm:$0xff] %v14198_v51  ;;  %v14216_v28 = vsel %vm6921_vm12, %v15722_v33, %v15820_v40  ;;  %v15823_v34 = vld [vmem:[#allocation158_spill] sm:$0xff]  ;;  %v15824_v7 = vld [vmem:[#allocation159_spill] sm:$0xff]  ;;  %vm15958_vm12 = vcmask 1043456  }
 0x790   : > { %15817 = vst [vmem:[#allocation25_spill] sm:$0xff] %v14204_v49  ;;  %15819 = vst [vmem:[#allocation26_spill] sm:$0xff] %v14210_v25  ;;  %v8597_v51 = vpack.c.bf16 %v15823_v34, %v15822_v41  ;;  %v15825_v52 = vld [vmem:[#allocation160_spill] sm:$0xff]  ;;  %v15826_v6 = vld [vmem:[#allocation161_spill] sm:$0xff] }
 0x791   : > { %15821 = vst [vmem:[#allocation27_spill] sm:$0xff] %v14216_v28  ;;  %v8598_v44 = vpack.c.bf16 %v15825_v52, %v15824_v7  ;;  %v15827_v9 = vld [vmem:[#allocation162_spill] sm:$0xff]  ;;  %v15828_v45 = vld [vmem:[#allocation47_spill] sm:$0xff]  ;;  %v15829_v3 = vld [vmem:[#allocation48_spill] sm:$0xff] }
 0x792   : > { %v8599_v49 = vpack.c.bf16 %v15827_v9, %v15826_v6  ;;  %v8600_v46 = vpack.c.bf16 %v15829_v3, %v15828_v45  ;;  %v15830_v58 = vld [vmem:[#allocation51_spill] sm:$0xff]  ;;  %v15835_v40 = vld [vmem:[#allocation164_spill] sm:$0xff]  ;;  %v15836_v57 = vld [vmem:[#allocation166_spill] sm:$0xff]  ;;  %7954 = vst [vmem:[#allocation8] sm:$0xff] %v8597_v51 }
 0x793   : > { %v15831_v22 = vld [vmem:[#allocation55_spill] sm:$0xff]  ;;  %v15837_v41 = vld [vmem:[#allocation168_spill] sm:$0xff]  ;;  %v15838_v18 = vld [vmem:[#allocation170_spill] sm:$0xff]  ;;  %7955 = vst [vmem:[#allocation8 + $0x8] sm:$0xff] %v8598_v44 }
 0x794   : > { %v8601_v25 = vpack.c.bf16 %v15831_v22, %v15830_v58  ;;  %v15832_v29 = vld [vmem:[#allocation59_spill] sm:$0xff]  ;;  %v8604_v34 = vpack.c.bf16 %v15837_v41, %v15836_v57  ;;  %v15839_v52 = vld [vmem:[#allocation172_spill] sm:$0xff]  ;;  %v15840_v21 = vld [vmem:[#allocation174_spill] sm:$0xff]  ;;  %7956 = vst [vmem:[#allocation8 + $0x10] sm:$0xff] %v8599_v49 }
 0x795   : > { %v15833_v27 = vld [vmem:[#allocation63_spill] sm:$0xff]  ;;  %v8605_v7 = vpack.c.bf16 %v15839_v52, %v15838_v18  ;;  %v15841_v6 = vld [vmem:[#allocation176_spill] sm:$0xff]  ;;  %v15842_v3 = vld [vmem:[#allocation178_spill] sm:$0xff]  ;;  %7957 = vst [vmem:[#allocation8 + $0x18] sm:$0xff] %v8600_v46 }
 0x796   : > { %v8602_v53 = vpack.c.bf16 %v15833_v27, %v15832_v29  ;;  %v15834_v33 = vld [vmem:[#allocation67_spill] sm:$0xff]  ;;  %v8606_v9 = vpack.c.bf16 %v15841_v6, %v15840_v21  ;;  %v15843_v45 = vld [vmem:[#allocation180_spill] sm:$0xff]  ;;  %v15844_v22 = vld [vmem:[#allocation182_spill] sm:$0xff]  ;;  %7958 = vst [vmem:[#allocation8 + $0x20] sm:$0xff] %v8601_v25 }
 0x797   : > { %v8603_v28 = vpack.c.bf16 %v15835_v40, %v15834_v33  ;;  %v8607_v58 = vpack.c.bf16 %v15843_v45, %v15842_v3  ;;  %v15845_v42 = vld [vmem:[#allocation184_spill] sm:$0xff]  ;;  %v15846_v29 = vld [vmem:[#allocation186_spill] sm:$0xff]  ;;  %v15851_v21 = vld [vmem:[#allocation195_spill] sm:$0xff]  ;;  %7961 = vst [vmem:[#allocation8 + $0x38] sm:$0xff] %v8604_v34 }
 0x798   : > { %v8608_v27 = vpack.c.bf16 %v15845_v42, %v15844_v22  ;;  %v15847_v61 = vld [vmem:[#allocation188_spill] sm:$0xff]  ;;  %v15848_v40 = vld [vmem:[#allocation190_spill] sm:$0xff]  ;;  %7959 = vst [vmem:[#allocation8 + $0x28] sm:$0xff] %v8602_v53  ;;  %v15852_v44 = vld [vmem:[#allocation199_spill] sm:$0xff] }
 0x799   : > { %v8609_v33 = vpack.c.bf16 %v15847_v61, %v15846_v29  ;;  %v15849_v26 = vld [vmem:[#allocation192_spill] sm:$0xff]  ;;  %v15850_v18 = vld [vmem:[#allocation194_spill] sm:$0xff]  ;;  %v15853_v41 = vld [vmem:[#allocation49_spill] sm:$0xff]  ;;  %7960 = vst [vmem:[#allocation8 + $0x30] sm:$0xff] %v8603_v28 }
 0x79a   : > { %v8610_v57 = vpack.c.bf16 %v15849_v26, %v15848_v40  ;;  %v8611_v51 = vpack.c.bf16 %v15851_v21, %v15850_v18  ;;  %v8612_v52 = vpack.c.bf16 %v15853_v41, %v15852_v44  ;;  %v15854_v6 = vld [vmem:[#allocation50_spill] sm:$0xff]  ;;  %v15855_v3 = vld [vmem:[#allocation52_spill] sm:$0xff]  ;;  %v15856_v42 = vld [vmem:[#allocation53_spill] sm:$0xff]  ;;  %7962 = vst [vmem:[#allocation8 + $0x40] sm:$0xff] %v8605_v7 }
 0x79b   : > { %v8613_v45 = vpack.c.bf16 %v15855_v3, %v15854_v6  ;;  %v15857_v22 = vld [vmem:[#allocation54_spill] sm:$0xff]  ;;  %7963 = vst [vmem:[#allocation8 + $0x48] sm:$0xff] %v8606_v9  ;;  %v15858_v26 = vld [vmem:[#allocation56_spill] sm:$0xff]  ;;  %v15859_v61 = vld [vmem:[#allocation57_spill] sm:$0xff] }
 0x79c   : > { %v8614_v48 = vpack.c.bf16 %v15857_v22, %v15856_v42  ;;  %v8615_v46 = vpack.c.bf16 %v15859_v61, %v15858_v26  ;;  %v15860_v53 = vld [vmem:[#allocation58_spill] sm:$0xff]  ;;  %v15861_v49 = vld [vmem:[#allocation60_spill] sm:$0xff]  ;;  %v15862_v29 = vld [vmem:[#allocation61_spill] sm:$0xff]  ;;  %7964 = vst [vmem:[#allocation8 + $0x50] sm:$0xff] %v8607_v58 }
 0x79d   : > { %v8616_v25 = vpack.c.bf16 %v15861_v49, %v15860_v53  ;;  %v15863_v40 = vld [vmem:[#allocation62_spill] sm:$0xff]  ;;  %v15864_v21 = vld [vmem:[#allocation64_spill] sm:$0xff]  ;;  %v15865_v44 = vld [vmem:[#allocation65_spill] sm:$0xff]  ;;  %7965 = vst [vmem:[#allocation8 + $0x58] sm:$0xff] %v8608_v27 }
 0x79e   : > { %v8617_v18 = vpack.c.bf16 %v15863_v40, %v15862_v29  ;;  %v8618_v41 = vpack.c.bf16 %v15865_v44, %v15864_v21  ;;  %7966 = vst [vmem:[#allocation8 + $0x60] sm:$0xff] %v8609_v33  ;;  %7967 = vst [vmem:[#allocation8 + $0x68] sm:$0xff] %v8610_v57  ;;  %v15866_v28 = vld [vmem:[#allocation66_spill] sm:$0xff]  ;;  %v15867_v34 = vld [vmem:[#allocation163_spill] sm:$0xff] }
 0x79f   : > { %v8619_v7 = vpack.c.bf16 %v15867_v34, %v15866_v28  ;;  %v15868_v9 = vld [vmem:[#allocation69_spill] sm:$0xff]  ;;  %v15869_v6 = vld [vmem:[#allocation70_spill] sm:$0xff]  ;;  %v15871_v22 = vld [vmem:[#allocation72_spill] sm:$0xff]  ;;  %7968 = vst [vmem:[#allocation8 + $0x70] sm:$0xff] %v8611_v51 }
 0x7a0   : > { %v8620_v3 = vpack.c.bf16 %v15869_v6, %v15868_v9  ;;  %v15870_v42 = vld [vmem:[#allocation165_spill] sm:$0xff]  ;;  %v15873_v53 = vld [vmem:[#allocation74_spill] sm:$0xff]  ;;  %7969 = vst [vmem:[#allocation8 + $0x78] sm:$0xff] %v8612_v52  ;;  %7970 = vst [vmem:[#allocation8 + $0x80] sm:$0xff] %v8613_v45 }
 0x7a1   : > { %v8621_v26 = vpack.c.bf16 %v15871_v22, %v15870_v42  ;;  %v15872_v61 = vld [vmem:[#allocation73_spill] sm:$0xff]  ;;  %7971 = vst [vmem:[#allocation8 + $0x88] sm:$0xff] %v8614_v48  ;;  %v15874_v58 = vld [vmem:[#allocation167_spill] sm:$0xff]  ;;  %v15875_v27 = vld [vmem:[#allocation76_spill] sm:$0xff] }
 0x7a2   : > { %v8622_v49 = vpack.c.bf16 %v15873_v53, %v15872_v61  ;;  %v8623_v33 = vpack.c.bf16 %v15875_v27, %v15874_v58  ;;  %v15876_v57 = vld [vmem:[#allocation77_spill] sm:$0xff]  ;;  %v15878_v21 = vld [vmem:[#allocation79_spill] sm:$0xff]  ;;  %v15879_v44 = vld [vmem:[#allocation80_spill] sm:$0xff]  ;;  %7972 = vst [vmem:[#allocation8 + $0x90] sm:$0xff] %v8615_v46 }
 0x7a3   : > { %v15877_v29 = vld [vmem:[#allocation169_spill] sm:$0xff]  ;;  %v8625_v28 = vpack.c.bf16 %v15879_v44, %v15878_v21  ;;  %v15880_v34 = vld [vmem:[#allocation122_spill] sm:$0xff]  ;;  %7973 = vst [vmem:[#allocation8 + $0x98] sm:$0xff] %v8616_v25  ;;  %7974 = vst [vmem:[#allocation8 + $0xa0] sm:$0xff] %v8617_v18 }
 0x7a4   : > { %v8624_v40 = vpack.c.bf16 %v15877_v29, %v15876_v57  ;;  %v8626_v9 = vpack.c.bf16 %v15880_v34, %v13472_v62  ;;  %7975 = vst [vmem:[#allocation8 + $0xa8] sm:$0xff] %v8618_v41  ;;  %v15881_v51 = vld [vmem:[#allocation123_spill] sm:$0xff]  ;;  %v15882_v52 = vld [vmem:[#allocation124_spill] sm:$0xff]  ;;  %v15883_v48 = vld [vmem:[#allocation125_spill] sm:$0xff] }
 0x7a5   : > { %v8627_v45 = vpack.c.bf16 %v15882_v52, %v15881_v51  ;;  %v8628_v6 = vpack.c.bf16 %v15883_v48, %v13500_v2  ;;  %v15884_v42 = vld [vmem:[#allocation171_spill] sm:$0xff]  ;;  %v15885_v22 = vld [vmem:[#allocation82_spill] sm:$0xff]  ;;  %7976 = vst [vmem:[#allocation8 + $0xb0] sm:$0xff] %v8619_v7  ;;  %7977 = vst [vmem:[#allocation8 + $0xb8] sm:$0xff] %v8620_v3 }
 0x7a6   : > { %v8629_v61 = vpack.c.bf16 %v15885_v22, %v15884_v42  ;;  %v15886_v53 = vld [vmem:[#allocation83_spill] sm:$0xff]  ;;  %7978 = vst [vmem:[#allocation8 + $0xc0] sm:$0xff] %v8621_v26  ;;  %7979 = vst [vmem:[#allocation8 + $0xc8] sm:$0xff] %v8622_v49  ;;  %v15887_v62 = vld [vmem:[#allocation173_spill] sm:$0xff] }
 0x7a7   : > { %v8630_v58 = vpack.c.bf16 %v15886_v53, %v13528_v32  ;;  %v15888_v46 = vld [vmem:[#allocation133_spill] sm:$0xff]  ;;  %v15889_v18 = vld [vmem:[#allocation135_spill] sm:$0xff]  ;;  %v15890_v27 = vld [vmem:[#allocation136_spill] sm:$0xff]  ;;  %7980 = vst [vmem:[#allocation8 + $0xd0] sm:$0xff] %v8623_v33 }
 0x7a8   : > { %v8631_v25 = vpack.c.bf16 %v15888_v46, %v15887_v62  ;;  %v8632_v41 = vpack.c.bf16 %v15889_v18, %v13556_v50  ;;  %v15891_v57 = vld [vmem:[#allocation85_spill] sm:$0xff]  ;;  %v15892_v2 = vld [vmem:[#allocation86_spill] sm:$0xff]  ;;  %7981 = vst [vmem:[#allocation8 + $0xd8] sm:$0xff] %v8624_v40  ;;  %7982 = vst [vmem:[#allocation8 + $0xe0] sm:$0xff] %v8625_v28 }
 0x7a9   : > { %v8633_v29 = vpack.c.bf16 %v15891_v57, %v15890_v27  ;;  %v8634_v21 = vpack.c.bf16 %v15892_v2, %v13584_v56  ;;  %7983 = vst [vmem:[#allocation8 + $0xe8] sm:$0xff] %v8626_v9  ;;  %v15893_v32 = vld [vmem:[#allocation175_spill] sm:$0xff]  ;;  %v15894_v7 = vld [vmem:[#allocation88_spill] sm:$0xff]  ;;  %v15895_v26 = vld [vmem:[#allocation138_spill] sm:$0xff] }
 0x7aa   : > { %v8635_v3 = vpack.c.bf16 %v15894_v7, %v15893_v32  ;;  %v8636_v49 = vpack.c.bf16 %v15895_v26, %v13612_v4  ;;  %v15896_v44 = vld [vmem:[#allocation139_spill] sm:$0xff]  ;;  %v15897_v34 = vld [vmem:[#allocation140_spill] sm:$0xff]  ;;  %v15898_v50 = vld [vmem:[#allocation89_spill] sm:$0xff]  ;;  %7984 = vst [vmem:[#allocation8 + $0xf0] sm:$0xff] %v8627_v45 }
 0x7ab   : > { %v8637_v51 = vpack.c.bf16 %v15897_v34, %v15896_v44  ;;  %v15899_v52 = vld [vmem:[#allocation177_spill] sm:$0xff]  ;;  %7985 = vst [vmem:[#allocation8 + $0xf8] sm:$0xff] %v8628_v6  ;;  %7986 = vst [vmem:[#allocation8 + $0x100] sm:$0xff] %v8629_v61  ;;  %v15900_v56 = vld [vmem:[#allocation91_spill] sm:$0xff] }
 0x7ac   : > { %v8638_v48 = vpack.c.bf16 %v15899_v52, %v15898_v50  ;;  %7987 = vst [vmem:[#allocation8 + $0x108] sm:$0xff] %v8630_v58  ;;  %v15901_v33 = vld [vmem:[#allocation92_spill] sm:$0xff]  ;;  %v15902_v28 = vld [vmem:[#allocation141_spill] sm:$0xff]  ;;  %v15903_v9 = vld [vmem:[#allocation142_spill] sm:$0xff] }
 0x7ad   : > { %v8639_v40 = vpack.c.bf16 %v15901_v33, %v15900_v56  ;;  %v8640_v42 = vpack.c.bf16 %v15903_v9, %v15902_v28  ;;  %v15904_v22 = vld [vmem:[#allocation144_spill] sm:$0xff]  ;;  %v15905_v53 = vld [vmem:[#allocation179_spill] sm:$0xff]  ;;  %v15906_v4 = vld [vmem:[#allocation94_spill] sm:$0xff]  ;;  %7988 = vst [vmem:[#allocation8 + $0x110] sm:$0xff] %v8631_v25 }
 0x7ae   : > { %v8641_v62 = vpack.c.bf16 %v15905_v53, %v15904_v22  ;;  %v15907_v46 = vld [vmem:[#allocation95_spill] sm:$0xff]  ;;  %7989 = vst [vmem:[#allocation8 + $0x118] sm:$0xff] %v8632_v41  ;;  %7990 = vst [vmem:[#allocation8 + $0x120] sm:$0xff] %v8633_v29  ;;  %v15908_v45 = vld [vmem:[#allocation181_spill] sm:$0xff] }
 0x7af   : > { %v8642_v18 = vpack.c.bf16 %v15907_v46, %v15906_v4  ;;  %7991 = vst [vmem:[#allocation8 + $0x128] sm:$0xff] %v8634_v21  ;;  %v15909_v6 = vld [vmem:[#allocation145_spill] sm:$0xff]  ;;  %v15910_v58 = vld [vmem:[#allocation147_spill] sm:$0xff]  ;;  %v15911_v27 = vld [vmem:[#allocation148_spill] sm:$0xff] }
 0x7b0   : > { %v8643_v61 = vpack.c.bf16 %v15909_v6, %v15908_v45  ;;  %v8644_v57 = vpack.c.bf16 %v15911_v27, %v15910_v58  ;;  %v15912_v2 = vld [vmem:[#allocation97_spill] sm:$0xff]  ;;  %v15913_v32 = vld [vmem:[#allocation98_spill] sm:$0xff]  ;;  %v15914_v26 = vld [vmem:[#allocation183_spill] sm:$0xff]  ;;  %7992 = vst [vmem:[#allocation8 + $0x130] sm:$0xff] %v8635_v3 }
 0x7b1   : > { %v8645_v7 = vpack.c.bf16 %v15913_v32, %v15912_v2  ;;  %v15915_v44 = vld [vmem:[#allocation100_spill] sm:$0xff]  ;;  %7993 = vst [vmem:[#allocation8 + $0x138] sm:$0xff] %v8636_v49  ;;  %7994 = vst [vmem:[#allocation8 + $0x140] sm:$0xff] %v8637_v51  ;;  %v15916_v25 = vld [vmem:[#allocation126_spill] sm:$0xff] }
 0x7b2   : > { %v8646_v34 = vpack.c.bf16 %v15915_v44, %v15914_v26  ;;  %7995 = vst [vmem:[#allocation8 + $0x148] sm:$0xff] %v8638_v48  ;;  %v15917_v41 = vld [vmem:[#allocation127_spill] sm:$0xff]  ;;  %v15918_v21 = vld [vmem:[#allocation128_spill] sm:$0xff]  ;;  %v15919_v50 = vld [vmem:[#allocation101_spill] sm:$0xff] }
 0x7b3   : > { %v8647_v29 = vpack.c.bf16 %v15917_v41, %v15916_v25  ;;  %v8648_v52 = vpack.c.bf16 %v15919_v50, %v15918_v21  ;;  %v15920_v56 = vld [vmem:[#allocation185_spill] sm:$0xff]  ;;  %v15921_v33 = vld [vmem:[#allocation103_spill] sm:$0xff]  ;;  %v15922_v9 = vld [vmem:[#allocation104_spill] sm:$0xff]  ;;  %7996 = vst [vmem:[#allocation8 + $0x150] sm:$0xff] %v8639_v40 }
 0x7b4   : > { %v8649_v28 = vpack.c.bf16 %v15921_v33, %v15920_v56  ;;  %v15923_v22 = vld [vmem:[#allocation129_spill] sm:$0xff]  ;;  %7997 = vst [vmem:[#allocation8 + $0x158] sm:$0xff] %v8640_v42  ;;  %7998 = vst [vmem:[#allocation8 + $0x160] sm:$0xff] %v8641_v62  ;;  %v15924_v3 = vld [vmem:[#allocation130_spill] sm:$0xff] }
 0x7b5   : > { %v8650_v53 = vpack.c.bf16 %v15923_v22, %v15922_v9  ;;  %7999 = vst [vmem:[#allocation8 + $0x168] sm:$0xff] %v8642_v18  ;;  %v15925_v49 = vld [vmem:[#allocation132_spill] sm:$0xff]  ;;  %v15926_v48 = vld [vmem:[#allocation187_spill] sm:$0xff]  ;;  %v15927_v4 = vld [vmem:[#allocation106_spill] sm:$0xff] }
 0x7b6   : > { %v8651_v51 = vpack.c.bf16 %v15925_v49, %v15924_v3  ;;  %v8652_v46 = vpack.c.bf16 %v15927_v4, %v15926_v48  ;;  %v15928_v45 = vld [vmem:[#allocation107_spill] sm:$0xff]  ;;  %v15929_v6 = vld [vmem:[#allocation189_spill] sm:$0xff]  ;;  %v15930_v27 = vld [vmem:[#allocation12_spill] sm:$0xff]  ;;  %8000 = vst [vmem:[#allocation8 + $0x170] sm:$0xff] %v8643_v61 }
 0x7b7   : > { %v8653_v58 = vpack.c.bf16 %v15929_v6, %v15928_v45  ;;  %v8654_v2 = vpack.c.bf16 %v13870_v43, %v15930_v27  ;;  %8001 = vst [vmem:[#allocation8 + $0x178] sm:$0xff] %v8644_v57  ;;  %8002 = vst [vmem:[#allocation8 + $0x180] sm:$0xff] %v8645_v7  ;;  %v15931_v40 = vld [vmem:[#allocation13_spill] sm:$0xff]  ;;  %v15932_v42 = vld [vmem:[#allocation14_spill] sm:$0xff]  ;;  %v8660_v57 = vpack.c.bf16 %v13952_v59, %v13946_v60 }
 0x7b8   : > { %8003 = vst [vmem:[#allocation8 + $0x188] sm:$0xff] %v8646_v34  ;;  %v8655_v62 = vpack.c.bf16 %v15932_v42, %v15931_v40  ;;  %v15933_v18 = vld [vmem:[#allocation15_spill] sm:$0xff]  ;;  %v15934_v26 = vld [vmem:[#allocation109_spill] sm:$0xff]  ;;  %v15935_v44 = vld [vmem:[#allocation110_spill] sm:$0xff]  ;;  %v8661_v7 = vpack.c.bf16 %v13964_v31, %v13958_v35  ;;  %v8664_v34 = vpack.c.bf16 %v14000_v54, %v13994_v8  ;;  %v8666_v60 = vpack.c.bf16 %v14024_v55, %v14018_v24 }
 0x7b9   : > { %v8656_v32 = vpack.c.bf16 %v15933_v18, %v13892_v20  ;;  %v8657_v25 = vpack.c.bf16 %v15935_v44, %v15934_v26  ;;  %v15936_v41 = vld [vmem:[#allocation191_spill] sm:$0xff]  ;;  %8004 = vst [vmem:[#allocation8 + $0x190] sm:$0xff] %v8647_v29  ;;  %8005 = vst [vmem:[#allocation8 + $0x198] sm:$0xff] %v8648_v52  ;;  %v15937_v43 = vld [vmem:[#allocation112_spill] sm:$0xff]  ;;  %v8662_v20 = vpack.c.bf16 %v13976_v23, %v13970_v11 }
 0x7ba   : > { %v8658_v21 = vpack.c.bf16 %v13926_v37, %v15936_v41  ;;  %8006 = vst [vmem:[#allocation8 + $0x1a0] sm:$0xff] %v8649_v28  ;;  %8007 = vst [vmem:[#allocation8 + $0x1a8] sm:$0xff] %v8650_v53  ;;  %v8659_v61 = vpack.c.bf16 %v15937_v43, %v13932_v17  ;;  %v8663_v37 = vpack.c.bf16 %v13988_v10, %v13982_v47  ;;  %v15938_v10 = vld [vmem:[#allocation16_spill] sm:$0xff]  ;;  %v15939_v8 = vld [vmem:[#allocation17_spill] sm:$0xff] }
 0x7bb   : > { %8008 = vst [vmem:[#allocation8 + $0x1b0] sm:$0xff] %v8651_v51  ;;  %8009 = vst [vmem:[#allocation8 + $0x1b8] sm:$0xff] %v8652_v46  ;;  %v8665_v17 = vpack.c.bf16 %v14012_v15, %v14006_v14  ;;  %v8667_v31 = vpack.c.bf16 %v14036_v39, %v14030_v16  ;;  %v8668_v59 = vpack.c.bf16 %v14048_v1, %v14042_v63  ;;  %v15940_v14 = vld [vmem:[#allocation18_spill] sm:$0xff]  ;;  %v15941_v15 = vld [vmem:[#allocation19_spill] sm:$0xff] }
 0x7bc   : > { %8010 = vst [vmem:[#allocation8 + $0x1c0] sm:$0xff] %v8653_v58  ;;  %8011 = vst [vmem:[#allocation8 + $0x1c8] sm:$0xff] %v8654_v2  ;;  %v8669_v35 = vpack.c.bf16 %v14060_v38, %v14054_v36  ;;  %v8670_v11 = vpack.c.bf16 %v14072_v0, %v14066_v30  ;;  %v8671_v23 = vpack.c.bf16 %v14084_v12, %v14078_v5  ;;  %v15942_v55 = vld [vmem:[#allocation113_spill] sm:$0xff]  ;;  %v15944_v63 = vld [vmem:[#allocation115_spill] sm:$0xff] }
 0x7bd   : > { %8012 = vst [vmem:[#allocation8 + $0x1d0] sm:$0xff] %v8655_v62  ;;  %8013 = vst [vmem:[#allocation8 + $0x1d8] sm:$0xff] %v8656_v32  ;;  %v8672_v47 = vpack.c.bf16 %v14096_v19, %v14090_v13  ;;  %v8673_v54 = vpack.c.bf16 %v15939_v8, %v15938_v10  ;;  %v8674_v24 = vpack.c.bf16 %v15941_v15, %v15940_v14  ;;  %v15943_v16 = vld [vmem:[#allocation193_spill] sm:$0xff]  ;;  %v15945_v1 = vld [vmem:[#allocation116_spill] sm:$0xff] }
 0x7be   : > { %8014 = vst [vmem:[#allocation8 + $0x1e0] sm:$0xff] %v8657_v25  ;;  %8015 = vst [vmem:[#allocation8 + $0x1e8] sm:$0xff] %v8658_v21  ;;  %v8675_v39 = vpack.c.bf16 %v15943_v16, %v15942_v55  ;;  %v8676_v36 = vpack.c.bf16 %v15945_v1, %v15944_v63  ;;  %v15946_v38 = vld [vmem:[#allocation20_spill] sm:$0xff]  ;;  %v15947_v30 = vld [vmem:[#allocation21_spill] sm:$0xff] }
 0x7bf   : > { %8016 = vst [vmem:[#allocation8 + $0x1f0] sm:$0xff] %v8659_v61  ;;  %8017 = vst [vmem:[#allocation8 + $0x1f8] sm:$0xff] %v8660_v57  ;;  %v8677_v0 = vpack.c.bf16 %v15947_v30, %v15946_v38  ;;  %v15948_v5 = vld [vmem:[#allocation22_spill] sm:$0xff]  ;;  %v15949_v12 = vld [vmem:[#allocation23_spill] sm:$0xff] }
 0x7c0   : > { %8018 = vst [vmem:[#allocation8 + $0x200] sm:$0xff] %v8661_v7  ;;  %8019 = vst [vmem:[#allocation8 + $0x208] sm:$0xff] %v8662_v20  ;;  %v8678_v13 = vpack.c.bf16 %v15949_v12, %v15948_v5  ;;  %v15950_v19 = vld [vmem:[#allocation117_spill] sm:$0xff]  ;;  %v15951_v29 = vld [vmem:[#allocation118_spill] sm:$0xff] }
 0x7c1   : > { %8020 = vst [vmem:[#allocation8 + $0x210] sm:$0xff] %v8663_v37  ;;  %8021 = vst [vmem:[#allocation8 + $0x218] sm:$0xff] %v8664_v34  ;;  %v8679_v50 = vpack.c.bf16 %v15951_v29, %v15950_v19  ;;  %v15952_v52 = vld [vmem:[#allocation196_spill] sm:$0xff]  ;;  %v15953_v56 = vld [vmem:[#allocation197_spill] sm:$0xff] }
 0x7c2   : > { %8022 = vst [vmem:[#allocation8 + $0x220] sm:$0xff] %v8665_v17  ;;  %8023 = vst [vmem:[#allocation8 + $0x228] sm:$0xff] %v8666_v60  ;;  %v8680_v33 = vpack.c.bf16 %v15953_v56, %v15952_v52  ;;  %v15954_v28 = vld [vmem:[#allocation24_spill] sm:$0xff]  ;;  %v15955_v9 = vld [vmem:[#allocation25_spill] sm:$0xff] }
 0x7c3   : > { %8024 = vst [vmem:[#allocation8 + $0x230] sm:$0xff] %v8667_v31  ;;  %8025 = vst [vmem:[#allocation8 + $0x238] sm:$0xff] %v8668_v59  ;;  %v8681_v22 = vpack.c.bf16 %v15955_v9, %v15954_v28  ;;  %v15956_v53 = vld [vmem:[#allocation26_spill] sm:$0xff]  ;;  %v15957_v3 = vld [vmem:[#allocation27_spill] sm:$0xff] }
 0x7c4   : > { %8026 = vst [vmem:[#allocation8 + $0x240] sm:$0xff] %v8669_v35  ;;  %8027 = vst [vmem:[#allocation8 + $0x248] sm:$0xff] %v8670_v11  ;;  %v8682_v49 = vpack.c.bf16 %v15957_v3, %v15956_v53 }
 0x7c5   : > { %8028 = vst [vmem:[#allocation8 + $0x250] sm:$0xff] %v8671_v23  ;;  %8029 = vst [vmem:[#allocation8 + $0x258] sm:$0xff] %v8672_v47 }
 0x7c6   : > { %8030 = vst [vmem:[#allocation8 + $0x260] sm:$0xff] %v8673_v54  ;;  %8031 = vst [vmem:[#allocation8 + $0x268] sm:$0xff] %v8674_v24 }
 0x7c7   : > { %8032 = vst [vmem:[#allocation8 + $0x270] sm:$0xff] %v8675_v39  ;;  %8033 = vst [vmem:[#allocation8 + $0x278] sm:$0xff] %v8676_v36 }
 0x7c8   : > { %8034 = vst [vmem:[#allocation8 + $0x280] sm:$0xff] %v8677_v0  ;;  %8035 = vst [vmem:[#allocation8 + $0x288] sm:$0xff] %v8678_v13 }
 0x7c9   : > { %8036 = vst [vmem:[#allocation8 + $0x290] sm:$0xff] %v8679_v50  ;;  %8037 = vst [vmem:[#allocation8 + $0x298] sm:$0xff] %v8680_v33 }
 0x7ca   : > { %8038 = vst [vmem:[#allocation8 + $0x2a0] sm:$0xff] %v8681_v22  ;;  %vm8040_vm5 = vmor %vm8039_vm0, %vm15958_vm12 }
 0x7cb   : > { %8041 = vst.msk [vmem:[#allocation8 + $0x2a8] sm:$0xff] %vm8040_vm5, %v8682_v49 }
 0x7cc PF: > { %p14393_p6 = scmp.eq.s32.totalorder %s8152_s18, 3  ;;  %s9198_s11 = smov [#allocation8]  }
 0x7cd   : > { %s8052_s29 = sshll.u32 %s9198_s11, 4  ;;  %s8053_s29 = int_to_ptr.vmem [resolvable:$true] %s8052_s29 }
 0x7ce   : > { %s9105_s20 = scalar_lea.vmem %s8053_s29, 11008  ;;  %p9112_p1 = scmp.lt.s32.totalorder %s8053_s29, %s8053_s29 }
 0x7cf   : > { %p9106_p2 = scmp.ne.s32.totalorder %s8053_s29, %s9105_s20  ;;  %p9113_p5 = scmp.lt.s32.totalorder %s9105_s20, %s9105_s20 }
 0x7d1   : > { %p9107_p3 = pnand %p9106_p2, %p14393_p6  ;;  %p9114_p10 = por %p9113_p5, %p9112_p1 }
 0x7d3   : > { %p9108_p4 = pneg %p9107_p3 }
 0x7d5   : > { %p9115_p11 = pnand %p9114_p10, %p9108_p4 }
 0x7d7   : > { %9118 = shalt.err (!%p9115_p11)
}
 0x7d8   : > { %s9119_s18 = scalar_lea.hbm %s14440_s3, 11008 }
 0x7d9   : > { %p9120_p0 = scmp.ne.s32.totalorder %s14440_s3, %s9119_s18  ;;  %p9125_p13 = scmp.lt.u32.totalorder %s9119_s18, %s14440_s3 }
 0x7db   : > { %p9121_p12 = pnand %p9120_p0, %p14393_p6 }
 0x7dd   : > { %p9122_p8 = pneg %p9121_p12 }
 0x7df   : > { %p9127_p7 = pnand %p9125_p13, %p9122_p8 }
 0x7e1   : > { %9130 = shalt.err (!%p9127_p7)
}
 0x7e2   : > { %8691 = dma.vmem_to_hbm [thread:$0]  (%p14393_p6), %s8053_s29, 11008, %s14440_s3, [#allocation5]  }
 0x7e3   : > { %9164 = dma.done.wait (%p14393_p6), [#allocation5], 11008  }
 0x7e4   : > { %9166 = vsyncadd (%p14393_p6), [#allocation5], 4294956288 }
 0x7e5 PF: > { %s20_s17 = sadd.s32 1, %s9189_s17   ;;  %s15960_s12 = smov %s9173_s13 }
 0x7e6   : > { %p17_p9 = scmp.ge.s32.totalorder %s20_s17, 6   ;;  %s15961_s13 = smov %s9177_s14 }
 0x7e7   : > { %s15962_s14 = smov %s9266_s23  ;;  %s15963_s15 = smov %s9185_s16 }
 0x7e8   : > { %s15964_s16 = smov %s15966_s19  ;;  %19 = sbr.rel (!%p17_p9) target bundleno = 7 (0x7), region = 94 }
 0x7ef   :  { %8065 = vsyncpa [#allocation4], 1 }
 0x7f0   :  { %8067 = vsyncpa [#allocation4 + $0x1], 1 }
 0x7f1   :  { %8068 = vsyncpa [#allocation7], 1 }
 0x7f2   :  { %8070 = vsyncpa [#allocation7 + $0x1], 1 }
 0x7f3   :  { %8071 = vsyncpa [#allocation5], 1 }
 0x7f4   :  { %8073 = vsyncpa [#allocation5 + $0x1], 1 }

</bundles_post_ra>
